<compile_context>
chip_gen: v6e
topology: v6e:2x2x1
jax: 0.10.0
libtpu: 0.0.40
codegen_flags: <defaults>
</compile_context>

<pallas_src>
import math
from functools import partial

import jax
import jax.numpy as jnp
from jax.experimental import pallas as pl
from jax.experimental.pallas import tpu as pltpu

EPS = 1e-5  # torch.nn.LayerNorm default eps


def _layernorm_f32(x, g, b):
    mean = jnp.mean(x, axis=-1, keepdims=True)
    var = jnp.mean(jnp.square(x - mean), axis=-1, keepdims=True)
    return (x - mean) * jax.lax.rsqrt(var + EPS) * g + b


# ------------------------------ Pallas kernels ------------------------------

def _ln_qkv_kernel(x_ref, g_ref, b_ref,
                   wq_ref, bq_ref, wk_ref, bk_ref, wv_ref, bv_ref,
                   q_ref, k_ref, v_ref, xn_ref):
    """Fused self_attn_layer_norm + per-head q/k/v projections.

    Grid = (batch, seq-tile, head).  xn is computed once per (batch, seq-tile) at
    h == 0 (head axis is 'arbitrary' so it runs sequentially on one core) and reused
    by every head's three MXU dots.  Weights are streamed one (D, Hd) head-slice per
    step, so weight VMEM is bounded regardless of the model width."""
    @pl.when(pl.program_id(2) == 0)
    def _():
        xn_ref[...] = _layernorm_f32(x_ref[0], g_ref[...], b_ref[...]).astype(xn_ref.dtype)

    xn = xn_ref[...]                                   # (TMs, D) bf16 MXU operand
    q_ref[0, 0] = (jnp.dot(xn, wq_ref[0], preferred_element_type=jnp.float32)
                   + bq_ref[0]).astype(q_ref.dtype)
    k_ref[0, 0] = (jnp.dot(xn, wk_ref[0], preferred_element_type=jnp.float32)
                   + bk_ref[0]).astype(k_ref.dtype)
    v_ref[0, 0] = (jnp.dot(xn, wv_ref[0], preferred_element_type=jnp.float32)
                   + bv_ref[0]).astype(v_ref.dtype)


def _flash_attn_kernel(q_ref, k_ref, v_ref, o_ref, m_ref, l_ref, acc_ref):
    """Flash-style attention for one (batch, head, q-tile) with the kv-tile axis as the
    grid reduction.  Online softmax in f32; no S x S score matrix is materialized.
    The full 1/head_dim score scaling is already folded into Wq/bq."""
    kv = pl.program_id(3)

    @pl.when(kv == 0)
    def _():
        m_ref[...] = jnp.full(m_ref.shape, -jnp.inf, m_ref.dtype)
        l_ref[...] = jnp.zeros(l_ref.shape, l_ref.dtype)
        acc_ref[...] = jnp.zeros(acc_ref.shape, acc_ref.dtype)

    q = q_ref[0, 0]                                    # (TQ,  Hd) bf16
    k = k_ref[0, 0]                                    # (TKV, Hd) bf16
    v = v_ref[0, 0]                                    # (TKV, Hd) bf16
    s = jax.lax.dot_general(q, k, (((1,), (1,)), ((), ())),
                            preferred_element_type=jnp.float32)    # (TQ, TKV) f32

    m_prev = m_ref[...]
    m_new = jnp.maximum(m_prev, jnp.max(s, axis=-1, keepdims=True))
    alpha = jnp.exp(m_prev - m_new)
    p = jnp.exp(s - m_new)
    l_ref[...] = alpha * l_ref[...] + jnp.sum(p, axis=-1, keepdims=True)
    acc_ref[...] = alpha * acc_ref[...] + jnp.dot(p.astype(v.dtype), v,
                                                  preferred_element_type=jnp.float32)
    m_ref[...] = m_new

    @pl.when(kv == pl.num_programs(3) - 1)
    def _():
        o_ref[0, 0] = (acc_ref[...] *
                       pl.reciprocal(l_ref[...], approx=True)).astype(o_ref.dtype)


def _out_proj_kernel(ctx_ref, wo_ref, bo_ref, res_ref, o_ref):
    """out_proj + first residual add (dropout p -> identity in eval), K-tiled over heads.
    The f32 output block stays resident across the head axis and accumulates."""
    @pl.when(pl.program_id(2) == 0)
    def _():
        o_ref[0] = res_ref[0] + bo_ref[...]            # residual + out_proj bias
    o_ref[0] += jnp.dot(ctx_ref[0, 0], wo_ref[0], preferred_element_type=jnp.float32)


def _ffn_kernel(x_ref, g_ref, b_ref, w1_ref, b1_ref, w2_ref, b2_ref, o_ref, xn_ref):
    """Fused final_layer_norm -> fc1 -> relu -> fc2 -> residual add.
    Grid axis 1 tiles the FFN dimension (reduction, 'arbitrary'); the f32 output block
    stays resident across it and accumulates; xn is cached in VMEM scratch."""
    @pl.when(pl.program_id(1) == 0)
    def _():
        x = x_ref[...]
        xn_ref[...] = _layernorm_f32(x, g_ref[...], b_ref[...]).astype(xn_ref.dtype)
        o_ref[...] = x + b2_ref[...]                   # residual + fc2 bias (f32)

    h = jnp.dot(xn_ref[...], w1_ref[...], preferred_element_type=jnp.float32) + b1_ref[...]
    h = jnp.maximum(h, 0.0)                            # OPT default activation = relu
    o_ref[...] += jnp.dot(h.astype(jnp.bfloat16), w2_ref[...],
                          preferred_element_type=jnp.float32)


# ------------------------------ wrapper --------------------------------------

def _vmem_limit(block_bytes):
    """Scoped-VMEM limit from the per-step block footprint (x2 buffering + margin),
    clamped to [32 MiB, 64 MiB] so it is valid on v5e/v6e/v7x."""
    need = int(2.5 * block_bytes) + (2 << 20)
    return int(min(max(need, 32 << 20), 64 << 20))


def prepare_params(params, num_heads):
    """One-time host-side prep: fold the double attention scaling into Wq/bq, reshape
    the projection weights into per-head slabs, cast matmul weights to bf16
    (biases / LN params stay f32)."""
    D = params["wq"].shape[0]
    H = num_heads
    Hd = D // H
    qscale = (Hd ** -0.5) / math.sqrt(Hd)              # == 1 / head_dim (double scaling)

    def heads_in_out(w):                               # (D, D) -> (H, D, Hd)  (output-head major)
        return jnp.transpose(w.reshape(D, H, Hd), (1, 0, 2))

    p = dict(
        ln1_g=params["ln1_g"], ln1_b=params["ln1_b"],
        ln2_g=params["ln2_g"], ln2_b=params["ln2_b"],
        wq_h=heads_in_out(params["wq"] * qscale).astype(jnp.bfloat16),
        bq_h=(params["bq"] * qscale).reshape(H, 1, Hd),
        wk_h=heads_in_out(params["wk"]).astype(jnp.bfloat16),
        bk_h=params["bk"].reshape(H, 1, Hd),
        wv_h=heads_in_out(params["wv"]).astype(jnp.bfloat16),
        bv_h=params["bv"].reshape(H, 1, Hd),
        wo_h=params["wo"].reshape(H, Hd, D).astype(jnp.bfloat16),   # input-head major rows
        bo=params["bo"],
        w1=params["w1"].astype(jnp.bfloat16), b1=params["b1"],
        w2=params["w2"].astype(jnp.bfloat16), b2=params["b2"],
    )
    return p


def opt_decoder_layer(hidden_states, prep, num_heads, *,
                      seq_tile=256, q_tile=256, kv_tile=512,
                      row_tile=256, ffn_tile=512):
    B, S, D = hidden_states.shape
    H = num_heads
    assert D % H == 0, "hidden size must be divisible by num_heads"
    Hd = D // H
    BS = B * S
    F = prep["w1"].shape[1]

    TMs = min(seq_tile, S)
    TQ = min(q_tile, S)
    TKV = min(kv_tile, S)
    TM = min(row_tile, BS)
    TF = min(ffn_tile, F)
    assert S % TMs == 0 and S % TQ == 0 and S % TKV == 0, "seq len must divide its tiles"
    assert BS % TM == 0 and F % TF == 0, "row / FFN tiles must divide their dims"
    n_s, n_q, n_kv = S // TMs, S // TQ, S // TKV
    n_rows, n_f = BS // TM, F // TF

    f32, bf16 = jnp.float32, jnp.bfloat16

    # ---- 1) fused LN1 + per-head Q/K/V projections -> head-major (B, H, S, Hd) ----
    head_out_spec = pl.BlockSpec((1, 1, TMs, Hd), lambda b, s, h: (b, h, s, 0))
    qkv_shape = jax.ShapeDtypeStruct((B, H, S, Hd), bf16)
    qkv_block_bytes = (TMs * D * 4 + 2 * D * 4 + 3 * (D * Hd * 2 + Hd * 4)
                       + 3 * TMs * Hd * 2 + TMs * D * 2)
    q, k, v = pl.pallas_call(
        _ln_qkv_kernel,
        out_shape=(qkv_shape, qkv_shape, qkv_shape),
        grid=(B, n_s, H),
        in_specs=[
            pl.BlockSpec((1, TMs, D), lambda b, s, h: (b, s, 0)),    # x (no re-DMA across h)
            pl.BlockSpec((1, D), lambda b, s, h: (0, 0)),            # ln1 gamma
            pl.BlockSpec((1, D), lambda b, s, h: (0, 0)),            # ln1 beta
            pl.BlockSpec((1, D, Hd), lambda b, s, h: (h, 0, 0)),     # Wq head h (streamed)
            pl.BlockSpec((1, 1, Hd), lambda b, s, h: (h, 0, 0)),     # bq head h
            pl.BlockSpec((1, D, Hd), lambda b, s, h: (h, 0, 0)),     # Wk head h
            pl.BlockSpec((1, 1, Hd), lambda b, s, h: (h, 0, 0)),     # bk head h
            pl.BlockSpec((1, D, Hd), lambda b, s, h: (h, 0, 0)),     # Wv head h
            pl.BlockSpec((1, 1, Hd), lambda b, s, h: (h, 0, 0)),     # bv head h
        ],
        out_specs=(head_out_spec, head_out_spec, head_out_spec),
        scratch_shapes=[pltpu.VMEM((TMs, D), bf16)],                 # cached xn
        compiler_params=pltpu.CompilerParams(
            dimension_semantics=("parallel", "parallel", "arbitrary"),
            vmem_limit_bytes=_vmem_limit(qkv_block_bytes)),
        cost_estimate=pl.CostEstimate(
            flops=2 * BS * D * 3 * D, transcendentals=BS,
            bytes_accessed=4 * BS * D + B * n_s * 3 * 2 * D * D + 3 * 2 * BS * D),
    )(hidden_states, prep["ln1_g"], prep["ln1_b"],
      prep["wq_h"], prep["bq_h"], prep["wk_h"], prep["bk_h"],
      prep["wv_h"], prep["bv_h"])

    # ---- 2) flash attention: grid (B, H, q-tiles, kv-tiles), online softmax --------
    q_spec = pl.BlockSpec((1, 1, TQ, Hd), lambda b, h, qi, ki: (b, h, qi, 0))
    kv_spec = pl.BlockSpec((1, 1, TKV, Hd), lambda b, h, qi, ki: (b, h, ki, 0))
    attn_block_bytes = (2 * TQ * Hd * 2 + 2 * TKV * Hd * 2
                        + TQ * Hd * 4 + 2 * TQ * 4 + TQ * TKV * 4)
    ctx = pl.pallas_call(
        _flash_attn_kernel,
        out_shape=jax.ShapeDtypeStruct((B, H, S, Hd), bf16),
        grid=(B, H, n_q, n_kv),
        in_specs=[q_spec, kv_spec, kv_spec],
        out_specs=q_spec,
        scratch_shapes=[pltpu.VMEM((TQ, 1), f32),        # running max
                        pltpu.VMEM((TQ, 1), f32),        # running denominator
                        pltpu.VMEM((TQ, Hd), f32)],      # context accumulator
        compiler_params=pltpu.CompilerParams(
            dimension_semantics=("parallel", "parallel", "parallel", "arbitrary"),
            vmem_limit_bytes=_vmem_limit(attn_block_bytes)),
        cost_estimate=pl.CostEstimate(
            flops=4 * B * S * S * D, transcendentals=B * H * S * S,
            bytes_accessed=2 * BS * D * (2 + 2 * n_q)),
    )(q, k, v)

    # ---- 3) out_proj + first residual add (K-reduction over heads) ------------------
    oproj_block_bytes = TMs * Hd * 2 + Hd * D * 2 + D * 4 + 2 * TMs * D * 4
    attn_out = pl.pallas_call(
        _out_proj_kernel,
        out_shape=jax.ShapeDtypeStruct((B, S, D), f32),
        grid=(B, n_s, H),
        in_specs=[
            pl.BlockSpec((1, 1, TMs, Hd), lambda b, s, h: (b, h, s, 0)),  # ctx head h
            pl.BlockSpec((1, Hd, D), lambda b, s, h: (h, 0, 0)),          # Wo rows of head h
            pl.BlockSpec((1, D), lambda b, s, h: (0, 0)),                 # bo
            pl.BlockSpec((1, TMs, D), lambda b, s, h: (b, s, 0)),         # residual
        ],
        out_specs=pl.BlockSpec((1, TMs, D), lambda b, s, h: (b, s, 0)),
        compiler_params=pltpu.CompilerParams(
            dimension_semantics=("parallel", "parallel", "arbitrary"),
            vmem_limit_bytes=_vmem_limit(oproj_block_bytes)),
        cost_estimate=pl.CostEstimate(
            flops=2 * BS * D * D, transcendentals=0,
            bytes_accessed=2 * BS * D + B * n_s * 2 * D * D + 8 * BS * D),
    )(ctx, prep["wo_h"], prep["bo"], hidden_states)

    # ---- 4) fused LN2 + fc1 + relu + fc2 + residual (FFN-dim tiled reduction) -------
    x_ffn = attn_out.reshape(BS, D)
    ffn_block_bytes = (2 * TM * D * 4 + 2 * D * 4 + D * TF * 2 + TF * 4
                       + TF * D * 2 + D * 4 + TM * D * 2)
    out = pl.pallas_call(
        _ffn_kernel,
        out_shape=jax.ShapeDtypeStruct((BS, D), f32),
        grid=(n_rows, n_f),
        in_specs=[pl.BlockSpec((TM, D), lambda i, j: (i, 0)),
                  pl.BlockSpec((1, D), lambda i, j: (0, 0)),
                  pl.BlockSpec((1, D), lambda i, j: (0, 0)),
                  pl.BlockSpec((D, TF), lambda i, j: (0, j)),
                  pl.BlockSpec((1, TF), lambda i, j: (0, j)),
                  pl.BlockSpec((TF, D), lambda i, j: (j, 0)),
                  pl.BlockSpec((1, D), lambda i, j: (0, 0))],
        out_specs=pl.BlockSpec((TM, D), lambda i, j: (i, 0)),
        scratch_shapes=[pltpu.VMEM((TM, D), bf16)],
        compiler_params=pltpu.CompilerParams(
            dimension_semantics=("parallel", "arbitrary"),
            vmem_limit_bytes=_vmem_limit(ffn_block_bytes)),
        input_output_aliases={0: 0},                   # in-place residual add over attn_out
        cost_estimate=pl.CostEstimate(
            flops=4 * BS * D * F, transcendentals=BS,
            bytes_accessed=8 * BS * D + n_rows * 2 * 2 * D * F),
    )(x_ffn, prep["ln2_g"], prep["ln2_b"],
      prep["w1"], prep["b1"], prep["w2"], prep["b2"])

    return out.reshape(B, S, D)


# ------------------------------ reference (pure JAX, f32) ---------------------

def reference(hs, params, H):
    B, S, D = hs.shape
    Hd = D // H
    x = hs.reshape(B * S, D)

    def ln(t, g, b):
        m = t.mean(-1, keepdims=True)
        v = ((t - m) ** 2).mean(-1, keepdims=True)
        return (t - m) / jnp.sqrt(v + EPS) * g + b

    h = ln(x, params["ln1_g"], params["ln1_b"])
    q = (h @ params["wq"] + params["bq"]) * (Hd ** -0.5)
    k = h @ params["wk"] + params["bk"]
    v = h @ params["wv"] + params["bv"]

    def heads(t):
        return t.reshape(B, S, H, Hd).transpose(0, 2, 1, 3)

    qh, kh, vh = heads(q), heads(k), heads(v)
    s = jnp.einsum("bhqd,bhkd->bhqk", qh, kh) / math.sqrt(Hd)
    p = jax.nn.softmax(s, axis=-1)
    ctx = jnp.einsum("bhqk,bhkd->bhqd", p, vh).transpose(0, 2, 1, 3).reshape(B * S, D)
    attn = x + ctx @ params["wo"] + params["bo"]
    h2 = ln(attn, params["ln2_g"], params["ln2_b"])
    f = jnp.maximum(h2 @ params["w1"] + params["b1"], 0.0)
    out = attn + f @ params["w2"] + params["b2"]
    return out.reshape(B, S, D)


# ------------------------------ setup -----------------------------------------

def init_params(key, D, F):
    ks = jax.random.split(key, 12)
    n = lambda k, shape: 0.02 * jax.random.normal(k, shape, jnp.float32)
    return dict(
        ln1_g=jnp.ones((1, D), jnp.float32), ln1_b=jnp.zeros((1, D), jnp.float32),
        wq=n(ks[0], (D, D)), bq=n(ks[1], (1, D)),
        wk=n(ks[2], (D, D)), bk=n(ks[3], (1, D)),
        wv=n(ks[4], (D, D)), bv=n(ks[5], (1, D)),
        wo=n(ks[6], (D, D)), bo=n(ks[7], (1, D)),
        ln2_g=jnp.ones((1, D), jnp.float32), ln2_b=jnp.zeros((1, D), jnp.float32),
        w1=n(ks[8], (D, F)), b1=n(ks[9], (1, F)),
        w2=n(ks[10], (F, D)), b2=n(ks[11], (1, D)),
    )


if __name__ == "__main__":
    # small OPT-like config: hidden=256, heads=4 (head_dim=64), ffn=512, seq=256, batch=2.
    # Tile sizes chosen below so every multi-tile / accumulation code path is exercised.
    B, S, D, H, F = 2, 256, 256, 4, 512

    key = jax.random.PRNGKey(0)
    k_x, k_p = jax.random.split(key)
    hidden_states = jax.random.normal(k_x, (B, S, D), jnp.float32)
    params = init_params(k_p, D, F)
    prep = prepare_params(params, num_heads=H)

    layer = jax.jit(partial(opt_decoder_layer, num_heads=H,
                            seq_tile=128, q_tile=128, kv_tile=128,
                            row_tile=256, ffn_tile=256))
    out = jax.block_until_ready(layer(hidden_states, prep))

    ref = reference(hidden_states, params, H)
    assert out.shape == (B, S, D)
    # bf16 MXU operands + approx softmax reciprocal -> bf16-level tolerance vs f32 reference
    err = float(jnp.max(jnp.abs(out - ref)))
    assert jnp.allclose(out, ref, atol=2e-2, rtol=2e-2), f"mismatch vs reference (max abs err {err})"

    print("KERNEL_OK")
</pallas_src>

<mosaic_0001>
module attributes {stable_mosaic.version = 11 : i64} {
  func.func @_flash_attn_kernel(%arg0: i32, %arg1: i32, %arg2: i32, %arg3: i32, %arg4: memref<1x1x128x64xbf16, #tpu.memory_space<vmem>>, %arg5: memref<1x1x128x64xbf16, #tpu.memory_space<vmem>>, %arg6: memref<1x1x128x64xbf16, #tpu.memory_space<vmem>>, %arg7: memref<1x1x128x64xbf16, #tpu.memory_space<vmem>>, %arg8: memref<128x1xf32, #tpu.memory_space<vmem>>, %arg9: memref<128x1xf32, #tpu.memory_space<vmem>>, %arg10: memref<128x64xf32, #tpu.memory_space<vmem>>) attributes {dimension_semantics = [#tpu.dimension_semantics<parallel>, #tpu.dimension_semantics<parallel>, #tpu.dimension_semantics<parallel>, #tpu.dimension_semantics<arbitrary>], iteration_bounds = array<i64: 2, 4, 2, 2>, scalar_prefetch = 0 : i64, scratch_operands = 3 : i64, tpu.core_type = #tpu.core_type<tc>, window_params = [{transform_indices = @transform_0, window_bounds = array<i64: 1, 1, 128, 64>}, {transform_indices = @transform_1, window_bounds = array<i64: 1, 1, 128, 64>}, {transform_indices = @transform_2, window_bounds = array<i64: 1, 1, 128, 64>}, {transform_indices = @transform_3, window_bounds = array<i64: 1, 1, 128, 64>}]} {
    %c0_i32 = arith.constant 0 : i32
    %0 = arith.cmpi eq, %arg3, %c0_i32 : i32
    %1 = arith.extui %0 : i1 to i32
    %c0_i32_0 = arith.constant 0 : i32
    %2 = arith.cmpi ne, %1, %c0_i32_0 : i32
    scf.if %2 {
      %cst_28 = arith.constant 0xFF800000 : f32
      %36 = vector.broadcast %cst_28 : f32 to vector<128x1xf32>
      %c0_29 = arith.constant 0 : index
      %c0_30 = arith.constant 0 : index
      %37 = vector.load %arg8[%c0_29, %c0_30] : memref<128x1xf32, #tpu.memory_space<vmem>>, vector<128x1xf32>
      tpu.vector_store %arg8[%c0_29, %c0_30], %36 {strides = array<i32>} : memref<128x1xf32, #tpu.memory_space<vmem>>, vector<128x1xf32>,
      %cst_31 = arith.constant 0.000000e+00 : f32
      %38 = vector.broadcast %cst_31 : f32 to vector<128x1xf32>
      %c0_32 = arith.constant 0 : index
      %c0_33 = arith.constant 0 : index
      %39 = vector.load %arg9[%c0_32, %c0_33] : memref<128x1xf32, #tpu.memory_space<vmem>>, vector<128x1xf32>
      tpu.vector_store %arg9[%c0_32, %c0_33], %38 {strides = array<i32>} : memref<128x1xf32, #tpu.memory_space<vmem>>, vector<128x1xf32>,
      %cst_34 = arith.constant 0.000000e+00 : f32
      %40 = vector.broadcast %cst_34 : f32 to vector<128x64xf32>
      %c0_35 = arith.constant 0 : index
      %c0_36 = arith.constant 0 : index
      %41 = vector.load %arg10[%c0_35, %c0_36] : memref<128x64xf32, #tpu.memory_space<vmem>>, vector<128x64xf32>
      tpu.vector_store %arg10[%c0_35, %c0_36], %40 {strides = array<i32>} : memref<128x64xf32, #tpu.memory_space<vmem>>, vector<128x64xf32>,
    } else {
    }
    %c0 = arith.constant 0 : index
    %c0_1 = arith.constant 0 : index
    %c0_2 = arith.constant 0 : index
    %c0_3 = arith.constant 0 : index
    %3 = vector.load %arg4[%c0, %c0_1, %c0_2, %c0_3] : memref<1x1x128x64xbf16, #tpu.memory_space<vmem>>, vector<1x1x128x64xbf16>
    %4 = vector.shape_cast %3 : vector<1x1x128x64xbf16> to vector<128x64xbf16>
    %c0_4 = arith.constant 0 : index
    %c0_5 = arith.constant 0 : index
    %c0_6 = arith.constant 0 : index
    %c0_7 = arith.constant 0 : index
    %5 = vector.load %arg5[%c0_4, %c0_5, %c0_6, %c0_7] : memref<1x1x128x64xbf16, #tpu.memory_space<vmem>>, vector<1x1x128x64xbf16>
    %6 = vector.shape_cast %5 : vector<1x1x128x64xbf16> to vector<128x64xbf16>
    %c0_8 = arith.constant 0 : index
    %c0_9 = arith.constant 0 : index
    %c0_10 = arith.constant 0 : index
    %c0_11 = arith.constant 0 : index
    %7 = vector.load %arg6[%c0_8, %c0_9, %c0_10, %c0_11] : memref<1x1x128x64xbf16, #tpu.memory_space<vmem>>, vector<1x1x128x64xbf16>
    %8 = vector.shape_cast %7 : vector<1x1x128x64xbf16> to vector<128x64xbf16>
    %cst = arith.constant dense<0.000000e+00> : vector<128x128xf32>
    %9 = tpu.matmul %4, %6, %cst {dimension_numbers = #tpu.dot_dimension_numbers<[1], [1], [0], [0], [0, 0, 1, 0], [], []>} : vector<128x64xbf16>, vector<128x64xbf16>, vector<128x128xf32> -> vector<128x128xf32>
    %c0_12 = arith.constant 0 : index
    %c0_13 = arith.constant 0 : index
    %10 = vector.load %arg8[%c0_12, %c0_13] : memref<128x1xf32, #tpu.memory_space<vmem>>, vector<128x1xf32>
    %cst_14 = arith.constant dense<0xFF800000> : vector<128xf32>
    %11 = vector.multi_reduction <maximumf>, %9, %cst_14 [1] : vector<128x128xf32> to vector<128xf32>
    %12 = vector.shape_cast %11 : vector<128xf32> to vector<128x1xf32>
    %13 = arith.maximumf %10, %12 : vector<128x1xf32>
    %14 = arith.subf %10, %13 : vector<128x1xf32>
    %15 = math.exp %14 : vector<128x1xf32>
    %16 = vector.broadcast %13 : vector<128x1xf32> to vector<128x128xf32>
    %17 = arith.subf %9, %16 : vector<128x128xf32>
    %18 = math.exp %17 : vector<128x128xf32>
    %c0_15 = arith.constant 0 : index
    %c0_16 = arith.constant 0 : index
    %19 = vector.load %arg9[%c0_15, %c0_16] : memref<128x1xf32, #tpu.memory_space<vmem>>, vector<128x1xf32>
    %20 = arith.mulf %15, %19 : vector<128x1xf32>
    %cst_17 = arith.constant dense<0.000000e+00> : vector<128xf32>
    %21 = vector.multi_reduction <add>, %18, %cst_17 [1] : vector<128x128xf32> to vector<128xf32>
    %22 = vector.shape_cast %21 : vector<128xf32> to vector<128x1xf32>
    %23 = arith.addf %20, %22 : vector<128x1xf32>
    %c0_18 = arith.constant 0 : index
    %c0_19 = arith.constant 0 : index
    %24 = vector.load %arg9[%c0_18, %c0_19] : memref<128x1xf32, #tpu.memory_space<vmem>>, vector<128x1xf32>
    tpu.vector_store %arg9[%c0_18, %c0_19], %23 {strides = array<i32>} : memref<128x1xf32, #tpu.memory_space<vmem>>, vector<128x1xf32>,
    %c0_20 = arith.constant 0 : index
    %c0_21 = arith.constant 0 : index
    %25 = vector.load %arg10[%c0_20, %c0_21] : memref<128x64xf32, #tpu.memory_space<vmem>>, vector<128x64xf32>
    %26 = vector.broadcast %15 : vector<128x1xf32> to vector<128x64xf32>
    %27 = arith.mulf %26, %25 : vector<128x64xf32>
    %28 = arith.truncf %18 : vector<128x128xf32> to vector<128x128xbf16>
    %cst_22 = arith.constant dense<0.000000e+00> : vector<128x64xf32>
    %29 = tpu.matmul %28, %8, %cst_22 {dimension_numbers = #tpu.dot_dimension_numbers<[1], [0], [0], [1], [0, 0, 1, 1], [], []>} : vector<128x128xbf16>, vector<128x64xbf16>, vector<128x64xf32> -> vector<128x64xf32>
    %30 = arith.addf %27, %29 : vector<128x64xf32>
    %c0_23 = arith.constant 0 : index
    %c0_24 = arith.constant 0 : index
    %31 = vector.load %arg10[%c0_23, %c0_24] : memref<128x64xf32, #tpu.memory_space<vmem>>, vector<128x64xf32>
    tpu.vector_store %arg10[%c0_23, %c0_24], %30 {strides = array<i32>} : memref<128x64xf32, #tpu.memory_space<vmem>>, vector<128x64xf32>,
    %c0_25 = arith.constant 0 : index
    %c0_26 = arith.constant 0 : index
    %32 = vector.load %arg8[%c0_25, %c0_26] : memref<128x1xf32, #tpu.memory_space<vmem>>, vector<128x1xf32>
    tpu.vector_store %arg8[%c0_25, %c0_26], %13 {strides = array<i32>} : memref<128x1xf32, #tpu.memory_space<vmem>>, vector<128x1xf32>,
    %c1_i32 = arith.constant 1 : i32
    %33 = arith.cmpi eq, %arg3, %c1_i32 : i32
    %34 = arith.extui %33 : i1 to i32
    %c0_i32_27 = arith.constant 0 : i32
    %35 = arith.cmpi ne, %34, %c0_i32_27 : i32
    scf.if %35 {
      %c0_28 = arith.constant 0 : index
      %c0_29 = arith.constant 0 : index
      %36 = vector.load %arg10[%c0_28, %c0_29] : memref<128x64xf32, #tpu.memory_space<vmem>>, vector<128x64xf32>
      %c0_30 = arith.constant 0 : index
      %c0_31 = arith.constant 0 : index
      %37 = vector.load %arg9[%c0_30, %c0_31] : memref<128x1xf32, #tpu.memory_space<vmem>>, vector<128x1xf32>
      %38 = tpu.reciprocal %37 {approx = true} : vector<128x1xf32> -> vector<128x1xf32>
      %39 = vector.broadcast %38 : vector<128x1xf32> to vector<128x64xf32>
      %40 = arith.mulf %36, %39 : vector<128x64xf32>
      %41 = arith.truncf %40 : vector<128x64xf32> to vector<128x64xbf16>
      %c0_32 = arith.constant 0 : index
      %c0_33 = arith.constant 0 : index
      %c0_34 = arith.constant 0 : index
      %c0_35 = arith.constant 0 : index
      %42 = vector.load %arg7[%c0_32, %c0_33, %c0_34, %c0_35] : memref<1x1x128x64xbf16, #tpu.memory_space<vmem>>, vector<1x1x128x64xbf16>
      %43 = vector.shape_cast %42 : vector<1x1x128x64xbf16> to vector<128x64xbf16>
      %44 = vector.shape_cast %41 : vector<128x64xbf16> to vector<1x1x128x64xbf16>
      tpu.vector_store %arg7[%c0_32, %c0_33, %c0_34, %c0_35], %44 {strides = array<i32>} : memref<1x1x128x64xbf16, #tpu.memory_space<vmem>>, vector<1x1x128x64xbf16>,
    } else {
    }
    return
  }
  func.func @transform_0(%arg0: i32, %arg1: i32, %arg2: i32, %arg3: i32) -> (i32, i32, i32, i32) {
    %c0_i32 = arith.constant 0 : i32
    %c0_i32_0 = arith.constant 0 : i32
    return %arg0, %arg1, %arg2, %c0_i32 : i32, i32, i32, i32
  }
  func.func @transform_1(%arg0: i32, %arg1: i32, %arg2: i32, %arg3: i32) -> (i32, i32, i32, i32) {
    %c0_i32 = arith.constant 0 : i32
    %c0_i32_0 = arith.constant 0 : i32
    return %arg0, %arg1, %arg3, %c0_i32 : i32, i32, i32, i32
  }
  func.func @transform_2(%arg0: i32, %arg1: i32, %arg2: i32, %arg3: i32) -> (i32, i32, i32, i32) {
    %c0_i32 = arith.constant 0 : i32
    %c0_i32_0 = arith.constant 0 : i32
    return %arg0, %arg1, %arg3, %c0_i32 : i32, i32, i32, i32
  }
  func.func @transform_3(%arg0: i32, %arg1: i32, %arg2: i32, %arg3: i32) -> (i32, i32, i32, i32) {
    %c0_i32 = arith.constant 0 : i32
    %c0_i32_0 = arith.constant 0 : i32
    return %arg0, %arg1, %arg2, %c0_i32 : i32, i32, i32, i32
  }
}

module attributes {stable_mosaic.version = 11 : i64} {
  func.func @_ln_qkv_kernel(%arg0: i32, %arg1: i32, %arg2: i32, %arg3: memref<1x128x256xf32, #tpu.memory_space<vmem>>, %arg4: memref<1x256xf32, #tpu.memory_space<vmem>>, %arg5: memref<1x256xf32, #tpu.memory_space<vmem>>, %arg6: memref<1x256x64xbf16, #tpu.memory_space<vmem>>, %arg7: memref<1x1x64xf32, #tpu.memory_space<vmem>>, %arg8: memref<1x256x64xbf16, #tpu.memory_space<vmem>>, %arg9: memref<1x1x64xf32, #tpu.memory_space<vmem>>, %arg10: memref<1x256x64xbf16, #tpu.memory_space<vmem>>, %arg11: memref<1x1x64xf32, #tpu.memory_space<vmem>>, %arg12: memref<1x1x128x64xbf16, #tpu.memory_space<vmem>>, %arg13: memref<1x1x128x64xbf16, #tpu.memory_space<vmem>>, %arg14: memref<1x1x128x64xbf16, #tpu.memory_space<vmem>>, %arg15: memref<128x256xbf16, #tpu.memory_space<vmem>>) attributes {dimension_semantics = [#tpu.dimension_semantics<parallel>, #tpu.dimension_semantics<parallel>, #tpu.dimension_semantics<arbitrary>], iteration_bounds = array<i64: 2, 2, 4>, scalar_prefetch = 0 : i64, scratch_operands = 1 : i64, tpu.core_type = #tpu.core_type<tc>, window_params = [{transform_indices = @transform_0, window_bounds = array<i64: 1, 128, 256>}, {pipeline_mode = #tpu.pipeline_mode<synchronous>, transform_indices = @transform_1, window_bounds = array<i64: 1, 256>}, {pipeline_mode = #tpu.pipeline_mode<synchronous>, transform_indices = @transform_2, window_bounds = array<i64: 1, 256>}, {transform_indices = @transform_3, window_bounds = array<i64: 1, 256, 64>}, {transform_indices = @transform_4, window_bounds = array<i64: 1, 1, 64>}, {transform_indices = @transform_5, window_bounds = array<i64: 1, 256, 64>}, {transform_indices = @transform_6, window_bounds = array<i64: 1, 1, 64>}, {transform_indices = @transform_7, window_bounds = array<i64: 1, 256, 64>}, {transform_indices = @transform_8, window_bounds = array<i64: 1, 1, 64>}, {transform_indices = @transform_9, window_bounds = array<i64: 1, 1, 128, 64>}, {transform_indices = @transform_10, window_bounds = array<i64: 1, 1, 128, 64>}, {transform_indices = @transform_11, window_bounds = array<i64: 1, 1, 128, 64>}]} {
    %c0_i32 = arith.constant 0 : i32
    %0 = arith.cmpi eq, %arg2, %c0_i32 : i32
    %1 = arith.extui %0 : i1 to i32
    %c0_i32_0 = arith.constant 0 : i32
    %2 = arith.cmpi ne, %1, %c0_i32_0 : i32
    scf.if %2 {
      %c0_34 = arith.constant 0 : index
      %c0_35 = arith.constant 0 : index
      %c0_36 = arith.constant 0 : index
      %37 = vector.load %arg3[%c0_34, %c0_35, %c0_36] : memref<1x128x256xf32, #tpu.memory_space<vmem>>, vector<1x128x256xf32>
      %38 = vector.shape_cast %37 : vector<1x128x256xf32> to vector<128x256xf32>
      %c0_37 = arith.constant 0 : index
      %c0_38 = arith.constant 0 : index
      %39 = vector.load %arg4[%c0_37, %c0_38] : memref<1x256xf32, #tpu.memory_space<vmem>>, vector<1x256xf32>
      %c0_39 = arith.constant 0 : index
      %c0_40 = arith.constant 0 : index
      %40 = vector.load %arg5[%c0_39, %c0_40] : memref<1x256xf32, #tpu.memory_space<vmem>>, vector<1x256xf32>
      %cst_41 = arith.constant dense<0.000000e+00> : vector<128xf32>
      %41 = vector.multi_reduction <add>, %38, %cst_41 [1] : vector<128x256xf32> to vector<128xf32>
      %42 = vector.shape_cast %41 : vector<128xf32> to vector<128x1xf32>
      %cst_42 = arith.constant 2.560000e+02 : f32
      %43 = vector.broadcast %cst_42 : f32 to vector<128x1xf32>
      %44 = arith.divf %42, %43 : vector<128x1xf32>
      %45 = vector.broadcast %44 : vector<128x1xf32> to vector<128x256xf32>
      %46 = arith.subf %38, %45 : vector<128x256xf32>
      %47 = arith.mulf %46, %46 : vector<128x256xf32>
      %cst_43 = arith.constant dense<0.000000e+00> : vector<128xf32>
      %48 = vector.multi_reduction <add>, %47, %cst_43 [1] : vector<128x256xf32> to vector<128xf32>
      %49 = vector.shape_cast %48 : vector<128xf32> to vector<128x1xf32>
      %cst_44 = arith.constant 2.560000e+02 : f32
      %50 = vector.broadcast %cst_44 : f32 to vector<128x1xf32>
      %51 = arith.divf %49, %50 : vector<128x1xf32>
      %52 = vector.broadcast %44 : vector<128x1xf32> to vector<128x256xf32>
      %53 = arith.subf %38, %52 : vector<128x256xf32>
      %cst_45 = arith.constant 9.99999974E-6 : f32
      %54 = vector.broadcast %cst_45 : f32 to vector<128x1xf32>
      %55 = arith.addf %51, %54 : vector<128x1xf32>
      %56 = math.rsqrt %55 : vector<128x1xf32>
      %57 = vector.broadcast %56 : vector<128x1xf32> to vector<128x256xf32>
      %58 = arith.mulf %53, %57 : vector<128x256xf32>
      %59 = vector.broadcast %39 : vector<1x256xf32> to vector<128x256xf32>
      %60 = arith.mulf %58, %59 : vector<128x256xf32>
      %61 = vector.broadcast %40 : vector<1x256xf32> to vector<128x256xf32>
      %62 = arith.addf %60, %61 : vector<128x256xf32>
      %63 = arith.truncf %62 : vector<128x256xf32> to vector<128x256xbf16>
      %c0_46 = arith.constant 0 : index
      %c0_47 = arith.constant 0 : index
      %64 = vector.load %arg15[%c0_46, %c0_47] : memref<128x256xbf16, #tpu.memory_space<vmem>>, vector<128x256xbf16>
      tpu.vector_store %arg15[%c0_46, %c0_47], %63 {strides = array<i32>} : memref<128x256xbf16, #tpu.memory_space<vmem>>, vector<128x256xbf16>,
    } else {
    }
    %c0 = arith.constant 0 : index
    %c0_1 = arith.constant 0 : index
    %3 = vector.load %arg15[%c0, %c0_1] : memref<128x256xbf16, #tpu.memory_space<vmem>>, vector<128x256xbf16>
    %c0_2 = arith.constant 0 : index
    %c0_3 = arith.constant 0 : index
    %c0_4 = arith.constant 0 : index
    %4 = vector.load %arg6[%c0_2, %c0_3, %c0_4] : memref<1x256x64xbf16, #tpu.memory_space<vmem>>, vector<1x256x64xbf16>
    %5 = vector.shape_cast %4 : vector<1x256x64xbf16> to vector<256x64xbf16>
    %cst = arith.constant dense<0.000000e+00> : vector<128x64xf32>
    %6 = tpu.matmul %3, %5, %cst {dimension_numbers = #tpu.dot_dimension_numbers<[1], [0], [0], [1], [0, 0, 1, 1], [], []>} : vector<128x256xbf16>, vector<256x64xbf16>, vector<128x64xf32> -> vector<128x64xf32>
    %c0_5 = arith.constant 0 : index
    %c0_6 = arith.constant 0 : index
    %c0_7 = arith.constant 0 : index
    %7 = vector.load %arg7[%c0_5, %c0_6, %c0_7] : memref<1x1x64xf32, #tpu.memory_space<vmem>>, vector<1x1x64xf32>
    %8 = vector.shape_cast %7 : vector<1x1x64xf32> to vector<1x64xf32>
    %9 = vector.broadcast %8 : vector<1x64xf32> to vector<128x64xf32>
    %10 = arith.addf %6, %9 : vector<128x64xf32>
    %11 = arith.truncf %10 : vector<128x64xf32> to vector<128x64xbf16>
    %c0_8 = arith.constant 0 : index
    %c0_9 = arith.constant 0 : index
    %c0_10 = arith.constant 0 : index
    %c0_11 = arith.constant 0 : index
    %12 = vector.load %arg12[%c0_8, %c0_9, %c0_10, %c0_11] : memref<1x1x128x64xbf16, #tpu.memory_space<vmem>>, vector<1x1x128x64xbf16>
    %13 = vector.shape_cast %12 : vector<1x1x128x64xbf16> to vector<128x64xbf16>
    %14 = vector.shape_cast %11 : vector<128x64xbf16> to vector<1x1x128x64xbf16>
    tpu.vector_store %arg12[%c0_8, %c0_9, %c0_10, %c0_11], %14 {strides = array<i32>} : memref<1x1x128x64xbf16, #tpu.memory_space<vmem>>, vector<1x1x128x64xbf16>,
    %c0_12 = arith.constant 0 : index
    %c0_13 = arith.constant 0 : index
    %c0_14 = arith.constant 0 : index
    %15 = vector.load %arg8[%c0_12, %c0_13, %c0_14] : memref<1x256x64xbf16, #tpu.memory_space<vmem>>, vector<1x256x64xbf16>
    %16 = vector.shape_cast %15 : vector<1x256x64xbf16> to vector<256x64xbf16>
    %cst_15 = arith.constant dense<0.000000e+00> : vector<128x64xf32>
    %17 = tpu.matmul %3, %16, %cst_15 {dimension_numbers = #tpu.dot_dimension_numbers<[1], [0], [0], [1], [0, 0, 1, 1], [], []>} : vector<128x256xbf16>, vector<256x64xbf16>, vector<128x64xf32> -> vector<128x64xf32>
    %c0_16 = arith.constant 0 : index
    %c0_17 = arith.constant 0 : index
    %c0_18 = arith.constant 0 : index
    %18 = vector.load %arg9[%c0_16, %c0_17, %c0_18] : memref<1x1x64xf32, #tpu.memory_space<vmem>>, vector<1x1x64xf32>
    %19 = vector.shape_cast %18 : vector<1x1x64xf32> to vector<1x64xf32>
    %20 = vector.broadcast %19 : vector<1x64xf32> to vector<128x64xf32>
    %21 = arith.addf %17, %20 : vector<128x64xf32>
    %22 = arith.truncf %21 : vector<128x64xf32> to vector<128x64xbf16>
    %c0_19 = arith.constant 0 : index
    %c0_20 = arith.constant 0 : index
    %c0_21 = arith.constant 0 : index
    %c0_22 = arith.constant 0 : index
    %23 = vector.load %arg13[%c0_19, %c0_20, %c0_21, %c0_22] : memref<1x1x128x64xbf16, #tpu.memory_space<vmem>>, vector<1x1x128x64xbf16>
    %24 = vector.shape_cast %23 : vector<1x1x128x64xbf16> to vector<128x64xbf16>
    %25 = vector.shape_cast %22 : vector<128x64xbf16> to vector<1x1x128x64xbf16>
    tpu.vector_store %arg13[%c0_19, %c0_20, %c0_21, %c0_22], %25 {strides = array<i32>} : memref<1x1x128x64xbf16, #tpu.memory_space<vmem>>, vector<1x1x128x64xbf16>,
    %c0_23 = arith.constant 0 : index
    %c0_24 = arith.constant 0 : index
    %c0_25 = arith.constant 0 : index
    %26 = vector.load %arg10[%c0_23, %c0_24, %c0_25] : memref<1x256x64xbf16, #tpu.memory_space<vmem>>, vector<1x256x64xbf16>
    %27 = vector.shape_cast %26 : vector<1x256x64xbf16> to vector<256x64xbf16>
    %cst_26 = arith.constant dense<0.000000e+00> : vector<128x64xf32>
    %28 = tpu.matmul %3, %27, %cst_26 {dimension_numbers = #tpu.dot_dimension_numbers<[1], [0], [0], [1], [0, 0, 1, 1], [], []>} : vector<128x256xbf16>, vector<256x64xbf16>, vector<128x64xf32> -> vector<128x64xf32>
    %c0_27 = arith.constant 0 : index
    %c0_28 = arith.constant 0 : index
    %c0_29 = arith.constant 0 : index
    %29 = vector.load %arg11[%c0_27, %c0_28, %c0_29] : memref<1x1x64xf32, #tpu.memory_space<vmem>>, vector<1x1x64xf32>
    %30 = vector.shape_cast %29 : vector<1x1x64xf32> to vector<1x64xf32>
    %31 = vector.broadcast %30 : vector<1x64xf32> to vector<128x64xf32>
    %32 = arith.addf %28, %31 : vector<128x64xf32>
    %33 = arith.truncf %32 : vector<128x64xf32> to vector<128x64xbf16>
    %c0_30 = arith.constant 0 : index
    %c0_31 = arith.constant 0 : index
    %c0_32 = arith.constant 0 : index
    %c0_33 = arith.constant 0 : index
    %34 = vector.load %arg14[%c0_30, %c0_31, %c0_32, %c0_33] : memref<1x1x128x64xbf16, #tpu.memory_space<vmem>>, vector<1x1x128x64xbf16>
    %35 = vector.shape_cast %34 : vector<1x1x128x64xbf16> to vector<128x64xbf16>
    %36 = vector.shape_cast %33 : vector<128x64xbf16> to vector<1x1x128x64xbf16>
    tpu.vector_store %arg14[%c0_30, %c0_31, %c0_32, %c0_33], %36 {strides = array<i32>} : memref<1x1x128x64xbf16, #tpu.memory_space<vmem>>, vector<1x1x128x64xbf16>,
    return
  }
  func.func @transform_0(%arg0: i32, %arg1: i32, %arg2: i32) -> (i32, i32, i32) {
    %c0_i32 = arith.constant 0 : i32
    %c0_i32_0 = arith.constant 0 : i32
    return %arg0, %arg1, %c0_i32 : i32, i32, i32
  }
  func.func @transform_1(%arg0: i32, %arg1: i32, %arg2: i32) -> (i32, i32) {
    %c0_i32 = arith.constant 0 : i32
    %c0_i32_0 = arith.constant 0 : i32
    %c0_i32_1 = arith.constant 0 : i32
    return %c0_i32, %c0_i32_0 : i32, i32
  }
  func.func @transform_2(%arg0: i32, %arg1: i32, %arg2: i32) -> (i32, i32) {
    %c0_i32 = arith.constant 0 : i32
    %c0_i32_0 = arith.constant 0 : i32
    %c0_i32_1 = arith.constant 0 : i32
    return %c0_i32, %c0_i32_0 : i32, i32
  }
  func.func @transform_3(%arg0: i32, %arg1: i32, %arg2: i32) -> (i32, i32, i32) {
    %c0_i32 = arith.constant 0 : i32
    %c0_i32_0 = arith.constant 0 : i32
    %c0_i32_1 = arith.constant 0 : i32
    return %arg2, %c0_i32, %c0_i32_0 : i32, i32, i32
  }
  func.func @transform_4(%arg0: i32, %arg1: i32, %arg2: i32) -> (i32, i32, i32) {
    %c0_i32 = arith.constant 0 : i32
    %c0_i32_0 = arith.constant 0 : i32
    %c0_i32_1 = arith.constant 0 : i32
    return %arg2, %c0_i32, %c0_i32_0 : i32, i32, i32
  }
  func.func @transform_5(%arg0: i32, %arg1: i32, %arg2: i32) -> (i32, i32, i32) {
    %c0_i32 = arith.constant 0 : i32
    %c0_i32_0 = arith.constant 0 : i32
    %c0_i32_1 = arith.constant 0 : i32
    return %arg2, %c0_i32, %c0_i32_0 : i32, i32, i32
  }
  func.func @transform_6(%arg0: i32, %arg1: i32, %arg2: i32) -> (i32, i32, i32) {
    %c0_i32 = arith.constant 0 : i32
    %c0_i32_0 = arith.constant 0 : i32
    %c0_i32_1 = arith.constant 0 : i32
    return %arg2, %c0_i32, %c0_i32_0 : i32, i32, i32
  }
  func.func @transform_7(%arg0: i32, %arg1: i32, %arg2: i32) -> (i32, i32, i32) {
    %c0_i32 = arith.constant 0 : i32
    %c0_i32_0 = arith.constant 0 : i32
    %c0_i32_1 = arith.constant 0 : i32
    return %arg2, %c0_i32, %c0_i32_0 : i32, i32, i32
  }
  func.func @transform_8(%arg0: i32, %arg1: i32, %arg2: i32) -> (i32, i32, i32) {
    %c0_i32 = arith.constant 0 : i32
    %c0_i32_0 = arith.constant 0 : i32
    %c0_i32_1 = arith.constant 0 : i32
    return %arg2, %c0_i32, %c0_i32_0 : i32, i32, i32
  }
  func.func @transform_9(%arg0: i32, %arg1: i32, %arg2: i32) -> (i32, i32, i32, i32) {
    %c0_i32 = arith.constant 0 : i32
    %c0_i32_0 = arith.constant 0 : i32
    return %arg0, %arg2, %arg1, %c0_i32 : i32, i32, i32, i32
  }
  func.func @transform_10(%arg0: i32, %arg1: i32, %arg2: i32) -> (i32, i32, i32, i32) {
    %c0_i32 = arith.constant 0 : i32
    %c0_i32_0 = arith.constant 0 : i32
    return %arg0, %arg2, %arg1, %c0_i32 : i32, i32, i32, i32
  }
  func.func @transform_11(%arg0: i32, %arg1: i32, %arg2: i32) -> (i32, i32, i32, i32) {
    %c0_i32 = arith.constant 0 : i32
    %c0_i32_0 = arith.constant 0 : i32
    return %arg0, %arg2, %arg1, %c0_i32 : i32, i32, i32, i32
  }
}

module attributes {stable_mosaic.version = 11 : i64} {
  func.func @_out_proj_kernel(%arg0: i32, %arg1: i32, %arg2: i32, %arg3: memref<1x1x128x64xbf16, #tpu.memory_space<vmem>>, %arg4: memref<1x64x256xbf16, #tpu.memory_space<vmem>>, %arg5: memref<1x256xf32, #tpu.memory_space<vmem>>, %arg6: memref<1x128x256xf32, #tpu.memory_space<vmem>>, %arg7: memref<1x128x256xf32, #tpu.memory_space<vmem>>) attributes {dimension_semantics = [#tpu.dimension_semantics<parallel>, #tpu.dimension_semantics<parallel>, #tpu.dimension_semantics<arbitrary>], iteration_bounds = array<i64: 2, 2, 4>, scalar_prefetch = 0 : i64, scratch_operands = 0 : i64, tpu.core_type = #tpu.core_type<tc>, window_params = [{transform_indices = @transform_0, window_bounds = array<i64: 1, 1, 128, 64>}, {transform_indices = @transform_1, window_bounds = array<i64: 1, 64, 256>}, {pipeline_mode = #tpu.pipeline_mode<synchronous>, transform_indices = @transform_2, window_bounds = array<i64: 1, 256>}, {transform_indices = @transform_3, window_bounds = array<i64: 1, 128, 256>}, {transform_indices = @transform_4, window_bounds = array<i64: 1, 128, 256>}]} {
    %c0_i32 = arith.constant 0 : i32
    %0 = arith.cmpi eq, %arg2, %c0_i32 : i32
    %1 = arith.extui %0 : i1 to i32
    %c0_i32_0 = arith.constant 0 : i32
    %2 = arith.cmpi ne, %1, %c0_i32_0 : i32
    scf.if %2 {
      %c0_13 = arith.constant 0 : index
      %c0_14 = arith.constant 0 : index
      %c0_15 = arith.constant 0 : index
      %14 = vector.load %arg6[%c0_13, %c0_14, %c0_15] : memref<1x128x256xf32, #tpu.memory_space<vmem>>, vector<1x128x256xf32>
      %15 = vector.shape_cast %14 : vector<1x128x256xf32> to vector<128x256xf32>
      %c0_16 = arith.constant 0 : index
      %c0_17 = arith.constant 0 : index
      %16 = vector.load %arg5[%c0_16, %c0_17] : memref<1x256xf32, #tpu.memory_space<vmem>>, vector<1x256xf32>
      %17 = vector.broadcast %16 : vector<1x256xf32> to vector<128x256xf32>
      %18 = arith.addf %15, %17 : vector<128x256xf32>
      %c0_18 = arith.constant 0 : index
      %c0_19 = arith.constant 0 : index
      %c0_20 = arith.constant 0 : index
      %19 = vector.load %arg7[%c0_18, %c0_19, %c0_20] : memref<1x128x256xf32, #tpu.memory_space<vmem>>, vector<1x128x256xf32>
      %20 = vector.shape_cast %19 : vector<1x128x256xf32> to vector<128x256xf32>
      %21 = vector.shape_cast %18 : vector<128x256xf32> to vector<1x128x256xf32>
      tpu.vector_store %arg7[%c0_18, %c0_19, %c0_20], %21 {strides = array<i32>} : memref<1x128x256xf32, #tpu.memory_space<vmem>>, vector<1x128x256xf32>,
    } else {
    }
    %c0 = arith.constant 0 : index
    %c0_1 = arith.constant 0 : index
    %c0_2 = arith.constant 0 : index
    %3 = vector.load %arg7[%c0, %c0_1, %c0_2] : memref<1x128x256xf32, #tpu.memory_space<vmem>>, vector<1x128x256xf32>
    %4 = vector.shape_cast %3 : vector<1x128x256xf32> to vector<128x256xf32>
    %c0_3 = arith.constant 0 : index
    %c0_4 = arith.constant 0 : index
    %c0_5 = arith.constant 0 : index
    %c0_6 = arith.constant 0 : index
    %5 = vector.load %arg3[%c0_3, %c0_4, %c0_5, %c0_6] : memref<1x1x128x64xbf16, #tpu.memory_space<vmem>>, vector<1x1x128x64xbf16>
    %6 = vector.shape_cast %5 : vector<1x1x128x64xbf16> to vector<128x64xbf16>
    %c0_7 = arith.constant 0 : index
    %c0_8 = arith.constant 0 : index
    %c0_9 = arith.constant 0 : index
    %7 = vector.load %arg4[%c0_7, %c0_8, %c0_9] : memref<1x64x256xbf16, #tpu.memory_space<vmem>>, vector<1x64x256xbf16>
    %8 = vector.shape_cast %7 : vector<1x64x256xbf16> to vector<64x256xbf16>
    %cst = arith.constant dense<0.000000e+00> : vector<128x256xf32>
    %9 = tpu.matmul %6, %8, %cst {dimension_numbers = #tpu.dot_dimension_numbers<[1], [0], [0], [1], [0, 0, 1, 1], [], []>} : vector<128x64xbf16>, vector<64x256xbf16>, vector<128x256xf32> -> vector<128x256xf32>
    %10 = arith.addf %4, %9 : vector<128x256xf32>
    %c0_10 = arith.constant 0 : index
    %c0_11 = arith.constant 0 : index
    %c0_12 = arith.constant 0 : index
    %11 = vector.load %arg7[%c0_10, %c0_11, %c0_12] : memref<1x128x256xf32, #tpu.memory_space<vmem>>, vector<1x128x256xf32>
    %12 = vector.shape_cast %11 : vector<1x128x256xf32> to vector<128x256xf32>
    %13 = vector.shape_cast %10 : vector<128x256xf32> to vector<1x128x256xf32>
    tpu.vector_store %arg7[%c0_10, %c0_11, %c0_12], %13 {strides = array<i32>} : memref<1x128x256xf32, #tpu.memory_space<vmem>>, vector<1x128x256xf32>,
    return
  }
  func.func @transform_0(%arg0: i32, %arg1: i32, %arg2: i32) -> (i32, i32, i32, i32) {
    %c0_i32 = arith.constant 0 : i32
    %c0_i32_0 = arith.constant 0 : i32
    return %arg0, %arg2, %arg1, %c0_i32 : i32, i32, i32, i32
  }
  func.func @transform_1(%arg0: i32, %arg1: i32, %arg2: i32) -> (i32, i32, i32) {
    %c0_i32 = arith.constant 0 : i32
    %c0_i32_0 = arith.constant 0 : i32
    %c0_i32_1 = arith.constant 0 : i32
    return %arg2, %c0_i32, %c0_i32_0 : i32, i32, i32
  }
  func.func @transform_2(%arg0: i32, %arg1: i32, %arg2: i32) -> (i32, i32) {
    %c0_i32 = arith.constant 0 : i32
    %c0_i32_0 = arith.constant 0 : i32
    %c0_i32_1 = arith.constant 0 : i32
    return %c0_i32, %c0_i32_0 : i32, i32
  }
  func.func @transform_3(%arg0: i32, %arg1: i32, %arg2: i32) -> (i32, i32, i32) {
    %c0_i32 = arith.constant 0 : i32
    %c0_i32_0 = arith.constant 0 : i32
    return %arg0, %arg1, %c0_i32 : i32, i32, i32
  }
  func.func @transform_4(%arg0: i32, %arg1: i32, %arg2: i32) -> (i32, i32, i32) {
    %c0_i32 = arith.constant 0 : i32
    %c0_i32_0 = arith.constant 0 : i32
    return %arg0, %arg1, %c0_i32 : i32, i32, i32
  }
}

module attributes {stable_mosaic.version = 11 : i64} {
  func.func @_ffn_kernel(%arg0: i32, %arg1: i32, %arg2: memref<256x256xf32, #tpu.memory_space<vmem>>, %arg3: memref<1x256xf32, #tpu.memory_space<vmem>>, %arg4: memref<1x256xf32, #tpu.memory_space<vmem>>, %arg5: memref<256x256xbf16, #tpu.memory_space<vmem>>, %arg6: memref<1x256xf32, #tpu.memory_space<vmem>>, %arg7: memref<256x256xbf16, #tpu.memory_space<vmem>>, %arg8: memref<1x256xf32, #tpu.memory_space<vmem>>, %arg9: memref<256x256xf32, #tpu.memory_space<vmem>>, %arg10: memref<256x256xbf16, #tpu.memory_space<vmem>>) attributes {dimension_semantics = [#tpu.dimension_semantics<parallel>, #tpu.dimension_semantics<arbitrary>], iteration_bounds = array<i64: 2, 2>, scalar_prefetch = 0 : i64, scratch_operands = 1 : i64, tpu.core_type = #tpu.core_type<tc>, window_params = [{transform_indices = @transform_0, window_bounds = array<i64: 256, 256>}, {pipeline_mode = #tpu.pipeline_mode<synchronous>, transform_indices = @transform_1, window_bounds = array<i64: 1, 256>}, {pipeline_mode = #tpu.pipeline_mode<synchronous>, transform_indices = @transform_2, window_bounds = array<i64: 1, 256>}, {transform_indices = @transform_3, window_bounds = array<i64: 256, 256>}, {transform_indices = @transform_4, window_bounds = array<i64: 1, 256>}, {transform_indices = @transform_5, window_bounds = array<i64: 256, 256>}, {pipeline_mode = #tpu.pipeline_mode<synchronous>, transform_indices = @transform_6, window_bounds = array<i64: 1, 256>}, {transform_indices = @transform_7, window_bounds = array<i64: 256, 256>}]} {
    %c0_i32 = arith.constant 0 : i32
    %0 = arith.cmpi eq, %arg1, %c0_i32 : i32
    %1 = arith.extui %0 : i1 to i32
    %c0_i32_0 = arith.constant 0 : i32
    %2 = arith.cmpi ne, %1, %c0_i32_0 : i32
    scf.if %2 {
      %c0_14 = arith.constant 0 : index
      %c0_15 = arith.constant 0 : index
      %17 = vector.load %arg2[%c0_14, %c0_15] : memref<256x256xf32, #tpu.memory_space<vmem>>, vector<256x256xf32>
      %c0_16 = arith.constant 0 : index
      %c0_17 = arith.constant 0 : index
      %18 = vector.load %arg3[%c0_16, %c0_17] : memref<1x256xf32, #tpu.memory_space<vmem>>, vector<1x256xf32>
      %c0_18 = arith.constant 0 : index
      %c0_19 = arith.constant 0 : index
      %19 = vector.load %arg4[%c0_18, %c0_19] : memref<1x256xf32, #tpu.memory_space<vmem>>, vector<1x256xf32>
      %cst_20 = arith.constant dense<0.000000e+00> : vector<256xf32>
      %20 = vector.multi_reduction <add>, %17, %cst_20 [1] : vector<256x256xf32> to vector<256xf32>
      %21 = vector.shape_cast %20 : vector<256xf32> to vector<256x1xf32>
      %cst_21 = arith.constant 2.560000e+02 : f32
      %22 = vector.broadcast %cst_21 : f32 to vector<256x1xf32>
      %23 = arith.divf %21, %22 : vector<256x1xf32>
      %24 = vector.broadcast %23 : vector<256x1xf32> to vector<256x256xf32>
      %25 = arith.subf %17, %24 : vector<256x256xf32>
      %26 = arith.mulf %25, %25 : vector<256x256xf32>
      %cst_22 = arith.constant dense<0.000000e+00> : vector<256xf32>
      %27 = vector.multi_reduction <add>, %26, %cst_22 [1] : vector<256x256xf32> to vector<256xf32>
      %28 = vector.shape_cast %27 : vector<256xf32> to vector<256x1xf32>
      %cst_23 = arith.constant 2.560000e+02 : f32
      %29 = vector.broadcast %cst_23 : f32 to vector<256x1xf32>
      %30 = arith.divf %28, %29 : vector<256x1xf32>
      %31 = vector.broadcast %23 : vector<256x1xf32> to vector<256x256xf32>
      %32 = arith.subf %17, %31 : vector<256x256xf32>
      %cst_24 = arith.constant 9.99999974E-6 : f32
      %33 = vector.broadcast %cst_24 : f32 to vector<256x1xf32>
      %34 = arith.addf %30, %33 : vector<256x1xf32>
      %35 = math.rsqrt %34 : vector<256x1xf32>
      %36 = vector.broadcast %35 : vector<256x1xf32> to vector<256x256xf32>
      %37 = arith.mulf %32, %36 : vector<256x256xf32>
      %38 = vector.broadcast %18 : vector<1x256xf32> to vector<256x256xf32>
      %39 = arith.mulf %37, %38 : vector<256x256xf32>
      %40 = vector.broadcast %19 : vector<1x256xf32> to vector<256x256xf32>
      %41 = arith.addf %39, %40 : vector<256x256xf32>
      %42 = arith.truncf %41 : vector<256x256xf32> to vector<256x256xbf16>
      %c0_25 = arith.constant 0 : index
      %c0_26 = arith.constant 0 : index
      %43 = vector.load %arg10[%c0_25, %c0_26] : memref<256x256xbf16, #tpu.memory_space<vmem>>, vector<256x256xbf16>
      tpu.vector_store %arg10[%c0_25, %c0_26], %42 {strides = array<i32>} : memref<256x256xbf16, #tpu.memory_space<vmem>>, vector<256x256xbf16>,
      %c0_27 = arith.constant 0 : index
      %c0_28 = arith.constant 0 : index
      %44 = vector.load %arg8[%c0_27, %c0_28] : memref<1x256xf32, #tpu.memory_space<vmem>>, vector<1x256xf32>
      %45 = vector.broadcast %44 : vector<1x256xf32> to vector<256x256xf32>
      %46 = arith.addf %17, %45 : vector<256x256xf32>
      %c0_29 = arith.constant 0 : index
      %c0_30 = arith.constant 0 : index
      %47 = vector.load %arg9[%c0_29, %c0_30] : memref<256x256xf32, #tpu.memory_space<vmem>>, vector<256x256xf32>
      tpu.vector_store %arg9[%c0_29, %c0_30], %46 {strides = array<i32>} : memref<256x256xf32, #tpu.memory_space<vmem>>, vector<256x256xf32>,
    } else {
    }
    %c0 = arith.constant 0 : index
    %c0_1 = arith.constant 0 : index
    %3 = vector.load %arg10[%c0, %c0_1] : memref<256x256xbf16, #tpu.memory_space<vmem>>, vector<256x256xbf16>
    %c0_2 = arith.constant 0 : index
    %c0_3 = arith.constant 0 : index
    %4 = vector.load %arg5[%c0_2, %c0_3] : memref<256x256xbf16, #tpu.memory_space<vmem>>, vector<256x256xbf16>
    %cst = arith.constant dense<0.000000e+00> : vector<256x256xf32>
    %5 = tpu.matmul %3, %4, %cst {dimension_numbers = #tpu.dot_dimension_numbers<[1], [0], [0], [1], [0, 0, 1, 1], [], []>} : vector<256x256xbf16>, vector<256x256xbf16>, vector<256x256xf32> -> vector<256x256xf32>
    %c0_4 = arith.constant 0 : index
    %c0_5 = arith.constant 0 : index
    %6 = vector.load %arg6[%c0_4, %c0_5] : memref<1x256xf32, #tpu.memory_space<vmem>>, vector<1x256xf32>
    %7 = vector.broadcast %6 : vector<1x256xf32> to vector<256x256xf32>
    %8 = arith.addf %5, %7 : vector<256x256xf32>
    %cst_6 = arith.constant 0.000000e+00 : f32
    %9 = vector.broadcast %cst_6 : f32 to vector<256x256xf32>
    %10 = arith.maximumf %8, %9 : vector<256x256xf32>
    %c0_7 = arith.constant 0 : index
    %c0_8 = arith.constant 0 : index
    %11 = vector.load %arg9[%c0_7, %c0_8] : memref<256x256xf32, #tpu.memory_space<vmem>>, vector<256x256xf32>
    %12 = arith.truncf %10 : vector<256x256xf32> to vector<256x256xbf16>
    %c0_9 = arith.constant 0 : index
    %c0_10 = arith.constant 0 : index
    %13 = vector.load %arg7[%c0_9, %c0_10] : memref<256x256xbf16, #tpu.memory_space<vmem>>, vector<256x256xbf16>
    %cst_11 = arith.constant dense<0.000000e+00> : vector<256x256xf32>
    %14 = tpu.matmul %12, %13, %cst_11 {dimension_numbers = #tpu.dot_dimension_numbers<[1], [0], [0], [1], [0, 0, 1, 1], [], []>} : vector<256x256xbf16>, vector<256x256xbf16>, vector<256x256xf32> -> vector<256x256xf32>
    %15 = arith.addf %11, %14 : vector<256x256xf32>
    %c0_12 = arith.constant 0 : index
    %c0_13 = arith.constant 0 : index
    %16 = vector.load %arg9[%c0_12, %c0_13] : memref<256x256xf32, #tpu.memory_space<vmem>>, vector<256x256xf32>
    tpu.vector_store %arg9[%c0_12, %c0_13], %15 {strides = array<i32>} : memref<256x256xf32, #tpu.memory_space<vmem>>, vector<256x256xf32>,
    return
  }
  func.func @transform_0(%arg0: i32, %arg1: i32) -> (i32, i32) {
    %c0_i32 = arith.constant 0 : i32
    %c0_i32_0 = arith.constant 0 : i32
    return %arg0, %c0_i32 : i32, i32
  }
  func.func @transform_1(%arg0: i32, %arg1: i32) -> (i32, i32) {
    %c0_i32 = arith.constant 0 : i32
    %c0_i32_0 = arith.constant 0 : i32
    %c0_i32_1 = arith.constant 0 : i32
    return %c0_i32, %c0_i32_0 : i32, i32
  }
  func.func @transform_2(%arg0: i32, %arg1: i32) -> (i32, i32) {
    %c0_i32 = arith.constant 0 : i32
    %c0_i32_0 = arith.constant 0 : i32
    %c0_i32_1 = arith.constant 0 : i32
    return %c0_i32, %c0_i32_0 : i32, i32
  }
  func.func @transform_3(%arg0: i32, %arg1: i32) -> (i32, i32) {
    %c0_i32 = arith.constant 0 : i32
    %c0_i32_0 = arith.constant 0 : i32
    return %c0_i32, %arg1 : i32, i32
  }
  func.func @transform_4(%arg0: i32, %arg1: i32) -> (i32, i32) {
    %c0_i32 = arith.constant 0 : i32
    %c0_i32_0 = arith.constant 0 : i32
    return %c0_i32, %arg1 : i32, i32
  }
  func.func @transform_5(%arg0: i32, %arg1: i32) -> (i32, i32) {
    %c0_i32 = arith.constant 0 : i32
    %c0_i32_0 = arith.constant 0 : i32
    return %arg1, %c0_i32 : i32, i32
  }
  func.func @transform_6(%arg0: i32, %arg1: i32) -> (i32, i32) {
    %c0_i32 = arith.constant 0 : i32
    %c0_i32_0 = arith.constant 0 : i32
    %c0_i32_1 = arith.constant 0 : i32
    return %c0_i32, %c0_i32_0 : i32, i32
  }
  func.func @transform_7(%arg0: i32, %arg1: i32) -> (i32, i32) {
    %c0_i32 = arith.constant 0 : i32
    %c0_i32_0 = arith.constant 0 : i32
    return %arg0, %c0_i32 : i32, i32
  }
}

</mosaic_0001>

<bundles_post_ra>
// kernel: opt_decoder_layer.6
= control target key start
LH: loop header
LB: loop body
LE: loop exit
PB: predicated region body
PF: predicated region fallthrough
CT: control target
= control target key end

     0   :  { %s1125_s15 = smov 0   ;;  %s1127_s16 = smov 0   ;;  %s1404_s0 = inlined_call_operand.vmem [shape: bf16[2,4,256,64], index: 0, kind: input, shape index: {}]   ;;  %s1405_s1 = inlined_call_operand.vmem [shape: bf16[4,64,256], index: 1, kind: input, shape index: {}]   ;;  %s1406_s2 = inlined_call_operand.vmem [shape: f32[1,256], index: 2, kind: input, shape index: {}]   ;;  %s1407_s3 = inlined_call_operand.vmem [shape: f32[2,256,256], index: 3, kind: input, shape index: {}]   ;;  %s1408_s4 = inlined_call_operand.vmem [shape: f32[2,256,256], index: 4, kind: output, shape index: {}]  }
   0x1   :  { %s1129_s17 = smov 0   ;;  %s1131_s18 = smov 0  }
   0x2   :  { %s1133_s19 = smov 0   ;;  %s1135_s20 = smov 0  }
   0x3   :  { %s1137_s21 = smov 0  }
   0x4 LB: > { %s26_s22 = sadd.s32 1, %s1085_s18  ;;  %s29_s23 = sadd.s32 1, %s1089_s19  ;;  %s1097_s21 = sphi %s1137_s21, %s14_s21   ;;  %s1093_s20 = sphi %s1135_s20, %s1420_s20   ;;  %s1089_s19 = sphi %s1133_s19, %s1419_s19   ;;  %s1085_s18 = sphi %s1131_s18, %s1418_s18   ;;  %s1081_s17 = sphi %s1129_s17, %s1417_s17   ;;  %s1077_s16 = sphi %s1127_s16, %s1416_s16   ;;  %s1073_s15 = sphi %s1125_s15, %s1415_s15  }
   0x5   : > { %p27_p0 = scmp.ge.s32.totalorder %s26_s22, 4  ;;  %p915_p1 = scmp.ge.s32.totalorder %s1097_s21, 1 }
   0x6   : > { %p224_p2 = scmp.lt.s32.totalorder %s1097_s21, 17  ;;  %s33_s24 = sadd.s32 1, %s1093_s20 }
   0x7   : > { %s1422_s22 = smov (%p27_p0, %s26_s22), 0  ;;  %s1424_s23 = smov (!%p27_p0, %s29_s23), %s1089_s19 }
   0x8   : > { %1409 = sst [smem:[#allocation2_spill]] %s1422_s22  ;;  %p225_p3 = pnand %p915_p1, %p224_p2 }
   0x9   : > { %p31_p4 = scmp.ge.s32.totalorder %s1424_s23, 2  ;;  %s916_s25 = sshll.u32 (!%p225_p3), %s1077_s16, 4 }
   0xa   : > { %p279_p6 = scmp.lt.s32.totalorder (!%p225_p3), %s1081_s17, 1  ;;  %p281_p7 = scmp.lt.s32.totalorder (!%p225_p3), %s1073_s15, 3 }
   0xb   : > { %s1426_s23 = smov (%p31_p4, %s1424_s23), 0  ;;  %s1428_s24 = smov (!%p31_p4, %s33_s24), %s1093_s20 }
   0xc   : > { %1410 = sst [smem:[#allocation3_spill]] %s1426_s23  ;;  %p35_p5 = scmp.ge.s32.totalorder %s1428_s24, 2 }
   0xd   : > { %228 = sbr.rel (%p225_p3) target bundleno = 302 (0x12e), region = 36  ;;  %p283_p8 = scmp.lt.s32.totalorder (!%p225_p3), %s916_s25, 31 }
   0xe   : > { %s1430_s24 = smov (%p35_p5, %s1428_s24), 0  ;;  %p930_p9 = scmp.ne.s32.totalorder (!%p225_p3), %s1073_s15, 0 }
   0xf   : > { %1411 = sst [smem:[#allocation4_spill]] %s1430_s24 }
  0x12   : > { %s1432_s17 = smov (!%p279_p6, %s1081_s17), 1  ;;  %s1434_s25 = smov (!%p283_p8, %s916_s25), 31 }
  0x13   : > { %s282_s26 = scalar_select %p281_p7, %s1073_s15, 3 }
  0x14   : > { %s918_s28 = sshll.u32 %s1432_s17, 7  ;;  %s923_s10 = sshll.u32 %s1434_s25, 1 }
  0x15   : > { %s917_s27 = sshll.u32 %s282_s26, 5  ;;  %s957_s30 = sshll.u32 %s282_s26, 6 }
  0x16   : > { %s286_s29 = sadd.s32 %s917_s27, %s1434_s25  ;;  %s1174_s8 = scalar_lea.vmem %s1405_s1, %s957_s30 }
  0x17   : > { %s288_s5 = sadd.s32 %s918_s28, %s286_s29  ;;  %s924_s14 = sshll.u32 %s1432_s17, 6 }
  0x18   : > { %s919_s9 = sshll.u32 %s288_s5, 2  ;;  %s304_s16 = sadd.s32 %s924_s14, %s923_s10 }
  0x19   : > { %s1179_s13 = scalar_lea.vmem %s1404_s0, %s919_s9  ;;  %s925_s24 = sshll.u32 %s304_s16, 3 }
  0x1a   : > { %s1184_s26 = scalar_lea.vmem %s1407_s3, %s925_s24  ;;  %s1189_s29 = scalar_lea.vmem %s1408_s4, %s925_s24 }
  0x1b   : > { %323 = sbr.rel (%p930_p9) target bundleno = 58 (0x3a), region = 40 }
  0x20   : > { %v358_v0 = vlaneseq  ;;  %v356_v1 = vld [vmem:[%s1406_s2] sm:$0x3]  ;;  %v325_v4 = vld [vmem:[%s1184_s26 + $0x8] sm:$0xff]  ;;  %v326_v5 = vld [vmem:[%s1184_s26 + $0x10] sm:$0xff] }
  0x21   : > { %v324_v3 = vld [vmem:[%s1184_s26] sm:$0xff]  ;;  %v327_v6 = vld [vmem:[%s1184_s26 + $0x18] sm:$0xff]  ;;  %v329_v10 = vld [vmem:[%s1184_s26 + $0x28] sm:$0xff] }
  0x22   : > { %v359_v2 = vshrl.u32 %v358_v0, 7  ;;  %v328_v9 = vld [vmem:[%s1184_s26 + $0x20] sm:$0xff]  ;;  %v330_v11 = vld [vmem:[%s1184_s26 + $0x30] sm:$0xff]  ;;  %v331_v12 = vld [vmem:[%s1184_s26 + $0x38] sm:$0xff] }
  0x23   : > { %v332_v13 = vld [vmem:[%s1184_s26 + $0x40] sm:$0xff]  ;;  %v333_v14 = vld [vmem:[%s1184_s26 + $0x48] sm:$0xff]  ;;  %v334_v15 = vld [vmem:[%s1184_s26 + $0x50] sm:$0xff] }
  0x24   : > { %v360_v7 = vsub.s32 0, %v359_v2  ;;  %v364_v8 = vsub.s32 1, %v359_v2  ;;  %v335_v18 = vld [vmem:[%s1184_s26 + $0x58] sm:$0xff]  ;;  %v336_v19 = vld [vmem:[%s1184_s26 + $0x60] sm:$0xff]  ;;  %v337_v20 = vld [vmem:[%s1184_s26 + $0x68] sm:$0xff] }
  0x25   : > { %v338_v21 = vld [vmem:[%s1184_s26 + $0x70] sm:$0xff]  ;;  %v339_v22 = vld [vmem:[%s1184_s26 + $0x78] sm:$0xff]  ;;  %v340_v23 = vld [vmem:[%s1184_s26 + $0x80] sm:$0xff] }
  0x26   : > { %v1206_v16 = vrot.slane %v356_v1, %v360_v7  ;;  %v1208_v17 = vrot.slane %v356_v1, %v364_v8  ;;  %v341_v28 = vld [vmem:[%s1184_s26 + $0x88] sm:$0xff]  ;;  %v342_v29 = vld [vmem:[%s1184_s26 + $0x90] sm:$0xff]  ;;  %v343_v30 = vld [vmem:[%s1184_s26 + $0x98] sm:$0xff] }
  0x27   : > { %v344_v35 = vld [vmem:[%s1184_s26 + $0xa0] sm:$0xff]  ;;  %v345_v36 = vld [vmem:[%s1184_s26 + $0xa8] sm:$0xff]  ;;  %v346_v37 = vld [vmem:[%s1184_s26 + $0xb0] sm:$0xff] }
  0x28   : > { %v368_v24 = vadd.f32 %v1206_v16, %v324_v3  ;;  %v369_v25 = vadd.f32 %v1208_v17, %v325_v4  ;;  %v370_v26 = vadd.f32 %v1206_v16, %v326_v5  ;;  %v371_v27 = vadd.f32 %v1208_v17, %v327_v6  ;;  %v347_v42 = vld [vmem:[%s1184_s26 + $0xb8] sm:$0xff]  ;;  %v348_v43 = vld [vmem:[%s1184_s26 + $0xc0] sm:$0xff]  ;;  %v349_v44 = vld [vmem:[%s1184_s26 + $0xc8] sm:$0xff] }
  0x29   : > { %v372_v31 = vadd.f32 %v1206_v16, %v328_v9  ;;  %v373_v32 = vadd.f32 %v1208_v17, %v329_v10  ;;  %v374_v33 = vadd.f32 %v1206_v16, %v330_v11  ;;  %v375_v34 = vadd.f32 %v1208_v17, %v331_v12  ;;  %v350_v49 = vld [vmem:[%s1184_s26 + $0xd0] sm:$0xff]  ;;  %v351_v50 = vld [vmem:[%s1184_s26 + $0xd8] sm:$0xff]  ;;  %v352_v51 = vld [vmem:[%s1184_s26 + $0xe0] sm:$0xff] }
  0x2a   : > { %400 = vst [vmem:[%s1189_s29] sm:$0xff] %v368_v24  ;;  %401 = vst [vmem:[%s1189_s29 + $0x8] sm:$0xff] %v369_v25  ;;  %v376_v38 = vadd.f32 %v1206_v16, %v332_v13  ;;  %v377_v39 = vadd.f32 %v1208_v17, %v333_v14  ;;  %v378_v40 = vadd.f32 %v1206_v16, %v334_v15  ;;  %v353_v56 = vld [vmem:[%s1184_s26 + $0xe8] sm:$0xff]  ;;  %v354_v57 = vld [vmem:[%s1184_s26 + $0xf0] sm:$0xff] }
  0x2b   : > { %402 = vst [vmem:[%s1189_s29 + $0x10] sm:$0xff] %v370_v26  ;;  %403 = vst [vmem:[%s1189_s29 + $0x18] sm:$0xff] %v371_v27  ;;  %v379_v41 = vadd.f32 %v1208_v17, %v335_v18  ;;  %v380_v45 = vadd.f32 %v1206_v16, %v336_v19  ;;  %v381_v46 = vadd.f32 %v1208_v17, %v337_v20  ;;  %v355_v58 = vld [vmem:[%s1184_s26 + $0xf8] sm:$0xff] }
  0x2c   : > { %404 = vst [vmem:[%s1189_s29 + $0x20] sm:$0xff] %v372_v31  ;;  %405 = vst [vmem:[%s1189_s29 + $0x28] sm:$0xff] %v373_v32  ;;  %v382_v47 = vadd.f32 %v1206_v16, %v338_v21  ;;  %v383_v48 = vadd.f32 %v1208_v17, %v339_v22  ;;  %v384_v52 = vadd.f32 %v1206_v16, %v340_v23 }
  0x2d   : > { %406 = vst [vmem:[%s1189_s29 + $0x30] sm:$0xff] %v374_v33  ;;  %407 = vst [vmem:[%s1189_s29 + $0x38] sm:$0xff] %v375_v34  ;;  %v385_v53 = vadd.f32 %v1208_v17, %v341_v28  ;;  %v386_v54 = vadd.f32 %v1206_v16, %v342_v29  ;;  %v387_v55 = vadd.f32 %v1208_v17, %v343_v30 }
  0x2e   : > { %408 = vst [vmem:[%s1189_s29 + $0x40] sm:$0xff] %v376_v38  ;;  %409 = vst [vmem:[%s1189_s29 + $0x48] sm:$0xff] %v377_v39  ;;  %v388_v59 = vadd.f32 %v1206_v16, %v344_v35  ;;  %v389_v60 = vadd.f32 %v1208_v17, %v345_v36  ;;  %v390_v61 = vadd.f32 %v1206_v16, %v346_v37 }
  0x2f   : > { %410 = vst [vmem:[%s1189_s29 + $0x50] sm:$0xff] %v378_v40  ;;  %411 = vst [vmem:[%s1189_s29 + $0x58] sm:$0xff] %v379_v41  ;;  %v391_v62 = vadd.f32 %v1208_v17, %v347_v42  ;;  %v392_v63 = vadd.f32 %v1206_v16, %v348_v43  ;;  %v393_v0 = vadd.f32 %v1208_v17, %v349_v44 }
  0x30   : > { %412 = vst [vmem:[%s1189_s29 + $0x60] sm:$0xff] %v380_v45  ;;  %413 = vst [vmem:[%s1189_s29 + $0x68] sm:$0xff] %v381_v46  ;;  %v394_v1 = vadd.f32 %v1206_v16, %v350_v49  ;;  %v395_v2 = vadd.f32 %v1208_v17, %v351_v50  ;;  %v396_v3 = vadd.f32 %v1206_v16, %v352_v51 }
  0x31   : > { %414 = vst [vmem:[%s1189_s29 + $0x70] sm:$0xff] %v382_v47  ;;  %415 = vst [vmem:[%s1189_s29 + $0x78] sm:$0xff] %v383_v48  ;;  %v397_v4 = vadd.f32 %v1208_v17, %v353_v56  ;;  %v398_v5 = vadd.f32 %v1206_v16, %v354_v57  ;;  %v399_v6 = vadd.f32 %v1208_v17, %v355_v58 }
  0x32   : > { %416 = vst [vmem:[%s1189_s29 + $0x80] sm:$0xff] %v384_v52  ;;  %417 = vst [vmem:[%s1189_s29 + $0x88] sm:$0xff] %v385_v53 }
  0x33   : > { %418 = vst [vmem:[%s1189_s29 + $0x90] sm:$0xff] %v386_v54  ;;  %419 = vst [vmem:[%s1189_s29 + $0x98] sm:$0xff] %v387_v55 }
  0x34   : > { %420 = vst [vmem:[%s1189_s29 + $0xa0] sm:$0xff] %v388_v59  ;;  %421 = vst [vmem:[%s1189_s29 + $0xa8] sm:$0xff] %v389_v60 }
  0x35   : > { %422 = vst [vmem:[%s1189_s29 + $0xb0] sm:$0xff] %v390_v61  ;;  %423 = vst [vmem:[%s1189_s29 + $0xb8] sm:$0xff] %v391_v62 }
  0x36   : > { %424 = vst [vmem:[%s1189_s29 + $0xc0] sm:$0xff] %v392_v63  ;;  %425 = vst [vmem:[%s1189_s29 + $0xc8] sm:$0xff] %v393_v0 }
  0x37   : > { %426 = vst [vmem:[%s1189_s29 + $0xd0] sm:$0xff] %v394_v1  ;;  %427 = vst [vmem:[%s1189_s29 + $0xd8] sm:$0xff] %v395_v2 }
  0x38   : > { %428 = vst [vmem:[%s1189_s29 + $0xe0] sm:$0xff] %v396_v3  ;;  %429 = vst [vmem:[%s1189_s29 + $0xe8] sm:$0xff] %v397_v4 }
  0x39   : > { %430 = vst [vmem:[%s1189_s29 + $0xf0] sm:$0xff] %v398_v5  ;;  %431 = vst [vmem:[%s1189_s29 + $0xf8] sm:$0xff] %v399_v6 }
  0x3a PF: > { %v1023_v7 = vld [vmem:[%s1174_s8 + $0x34] ss:$8 sps:$4 sm:$0xff]   ;;  %v1025_v8 = vld [vmem:[%s1174_s8 + $0x30] ss:$8 sps:$4 sm:$0xff]   ;;  %v1099_v9 = vmov 0   ;;  %v1035_v16 = vld [vmem:[%s1179_s13] sm:$0xff]  }
  0x3b   : > { %625 = vmatprep.mubr.bf16.mxu0 %v1099_v9  ;;  %665 = vmatprep.mubr.bf16.mxu1 %v1099_v9  ;;  %v1026_v10 = vld [vmem:[%s1174_s8 + $0x24] ss:$8 sps:$4 sm:$0xff]   ;;  %v1028_v11 = vld [vmem:[%s1174_s8 + $0x20] ss:$8 sps:$4 sm:$0xff]   ;;  %v1029_v12 = vld [vmem:[%s1174_s8 + $0x14] ss:$8 sps:$4 sm:$0xff]  }
  0x3c   : > { %601 = vmatprep.subr.bf16.mxu0 %v1023_v7  ;;  %958 = vmatprep.subr.bf16.mxu1 %v1023_v7  ;;  %v1031_v13 = vld [vmem:[%s1174_s8 + $0x10] ss:$8 sps:$4 sm:$0xff]   ;;  %v1032_v14 = vld [vmem:[%s1174_s8 + $0x4] ss:$8 sps:$4 sm:$0xff]   ;;  %v1034_v15 = vld [vmem:[%s1174_s8] ss:$8 sps:$4 sm:$0xff]  }
  0x3d   : > { %602 = vmatpush1.bf16.msra.mxu0 %v1025_v8  ;;  %962 = vmatpush1.bf16.msra.mxu1 %v1025_v8  ;;  %v1036_v17 = vld [vmem:[%s1179_s13 + $0x20] sm:$0xff]   ;;  %vm568_vm0 = vcmask 523264   ;;  %v1037_v18 = vld [vmem:[%s1179_s13 + $0x8] sm:$0xff]   ;;  %v1039_v20 = vld [vmem:[%s1179_s13 + $0x10] sm:$0xff]  }
  0x3e   : > { %603 = vmatprep.subr.bf16.mxu0 %v1026_v10  ;;  %959 = vmatprep.subr.bf16.mxu1 %v1026_v10  ;;  %v1038_v19 = vld [vmem:[%s1179_s13 + $0x28] sm:$0xff]   ;;  %v1040_v21 = vld [vmem:[%s1179_s13 + $0x30] sm:$0xff]   ;;  %v1041_v22 = vld [vmem:[%s1179_s13 + $0x18] sm:$0xff]  }
  0x3f   : > { %v1042_v23 = vld [vmem:[%s1179_s13 + $0x38] sm:$0xff]   ;;  %v432_v24 = vld [vmem:[%s1189_s29] sm:$0xff]  ;;  %v433_v28 = vld [vmem:[%s1189_s29 + $0x8] sm:$0xff] }
  0x40   : > { %v448_v25 = vld [vmem:[%s1189_s29 + $0x80] sm:$0xff]  ;;  %v449_v29 = vld [vmem:[%s1189_s29 + $0x88] sm:$0xff]  ;;  %v434_v34 = vld [vmem:[%s1189_s29 + $0x10] sm:$0xff] }
  0x41   : > { %604 = vmatpush1.bf16.msra.mxu0 %v1028_v11  ;;  %963 = vmatpush1.bf16.msra.mxu1 %v1028_v11  ;;  %v450_v35 = vld [vmem:[%s1189_s29 + $0x90] sm:$0xff]  ;;  %v435_v40 = vld [vmem:[%s1189_s29 + $0x18] sm:$0xff]  ;;  %v436_v46 = vld [vmem:[%s1189_s29 + $0x20] sm:$0xff] }
  0x42   : > { %605 = vmatprep.subr.bf16.mxu0 %v1029_v12  ;;  %960 = vmatprep.subr.bf16.mxu1 %v1029_v12  ;;  %v451_v41 = vld [vmem:[%s1189_s29 + $0x98] sm:$0xff]  ;;  %v452_v47 = vld [vmem:[%s1189_s29 + $0xa0] sm:$0xff]  ;;  %v437_v52 = vld [vmem:[%s1189_s29 + $0x28] sm:$0xff] }
  0x43   : > { %v453_v53 = vld [vmem:[%s1189_s29 + $0xa8] sm:$0xff]  ;;  %v438_v58 = vld [vmem:[%s1189_s29 + $0x30] sm:$0xff]  ;;  %v439_v0 = vld [vmem:[%s1189_s29 + $0x38] sm:$0xff] }
  0x44   : > { %v454_v59 = vld [vmem:[%s1189_s29 + $0xb0] sm:$0xff]  ;;  %v455_v1 = vld [vmem:[%s1189_s29 + $0xb8] sm:$0xff]  ;;  %v440_v6 = vld [vmem:[%s1189_s29 + $0x40] sm:$0xff] }
  0x45   : > { %606 = vmatpush1.bf16.msra.mxu0 %v1031_v13  ;;  %964 = vmatpush1.bf16.msra.mxu1 %v1031_v13  ;;  %v456_v7 = vld [vmem:[%s1189_s29 + $0xc0] sm:$0xff]  ;;  %v441_v12 = vld [vmem:[%s1189_s29 + $0x48] sm:$0xff] }
  0x46   : > { %607 = vmatprep.subr.bf16.mxu0 %v1032_v14  ;;  %961 = vmatprep.subr.bf16.mxu1 %v1032_v14  ;;  %v457_v13 = vld [vmem:[%s1189_s29 + $0xc8] sm:$0xff] }
  0x49   : > { %608 = vmatpush1.bf16.msra.mxu0 %v1034_v15  ;;  %965 = vmatpush1.bf16.msra.mxu1 %v1034_v15 }
  0x4c   : > { %947 = vmatmul.mubr.msk.bf16.vlgmr.msra.gmra.mxu0 %vm568_vm0, %v1035_v16  ;;  %951 = vmatmul.mubr.msk.bf16.vlgmr.msra.gmra.mxu1 %vm568_vm0, %v1036_v17 }
  0x4d   : > { %635 = vmatprep.mubr.bf16.mxu0 %v1099_v9  ;;  %675 = vmatprep.mubr.bf16.mxu1 %v1099_v9 }
  0x54   : > { %948 = vmatmul.mubr.msk.bf16.gmra.mxu0 %vm568_vm0, %v1037_v18  ;;  %952 = vmatmul.mubr.msk.bf16.gmra.mxu1 %vm568_vm0, %v1038_v19  ;;  %v442_v18 = vld [vmem:[%s1189_s29 + $0x50] sm:$0xff] }
  0x55   : > { %645 = vmatprep.mubr.bf16.mxu0 %v1099_v9  ;;  %685 = vmatprep.mubr.bf16.mxu1 %v1099_v9  ;;  %v458_v19 = vld [vmem:[%s1189_s29 + $0xd0] sm:$0xff] }
  0x5c   : > { %949 = vmatmul.mubr.msk.bf16.gmra.mxu0 %vm568_vm0, %v1039_v20  ;;  %953 = vmatmul.mubr.msk.bf16.gmra.mxu1 %vm568_vm0, %v1040_v21 }
  0x5d   : > { %655 = vmatprep.mubr.bf16.mxu0 %v1099_v9  ;;  %695 = vmatprep.mubr.bf16.mxu1 %v1099_v9 }
  0x64   : > { %950 = vmatmul.mubr.msk.bf16.gmra.mxu0 %vm568_vm0, %v1041_v22  ;;  %954 = vmatmul.mubr.msk.bf16.gmra.mxu1 %vm568_vm0, %v1042_v23 }
 0x10c   : > { %v627_v26 = vpop.f32.mrf.mxu0  ;;  %v667_v27 = vpop.f32.mrf.mxu1 }
 0x10d   : > { %v706_v30 = vadd.f32 %v627_v26, %v432_v24  ;;  %v722_v31 = vadd.f32 %v667_v27, %v448_v25  ;;  %v443_v24 = vld [vmem:[%s1189_s29 + $0x58] sm:$0xff] }
 0x10e   : > { %v629_v32 = vpop.f32.mrf.mxu0  ;;  %v669_v33 = vpop.f32.mrf.mxu1  ;;  %v459_v25 = vld [vmem:[%s1189_s29 + $0xd8] sm:$0xff] }
 0x10f   : > { %738 = vst [vmem:[%s1189_s29] sm:$0xff] %v706_v30  ;;  %754 = vst [vmem:[%s1189_s29 + $0x80] sm:$0xff] %v722_v31  ;;  %v707_v36 = vadd.f32 %v629_v32, %v433_v28  ;;  %v723_v37 = vadd.f32 %v669_v33, %v449_v29  ;;  %v444_v30 = vld [vmem:[%s1189_s29 + $0x60] sm:$0xff] }
 0x110   : > { %v631_v38 = vpop.f32.mrf.mxu0  ;;  %v671_v39 = vpop.f32.mrf.mxu1  ;;  %v460_v31 = vld [vmem:[%s1189_s29 + $0xe0] sm:$0xff] }
 0x111   : > { %739 = vst [vmem:[%s1189_s29 + $0x8] sm:$0xff] %v707_v36  ;;  %755 = vst [vmem:[%s1189_s29 + $0x88] sm:$0xff] %v723_v37  ;;  %v708_v42 = vadd.f32 %v631_v38, %v434_v34  ;;  %v724_v43 = vadd.f32 %v671_v39, %v450_v35  ;;  %v445_v36 = vld [vmem:[%s1189_s29 + $0x68] sm:$0xff] }
 0x112   : > { %v633_v44 = vpop.f32.mrf.mxu0  ;;  %v673_v45 = vpop.f32.mrf.mxu1  ;;  %v461_v37 = vld [vmem:[%s1189_s29 + $0xe8] sm:$0xff] }
 0x113   : > { %740 = vst [vmem:[%s1189_s29 + $0x10] sm:$0xff] %v708_v42  ;;  %756 = vst [vmem:[%s1189_s29 + $0x90] sm:$0xff] %v724_v43  ;;  %v709_v48 = vadd.f32 %v633_v44, %v435_v40  ;;  %v725_v49 = vadd.f32 %v673_v45, %v451_v41  ;;  %v446_v42 = vld [vmem:[%s1189_s29 + $0x70] sm:$0xff] }
 0x114   : > { %v637_v50 = vpop.f32.mrf.mxu0  ;;  %v677_v51 = vpop.f32.mrf.mxu1  ;;  %v462_v43 = vld [vmem:[%s1189_s29 + $0xf0] sm:$0xff] }
 0x115   : > { %741 = vst [vmem:[%s1189_s29 + $0x18] sm:$0xff] %v709_v48  ;;  %757 = vst [vmem:[%s1189_s29 + $0x98] sm:$0xff] %v725_v49  ;;  %v710_v54 = vadd.f32 %v637_v50, %v436_v46  ;;  %v726_v55 = vadd.f32 %v677_v51, %v452_v47  ;;  %v447_v48 = vld [vmem:[%s1189_s29 + $0x78] sm:$0xff] }
 0x116   : > { %v639_v56 = vpop.f32.mrf.mxu0  ;;  %v679_v57 = vpop.f32.mrf.mxu1  ;;  %v463_v49 = vld [vmem:[%s1189_s29 + $0xf8] sm:$0xff] }
 0x117   : > { %742 = vst [vmem:[%s1189_s29 + $0x20] sm:$0xff] %v710_v54  ;;  %758 = vst [vmem:[%s1189_s29 + $0xa0] sm:$0xff] %v726_v55  ;;  %v711_v60 = vadd.f32 %v639_v56, %v437_v52  ;;  %v727_v61 = vadd.f32 %v679_v57, %v453_v53 }
 0x118   : > { %v641_v62 = vpop.f32.mrf.mxu0  ;;  %v681_v63 = vpop.f32.mrf.mxu1 }
 0x119   : > { %743 = vst [vmem:[%s1189_s29 + $0x28] sm:$0xff] %v711_v60  ;;  %759 = vst [vmem:[%s1189_s29 + $0xa8] sm:$0xff] %v727_v61  ;;  %v712_v2 = vadd.f32 %v641_v62, %v438_v58  ;;  %v728_v3 = vadd.f32 %v681_v63, %v454_v59 }
 0x11a   : > { %v643_v4 = vpop.f32.mrf.mxu0  ;;  %v683_v5 = vpop.f32.mrf.mxu1 }
 0x11b   : > { %744 = vst [vmem:[%s1189_s29 + $0x30] sm:$0xff] %v712_v2  ;;  %760 = vst [vmem:[%s1189_s29 + $0xb0] sm:$0xff] %v728_v3  ;;  %v713_v8 = vadd.f32 %v643_v4, %v439_v0  ;;  %v729_v9 = vadd.f32 %v683_v5, %v455_v1 }
 0x11c   : > { %v647_v10 = vpop.f32.mrf.mxu0  ;;  %v687_v11 = vpop.f32.mrf.mxu1 }
 0x11d   : > { %745 = vst [vmem:[%s1189_s29 + $0x38] sm:$0xff] %v713_v8  ;;  %761 = vst [vmem:[%s1189_s29 + $0xb8] sm:$0xff] %v729_v9  ;;  %v714_v14 = vadd.f32 %v647_v10, %v440_v6  ;;  %v730_v15 = vadd.f32 %v687_v11, %v456_v7 }
 0x11e   : > { %v649_v16 = vpop.f32.mrf.mxu0  ;;  %v689_v17 = vpop.f32.mrf.mxu1 }
 0x11f   : > { %746 = vst [vmem:[%s1189_s29 + $0x40] sm:$0xff] %v714_v14  ;;  %762 = vst [vmem:[%s1189_s29 + $0xc0] sm:$0xff] %v730_v15  ;;  %v715_v20 = vadd.f32 %v649_v16, %v441_v12  ;;  %v731_v21 = vadd.f32 %v689_v17, %v457_v13 }
 0x120   : > { %v651_v22 = vpop.f32.mrf.mxu0  ;;  %v691_v23 = vpop.f32.mrf.mxu1 }
 0x121   : > { %747 = vst [vmem:[%s1189_s29 + $0x48] sm:$0xff] %v715_v20  ;;  %763 = vst [vmem:[%s1189_s29 + $0xc8] sm:$0xff] %v731_v21  ;;  %v716_v26 = vadd.f32 %v651_v22, %v442_v18  ;;  %v732_v27 = vadd.f32 %v691_v23, %v458_v19 }
 0x122   : > { %v653_v28 = vpop.f32.mrf.mxu0  ;;  %v693_v29 = vpop.f32.mrf.mxu1 }
 0x123   : > { %748 = vst [vmem:[%s1189_s29 + $0x50] sm:$0xff] %v716_v26  ;;  %764 = vst [vmem:[%s1189_s29 + $0xd0] sm:$0xff] %v732_v27  ;;  %v717_v32 = vadd.f32 %v653_v28, %v443_v24  ;;  %v733_v33 = vadd.f32 %v693_v29, %v459_v25 }
 0x124   : > { %v657_v34 = vpop.f32.mrf.mxu0  ;;  %v697_v35 = vpop.f32.mrf.mxu1 }
 0x125   : > { %749 = vst [vmem:[%s1189_s29 + $0x58] sm:$0xff] %v717_v32  ;;  %765 = vst [vmem:[%s1189_s29 + $0xd8] sm:$0xff] %v733_v33  ;;  %v718_v38 = vadd.f32 %v657_v34, %v444_v30  ;;  %v734_v39 = vadd.f32 %v697_v35, %v460_v31 }
 0x126   : > { %v659_v40 = vpop.f32.mrf.mxu0  ;;  %v699_v41 = vpop.f32.mrf.mxu1 }
 0x127   : > { %750 = vst [vmem:[%s1189_s29 + $0x60] sm:$0xff] %v718_v38  ;;  %766 = vst [vmem:[%s1189_s29 + $0xe0] sm:$0xff] %v734_v39  ;;  %v719_v44 = vadd.f32 %v659_v40, %v445_v36  ;;  %v735_v45 = vadd.f32 %v699_v41, %v461_v37 }
 0x128   : > { %v661_v46 = vpop.f32.mrf.mxu0  ;;  %v701_v47 = vpop.f32.mrf.mxu1 }
 0x129   : > { %751 = vst [vmem:[%s1189_s29 + $0x68] sm:$0xff] %v719_v44  ;;  %767 = vst [vmem:[%s1189_s29 + $0xe8] sm:$0xff] %v735_v45  ;;  %v720_v50 = vadd.f32 %v661_v46, %v446_v42  ;;  %v736_v51 = vadd.f32 %v701_v47, %v462_v43 }
 0x12a   : > { %v663_v52 = vpop.f32.mrf.mxu0  ;;  %v703_v53 = vpop.f32.mrf.mxu1 }
 0x12b   : > { %752 = vst [vmem:[%s1189_s29 + $0x70] sm:$0xff] %v720_v50  ;;  %768 = vst [vmem:[%s1189_s29 + $0xf0] sm:$0xff] %v736_v51  ;;  %v721_v54 = vadd.f32 %v663_v52, %v447_v48  ;;  %v737_v55 = vadd.f32 %v703_v53, %v463_v49 }
 0x12d   : > { %753 = vst [vmem:[%s1189_s29 + $0x78] sm:$0xff] %v721_v54  ;;  %769 = vst [vmem:[%s1189_s29 + $0xf8] sm:$0xff] %v737_v55 }
 0x12e PF: > { %s14_s21 = sadd.s32 1, %s1097_s21   ;;  %s1412_s22 = sld [smem:[#allocation2_spill]] }
 0x12f   : > { %p11_p10 = scmp.ge.s32.totalorder %s14_s21, 18   ;;  %s1413_s23 = sld [smem:[#allocation3_spill]] }
 0x130   : > { %s1414_s24 = sld [smem:[#allocation4_spill]]  ;;  %s1415_s15 = smov %s1085_s18 }
 0x131   : > { %s1416_s16 = smov %s1089_s19  ;;  %s1417_s17 = smov %s1093_s20 }
 0x132   :  { %13 = sbr.rel (!%p11_p10) target bundleno = 4 (0x4), region = 76 }
 0x134   : > { %s1418_s18 = smov %s1412_s22 }
 0x135   : > { %s1419_s19 = smov %s1413_s23 }
 0x136   : > { %s1420_s20 = smov %s1414_s24 }

// kernel: opt_decoder_layer.5
= control target key start
LH: loop header
LB: loop body
LE: loop exit
PB: predicated region body
PF: predicated region fallthrough
CT: control target
= control target key end

     0   :  { %s2217_s12 = smov 0   ;;  %s2219_s13 = smov 0   ;;  %s2807_s0 = inlined_call_operand.vmem [shape: bf16[2,4,256,64], index: 0, kind: input, shape index: {}]   ;;  %s2808_s1 = inlined_call_operand.vmem [shape: bf16[2,4,256,64], index: 1, kind: input, shape index: {}]   ;;  %s2809_s2 = inlined_call_operand.vmem [shape: bf16[2,4,256,64], index: 2, kind: input, shape index: {}]   ;;  %s2810_s3 = inlined_call_operand.vmem [shape: bf16[2,4,256,64], index: 3, kind: output, shape index: {}]  }
   0x1   :  { %s2221_s14 = smov 0   ;;  %s2223_s15 = smov 0  }
   0x2   :  { %s2225_s16 = smov 0   ;;  %s2227_s17 = smov 0  }
   0x3   :  { %s2229_s18 = smov 0   ;;  %s2231_s19 = smov 0  }
   0x4   :  { %s2233_s20 = smov 0  }
   0x5 LB: > { %s28_s21 = sadd.s32 1, %s2175_s16  ;;  %s31_s22 = sadd.s32 1, %s2179_s17  ;;  %s2191_s20 = sphi %s2233_s20, %s13_s20   ;;  %s2187_s19 = sphi %s2231_s19, %s2820_s19   ;;  %s2183_s18 = sphi %s2229_s18, %s2819_s18   ;;  %s2179_s17 = sphi %s2227_s17, %s2818_s17   ;;  %s2175_s16 = sphi %s2225_s16, %s2817_s16   ;;  %s2171_s15 = sphi %s2223_s15, %s2816_s15   ;;  %s2167_s14 = sphi %s2221_s14, %s2815_s14   ;;  %s2163_s13 = sphi %s2219_s13, %s2814_s13   ;;  %s2159_s12 = sphi %s2217_s12, %s2813_s12  }
   0x6   : > { %p29_p0 = scmp.ge.s32.totalorder %s28_s21, 2  ;;  %p1732_p1 = scmp.ge.s32.totalorder %s2191_s20, 1 }
   0x7   : > { %p226_p2 = scmp.lt.s32.totalorder %s2191_s20, 33  ;;  %s35_s23 = sadd.s32 1, %s2183_s18 }
   0x8   : > { %s2822_s21 = smov (%p29_p0, %s28_s21), 0  ;;  %s2824_s22 = smov (!%p29_p0, %s31_s22), %s2179_s17 }
   0x9   : > { %p33_p3 = scmp.ge.s32.totalorder %s2824_s22, 2  ;;  %p227_p4 = pnand %p1732_p1, %p226_p2 }
   0xa   : > { %s39_s24 = sadd.s32 1, %s2187_s19  ;;  %s1733_s25 = sshll.u32 (!%p227_p4), %s2163_s13, 4 }
   0xb   : > { %s2826_s22 = smov (%p33_p3, %s2824_s22), 0  ;;  %s2828_s23 = smov (!%p33_p3, %s35_s23), %s2183_s18 }
   0xc   : > { %p37_p5 = scmp.ge.s32.totalorder %s2828_s23, 4  ;;  %p293_p7 = scmp.lt.s32.totalorder (!%p227_p4), %s2171_s15, 1 }
   0xd   : > { %p295_p8 = scmp.lt.s32.totalorder (!%p227_p4), %s2167_s14, 3  ;;  %p297_p9 = scmp.lt.s32.totalorder (!%p227_p4), %s1733_s25, 31 }
   0xe   : > { %s2830_s23 = smov (%p37_p5, %s2828_s23), 0  ;;  %s2832_s24 = smov (!%p37_p5, %s39_s24), %s2187_s19 }
   0xf   : > { %p41_p6 = scmp.ge.s32.totalorder %s2832_s24, 2  ;;  %230 = sbr.rel (%p227_p4) target bundleno = 1015 (0x3f7), region = 32 }
  0x10   : > { %s1737_s29 = sshll.u32 (!%p227_p4), %s2159_s12, 4  ;;  %p1749_p11 = scmp.ne.s32.totalorder (!%p227_p4), %s2159_s12, 0 }
  0x11   : > { %s2834_s24 = smov (%p41_p6, %s2832_s24), 0  ;;  %p311_p10 = scmp.lt.s32.totalorder (!%p227_p4), %s1737_s29, 31 }
  0x12   : > { %2811 = sst [smem:[#allocation5_spill]] %s2834_s24 }
  0x14   : > { %s2836_s15 = smov (!%p293_p7, %s2171_s15), 1  ;;  %s2838_s14 = smov (!%p295_p8, %s2167_s14), 3 }
  0x15   : > { %s2840_s25 = smov (!%p297_p9, %s1733_s25), 31  ;;  %s1734_s26 = sshll.u32 %s2838_s14, 5 }
  0x16   : > { %s1735_s27 = sshll.u32 %s2836_s15, 7  ;;  %s300_s28 = sadd.s32 %s1734_s26, %s2840_s25 }
  0x17   : > { %s302_s30 = sadd.s32 %s1735_s27, %s300_s28  ;;  %s2842_s29 = smov (!%p311_p10, %s1737_s29), 31 }
  0x18   : > { %s1736_s4 = sshll.u32 %s302_s30, 2  ;;  %s314_s11 = sadd.s32 %s1734_s26, %s2842_s29 }
  0x19   : > { %s2284_s7 = scalar_lea.vmem %s2807_s0, %s1736_s4  ;;  %s2289_s10 = scalar_lea.vmem %s2810_s3, %s1736_s4 }
  0x1a   : > { %s316_s13 = sadd.s32 %s1735_s27, %s314_s11  ;;  %352 = sbr.rel (%p1749_p11) target bundleno = 56 (0x38), region = 36 }
  0x1b   : > { %s1740_s14 = sshll.u32 %s316_s13, 2 }
  0x1c   : > { %s2294_s28 = scalar_lea.vmem %s2808_s1, %s1740_s14  ;;  %s2299_s5 = scalar_lea.vmem %s2809_s2, %s1740_s14 }
  0x1f   : > { %vm353_vm0 = vcmask 7168   ;;  %vm386_vm1 = vcmask 523264   ;;  %v2193_v0 = vmov -inf   ;;  %v2194_v1 = vmov 0.0  }
  0x20   : > { %354 = vst.msk [vmem:[#allocation2] sm:$0xff] %vm353_vm0, %v2193_v0  ;;  %355 = vst.msk [vmem:[#allocation2 + $0x8] sm:$0xff] %vm353_vm0, %v2193_v0 }
  0x21   : > { %356 = vst.msk [vmem:[#allocation2 + $0x10] sm:$0xff] %vm353_vm0, %v2193_v0  ;;  %357 = vst.msk [vmem:[#allocation2 + $0x18] sm:$0xff] %vm353_vm0, %v2193_v0 }
  0x22   : > { %358 = vst.msk [vmem:[#allocation2 + $0x20] sm:$0xff] %vm353_vm0, %v2193_v0  ;;  %359 = vst.msk [vmem:[#allocation2 + $0x28] sm:$0xff] %vm353_vm0, %v2193_v0 }
  0x23   : > { %360 = vst.msk [vmem:[#allocation2 + $0x30] sm:$0xff] %vm353_vm0, %v2193_v0  ;;  %361 = vst.msk [vmem:[#allocation2 + $0x38] sm:$0xff] %vm353_vm0, %v2193_v0 }
  0x24   : > { %362 = vst.msk [vmem:[#allocation2 + $0x40] sm:$0xff] %vm353_vm0, %v2193_v0  ;;  %363 = vst.msk [vmem:[#allocation2 + $0x48] sm:$0xff] %vm353_vm0, %v2193_v0 }
  0x25   : > { %364 = vst.msk [vmem:[#allocation2 + $0x50] sm:$0xff] %vm353_vm0, %v2193_v0  ;;  %365 = vst.msk [vmem:[#allocation2 + $0x58] sm:$0xff] %vm353_vm0, %v2193_v0 }
  0x26   : > { %366 = vst.msk [vmem:[#allocation2 + $0x60] sm:$0xff] %vm353_vm0, %v2193_v0  ;;  %367 = vst.msk [vmem:[#allocation2 + $0x68] sm:$0xff] %vm353_vm0, %v2193_v0 }
  0x27   : > { %368 = vst.msk [vmem:[#allocation2 + $0x70] sm:$0xff] %vm353_vm0, %v2193_v0  ;;  %369 = vst.msk [vmem:[#allocation2 + $0x78] sm:$0xff] %vm353_vm0, %v2193_v0 }
  0x28   : > { %370 = vst.msk [vmem:[#allocation3] sm:$0xff] %vm353_vm0, %v2194_v1  ;;  %371 = vst.msk [vmem:[#allocation3 + $0x8] sm:$0xff] %vm353_vm0, %v2194_v1 }
  0x29   : > { %372 = vst.msk [vmem:[#allocation3 + $0x10] sm:$0xff] %vm353_vm0, %v2194_v1  ;;  %373 = vst.msk [vmem:[#allocation3 + $0x18] sm:$0xff] %vm353_vm0, %v2194_v1 }
  0x2a   : > { %374 = vst.msk [vmem:[#allocation3 + $0x20] sm:$0xff] %vm353_vm0, %v2194_v1  ;;  %375 = vst.msk [vmem:[#allocation3 + $0x28] sm:$0xff] %vm353_vm0, %v2194_v1 }
  0x2b   : > { %376 = vst.msk [vmem:[#allocation3 + $0x30] sm:$0xff] %vm353_vm0, %v2194_v1  ;;  %377 = vst.msk [vmem:[#allocation3 + $0x38] sm:$0xff] %vm353_vm0, %v2194_v1 }
  0x2c   : > { %378 = vst.msk [vmem:[#allocation3 + $0x40] sm:$0xff] %vm353_vm0, %v2194_v1  ;;  %379 = vst.msk [vmem:[#allocation3 + $0x48] sm:$0xff] %vm353_vm0, %v2194_v1 }
  0x2d   : > { %380 = vst.msk [vmem:[#allocation3 + $0x50] sm:$0xff] %vm353_vm0, %v2194_v1  ;;  %381 = vst.msk [vmem:[#allocation3 + $0x58] sm:$0xff] %vm353_vm0, %v2194_v1 }
  0x2e   : > { %382 = vst.msk [vmem:[#allocation3 + $0x60] sm:$0xff] %vm353_vm0, %v2194_v1  ;;  %383 = vst.msk [vmem:[#allocation3 + $0x68] sm:$0xff] %vm353_vm0, %v2194_v1 }
  0x2f   : > { %384 = vst.msk [vmem:[#allocation3 + $0x70] sm:$0xff] %vm353_vm0, %v2194_v1  ;;  %385 = vst.msk [vmem:[#allocation3 + $0x78] sm:$0xff] %vm353_vm0, %v2194_v1 }
  0x30   : > { %387 = vst.msk [vmem:[#allocation4] sm:$0xff] %vm386_vm1, %v2194_v1  ;;  %388 = vst.msk [vmem:[#allocation4 + $0x8] sm:$0xff] %vm386_vm1, %v2194_v1 }
  0x31   : > { %389 = vst.msk [vmem:[#allocation4 + $0x10] sm:$0xff] %vm386_vm1, %v2194_v1  ;;  %390 = vst.msk [vmem:[#allocation4 + $0x18] sm:$0xff] %vm386_vm1, %v2194_v1 }
  0x32   : > { %391 = vst.msk [vmem:[#allocation4 + $0x20] sm:$0xff] %vm386_vm1, %v2194_v1  ;;  %392 = vst.msk [vmem:[#allocation4 + $0x28] sm:$0xff] %vm386_vm1, %v2194_v1 }
  0x33   : > { %393 = vst.msk [vmem:[#allocation4 + $0x30] sm:$0xff] %vm386_vm1, %v2194_v1  ;;  %394 = vst.msk [vmem:[#allocation4 + $0x38] sm:$0xff] %vm386_vm1, %v2194_v1 }
  0x34   : > { %395 = vst.msk [vmem:[#allocation4 + $0x40] sm:$0xff] %vm386_vm1, %v2194_v1  ;;  %396 = vst.msk [vmem:[#allocation4 + $0x48] sm:$0xff] %vm386_vm1, %v2194_v1 }
  0x35   : > { %397 = vst.msk [vmem:[#allocation4 + $0x50] sm:$0xff] %vm386_vm1, %v2194_v1  ;;  %398 = vst.msk [vmem:[#allocation4 + $0x58] sm:$0xff] %vm386_vm1, %v2194_v1 }
  0x36   : > { %399 = vst.msk [vmem:[#allocation4 + $0x60] sm:$0xff] %vm386_vm1, %v2194_v1  ;;  %400 = vst.msk [vmem:[#allocation4 + $0x68] sm:$0xff] %vm386_vm1, %v2194_v1 }
  0x37   : > { %401 = vst.msk [vmem:[#allocation4 + $0x70] sm:$0xff] %vm386_vm1, %v2194_v1  ;;  %402 = vst.msk [vmem:[#allocation4 + $0x78] sm:$0xff] %vm386_vm1, %v2194_v1 }
  0x38 PF: > { %v1999_v2 = vld [vmem:[%s2294_s28 + $0x38] sm:$0xff]   ;;  %vm531_vm2 = vcmask 523264   ;;  %v2000_v3 = vld [vmem:[%s2294_s28 + $0x30] sm:$0xff]   ;;  %v2001_v5 = vld [vmem:[%s2294_s28 + $0x28] sm:$0xff]   ;;  %v2195_v33 = vmov 0   ;;  %vm997_vm3 = vcmask 7168  }
  0x39   : > { %1913 = vmatprep.subr.msk.bf16.mxu0 %vm531_vm2, %v1999_v2  ;;  %v578_v4 = vsel %vm531_vm2, %v1999_v2, 0  ;;  %v575_v6 = vsel %vm531_vm2, %v2000_v3, 0  ;;  %v2007_v7 = vld [vmem:[%s2284_s7] sm:$0xff]   ;;  %v572_v8 = vsel %vm531_vm2, %v2001_v5, 0  ;;  %v2003_v11 = vld [vmem:[%s2294_s28 + $0x18] sm:$0xff]   ;;  %v2004_v13 = vld [vmem:[%s2294_s28 + $0x10] sm:$0xff]   ;;  %1998 = vset.pattern.permute.xlu1 %v2195_v33 }
  0x3a   : > { %1850 = vmatpush3.bf16.xpose.msra.mxu0 %v578_v4  ;;  %1865 = vmatprep.mubr.msk.bf16.mxu0 %vm531_vm2, %v2007_v7  ;;  %v2002_v9 = vld [vmem:[%s2294_s28 + $0x20] sm:$0xff]   ;;  %v566_v12 = vsel %vm531_vm2, %v2003_v11, 0  ;;  %v563_v14 = vsel %vm531_vm2, %v2004_v13, 0  ;;  %v2005_v15 = vld [vmem:[%s2294_s28 + $0x8] sm:$0xff]   ;;  %v2009_v20 = vld [vmem:[%s2284_s7 + $0x10] sm:$0xff]   ;;  %p1782_p12 = scmp.ne.s32.totalorder %s2159_s12, 1 }
  0x3b   : > { %1914 = vmatprep.subr.msk.bf16.mxu0 %vm531_vm2, %v2000_v3  ;;  %v569_v10 = vsel %vm531_vm2, %v2002_v9, 0  ;;  %v560_v16 = vsel %vm531_vm2, %v2005_v15, 0  ;;  %v2006_v17 = vld [vmem:[%s2294_s28] sm:$0xff]   ;;  %v2008_v19 = vld [vmem:[%s2284_s7 + $0x8] sm:$0xff]   ;;  %v2010_v21 = vld [vmem:[%s2284_s7 + $0x18] sm:$0xff]   ;;  %1997 = vset.pattern.permute.xlu0 %v2195_v33 }
  0x3c   : > { %v557_v18 = vsel %vm531_vm2, %v2006_v17, 0  ;;  %v2011_v22 = vld [vmem:[%s2284_s7 + $0x20] sm:$0xff]   ;;  %v2012_v23 = vld [vmem:[%s2284_s7 + $0x28] sm:$0xff]   ;;  %v2013_v24 = vld [vmem:[%s2284_s7 + $0x30] sm:$0xff]  }
  0x3d   : > { %v2014_v25 = vld [vmem:[%s2284_s7 + $0x38] sm:$0xff]   ;;  %v2439_v44 = vld [vmem:[#allocation2 + $0x10] sm:$0xff]  ;;  %v2442_v47 = vld [vmem:[#allocation2] sm:$0xff] }
  0x3e   : > { %v2015_v43 = vld [vmem:[%s2299_s5 + $0x38] sm:$0xff]   ;;  %v2016_v45 = vld [vmem:[%s2299_s5 + $0x30] sm:$0xff]   ;;  %v2017_v51 = vld [vmem:[%s2299_s5 + $0x28] sm:$0xff]  }
  0x3f   : > { %1881 = vmatprep.subr.bf16.mxu1 %v2015_v43  ;;  %v2447_v50 = vld [vmem:[#allocation2 + $0x18] sm:$0xff]  ;;  %v2456_v54 = vld [vmem:[#allocation2 + $0x8] sm:$0xff]  ;;  %v2018_v57 = vld [vmem:[%s2299_s5 + $0x20] sm:$0xff]  }
  0x40   : > { %1882 = vmatpush3.bf16.msra.mxu1 %v2015_v43  ;;  %v2471_v59 = vld [vmem:[#allocation2 + $0x20] sm:$0xff]  ;;  %v2475_v61 = vld [vmem:[#allocation2 + $0x38] sm:$0xff]  ;;  %v2482_v1 = vld [vmem:[#allocation2 + $0x30] sm:$0xff] }
  0x41   : > { %1883 = vmatprep.subr.bf16.mxu1 %v2016_v45  ;;  %v2019_v62 = vld [vmem:[%s2299_s5 + $0x18] sm:$0xff]   ;;  %v2489_v4 = vld [vmem:[#allocation2 + $0x28] sm:$0xff] }
  0x42   : > { %1852 = vmatpush3.bf16.xpose.msra.mxu0 %v575_v6 }
  0x43   : > { %1915 = vmatprep.subr.msk.bf16.mxu0 %vm531_vm2, %v2001_v5  ;;  %v2020_v5 = vld [vmem:[%s2299_s5 + $0x10] sm:$0xff]  }
  0x44   : > { %1884 = vmatpush3.bf16.msra.mxu1 %v2016_v45  ;;  %v2536_v45 = vld [vmem:[#allocation2 + $0x78] sm:$0xff] }
  0x45   : > { %1885 = vmatprep.subr.bf16.mxu1 %v2017_v51 }
  0x48   : > { %1886 = vmatpush3.bf16.msra.mxu1 %v2017_v51  ;;  %v2544_v51 = vld [vmem:[#allocation2 + $0x70] sm:$0xff] }
  0x49   : > { %1887 = vmatprep.subr.bf16.mxu1 %v2018_v57 }
  0x4a   : > { %1854 = vmatpush3.bf16.xpose.msra.mxu0 %v572_v8  ;;  %v2497_v8 = vld [vmem:[#allocation2 + $0x40] sm:$0xff] }
  0x4b   : > { %1916 = vmatprep.subr.msk.bf16.mxu0 %vm531_vm2, %v2002_v9 }
  0x4c   : > { %1888 = vmatpush3.bf16.msra.mxu1 %v2018_v57 }
  0x4d   : > { %1889 = vmatprep.subr.bf16.mxu1 %v2019_v62 }
  0x50   : > { %1890 = vmatpush3.bf16.msra.mxu1 %v2019_v62 }
  0x51   : > { %1891 = vmatprep.subr.bf16.mxu1 %v2020_v5 }
  0x52   : > { %1856 = vmatpush3.bf16.xpose.msra.mxu0 %v569_v10 }
  0x53   : > { %1917 = vmatprep.subr.msk.bf16.mxu0 %vm531_vm2, %v2003_v11  ;;  %v2505_v11 = vld [vmem:[#allocation2 + $0x58] sm:$0xff] }
  0x54   : > { %1892 = vmatpush3.bf16.msra.mxu1 %v2020_v5 }
  0x5a   : > { %1858 = vmatpush3.bf16.xpose.msra.mxu0 %v566_v12  ;;  %v2021_v12 = vld [vmem:[%s2299_s5 + $0x8] sm:$0xff]  }
  0x5b   : > { %1918 = vmatprep.subr.msk.bf16.mxu0 %vm531_vm2, %v2004_v13  ;;  %1893 = vmatprep.subr.bf16.mxu1 %v2021_v12 }
  0x5c   : > { %1894 = vmatpush3.bf16.msra.mxu1 %v2021_v12 }
  0x62   : > { %1860 = vmatpush3.bf16.xpose.msra.mxu0 %v563_v14 }
  0x63   : > { %1919 = vmatprep.subr.msk.bf16.mxu0 %vm531_vm2, %v2005_v15  ;;  %v2513_v15 = vld [vmem:[#allocation2 + $0x50] sm:$0xff] }
  0x6a   : > { %1862 = vmatpush3.bf16.xpose.msra.mxu0 %v560_v16 }
  0x6b   : > { %1920 = vmatprep.subr.msk.bf16.mxu0 %vm531_vm2, %v2006_v17 }
  0x72   : > { %1864 = vmatpush3.bf16.xpose.msra.mxu0 %v557_v18 }
  0x79   : > { %1866 = vmatmul.mubr.msk.bf16.vlgmr.msra.gmra.mxu0 %vm531_vm2, %v2008_v19  ;;  %v2521_v19 = vld [vmem:[#allocation2 + $0x48] sm:$0xff] }
  0x7a   : > { %1869 = vmatprep.mubr.msk.bf16.mxu0 %vm531_vm2, %v2009_v20  ;;  %v2022_v20 = vld [vmem:[%s2299_s5] sm:$0xff]  }
  0x7b   : > { %1895 = vmatprep.subr.bf16.mxu1 %v2022_v20 }
  0x7c   : > { %1896 = vmatpush3.bf16.msra.mxu1 %v2022_v20 }
  0x81   : > { %1870 = vmatmul.mubr.msk.bf16.gmra.mxu0 %vm531_vm2, %v2010_v21 }
  0x82   : > { %1873 = vmatprep.mubr.msk.bf16.mxu0 %vm531_vm2, %v2011_v22 }
  0x89   : > { %1874 = vmatmul.mubr.msk.bf16.gmra.mxu0 %vm531_vm2, %v2012_v23 }
  0x8a   : > { %1877 = vmatprep.mubr.msk.bf16.mxu0 %vm531_vm2, %v2013_v24  ;;  %v2530_v24 = vld [vmem:[#allocation2 + $0x60] sm:$0xff] }
  0x91   : > { %1878 = vmatmul.mubr.msk.bf16.gmra.mxu0 %vm531_vm2, %v2014_v25 }
 0x139   : > { %v2390_v26 = vpop.f32.mrf.mxu0 }
 0x13a   : > { %697 = vmax.xlane.f32.xlu1 %v2390_v26 }
 0x13b   : > { %v2393_v27 = vpop.f32.mrf.mxu0 }
 0x13c   : > { %693 = vmax.xlane.f32.xlu0 %v2393_v27 }
 0x13d   : > { %v2396_v28 = vpop.f32.mrf.mxu0 }
 0x13e   : > { %699 = vmax.xlane.f32.xlu1 %v2396_v28 }
 0x13f   : > { %v2399_v29 = vpop.f32.mrf.mxu0 }
 0x140   : > { %695 = vmax.xlane.f32.xlu0 %v2399_v29 }
 0x141   : > { %v2402_v30 = vpop.f32.mrf.mxu0 }
 0x143   : > { %v2404_v31 = vpop.f32.mrf.mxu0 }
 0x144   : > { %701 = vmax.xlane.f32.xlu0 %v2404_v31 }
 0x145   : > { %v2407_v32 = vpop.f32.mrf.mxu0 }
 0x146   : > { %707 = vmax.xlane.f32.xlu1 %v2407_v32 }
 0x147   : > { %v2410_v34 = vpop.f32.mrf.mxu0 }
 0x148   : > { %705 = vmax.xlane.f32.xlu0 %v2402_v30 }
 0x149   : > { %v2413_v35 = vpop.f32.mrf.mxu0 }
 0x14a   : > { %703 = vmax.xlane.f32.xlu1 %v2410_v34 }
 0x14b   : > { %v2416_v36 = vpop.f32.mrf.mxu0 }
 0x14c   : > { %709 = vmax.xlane.f32.xlu0 %v2416_v36 }
 0x14d   : > { %v2419_v37 = vpop.f32.mrf.mxu0 }
 0x14e   : > { %715 = vmax.xlane.f32.xlu1 %v2419_v37 }
 0x14f   : > { %v2422_v38 = vpop.f32.mrf.mxu0 }
 0x150   : > { %713 = vmax.xlane.f32.xlu0 %v2413_v35 }
 0x151   : > { %v2425_v39 = vpop.f32.mrf.mxu0 }
 0x152   : > { %711 = vmax.xlane.f32.xlu1 %v2422_v38 }
 0x153   : > { %v2428_v40 = vpop.f32.mrf.mxu0 }
 0x154   : > { %717 = vmax.xlane.f32.xlu0 %v2428_v40 }
 0x155   : > { %v2431_v41 = vpop.f32.mrf.mxu0 }
 0x156   : > { %723 = vmax.xlane.f32.xlu1 %v2431_v41 }
 0x157   : > { %v2435_v42 = vpop.f32.mrf.mxu0 }
 0x158   : > { %721 = vmax.xlane.f32.xlu0 %v2425_v39 }
 0x15a   : > { %719 = vmax.xlane.f32.xlu1 %v2435_v42 }
 0x1c3   : > { %v698_v46 = vpop.xlane.xlu1 %697 }
 0x1c4   : > { %v2445_v48 = vmax.f32 %v2439_v44, %v698_v46 }
 0x1c5   : > { %v694_v49 = vpop.xlane.xlu0 %693 }
 0x1c6   : > { %1313 = vst.msk [vmem:[#allocation2 + $0x10] sm:$0xff] %vm997_vm3, %v2445_v48  ;;  %v2453_v52 = vmax.f32 %v2442_v47, %v694_v49  ;;  %801 = vperm.xlu1 %1998, %v2445_v48  }
 0x1c7   : > { %v700_v53 = vpop.xlane.xlu1 %699 }
 0x1c8   : > { %1311 = vst.msk [vmem:[#allocation2] sm:$0xff] %vm997_vm3, %v2453_v52  ;;  %v2461_v55 = vmax.f32 %v2447_v50, %v700_v53  ;;  %791 = vperm.xlu0 %1997, %v2453_v52   ;;  %v741_v16 = vsub.f32 %v2442_v47, %v2453_v52 }
 0x1c9   : > { %v696_v56 = vpop.xlane.xlu0 %695 }
 0x1ca   : > { %1314 = vst.msk [vmem:[#allocation2 + $0x18] sm:$0xff] %vm997_vm3, %v2461_v55  ;;  %v2468_v58 = vmax.f32 %v2456_v54, %v696_v56  ;;  %806 = vperm.xlu1 %1998, %v2461_v55   ;;  %v744_v22 = vsub.f32 %v2447_v50, %v2461_v55  ;;  %v757_v25 = vmul.f32 1.442695, %v741_v16  ;;  %v690_v55 = vld [vmem:[#allocation2 + $0x68] sm:$0xff]  ;;  %v743_v56 = vsub.f32 %v2439_v44, %v2445_v48 }
 0x1cc   : > { %1312 = vst.msk [vmem:[#allocation2 + $0x8] sm:$0xff] %vm997_vm3, %v2468_v58  ;;  %v742_v46 = vsub.f32 %v2456_v54, %v2468_v58  ;;  %v763_v49 = vmul.f32 1.442695, %v744_v22  ;;  %2023 = vpow2.f32 %v757_v25 }
 0x1cd   : > { %v702_v60 = vpop.xlane.xlu0 %701 }
 0x1ce   : > { %v2479_v63 = vmax.f32 %v2471_v59, %v702_v60  ;;  %796 = vperm.xlu1 %1998, %v2468_v58   ;;  %v759_v57 = vmul.f32 1.442695, %v742_v46  ;;  %2025 = vpow2.f32 %v763_v49 }
 0x1cf   : > { %v708_v0 = vpop.xlane.xlu1 %707 }
 0x1d0   : > { %1315 = vst.msk [vmem:[#allocation2 + $0x20] sm:$0xff] %vm997_vm3, %v2479_v63  ;;  %v2487_v2 = vmax.f32 %v2475_v61, %v708_v0  ;;  %2027 = vpow2.f32 %v759_v57 }
 0x1d1   : > { %v706_v3 = vpop.xlane.xlu0 %705 }
 0x1d2   : > { %1318 = vst.msk [vmem:[#allocation2 + $0x38] sm:$0xff] %vm997_vm3, %v2487_v2  ;;  %v2495_v6 = vmax.f32 %v2482_v1, %v706_v3  ;;  %v748_v52 = vsub.f32 %v2475_v61, %v2487_v2  ;;  %v745_v3 = vsub.f32 %v2471_v59, %v2479_v63 }
 0x1d3   : > { %v704_v7 = vpop.xlane.xlu1 %703 }
 0x1d4   : > { %1317 = vst.msk [vmem:[#allocation2 + $0x30] sm:$0xff] %vm997_vm3, %v2495_v6  ;;  %v2502_v9 = vmax.f32 %v2489_v4, %v704_v7  ;;  %821 = vperm.xlu1 %1998, %v2495_v6   ;;  %v771_v62 = vmul.f32 1.442695, %v748_v52  ;;  %v765_v7 = vmul.f32 1.442695, %v745_v3 }
 0x1d5   : > { %v710_v10 = vpop.xlane.xlu0 %709 }
 0x1d6   : > { %1316 = vst.msk [vmem:[#allocation2 + $0x28] sm:$0xff] %vm997_vm3, %v2502_v9  ;;  %v2511_v13 = vmax.f32 %v2497_v8, %v710_v10  ;;  %v746_v0 = vsub.f32 %v2489_v4, %v2502_v9  ;;  %2029 = vpow2.f32 %v771_v62 }
 0x1d7   : > { %v716_v14 = vpop.xlane.xlu1 %715 }
 0x1d8   : > { %1319 = vst.msk [vmem:[#allocation2 + $0x40] sm:$0xff] %vm997_vm3, %v2511_v13  ;;  %v736_v17 = vmax.f32 %v2505_v11, %v716_v14  ;;  %811 = vperm.xlu1 %1998, %v2479_v63   ;;  %v767_v5 = vmul.f32 1.442695, %v746_v0  ;;  %v749_v16 = vsub.f32 %v2497_v8, %v2511_v13 }
 0x1d9   : > { %v714_v18 = vpop.xlane.xlu0 %713  ;;  %v2580_v63 = vpop.eup %2023 }
 0x1da   : > { %1322 = vst.msk [vmem:[#allocation2 + $0x58] sm:$0xff] %vm997_vm3, %v736_v17  ;;  %v2526_v21 = vmax.f32 %v2513_v15, %v714_v18  ;;  %v752_v4 = vsub.f32 %v2505_v11, %v736_v17  ;;  %v773_v20 = vmul.f32 1.442695, %v749_v16 }
 0x1db   : > { %v712_v23 = vpop.xlane.xlu1 %711  ;;  %v2585_v14 = vpop.eup %2025 }
 0x1dc   : > { %1321 = vst.msk [vmem:[#allocation2 + $0x50] sm:$0xff] %vm997_vm3, %v2526_v21  ;;  %v734_v33 = vmax.f32 %v2521_v19, %v712_v23  ;;  %816 = vperm.xlu1 %1998, %v2502_v9   ;;  %v747_v9 = vsub.f32 %v2482_v1, %v2495_v6  ;;  %v779_v10 = vmul.f32 1.442695, %v752_v4  ;;  %v751_v11 = vsub.f32 %v2513_v15, %v2526_v21 }
 0x1dd   : > { %v718_v43 = vpop.xlane.xlu0 %717  ;;  %v2591_v18 = vpop.eup %2027 }
 0x1de   : > { %1320 = vst.msk [vmem:[#allocation2 + $0x48] sm:$0xff] %vm997_vm3, %v734_v33  ;;  %v2542_v47 = vmax.f32 %v2530_v24, %v718_v43  ;;  %836 = vperm.xlu0 %1997, %v734_v33   ;;  %v750_v59 = vsub.f32 %v2521_v19, %v734_v33  ;;  %v769_v12 = vmul.f32 1.442695, %v747_v9 }
 0x1df   : > { %v724_v50 = vpop.xlane.xlu1 %723 }
 0x1e0   : > { %1323 = vst.msk [vmem:[#allocation2 + $0x60] sm:$0xff] %vm997_vm3, %v2542_v47  ;;  %v2551_v53 = vmax.f32 %v2536_v45, %v724_v50  ;;  %826 = vperm.xlu1 %1998, %v2487_v2   ;;  %v761_v2 = vmul.f32 1.442695, %v743_v56  ;;  %v775_v1 = vmul.f32 1.442695, %v750_v59 }
 0x1e1   : > { %v722_v54 = vpop.xlane.xlu0 %721 }
 0x1e2   : > { %v756_v58 = vsub.f32 %v2536_v45, %v2551_v53  ;;  %1326 = vst.msk [vmem:[#allocation2 + $0x78] sm:$0xff] %vm997_vm3, %v2551_v53  ;;  %v2561_v60 = vmax.f32 %v2544_v51, %v722_v54  ;;  %846 = vperm.xlu0 %1997, %v736_v17   ;;  %2031 = vpow2.f32 %v761_v2  ;;  %v777_v17 = vmul.f32 1.442695, %v751_v11 }
 0x1e3   : > { %v720_v61 = vpop.xlane.xlu1 %719  ;;  %2033 = vpow2.f32 %v767_v5  ;;  %v2594_v19 = vpop.eup %2029 }
 0x1e4   : > { %v755_v44 = vsub.f32 %v2544_v51, %v2561_v60  ;;  %1325 = vst.msk [vmem:[#allocation2 + $0x70] sm:$0xff] %vm997_vm3, %v2561_v60  ;;  %v738_v48 = vmax.f32 %v690_v55, %v720_v61  ;;  %831 = vperm.xlu1 %1998, %v2511_v13   ;;  %2035 = vpow2.f32 %v765_v7 }
 0x1e5   : > { %2037 = vpow2.f32 %v779_v10 }
 0x1e6   : > { %1324 = vst.msk [vmem:[#allocation2 + $0x68] sm:$0xff] %vm997_vm3, %v738_v48  ;;  %856 = vperm.xlu0 %1997, %v738_v48   ;;  %v754_v6 = vsub.f32 %v690_v55, %v738_v48  ;;  %2039 = vpow2.f32 %v769_v12 }
 0x1e7   : > { %2041 = vpow2.f32 %v775_v1 }
 0x1e8   : > { %841 = vperm.xlu1 %1998, %v2526_v21   ;;  %v783_v15 = vmul.f32 1.442695, %v754_v6  ;;  %2043 = vpow2.f32 %v777_v17  ;;  %v753_v21 = vsub.f32 %v2530_v24, %v2542_v47 }
 0x1ea   : > { %866 = vperm.xlu0 %1997, %v2551_v53   ;;  %2045 = vpow2.f32 %v783_v15  ;;  %v781_v13 = vmul.f32 1.442695, %v753_v21 }
 0x1eb   : > { %2047 = vpow2.f32 %v773_v20 }
 0x1ec   : > { %851 = vperm.xlu1 %1998, %v2542_v47   ;;  %2049 = vpow2.f32 %v781_v13 }
 0x1ee   : > { %1032 = vperm.xlu0 %1997, %v2580_v63  }
 0x1ef   : > { %v2599_v22 = vpop.eup %2031 }
 0x1f0   : > { %861 = vperm.xlu1 %1998, %v2561_v60   ;;  %v2602_v8 = vpop.eup %2033 }
 0x1f1   : > { %v2605_v23 = vpop.eup %2035 }
 0x1f2   : > { %1047 = vperm.xlu0 %1997, %v2585_v14   ;;  %v2608_v25 = vpop.eup %2037 }
 0x1f3   : > { %v2611_v24 = vpop.eup %2039 }
 0x1f4   : > { %1037 = vperm.xlu1 %1998, %v2591_v18   ;;  %v2614_v33 = vpop.eup %2041 }
 0x1f5   : > { %v2617_v43 = vpop.eup %2043 }
 0x1f6   : > { %1067 = vperm.xlu0 %1997, %v2594_v19  }
 0x1f7   : > { %v2620_v46 = vpop.eup %2045 }
 0x1f8   : > { %1042 = vperm.xlu1 %1998, %v2599_v22   ;;  %v2623_v47 = vpop.eup %2047 }
 0x1f9   : > { %v2626_v49 = vpop.eup %2049 }
 0x1fa   : > { %1057 = vperm.xlu0 %1997, %v2602_v8  }
 0x1fc   : > { %1052 = vperm.xlu1 %1998, %v2605_v23  }
 0x1fe   : > { %1087 = vperm.xlu0 %1997, %v2608_v25  }
 0x200   : > { %1062 = vperm.xlu1 %1998, %v2611_v24  }
 0x202   : > { %1077 = vperm.xlu0 %1997, %v2614_v33  }
 0x204   : > { %1082 = vperm.xlu1 %1998, %v2617_v43  }
 0x206   : > { %1097 = vperm.xlu0 %1997, %v2620_v46  }
 0x208   : > { %1072 = vperm.xlu1 %1998, %v2623_v47  }
 0x20c   : > { %1092 = vperm.xlu1 %1998, %v2626_v49  }
 0x241   : > { %v802_v50 = vpop.permute.xlu1 %801 }
 0x242   : > { %v871_v52 = vsub.f32 %v2390_v26, %v802_v50 }
 0x243   : > { %v792_v54 = vpop.permute.xlu0 %791 }
 0x244   : > { %v889_v55 = vmul.f32 1.442695, %v871_v52  ;;  %v869_v56 = vsub.f32 %v2393_v27, %v792_v54 }
 0x245   : > { %v807_v57 = vpop.permute.xlu1 %806 }
 0x246   : > { %2051 = vpow2.f32 %v889_v55  ;;  %v885_v61 = vmul.f32 1.442695, %v869_v56  ;;  %v872_v62 = vsub.f32 %v2396_v28, %v807_v57 }
 0x248   : > { %2053 = vpow2.f32 %v885_v61  ;;  %v891_v0 = vmul.f32 1.442695, %v872_v62 }
 0x249   : > { %v797_v48 = vpop.permute.xlu1 %796 }
 0x24a   : > { %v870_v2 = vsub.f32 %v2399_v29, %v797_v48  ;;  %2055 = vpow2.f32 %v891_v0 }
 0x24c   : > { %v887_v3 = vmul.f32 1.442695, %v870_v2 }
 0x24e   : > { %2057 = vpow2.f32 %v887_v3 }
 0x24f   : > { %v822_v5 = vpop.permute.xlu1 %821 }
 0x250   : > { %v875_v26 = vsub.f32 %v2402_v30, %v822_v5 }
 0x252   : > { %v897_v4 = vmul.f32 1.442695, %v875_v26 }
 0x253   : > { %v2052_v7 = vpop.eup %2051  ;;  %v812_v9 = vpop.permute.xlu1 %811 }
 0x254   : > { %2059 = vpow2.f32 %v897_v4  ;;  %v873_v27 = vsub.f32 %v2404_v31, %v812_v9  ;;  %953 = vadd.xlane.f32.xlu0 %v2052_v7 }
 0x255   : > { %v2054_v10 = vpop.eup %2053 }
 0x256   : > { %v893_v28 = vmul.f32 1.442695, %v873_v27  ;;  %949 = vadd.xlane.f32.xlu1 %v2054_v10 }
 0x257   : > { %v817_v59 = vpop.permute.xlu1 %816  ;;  %v2056_v12 = vpop.eup %2055 }
 0x258   : > { %2061 = vpow2.f32 %v893_v28  ;;  %v874_v29 = vsub.f32 %v2410_v34, %v817_v59  ;;  %v1127_v20 = vpack.c.bf16 %v2056_v12, %v2052_v7 }
 0x259   : > { %v837_v11 = vpop.permute.xlu0 %836 }
 0x25a   : > { %v895_v1 = vmul.f32 1.442695, %v874_v29  ;;  %955 = vadd.xlane.f32.xlu1 %v2056_v12  ;;  %v878_v30 = vsub.f32 %v2422_v38, %v837_v11 }
 0x25b   : > { %v2058_v6 = vpop.eup %2057  ;;  %v827_v16 = vpop.permute.xlu1 %826 }
 0x25c   : > { %2063 = vpow2.f32 %v895_v1  ;;  %v876_v17 = vsub.f32 %v2407_v32, %v827_v16  ;;  %951 = vadd.xlane.f32.xlu0 %v2058_v6  ;;  %v1126_v31 = vpack.c.bf16 %v2058_v6, %v2054_v10  ;;  %v903_v13 = vmul.f32 1.442695, %v878_v30 }
 0x25d   : > { %v847_v15 = vpop.permute.xlu0 %846 }
 0x25e   : > { %v899_v21 = vmul.f32 1.442695, %v876_v17  ;;  %1897 = vmatprep.mubr.bf16.mxu1 %v1126_v31  ;;  %v880_v34 = vsub.f32 %v2419_v37, %v847_v15  ;;  %v785_v17 = vmul.f32 1.442695, %v755_v44  ;;  %v787_v31 = vmul.f32 1.442695, %v756_v58 }
 0x25f   : > { %1898 = vmatmul.mubr.bf16.vlgmr.msra.gmra.mxu1 %v1127_v20  ;;  %v832_v50 = vpop.permute.xlu1 %831 }
 0x260   : > { %2065 = vpow2.f32 %v899_v21  ;;  %v877_v52 = vsub.f32 %v2416_v36, %v832_v50  ;;  %v907_v32 = vmul.f32 1.442695, %v880_v34 }
 0x261   : > { %v2060_v54 = vpop.eup %2059  ;;  %v857_v38 = vpop.permute.xlu0 %856  ;;  %2067 = vpow2.f32 %v903_v13 }
 0x262   : > { %v901_v55 = vmul.f32 1.442695, %v877_v52  ;;  %961 = vadd.xlane.f32.xlu0 %v2060_v54  ;;  %v882_v56 = vsub.f32 %v2435_v42, %v857_v38 }
 0x263   : > { %v842_v57 = vpop.permute.xlu1 %841 }
 0x264   : > { %2069 = vpow2.f32 %v901_v55  ;;  %v879_v61 = vsub.f32 %v2413_v35, %v842_v57  ;;  %v911_v48 = vmul.f32 1.442695, %v882_v56  ;;  %v919_v55 = vld [vmem:[#allocation3 + $0x10] sm:$0xff]  ;;  %v917_v56 = vld [vmem:[#allocation3] sm:$0xff] }
 0x265   : > { %v2062_v62 = vpop.eup %2061  ;;  %v867_v0 = vpop.permute.xlu0 %866  ;;  %2071 = vpow2.f32 %v907_v32  ;;  %v935_v57 = vmul.f32 %v2599_v22, %v919_v55 }
 0x266   : > { %v905_v37 = vmul.f32 1.442695, %v879_v61  ;;  %957 = vadd.xlane.f32.xlu0 %v2062_v62  ;;  %v884_v36 = vsub.f32 %v2431_v41, %v867_v0  ;;  %v933_v0 = vmul.f32 %v2580_v63, %v917_v56 }
 0x267   : > { %v852_v2 = vpop.permute.xlu1 %851 }
 0x268   : > { %2073 = vpow2.f32 %v905_v37  ;;  %v881_v3 = vsub.f32 %v2428_v40, %v852_v2  ;;  %v915_v42 = vmul.f32 1.442695, %v884_v36  ;;  %v918_v2 = vld [vmem:[#allocation3 + $0x8] sm:$0xff] }
 0x269   : > { %v2064_v5 = vpop.eup %2063  ;;  %2075 = vpow2.f32 %v911_v48  ;;  %v2657_v21 = vpop.permute.xlu0 %1032  ;;  %v920_v48 = vld [vmem:[#allocation3 + $0x18] sm:$0xff] }
 0x26a   : > { %v909_v26 = vmul.f32 1.442695, %v881_v3  ;;  %v1128_v4 = vpack.c.bf16 %v2064_v5, %v2062_v62  ;;  %v936_v3 = vmul.f32 %v2585_v14, %v920_v48 }
 0x26b   : > { %v862_v7 = vpop.permute.xlu1 %861 }
 0x26c   : > { %2077 = vpow2.f32 %v909_v26  ;;  %v883_v35 = vsub.f32 %v2425_v39, %v862_v7  ;;  %1901 = vmatprep.mubr.bf16.mxu1 %v1128_v4  ;;  %v934_v4 = vmul.f32 %v2591_v18, %v918_v2  ;;  %v923_v7 = vld [vmem:[#allocation3 + $0x30] sm:$0xff]  ;;  %v924_v18 = vld [vmem:[#allocation3 + $0x38] sm:$0xff] }
 0x26d   : > { %v2066_v9 = vpop.eup %2065  ;;  %2079 = vpow2.f32 %v915_v42  ;;  %v2661_v60 = vpop.permute.xlu0 %1047  ;;  %v939_v63 = vmul.f32 %v2611_v24, %v923_v7 }
 0x26e   : > { %v913_v27 = vmul.f32 1.442695, %v883_v35  ;;  %963 = vadd.xlane.f32.xlu1 %v2066_v9  ;;  %v1129_v10 = vpack.c.bf16 %v2066_v9, %v2060_v54  ;;  %v2068_v41 = vpop.eup %2067  ;;  %v921_v9 = vld [vmem:[#allocation3 + $0x20] sm:$0xff] }
 0x26f   : > { %v2659_v51 = vpop.permute.xlu1 %1037  ;;  %v937_v14 = vmul.f32 %v2605_v23, %v921_v9  ;;  %v1017_v9 = vld [vmem:[#allocation4 + $0x18] sm:$0xff] }
 0x270   : > { %2081 = vpow2.f32 %v913_v27  ;;  %1902 = vmatmul.mubr.bf16.gmra.mxu1 %v1129_v10 }
 0x271   : > { %v2070_v28 = vpop.eup %2069  ;;  %2083 = vpow2.f32 %v785_v17  ;;  %v2665_v13 = vpop.permute.xlu0 %1067  ;;  %v926_v17 = vld [vmem:[#allocation3 + $0x48] sm:$0xff] }
 0x272   : > { %959 = vadd.xlane.f32.xlu1 %v2064_v5  ;;  %v1130_v40 = vpack.c.bf16 %v2068_v41, %v2070_v28  ;;  %v2072_v59 = vpop.eup %2071  ;;  %2085 = vpow2.f32 %v787_v31  ;;  %v942_v56 = vmul.f32 %v2614_v33, %v926_v17 }
 0x273   : > { %v2663_v44 = vpop.permute.xlu1 %1042 }
 0x274   : > { %1905 = vmatprep.mubr.bf16.mxu1 %v1130_v40 }
 0x275   : > { %v2074_v29 = vpop.eup %2073  ;;  %v2669_v53 = vpop.permute.xlu0 %1057 }
 0x276   : > { %971 = vadd.xlane.f32.xlu1 %v2072_v59  ;;  %969 = vadd.xlane.f32.xlu0 %v2074_v29  ;;  %v1131_v12 = vpack.c.bf16 %v2072_v59, %v2074_v29  ;;  %v2076_v11 = vpop.eup %2075  ;;  %v922_v59 = vld [vmem:[#allocation3 + $0x28] sm:$0xff] }
 0x277   : > { %v2667_v45 = vpop.permute.xlu1 %1052  ;;  %v938_v24 = vmul.f32 %v2602_v8, %v922_v59 }
 0x278   : > { %1906 = vmatmul.mubr.bf16.gmra.mxu1 %v1131_v12 }
 0x279   : > { %v2078_v39 = vpop.eup %2077  ;;  %v2673_v34 = vpop.permute.xlu0 %1087 }
 0x27a   : > { %967 = vadd.xlane.f32.xlu1 %v2068_v41  ;;  %965 = vadd.xlane.f32.xlu0 %v2070_v28  ;;  %v1132_v1 = vpack.c.bf16 %v2076_v11, %v2078_v39  ;;  %v2080_v6 = vpop.eup %2079  ;;  %v940_v28 = vmul.f32 %v2594_v19, %v924_v18  ;;  %v925_v19 = vld [vmem:[#allocation3 + $0x40] sm:$0xff] }
 0x27b   : > { %v2671_v58 = vpop.permute.xlu1 %1062  ;;  %v941_v8 = vmul.f32 %v2623_v47, %v925_v19  ;;  %v930_v47 = vld [vmem:[#allocation3 + $0x68] sm:$0xff] }
 0x27c   : > { %1909 = vmatprep.mubr.bf16.mxu1 %v1132_v1 }
 0x27d   : > { %v2082_v30 = vpop.eup %2081  ;;  %v2677_v52 = vpop.permute.xlu0 %1077 }
 0x27e   : > { %979 = vadd.xlane.f32.xlu1 %v2080_v6  ;;  %977 = vadd.xlane.f32.xlu0 %v2082_v30  ;;  %v1133_v16 = vpack.c.bf16 %v2080_v6, %v2082_v30  ;;  %v2651_v15 = vpop.eup %2083 }
 0x27f   : > { %v2654_v20 = vpop.eup %2085  ;;  %v2675_v50 = vpop.permute.xlu1 %1082 }
 0x280   : > { %1910 = vmatmul.mubr.bf16.gmra.mxu1 %v1133_v16 }
 0x281   : > { %v2681_v38 = vpop.permute.xlu0 %1097 }
 0x282   : > { %975 = vadd.xlane.f32.xlu1 %v2076_v11  ;;  %973 = vadd.xlane.f32.xlu0 %v2078_v39  ;;  %v927_v11 = vld [vmem:[#allocation3 + $0x50] sm:$0xff]  ;;  %v928_v39 = vld [vmem:[#allocation3 + $0x58] sm:$0xff] }
 0x283   : > { %v2679_v54 = vpop.permute.xlu1 %1072  ;;  %v943_v23 = vmul.f32 %v2617_v43, %v927_v11  ;;  %v944_v6 = vmul.f32 %v2608_v25, %v928_v39  ;;  %v932_v43 = vld [vmem:[#allocation3 + $0x78] sm:$0xff] }
 0x284   : > { %v948_v48 = vmul.f32 %v2654_v20, %v932_v43 }
 0x287   : > { %v2683_v32 = vpop.permute.xlu1 %1092 }
 0x293   : > { %1102 = vperm.xlu1 %1998, %v2651_v15  }
 0x298   : > { %1107 = vperm.xlu0 %1997, %v2654_v20   ;;  %v1016_v20 = vld [vmem:[#allocation4 + $0x10] sm:$0xff] }
 0x2dd   : > { %v954_v61 = vpop.xlane.xlu0 %953 }
 0x2de   : > { %v983_v62 = vadd.f32 %v954_v61, %v935_v57 }
 0x2df   : > { %v950_v37 = vpop.xlane.xlu1 %949 }
 0x2e0   : > { %1000 = vst.msk [vmem:[#allocation3 + $0x10] sm:$0xff] %vm997_vm3, %v983_v62  ;;  %v981_v36 = vadd.f32 %v950_v37, %v933_v0  ;;  %v931_v62 = vld [vmem:[#allocation3 + $0x70] sm:$0xff] }
 0x2e1   : > { %v947_v37 = vmul.f32 %v2651_v15, %v931_v62  ;;  %v1023_v62 = vld [vmem:[#allocation4 + $0x48] sm:$0xff] }
 0x2e2   : > { %998 = vst.msk [vmem:[#allocation3] sm:$0xff] %vm997_vm3, %v981_v36 }
 0x2e3   : > { %v956_v5 = vpop.xlane.xlu1 %955 }
 0x2e4   : > { %v984_v26 = vadd.f32 %v956_v5, %v936_v3  ;;  %v929_v3 = vld [vmem:[#allocation3 + $0x60] sm:$0xff] }
 0x2e5   : > { %v952_v42 = vpop.xlane.xlu0 %951 }
 0x2e6   : > { %1001 = vst.msk [vmem:[#allocation3 + $0x18] sm:$0xff] %vm997_vm3, %v984_v26  ;;  %v982_v22 = vadd.f32 %v952_v42, %v934_v4  ;;  %v945_v26 = vmul.f32 %v2626_v49, %v929_v3  ;;  %v946_v4 = vmul.f32 %v2620_v46, %v930_v47  ;;  %v1015_v49 = vld [vmem:[#allocation4 + $0x8] sm:$0xff]  ;;  %v1113_v46 = vmul.f32 %v2661_v60, %v1017_v9  ;;  %v1021_v60 = vld [vmem:[#allocation4 + $0x38] sm:$0xff] }
 0x2e8   : > { %999 = vst.msk [vmem:[#allocation3 + $0x8] sm:$0xff] %vm997_vm3, %v982_v22 }
 0x2eb   : > { %v962_v35 = vpop.xlane.xlu0 %961 }
 0x2ec   : > { %v987_v27 = vadd.f32 %v962_v35, %v939_v63  ;;  %v1014_v63 = vld [vmem:[#allocation4] sm:$0xff]  ;;  %v1112_v35 = vmul.f32 %v2663_v44, %v1016_v20 }
 0x2ee   : > { %1004 = vst.msk [vmem:[#allocation3 + $0x30] sm:$0xff] %vm997_vm3, %v987_v27 }
 0x2ef   : > { %v958_v10 = vpop.xlane.xlu0 %957 }
 0x2f0   : > { %v985_v41 = vadd.f32 %v958_v10, %v937_v14  ;;  %v1110_v14 = vmul.f32 %v2657_v21, %v1014_v63  ;;  %v1020_v21 = vld [vmem:[#allocation4 + $0x30] sm:$0xff] }
 0x2f2   : > { %1002 = vst.msk [vmem:[#allocation3 + $0x20] sm:$0xff] %vm997_vm3, %v985_v41 }
 0x2f7   : > { %v964_v40 = vpop.xlane.xlu1 %963 }
 0x2f8   : > { %v988_v29 = vadd.f32 %v964_v40, %v940_v28  ;;  %v1111_v40 = vmul.f32 %v2659_v51, %v1015_v49 }
 0x2fa   : > { %1005 = vst.msk [vmem:[#allocation3 + $0x38] sm:$0xff] %vm997_vm3, %v988_v29 }
 0x2fb   : > { %v960_v12 = vpop.xlane.xlu1 %959 }
 0x2fc   : > { %v986_v1 = vadd.f32 %v960_v12, %v938_v24  ;;  %v1018_v24 = vld [vmem:[#allocation4 + $0x20] sm:$0xff]  ;;  %v1116_v12 = vmul.f32 %v2671_v58, %v1020_v21 }
 0x2fd   : > { %v1114_v39 = vmul.f32 %v2667_v45, %v1018_v24  ;;  %v1022_v58 = vld [vmem:[#allocation4 + $0x40] sm:$0xff] }
 0x2fe   : > { %1003 = vst.msk [vmem:[#allocation3 + $0x28] sm:$0xff] %vm997_vm3, %v986_v1 }
 0x2ff   : > { %v970_v30 = vpop.xlane.xlu0 %969  ;;  %v972_v16 = vpop.xlane.xlu1 %971 }
 0x300   : > { %v991_v31 = vadd.f32 %v970_v30, %v943_v23  ;;  %v992_v55 = vadd.f32 %v972_v16, %v944_v6  ;;  %v1019_v23 = vld [vmem:[#allocation4 + $0x28] sm:$0xff]  ;;  %v1117_v6 = vmul.f32 %v2665_v13, %v1021_v60  ;;  %v1024_v16 = vld [vmem:[#allocation4 + $0x50] sm:$0xff]  ;;  %v1118_v13 = vmul.f32 %v2679_v54, %v1022_v58 }
 0x301   : > { %v1115_v17 = vmul.f32 %v2669_v53, %v1019_v23 }
 0x302   : > { %1008 = vst.msk [vmem:[#allocation3 + $0x50] sm:$0xff] %vm997_vm3, %v991_v31  ;;  %1009 = vst.msk [vmem:[#allocation3 + $0x58] sm:$0xff] %vm997_vm3, %v992_v55 }
 0x303   : > { %v966_v57 = vpop.xlane.xlu0 %965  ;;  %v968_v61 = vpop.xlane.xlu1 %967 }
 0x304   : > { %v989_v0 = vadd.f32 %v966_v57, %v941_v8  ;;  %v990_v25 = vadd.f32 %v968_v61, %v942_v56  ;;  %v1120_v8 = vmul.f32 %v2675_v50, %v1024_v16  ;;  %v1025_v56 = vld [vmem:[#allocation4 + $0x58] sm:$0xff] }
 0x305   : > { %v1121_v53 = vmul.f32 %v2673_v34, %v1025_v56 }
 0x306   : > { %1006 = vst.msk [vmem:[#allocation3 + $0x40] sm:$0xff] %vm997_vm3, %v989_v0  ;;  %1007 = vst.msk [vmem:[#allocation3 + $0x48] sm:$0xff] %vm997_vm3, %v990_v25  ;;  %v1028_v25 = vld [vmem:[#allocation4 + $0x70] sm:$0xff] }
 0x307   : > { %v978_v36 = vpop.xlane.xlu0 %977  ;;  %v980_v2 = vpop.xlane.xlu1 %979 }
 0x308   : > { %v995_v5 = vadd.f32 %v978_v36, %v947_v37  ;;  %v996_v33 = vadd.f32 %v980_v2, %v948_v48  ;;  %v1119_v48 = vmul.f32 %v2677_v52, %v1023_v62  ;;  %v1026_v2 = vld [vmem:[#allocation4 + $0x60] sm:$0xff] }
 0x30a   : > { %1012 = vst.msk [vmem:[#allocation3 + $0x70] sm:$0xff] %vm997_vm3, %v995_v5  ;;  %1013 = vst.msk [vmem:[#allocation3 + $0x78] sm:$0xff] %vm997_vm3, %v996_v33  ;;  %v1029_v5 = vld [vmem:[#allocation4 + $0x78] sm:$0xff] }
 0x30b   : > { %v974_v42 = vpop.xlane.xlu0 %973  ;;  %v976_v22 = vpop.xlane.xlu1 %975 }
 0x30c   : > { %v993_v7 = vadd.f32 %v974_v42, %v945_v26  ;;  %v994_v15 = vadd.f32 %v976_v22, %v946_v4  ;;  %v1122_v26 = vmul.f32 %v2683_v32, %v1026_v2  ;;  %v1027_v42 = vld [vmem:[#allocation4 + $0x68] sm:$0xff] }
 0x30d   : > { %v1123_v20 = vmul.f32 %v2681_v38, %v1027_v42 }
 0x30e   : > { %1010 = vst.msk [vmem:[#allocation3 + $0x60] sm:$0xff] %vm997_vm3, %v993_v7  ;;  %1011 = vst.msk [vmem:[#allocation3 + $0x68] sm:$0xff] %vm997_vm3, %v994_v15 }
 0x30f   : > { %v1103_v37 = vpop.permute.xlu1 %1102 }
 0x310   : > { %v1124_v3 = vmul.f32 %v1103_v37, %v1028_v25 }
 0x313   : > { %v1108_v33 = vpop.permute.xlu0 %1107 }
 0x314   : > { %v1125_v52 = vmul.f32 %v1108_v33, %v1029_v5 }
 0x31f   : > { %v1899_v27 = vpop.f32.mrf.mxu1 }
 0x320   : > { %v1281_v10 = vadd.f32 %v1899_v27, %v1112_v35 }
 0x321   : > { %v1216_v41 = vpop.f32.mrf.mxu1 }
 0x322   : > { %1297 = vst.msk [vmem:[#allocation4 + $0x10] sm:$0xff] %vm531_vm2, %v1281_v10  ;;  %v1279_v18 = vadd.f32 %v1216_v41, %v1110_v14 }
 0x323   : > { %v1900_v28 = vpop.f32.mrf.mxu1 }
 0x324   : > { %1295 = vst.msk [vmem:[#allocation4] sm:$0xff] %vm531_vm2, %v1279_v18  ;;  %v1282_v59 = vadd.f32 %v1900_v28, %v1113_v46 }
 0x325   : > { %v1219_v29 = vpop.f32.mrf.mxu1 }
 0x326   : > { %1298 = vst.msk [vmem:[#allocation4 + $0x18] sm:$0xff] %vm531_vm2, %v1282_v59  ;;  %v1280_v44 = vadd.f32 %v1219_v29, %v1111_v40 }
 0x328   : > { %1296 = vst.msk [vmem:[#allocation4 + $0x8] sm:$0xff] %vm531_vm2, %v1280_v44 }
 0x330   : > { %v1903_v11 = vpop.f32.mrf.mxu1 }
 0x331   : > { %v1285_v1 = vadd.f32 %v1903_v11, %v1116_v12 }
 0x332   : > { %v1232_v51 = vpop.f32.mrf.mxu1 }
 0x333   : > { %1301 = vst.msk [vmem:[#allocation4 + $0x30] sm:$0xff] %vm531_vm2, %v1285_v1  ;;  %v1283_v30 = vadd.f32 %v1232_v51, %v1114_v39 }
 0x334   : > { %v1904_v19 = vpop.f32.mrf.mxu1 }
 0x335   : > { %1299 = vst.msk [vmem:[#allocation4 + $0x20] sm:$0xff] %vm531_vm2, %v1283_v30  ;;  %v1286_v31 = vadd.f32 %v1904_v19, %v1117_v6 }
 0x336   : > { %v1235_v55 = vpop.f32.mrf.mxu1 }
 0x337   : > { %1302 = vst.msk [vmem:[#allocation4 + $0x38] sm:$0xff] %vm531_vm2, %v1286_v31  ;;  %v1284_v45 = vadd.f32 %v1235_v55, %v1115_v17 }
 0x338   : > { %v1907_v57 = vpop.f32.mrf.mxu1 }
 0x339   : > { %1300 = vst.msk [vmem:[#allocation4 + $0x28] sm:$0xff] %vm531_vm2, %v1284_v45  ;;  %v1289_v61 = vadd.f32 %v1907_v57, %v1120_v8 }
 0x33a   : > { %v1248_v43 = vpop.f32.mrf.mxu1 }
 0x33b   : > { %1305 = vst.msk [vmem:[#allocation4 + $0x50] sm:$0xff] %vm531_vm2, %v1289_v61  ;;  %v1287_v0 = vadd.f32 %v1248_v43, %v1118_v13 }
 0x33c   : > { %v1908_v50 = vpop.f32.mrf.mxu1 }
 0x33d   : > { %1303 = vst.msk [vmem:[#allocation4 + $0x40] sm:$0xff] %vm531_vm2, %v1287_v0  ;;  %v1290_v36 = vadd.f32 %v1908_v50, %v1121_v53 }
 0x33e   : > { %v1251_v54 = vpop.f32.mrf.mxu1 }
 0x33f   : > { %1306 = vst.msk [vmem:[#allocation4 + $0x58] sm:$0xff] %vm531_vm2, %v1290_v36  ;;  %v1288_v47 = vadd.f32 %v1251_v54, %v1119_v48 }
 0x340   : > { %v1911_v34 = vpop.f32.mrf.mxu1 }
 0x341   : > { %1304 = vst.msk [vmem:[#allocation4 + $0x48] sm:$0xff] %vm531_vm2, %v1288_v47  ;;  %v1293_v4 = vadd.f32 %v1911_v34, %v1124_v3 }
 0x342   : > { %v1264_v22 = vpop.f32.mrf.mxu1 }
 0x343   : > { %1309 = vst.msk [vmem:[#allocation4 + $0x70] sm:$0xff] %vm531_vm2, %v1293_v4  ;;  %v1291_v7 = vadd.f32 %v1264_v22, %v1122_v26 }
 0x344   : > { %v1912_v15 = vpop.f32.mrf.mxu1 }
 0x345   : > { %1307 = vst.msk [vmem:[#allocation4 + $0x60] sm:$0xff] %vm531_vm2, %v1291_v7  ;;  %v1294_v63 = vadd.f32 %v1912_v15, %v1125_v52  ;;  %1330 = sbr.rel (%p1782_p12) target bundleno = 1015 (0x3f7), region = 40 }
 0x346   : > { %v1267_v35 = vpop.f32.mrf.mxu1 }
 0x347   : > { %1310 = vst.msk [vmem:[#allocation4 + $0x78] sm:$0xff] %vm531_vm2, %v1294_v63  ;;  %v1292_v9 = vadd.f32 %v1267_v35, %v1123_v20 }
 0x349   : > { %1308 = vst.msk [vmem:[#allocation4 + $0x68] sm:$0xff] %vm531_vm2, %v1292_v9 }
 0x34a   : > { %v1349_v32 = vld [vmem:[#allocation3 + $0x10] sm:$0xff]  ;;  %v1347_v27 = vld [vmem:[#allocation3] sm:$0xff]  ;;  %v1350_v14 = vld [vmem:[#allocation3 + $0x18] sm:$0xff]  ;;  %v2196_v10 = vmov 0   ;;  %vm1539_vm4 = vcmask 519168  }
 0x34b   : > { %2088 = vset.pattern.permute.xlu1 %v2196_v10  ;;  %2087 = vset.pattern.permute.xlu0 %v2196_v10  ;;  %2089 = vrcp.f32 %v1349_v32  ;;  %v1348_v38 = vld [vmem:[#allocation3 + $0x8] sm:$0xff]  ;;  %v1351_v41 = vld [vmem:[#allocation3 + $0x20] sm:$0xff]  ;;  %v1354_v46 = vld [vmem:[#allocation3 + $0x38] sm:$0xff] }
 0x34c   : > { %2091 = vrcp.f32 %v1347_v27  ;;  %v1352_v49 = vld [vmem:[#allocation3 + $0x28] sm:$0xff]  ;;  %v1353_v18 = vld [vmem:[#allocation3 + $0x30] sm:$0xff]  ;;  %v1355_v40 = vld [vmem:[#allocation3 + $0x40] sm:$0xff] }
 0x34d   : > { %2093 = vrcp.f32 %v1350_v14  ;;  %v1356_v28 = vld [vmem:[#allocation3 + $0x48] sm:$0xff]  ;;  %v1358_v21 = vld [vmem:[#allocation3 + $0x58] sm:$0xff]  ;;  %v1357_v12 = vld [vmem:[#allocation3 + $0x50] sm:$0xff] }
 0x34e   : > { %2095 = vrcp.f32 %v1348_v38  ;;  %v1360_v11 = vld [vmem:[#allocation3 + $0x68] sm:$0xff]  ;;  %v1359_v1 = vld [vmem:[#allocation3 + $0x60] sm:$0xff]  ;;  %v1362_v51 = vld [vmem:[#allocation3 + $0x78] sm:$0xff] }
 0x34f   : > { %2097 = vrcp.f32 %v1352_v49  ;;  %v1361_v30 = vld [vmem:[#allocation3 + $0x70] sm:$0xff]  ;;  %v1331_v57 = vld [vmem:[#allocation4] sm:$0xff]  ;;  %v1334_v53 = vld [vmem:[#allocation4 + $0x18] sm:$0xff] }
 0x350   : > { %2099 = vrcp.f32 %v1351_v41  ;;  %v1333_v56 = vld [vmem:[#allocation4 + $0x10] sm:$0xff]  ;;  %v1332_v25 = vld [vmem:[#allocation4 + $0x8] sm:$0xff]  ;;  %v1335_v47 = vld [vmem:[#allocation4 + $0x20] sm:$0xff] }
 0x351   : > { %2101 = vrcp.f32 %v1354_v46  ;;  %v1336_v54 = vld [vmem:[#allocation4 + $0x28] sm:$0xff]  ;;  %v1338_v42 = vld [vmem:[#allocation4 + $0x38] sm:$0xff]  ;;  %v1337_v52 = vld [vmem:[#allocation4 + $0x30] sm:$0xff] }
 0x352   : > { %2103 = vrcp.f32 %v1353_v18  ;;  %v1340_v9 = vld [vmem:[#allocation4 + $0x48] sm:$0xff]  ;;  %v1339_v27 = vld [vmem:[#allocation4 + $0x40] sm:$0xff]  ;;  %v1342_v46 = vld [vmem:[#allocation4 + $0x58] sm:$0xff] }
 0x353   : > { %2105 = vrcp.f32 %v1356_v28  ;;  %v1341_v28 = vld [vmem:[#allocation4 + $0x50] sm:$0xff] }
 0x354   : > { %2107 = vrcp.f32 %v1355_v40 }
 0x355   : > { %2109 = vrcp.f32 %v1358_v21 }
 0x356   : > { %2111 = vrcp.f32 %v1357_v12 }
 0x357   : > { %2113 = vrcp.f32 %v1360_v11 }
 0x358   : > { %v2090_v59 = vpop.eup %2089  ;;  %2115 = vrcp.f32 %v1359_v1 }
 0x359   : > { %v2092_v29 = vpop.eup %2091  ;;  %1391 = vperm.xlu1 %2088, %v2090_v59   ;;  %2117 = vrcp.f32 %v1362_v51 }
 0x35a   : > { %v2094_v44 = vpop.eup %2093  ;;  %1381 = vperm.xlu0 %2087, %v2092_v29   ;;  %2119 = vrcp.f32 %v1361_v30 }
 0x35b   : > { %v2096_v24 = vpop.eup %2095 }
 0x35c   : > { %v2098_v60 = vpop.eup %2097 }
 0x35d   : > { %1396 = vperm.xlu1 %2088, %v2094_v44   ;;  %v2100_v39 = vpop.eup %2099 }
 0x35e   : > { %1386 = vperm.xlu0 %2087, %v2096_v24   ;;  %v2102_v23 = vpop.eup %2101  ;;  %v1344_v24 = vld [vmem:[#allocation4 + $0x68] sm:$0xff] }
 0x35f   : > { %v2104_v6 = vpop.eup %2103 }
 0x360   : > { %v2106_v16 = vpop.eup %2105 }
 0x361   : > { %1406 = vperm.xlu1 %2088, %v2098_v60   ;;  %v2108_v19 = vpop.eup %2107  ;;  %v1343_v60 = vld [vmem:[#allocation4 + $0x60] sm:$0xff] }
 0x362   : > { %1401 = vperm.xlu0 %2087, %v2100_v39   ;;  %v2110_v17 = vpop.eup %2109 }
 0x363   : > { %v2112_v31 = vpop.eup %2111 }
 0x364   : > { %v2114_v58 = vpop.eup %2113 }
 0x365   : > { %1416 = vperm.xlu1 %2088, %v2102_v23   ;;  %v2116_v55 = vpop.eup %2115 }
 0x366   : > { %1411 = vperm.xlu0 %2087, %v2104_v6   ;;  %v2118_v8 = vpop.eup %2117  ;;  %v1346_v6 = vld [vmem:[#allocation4 + $0x78] sm:$0xff] }
 0x367   : > { %v2120_v45 = vpop.eup %2119 }
 0x369   : > { %1426 = vperm.xlu1 %2088, %v2106_v16   ;;  %v1345_v16 = vld [vmem:[#allocation4 + $0x70] sm:$0xff] }
 0x36a   : > { %1421 = vperm.xlu0 %2087, %v2108_v19  }
 0x36d   : > { %1436 = vperm.xlu1 %2088, %v2110_v17  }
 0x36e   : > { %1431 = vperm.xlu0 %2087, %v2112_v31  }
 0x371   : > { %1446 = vperm.xlu1 %2088, %v2114_v58  }
 0x372   : > { %1441 = vperm.xlu0 %2087, %v2116_v55  }
 0x375   : > { %1456 = vperm.xlu1 %2088, %v2118_v8  }
 0x376   : > { %1451 = vperm.xlu0 %2087, %v2120_v45  }
 0x3d4   : > { %v1392_v13 = vpop.permute.xlu1 %1391 }
 0x3d5   : > { %v1461_v61 = vmul.f32 %v1392_v13, %v1333_v56  ;;  %v1382_v62 = vpop.permute.xlu0 %1381 }
 0x3d6   : > { %v1459_v43 = vmul.f32 %v1382_v62, %v1331_v57 }
 0x3d7   : > { %v1803_v0 = vpack.c.bf16 %v1461_v61, %v1461_v61 }
 0x3d8   : > { %v1801_v37 = vpack.c.bf16 %v1459_v43, %v1459_v43  ;;  %v1397_v50 = vpop.permute.xlu1 %1396 }
 0x3d9   : > { %1542 = vst.msk [vmem:[%s2289_s10 + $0x8] sm:$0xf] %vm1539_vm4, %v1803_v0  ;;  %v1462_v48 = vmul.f32 %v1397_v50, %v1334_v53  ;;  %v1387_v36 = vpop.permute.xlu0 %1386 }
 0x3da   : > { %1540 = vst.msk [vmem:[%s2289_s10] sm:$0xf] %vm1539_vm4, %v1801_v37  ;;  %v1460_v2 = vmul.f32 %v1387_v36, %v1332_v25 }
 0x3db   : > { %v1804_v3 = vpack.c.bf16 %v1462_v48, %v1462_v48 }
 0x3dc   : > { %v1802_v5 = vpack.c.bf16 %v1460_v2, %v1460_v2  ;;  %v1407_v33 = vpop.permute.xlu1 %1406 }
 0x3dd   : > { %1543 = vst.msk [vmem:[%s2289_s10 + $0xc] sm:$0xf] %vm1539_vm4, %v1804_v3  ;;  %v1464_v34 = vmul.f32 %v1407_v33, %v1336_v54  ;;  %v1402_v26 = vpop.permute.xlu0 %1401 }
 0x3de   : > { %1541 = vst.msk [vmem:[%s2289_s10 + $0x4] sm:$0xf] %vm1539_vm4, %v1802_v5  ;;  %v1463_v4 = vmul.f32 %v1402_v26, %v1335_v47 }
 0x3df   : > { %v1806_v22 = vpack.c.bf16 %v1464_v34, %v1464_v34 }
 0x3e0   : > { %v1805_v7 = vpack.c.bf16 %v1463_v4, %v1463_v4  ;;  %v1417_v15 = vpop.permute.xlu1 %1416 }
 0x3e1   : > { %1545 = vst.msk [vmem:[%s2289_s10 + $0x14] sm:$0xf] %vm1539_vm4, %v1806_v22  ;;  %v1466_v20 = vmul.f32 %v1417_v15, %v1338_v42  ;;  %v1412_v63 = vpop.permute.xlu0 %1411 }
 0x3e2   : > { %1544 = vst.msk [vmem:[%s2289_s10 + $0x10] sm:$0xf] %vm1539_vm4, %v1805_v7  ;;  %v1465_v35 = vmul.f32 %v1412_v63, %v1337_v52 }
 0x3e3   : > { %v1808_v32 = vpack.c.bf16 %v1466_v20, %v1466_v20 }
 0x3e4   : > { %v1807_v14 = vpack.c.bf16 %v1465_v35, %v1465_v35  ;;  %v1427_v10 = vpop.permute.xlu1 %1426 }
 0x3e5   : > { %1547 = vst.msk [vmem:[%s2289_s10 + $0x1c] sm:$0xf] %vm1539_vm4, %v1808_v32  ;;  %v1468_v38 = vmul.f32 %v1427_v10, %v1340_v9  ;;  %v1422_v49 = vpop.permute.xlu0 %1421 }
 0x3e6   : > { %1546 = vst.msk [vmem:[%s2289_s10 + $0x18] sm:$0xf] %vm1539_vm4, %v1807_v14  ;;  %v1467_v41 = vmul.f32 %v1422_v49, %v1339_v27 }
 0x3e7   : > { %v1810_v18 = vpack.c.bf16 %v1468_v38, %v1468_v38 }
 0x3e8   : > { %v1809_v40 = vpack.c.bf16 %v1467_v41, %v1467_v41  ;;  %v1437_v59 = vpop.permute.xlu1 %1436 }
 0x3e9   : > { %1549 = vst.msk [vmem:[%s2289_s10 + $0x24] sm:$0xf] %vm1539_vm4, %v1810_v18  ;;  %v1470_v29 = vmul.f32 %v1437_v59, %v1342_v46  ;;  %v1432_v44 = vpop.permute.xlu0 %1431 }
 0x3ea   : > { %1548 = vst.msk [vmem:[%s2289_s10 + $0x20] sm:$0xf] %vm1539_vm4, %v1809_v40  ;;  %v1469_v21 = vmul.f32 %v1432_v44, %v1341_v28 }
 0x3eb   : > { %v1812_v12 = vpack.c.bf16 %v1470_v29, %v1470_v29 }
 0x3ec   : > { %v1811_v11 = vpack.c.bf16 %v1469_v21, %v1469_v21  ;;  %v1447_v39 = vpop.permute.xlu1 %1446 }
 0x3ed   : > { %1551 = vst.msk [vmem:[%s2289_s10 + $0x2c] sm:$0xf] %vm1539_vm4, %v1812_v12  ;;  %v1472_v1 = vmul.f32 %v1447_v39, %v1344_v24  ;;  %v1442_v23 = vpop.permute.xlu0 %1441 }
 0x3ee   : > { %1550 = vst.msk [vmem:[%s2289_s10 + $0x28] sm:$0xf] %vm1539_vm4, %v1811_v11  ;;  %v1471_v51 = vmul.f32 %v1442_v23, %v1343_v60 }
 0x3ef   : > { %v1814_v30 = vpack.c.bf16 %v1472_v1, %v1472_v1 }
 0x3f0   : > { %v1813_v19 = vpack.c.bf16 %v1471_v51, %v1471_v51  ;;  %v1457_v17 = vpop.permute.xlu1 %1456 }
 0x3f1   : > { %1553 = vst.msk [vmem:[%s2289_s10 + $0x34] sm:$0xf] %vm1539_vm4, %v1814_v30  ;;  %v1474_v31 = vmul.f32 %v1457_v17, %v1346_v6  ;;  %v1452_v58 = vpop.permute.xlu0 %1451 }
 0x3f2   : > { %1552 = vst.msk [vmem:[%s2289_s10 + $0x30] sm:$0xf] %vm1539_vm4, %v1813_v19  ;;  %v1473_v55 = vmul.f32 %v1452_v58, %v1345_v16 }
 0x3f3   : > { %v1816_v8 = vpack.c.bf16 %v1474_v31, %v1474_v31 }
 0x3f4   : > { %v1815_v45 = vpack.c.bf16 %v1473_v55, %v1473_v55 }
 0x3f5   : > { %1555 = vst.msk [vmem:[%s2289_s10 + $0x3c] sm:$0xf] %vm1539_vm4, %v1816_v8 }
 0x3f6   : > { %1554 = vst.msk [vmem:[%s2289_s10 + $0x38] sm:$0xf] %vm1539_vm4, %v1815_v45 }
 0x3f7 PF: > { %s13_s20 = sadd.s32 1, %s2191_s20   ;;  %s2812_s24 = sld [smem:[#allocation5_spill]] }
 0x3f8   : > { %p10_p13 = scmp.ge.s32.totalorder %s13_s20, 34   ;;  %s2813_s12 = smov %s2175_s16 }
 0x3f9   : > { %s2814_s13 = smov %s2179_s17  ;;  %s2815_s14 = smov %s2183_s18 }
 0x3fa   : > { %s2816_s15 = smov %s2187_s19  ;;  %s2817_s16 = smov %s2822_s21 }
 0x3fb   : > { %s2818_s17 = smov %s2826_s22  ;;  %s2819_s18 = smov %s2830_s23 }
 0x3fc   :  { %12 = sbr.rel (!%p10_p13) target bundleno = 5 (0x5), region = 76 }
 0x3fd   : > { %s2820_s19 = smov %s2812_s24 }

// kernel: opt_decoder_layer.4
= control target key start
LH: loop header
LB: loop body
LE: loop exit
PB: predicated region body
PF: predicated region fallthrough
CT: control target
= control target key end

     0   :  { %s3155_s17 = smov 0   ;;  %s3157_s18 = smov 0   ;;  %s3940_s0 = inlined_call_operand.vmem [shape: f32[2,256,256], index: 0, kind: input, shape index: {}]   ;;  %s3941_s1 = inlined_call_operand.vmem [shape: f32[1,256], index: 1, kind: input, shape index: {}]   ;;  %s3942_s2 = inlined_call_operand.vmem [shape: f32[1,256], index: 2, kind: input, shape index: {}]   ;;  %s3943_s3 = inlined_call_operand.vmem [shape: bf16[4,256,64], index: 3, kind: input, shape index: {}]   ;;  %s3944_s4 = inlined_call_operand.vmem [shape: f32[4,1,64], index: 4, kind: input, shape index: {}]   ;;  %s3945_s5 = inlined_call_operand.vmem [shape: bf16[4,256,64], index: 5, kind: input, shape index: {}]   ;;  %s3946_s6 = inlined_call_operand.vmem [shape: f32[4,1,64], index: 6, kind: input, shape index: {}]   ;;  %s3947_s7 = inlined_call_operand.vmem [shape: bf16[4,256,64], index: 7, kind: input, shape index: {}]   ;;  %s3948_s8 = inlined_call_operand.vmem [shape: f32[4,1,64], index: 8, kind: input, shape index: {}]   ;;  %s3949_s9 = inlined_call_operand.vmem [shape: bf16[2,4,256,64], index: 9, kind: output, shape index: {0}]   ;;  %s3950_s10 = inlined_call_operand.vmem [shape: bf16[2,4,256,64], index: 10, kind: output, shape index: {1}]   ;;  %s3951_s11 = inlined_call_operand.vmem [shape: bf16[2,4,256,64], index: 11, kind: output, shape index: {2}]  }
   0x1   :  { %3956 = sst [smem:[#allocation10_spill]] %s3940_s0  ;;  %s3159_s19 = smov 0  }
   0x2   :  { %3957 = sst [smem:[#allocation11_spill]] %s3942_s2  ;;  %s3161_s20 = smov 0  }
   0x3   :  { %3958 = sst [smem:[#allocation12_spill]] %s3943_s3  ;;  %s3163_s21 = smov 0  }
   0x4   :  { %3959 = sst [smem:[#allocation13_spill]] %s3944_s4  ;;  %s3165_s22 = smov 0  }
   0x5   :  { %3960 = sst [smem:[#allocation14_spill]] %s3945_s5  ;;  %s3167_s23 = smov 0  }
   0x6 LB: > { %3961 = sst [smem:[#allocation3_spill]] %s3081_s20  ;;  %s34_s24 = sadd.s32 1, %s3081_s20  ;;  %s3093_s23 = sphi %s3167_s23, %s22_s23   ;;  %s3089_s22 = sphi %s3165_s22, %s3982_s22   ;;  %s3085_s21 = sphi %s3163_s21, %s3981_s21   ;;  %s3081_s20 = sphi %s3161_s20, %s3980_s20   ;;  %s3077_s19 = sphi %s3159_s19, %s3979_s19   ;;  %s3073_s18 = sphi %s3157_s18, %s3978_s18   ;;  %s3069_s17 = sphi %s3155_s17, %s3977_s17  }
   0x7   : > { %3962 = sst [smem:[#allocation4_spill]] %s3085_s21  ;;  %p35_p0 = scmp.ge.s32.totalorder %s34_s24, 4 }
   0x8   : > { %3963 = sst [smem:[#allocation5_spill]] %s3089_s22  ;;  %s37_s25 = sadd.s32 1, %s3085_s21 }
   0x9   : > { %3964 = sst [smem:[#allocation6_spill]] %s3093_s23  ;;  %p2456_p1 = scmp.ge.s32.totalorder %s3093_s23, 1 }
   0xa   : > { %p435_p2 = scmp.lt.s32.totalorder %s3093_s23, 17  ;;  %s3984_s24 = smov (%p35_p0, %s34_s24), 0 }
   0xb   : > { %3965 = sst [smem:[#allocation7_spill]] %s3984_s24  ;;  %s3986_s25 = smov (!%p35_p0, %s37_s25), %s3085_s21 }
   0xc   : > { %p436_p3 = pnand %p2456_p1, %p435_p2  ;;  %p39_p4 = scmp.ge.s32.totalorder %s3986_s25, 2 }
   0xd   : > { %s41_s26 = sadd.s32 1, %s3089_s22  ;;  %s2457_s27 = sshll.u32 (!%p436_p3), %s3073_s18, 4 }
   0xe   : > { %s3988_s25 = smov (%p39_p4, %s3986_s25), 0  ;;  %s3990_s26 = smov (!%p39_p4, %s41_s26), %s3089_s22 }
   0xf   : > { %3966 = sst [smem:[#allocation8_spill]] %s3988_s25  ;;  %p43_p5 = scmp.ge.s32.totalorder %s3990_s26, 2 }
  0x10   : > { %439 = sbr.rel (%p436_p3) target bundleno = 717 (0x2cd), region = 56  ;;  %p539_p6 = scmp.lt.s32.totalorder (!%p436_p3), %s3077_s19, 1 }
  0x11   : > { %s3992_s26 = smov (%p43_p5, %s3990_s26), 0  ;;  %p541_p7 = scmp.lt.s32.totalorder (!%p436_p3), %s2457_s27, 31 }
  0x12   : > { %3967 = sst [smem:[#allocation9_spill]] %s3992_s26  ;;  %p549_p8 = scmp.lt.s32.totalorder (!%p436_p3), %s3069_s17, 3 }
  0x13   : > { %s3968_s0 = sld [smem:[#allocation10_spill]] (!%p436_p3)  ;;  %p2479_p9 = scmp.ne.s32.totalorder (!%p436_p3), %s3069_s17, 0 }
  0x14   : > { %s3970_s3 = sld [smem:[#allocation12_spill]] (!%p436_p3) }
  0x15   : > { %s3994_s19 = smov (!%p539_p6, %s3077_s19), 1  ;;  %s3996_s27 = smov (!%p541_p7, %s2457_s27), 31 }
  0x16   : > { %s2459_s28 = sshll.u32 %s3994_s19, 6  ;;  %s2458_s29 = sshll.u32 %s3996_s27, 1 }
  0x17   : > { %s545_s30 = sadd.s32 %s2459_s28, %s2458_s29  ;;  %s2469_s18 = sshll.u32 %s3994_s19, 7 }
  0x18   : > { %s2460_s12 = sshll.u32 %s545_s30, 3  ;;  %s3971_s5 = sld [smem:[#allocation14_spill]] }
  0x19   : > { %s3203_s15 = scalar_lea.vmem %s3968_s0, %s2460_s12 }
  0x1a   : > { %s3206_s16 = scalar_select %p549_p8, %s3069_s17, 3 }
  0x1c   : > { %s2613_s26 = sshll.u32 %s3206_s16, 7  ;;  %s572_s28 = scalar_lea.vmem %s3948_s8, %s3206_s16 }
  0x1d   : > { %s3216_s30 = scalar_lea.vmem %s3970_s3, %s2613_s26  ;;  %s3230_s2 = scalar_lea.vmem %s3947_s7, %s2613_s26 }
  0x1e   : > { %s3221_s14 = scalar_lea.vmem %s3971_s5, %s2613_s26  ;;  %s2468_s29 = sshll.u32 %s3206_s16, 5 }
  0x1f   : > { %s581_s22 = sadd.s32 %s2468_s29, %s3996_s27  ;;  %619 = sbr.rel (%p2479_p9) target bundleno = 390 (0x186), region = 60 }
  0x20   : > { %s583_s3 = sadd.s32 %s2469_s18, %s581_s22  ;;  %s3972_s27 = sld [smem:[#allocation11_spill]] (!%p2479_p9) }
  0x21   : > { %s2470_s4 = sshll.u32 %s583_s3, 2 }
  0x22   : > { %s3240_s5 = scalar_lea.vmem %s3949_s9, %s2470_s4  ;;  %s3245_s20 = scalar_lea.vmem %s3950_s10, %s2470_s4 }
  0x23   : > { %s3250_s19 = scalar_lea.vmem %s3951_s11, %s2470_s4 }
  0x24   : > { %v3254_v0 = vld [vmem:[%s3203_s15] sm:$0xff]  ;;  %v3257_v1 = vld [vmem:[%s3203_s15 + $0x8] sm:$0xff]  ;;  %v3268_v5 = vld [vmem:[%s3203_s15 + $0x10] sm:$0xff] }
  0x25   : > { %v3260_v2 = vld [vmem:[%s3203_s15 + $0x20] sm:$0xff]  ;;  %v654_v3 = vadd.f32 %v3257_v1, %v3254_v0  ;;  %v3265_v4 = vld [vmem:[%s3203_s15 + $0x28] sm:$0xff]  ;;  %v3271_v6 = vld [vmem:[%s3203_s15 + $0x18] sm:$0xff] }
  0x26   : > { %v660_v7 = vadd.f32 %v3265_v4, %v3260_v2  ;;  %v3276_v8 = vld [vmem:[%s3203_s15 + $0x30] sm:$0xff]  ;;  %v3279_v9 = vld [vmem:[%s3203_s15 + $0x38] sm:$0xff]  ;;  %v657_v10 = vadd.f32 %v3271_v6, %v3268_v5  ;;  %v3286_v12 = vld [vmem:[%s3203_s15 + $0x40] sm:$0xff] }
  0x27   : > { %655 = vadd.xlane.f32.xlu0 %v654_v3  ;;  %v663_v11 = vadd.f32 %v3279_v9, %v3276_v8  ;;  %v3289_v13 = vld [vmem:[%s3203_s15 + $0x48] sm:$0xff]  ;;  %v3292_v14 = vld [vmem:[%s3203_s15 + $0x50] sm:$0xff]  ;;  %v3295_v15 = vld [vmem:[%s3203_s15 + $0x58] sm:$0xff] }
  0x28   : > { %661 = vadd.xlane.f32.xlu1 %v660_v7  ;;  %v666_v16 = vadd.f32 %v3289_v13, %v3286_v12  ;;  %v669_v17 = vadd.f32 %v3295_v15, %v3292_v14  ;;  %v3302_v18 = vld [vmem:[%s3203_s15 + $0x60] sm:$0xff]  ;;  %v3305_v19 = vld [vmem:[%s3203_s15 + $0x68] sm:$0xff]  ;;  %v3308_v20 = vld [vmem:[%s3203_s15 + $0x70] sm:$0xff] }
  0x29   : > { %v3311_v21 = vld [vmem:[%s3203_s15 + $0x78] sm:$0xff]  ;;  %v672_v22 = vadd.f32 %v3305_v19, %v3302_v18  ;;  %v3318_v24 = vld [vmem:[%s3203_s15 + $0x80] sm:$0xff]  ;;  %v3321_v25 = vld [vmem:[%s3203_s15 + $0x88] sm:$0xff] }
  0x2a   : > { %v675_v23 = vadd.f32 %v3311_v21, %v3308_v20  ;;  %v3324_v26 = vld [vmem:[%s3203_s15 + $0x90] sm:$0xff]  ;;  %v3327_v27 = vld [vmem:[%s3203_s15 + $0x98] sm:$0xff]  ;;  %v678_v28 = vadd.f32 %v3321_v25, %v3318_v24  ;;  %v3334_v30 = vld [vmem:[%s3203_s15 + $0xa0] sm:$0xff] }
  0x2b   : > { %658 = vadd.xlane.f32.xlu0 %v657_v10  ;;  %v681_v29 = vadd.f32 %v3327_v27, %v3324_v26  ;;  %v3337_v31 = vld [vmem:[%s3203_s15 + $0xa8] sm:$0xff]  ;;  %v3340_v32 = vld [vmem:[%s3203_s15 + $0xb0] sm:$0xff]  ;;  %v3343_v33 = vld [vmem:[%s3203_s15 + $0xb8] sm:$0xff] }
  0x2c   : > { %664 = vadd.xlane.f32.xlu1 %v663_v11  ;;  %v684_v34 = vadd.f32 %v3337_v31, %v3334_v30  ;;  %v687_v35 = vadd.f32 %v3343_v33, %v3340_v32  ;;  %v3350_v36 = vld [vmem:[%s3203_s15 + $0xc0] sm:$0xff]  ;;  %v3353_v37 = vld [vmem:[%s3203_s15 + $0xc8] sm:$0xff]  ;;  %v3356_v38 = vld [vmem:[%s3203_s15 + $0xd0] sm:$0xff] }
  0x2d   : > { %v3359_v39 = vld [vmem:[%s3203_s15 + $0xd8] sm:$0xff]  ;;  %v690_v40 = vadd.f32 %v3353_v37, %v3350_v36  ;;  %v3366_v42 = vld [vmem:[%s3203_s15 + $0xe0] sm:$0xff]  ;;  %v3369_v43 = vld [vmem:[%s3203_s15 + $0xe8] sm:$0xff] }
  0x2e   : > { %v693_v41 = vadd.f32 %v3359_v39, %v3356_v38  ;;  %v3372_v44 = vld [vmem:[%s3203_s15 + $0xf0] sm:$0xff]  ;;  %v3375_v45 = vld [vmem:[%s3203_s15 + $0xf8] sm:$0xff]  ;;  %v696_v46 = vadd.f32 %v3369_v43, %v3366_v42 }
  0x2f   : > { %667 = vadd.xlane.f32.xlu0 %v666_v16  ;;  %v699_v47 = vadd.f32 %v3375_v45, %v3372_v44 }
  0x30   : > { %670 = vadd.xlane.f32.xlu1 %v669_v17 }
  0x33   : > { %673 = vadd.xlane.f32.xlu0 %v672_v22 }
  0x34   : > { %676 = vadd.xlane.f32.xlu1 %v675_v23 }
  0x37   : > { %679 = vadd.xlane.f32.xlu0 %v678_v28 }
  0x38   : > { %682 = vadd.xlane.f32.xlu1 %v681_v29 }
  0x3b   : > { %685 = vadd.xlane.f32.xlu0 %v684_v34 }
  0x3c   : > { %688 = vadd.xlane.f32.xlu1 %v687_v35 }
  0x3f   : > { %691 = vadd.xlane.f32.xlu0 %v690_v40 }
  0x40   : > { %694 = vadd.xlane.f32.xlu1 %v693_v41 }
  0x43   : > { %697 = vadd.xlane.f32.xlu0 %v696_v46 }
  0x44   : > { %700 = vadd.xlane.f32.xlu1 %v699_v47 }
  0xb0   : > { %v656_v48 = vpop.xlane.xlu0 %655 }
  0xb1   : > { %v703_v49 = vmul.f32 0.00390625, %v656_v48  ;;  %v662_v50 = vpop.xlane.xlu1 %661 }
  0xb2   : > { %v705_v51 = vmul.f32 0.00390625, %v662_v50 }
  0xb3   : > { %v3382_v52 = vsub.f32 %v3254_v0, %v703_v49  ;;  %v3385_v53 = vsub.f32 %v3257_v1, %v703_v49 }
  0xb4   : > { %v3388_v54 = vsub.f32 %v3260_v2, %v705_v51  ;;  %v3391_v55 = vsub.f32 %v3265_v4, %v705_v51  ;;  %v659_v56 = vpop.xlane.xlu0 %658 }
  0xb5   : > { %v704_v57 = vmul.f32 0.00390625, %v659_v56  ;;  %v665_v58 = vpop.xlane.xlu1 %664  ;;  %v751_v59 = vmul.f32 %v3382_v52, %v3382_v52  ;;  %v752_v60 = vmul.f32 %v3385_v53, %v3385_v53 }
  0xb6   : > { %v706_v61 = vmul.f32 0.00390625, %v665_v58  ;;  %v755_v62 = vmul.f32 %v3388_v54, %v3388_v54  ;;  %v756_v63 = vmul.f32 %v3391_v55, %v3391_v55 }
  0xb7   : > { %v3402_v0 = vsub.f32 %v3268_v5, %v704_v57  ;;  %v3405_v1 = vsub.f32 %v3271_v6, %v704_v57  ;;  %v783_v2 = vadd.f32 %v752_v60, %v751_v59 }
  0xb8   : > { %v3408_v3 = vsub.f32 %v3276_v8, %v706_v61  ;;  %v3411_v4 = vsub.f32 %v3279_v9, %v706_v61  ;;  %v668_v7 = vpop.xlane.xlu0 %667  ;;  %v789_v16 = vadd.f32 %v756_v63, %v755_v62 }
  0xb9   : > { %v707_v10 = vmul.f32 0.00390625, %v668_v7  ;;  %784 = vadd.xlane.f32.xlu0 %v783_v2  ;;  %v671_v11 = vpop.xlane.xlu1 %670  ;;  %v753_v17 = vmul.f32 %v3402_v0, %v3402_v0  ;;  %v754_v5 = vmul.f32 %v3405_v1, %v3405_v1 }
  0xba   : > { %v708_v6 = vmul.f32 0.00390625, %v671_v11  ;;  %v757_v22 = vmul.f32 %v3408_v3, %v3408_v3  ;;  %v758_v8 = vmul.f32 %v3411_v4, %v3411_v4 }
  0xbb   : > { %v3422_v9 = vsub.f32 %v3286_v12, %v707_v10  ;;  %v3425_v23 = vsub.f32 %v3289_v13, %v707_v10  ;;  %v786_v28 = vadd.f32 %v754_v5, %v753_v17 }
  0xbc   : > { %v3428_v29 = vsub.f32 %v3292_v14, %v708_v6  ;;  %v3431_v34 = vsub.f32 %v3295_v15, %v708_v6  ;;  %v674_v35 = vpop.xlane.xlu0 %673  ;;  %v792_v46 = vadd.f32 %v758_v8, %v757_v22 }
  0xbd   : > { %v709_v40 = vmul.f32 0.00390625, %v674_v35  ;;  %790 = vadd.xlane.f32.xlu0 %v789_v16  ;;  %787 = vadd.xlane.f32.xlu1 %v786_v28  ;;  %v677_v41 = vpop.xlane.xlu1 %676  ;;  %v759_v12 = vmul.f32 %v3422_v9, %v3422_v9  ;;  %v760_v13 = vmul.f32 %v3425_v23, %v3425_v23 }
  0xbe   : > { %v710_v47 = vmul.f32 0.00390625, %v677_v41  ;;  %v761_v14 = vmul.f32 %v3428_v29, %v3428_v29  ;;  %v762_v15 = vmul.f32 %v3431_v34, %v3431_v34 }
  0xbf   : > { %v3442_v48 = vsub.f32 %v3302_v18, %v709_v40  ;;  %v3445_v49 = vsub.f32 %v3305_v19, %v709_v40  ;;  %v795_v50 = vadd.f32 %v760_v13, %v759_v12 }
  0xc0   : > { %v3448_v51 = vsub.f32 %v3308_v20, %v710_v47  ;;  %v3451_v56 = vsub.f32 %v3311_v21, %v710_v47  ;;  %v680_v57 = vpop.xlane.xlu0 %679  ;;  %v798_v60 = vadd.f32 %v762_v15, %v761_v14 }
  0xc1   : > { %v711_v58 = vmul.f32 0.00390625, %v680_v57  ;;  %793 = vadd.xlane.f32.xlu1 %v792_v46  ;;  %796 = vadd.xlane.f32.xlu0 %v795_v50  ;;  %v683_v59 = vpop.xlane.xlu1 %682  ;;  %v763_v18 = vmul.f32 %v3442_v48, %v3442_v48  ;;  %v764_v19 = vmul.f32 %v3445_v49, %v3445_v49 }
  0xc2   : > { %v712_v61 = vmul.f32 0.00390625, %v683_v59  ;;  %v765_v20 = vmul.f32 %v3448_v51, %v3448_v51  ;;  %v766_v21 = vmul.f32 %v3451_v56, %v3451_v56 }
  0xc3   : > { %v3462_v62 = vsub.f32 %v3318_v24, %v711_v58  ;;  %v3465_v63 = vsub.f32 %v3321_v25, %v711_v58  ;;  %v801_v2 = vadd.f32 %v764_v19, %v763_v18 }
  0xc4   : > { %v3468_v7 = vsub.f32 %v3324_v26, %v712_v61  ;;  %v3471_v10 = vsub.f32 %v3327_v27, %v712_v61  ;;  %v686_v11 = vpop.xlane.xlu0 %685  ;;  %v804_v5 = vadd.f32 %v766_v21, %v765_v20 }
  0xc5   : > { %v713_v16 = vmul.f32 0.00390625, %v686_v11  ;;  %799 = vadd.xlane.f32.xlu1 %v798_v60  ;;  %802 = vadd.xlane.f32.xlu0 %v801_v2  ;;  %v689_v17 = vpop.xlane.xlu1 %688  ;;  %v767_v24 = vmul.f32 %v3462_v62, %v3462_v62  ;;  %v768_v25 = vmul.f32 %v3465_v63, %v3465_v63 }
  0xc6   : > { %v714_v6 = vmul.f32 0.00390625, %v689_v17  ;;  %v769_v26 = vmul.f32 %v3468_v7, %v3468_v7  ;;  %v770_v27 = vmul.f32 %v3471_v10, %v3471_v10 }
  0xc7   : > { %v3482_v22 = vsub.f32 %v3334_v30, %v713_v16  ;;  %v3485_v8 = vsub.f32 %v3337_v31, %v713_v16  ;;  %v807_v28 = vadd.f32 %v768_v25, %v767_v24 }
  0xc8   : > { %v3488_v35 = vsub.f32 %v3340_v32, %v714_v6  ;;  %v3491_v40 = vsub.f32 %v3343_v33, %v714_v6  ;;  %v692_v41 = vpop.xlane.xlu0 %691  ;;  %v810_v13 = vadd.f32 %v770_v27, %v769_v26  ;;  %v912_v27 = vlaneseq }
  0xc9   : > { %v715_v46 = vmul.f32 0.00390625, %v692_v41  ;;  %805 = vadd.xlane.f32.xlu1 %v804_v5  ;;  %808 = vadd.xlane.f32.xlu0 %v807_v28  ;;  %v695_v12 = vpop.xlane.xlu1 %694  ;;  %v771_v30 = vmul.f32 %v3482_v22, %v3482_v22  ;;  %v772_v31 = vmul.f32 %v3485_v8, %v3485_v8 }
  0xca   : > { %v716_v47 = vmul.f32 0.00390625, %v695_v12  ;;  %v773_v32 = vmul.f32 %v3488_v35, %v3488_v35  ;;  %v774_v33 = vmul.f32 %v3491_v40, %v3491_v40 }
  0xcb   : > { %v3502_v14 = vsub.f32 %v3350_v36, %v715_v46  ;;  %v3505_v15 = vsub.f32 %v3353_v37, %v715_v46  ;;  %v813_v50 = vadd.f32 %v772_v31, %v771_v30  ;;  %v913_v31 = vshrl.u32 %v912_v27, 7 }
  0xcc   : > { %v3508_v57 = vsub.f32 %v3356_v38, %v716_v47  ;;  %v3511_v58 = vsub.f32 %v3359_v39, %v716_v47  ;;  %v698_v59 = vpop.xlane.xlu0 %697  ;;  %v816_v19 = vadd.f32 %v774_v33, %v773_v32 }
  0xcd   : > { %v717_v60 = vmul.f32 0.00390625, %v698_v59  ;;  %811 = vadd.xlane.f32.xlu1 %v810_v13  ;;  %814 = vadd.xlane.f32.xlu0 %v813_v50  ;;  %v701_v18 = vpop.xlane.xlu1 %700  ;;  %v775_v36 = vmul.f32 %v3502_v14, %v3502_v14  ;;  %v776_v37 = vmul.f32 %v3505_v15, %v3505_v15 }
  0xce   : > { %v718_v61 = vmul.f32 0.00390625, %v701_v18  ;;  %v777_v38 = vmul.f32 %v3508_v57, %v3508_v57  ;;  %v778_v39 = vmul.f32 %v3511_v58, %v3511_v58  ;;  %v914_v18 = vsub.s32 0, %v913_v31 }
  0xcf   : > { %v3522_v20 = vsub.f32 %v3366_v42, %v717_v60  ;;  %v3525_v21 = vsub.f32 %v3369_v43, %v717_v60  ;;  %v819_v2 = vadd.f32 %v776_v37, %v775_v36  ;;  %v652_v37 = vld [vmem:[%s3941_s1] sm:$0x3] }
  0xd0   : > { %v3528_v11 = vsub.f32 %v3372_v44, %v718_v61  ;;  %v3531_v16 = vsub.f32 %v3375_v45, %v718_v61  ;;  %v822_v17 = vadd.f32 %v778_v39, %v777_v38  ;;  %v918_v61 = vsub.s32 1, %v913_v31 }
  0xd1   : > { %817 = vadd.xlane.f32.xlu1 %v816_v19  ;;  %820 = vadd.xlane.f32.xlu0 %v819_v2  ;;  %v779_v5 = vmul.f32 %v3522_v20, %v3522_v20  ;;  %v780_v42 = vmul.f32 %v3525_v21, %v3525_v21  ;;  %v653_v2 = vld [vmem:[%s3972_s27] sm:$0x3] }
  0xd2   : > { %v781_v43 = vmul.f32 %v3528_v11, %v3528_v11  ;;  %v782_v24 = vmul.f32 %v3531_v16, %v3531_v16  ;;  %v3553_v27 = vrot.slane %v653_v2, %v918_v61 }
  0xd3   : > { %v825_v44 = vadd.f32 %v780_v42, %v779_v5  ;;  %v3547_v42 = vrot.slane %v652_v37, %v914_v18 }
  0xd4   : > { %v828_v45 = vadd.f32 %v782_v24, %v781_v43 }
  0xd5   : > { %823 = vadd.xlane.f32.xlu1 %v822_v17  ;;  %826 = vadd.xlane.f32.xlu0 %v825_v44  ;;  %v3549_v44 = vrot.slane %v652_v37, %v918_v61 }
  0xd9   : > { %829 = vadd.xlane.f32.xlu1 %v828_v45 }
 0x142   : > { %v785_v25 = vpop.xlane.xlu0 %784 }
 0x143   : > { %v831_v6 = vmul.f32 0.00390625, %v785_v25 }
 0x145   : > { %v847_v26 = vadd.f32 1e-05, %v831_v6 }
 0x146   : > { %v788_v28 = vpop.xlane.xlu1 %787  ;;  %v791_v41 = vpop.xlane.xlu0 %790 }
 0x147   : > { %2944 = vrsqrt.f32 %v847_v26  ;;  %v832_v46 = vmul.f32 0.00390625, %v788_v28  ;;  %v833_v12 = vmul.f32 0.00390625, %v791_v41  ;;  %v3551_v26 = vrot.slane %v653_v2, %v914_v18 }
 0x149   : > { %v848_v13 = vadd.f32 1e-05, %v832_v46  ;;  %v849_v30 = vadd.f32 1e-05, %v833_v12 }
 0x14a   : > { %v794_v47 = vpop.xlane.xlu1 %793  ;;  %v797_v32 = vpop.xlane.xlu0 %796 }
 0x14b   : > { %2946 = vrsqrt.f32 %v848_v13  ;;  %v834_v33 = vmul.f32 0.00390625, %v794_v47  ;;  %v835_v50 = vmul.f32 0.00390625, %v797_v32 }
 0x14c   : > { %2948 = vrsqrt.f32 %v849_v30 }
 0x14d   : > { %v850_v59 = vadd.f32 1e-05, %v834_v33  ;;  %v851_v60 = vadd.f32 1e-05, %v835_v50 }
 0x14e   : > { %v800_v19 = vpop.xlane.xlu1 %799  ;;  %v803_v36 = vpop.xlane.xlu0 %802 }
 0x14f   : > { %2950 = vrsqrt.f32 %v850_v59  ;;  %v836_v38 = vmul.f32 0.00390625, %v800_v19  ;;  %v837_v39 = vmul.f32 0.00390625, %v803_v36 }
 0x150   : > { %2952 = vrsqrt.f32 %v851_v60 }
 0x151   : > { %v852_v17 = vadd.f32 1e-05, %v836_v38  ;;  %v853_v5 = vadd.f32 1e-05, %v837_v39 }
 0x152   : > { %v806_v43 = vpop.xlane.xlu1 %805  ;;  %v809_v24 = vpop.xlane.xlu0 %808 }
 0x153   : > { %2954 = vrsqrt.f32 %v852_v17  ;;  %v838_v45 = vmul.f32 0.00390625, %v806_v43  ;;  %v839_v25 = vmul.f32 0.00390625, %v809_v24 }
 0x154   : > { %v2945_v6 = vpop.eup %2944  ;;  %2956 = vrsqrt.f32 %v853_v5 }
 0x155   : > { %v879_v28 = vmul.f32 %v2945_v6, %v3382_v52  ;;  %v880_v41 = vmul.f32 %v2945_v6, %v3385_v53  ;;  %v854_v46 = vadd.f32 1e-05, %v838_v45  ;;  %v855_v12 = vadd.f32 1e-05, %v839_v25 }
 0x156   : > { %v812_v13 = vpop.xlane.xlu1 %811  ;;  %v815_v30 = vpop.xlane.xlu0 %814 }
 0x157   : > { %v922_v31 = vmul.f32 %v3547_v42, %v879_v28  ;;  %v923_v47 = vmul.f32 %v3549_v44, %v880_v41  ;;  %2958 = vrsqrt.f32 %v854_v46  ;;  %v840_v32 = vmul.f32 0.00390625, %v812_v13 }
 0x158   : > { %v2947_v33 = vpop.eup %2946  ;;  %2960 = vrsqrt.f32 %v855_v12  ;;  %v841_v50 = vmul.f32 0.00390625, %v815_v30 }
 0x159   : > { %v2949_v59 = vpop.eup %2948  ;;  %v965_v60 = vadd.f32 %v3551_v26, %v922_v31  ;;  %v966_v52 = vadd.f32 %v3553_v27, %v923_v47  ;;  %v881_v53 = vmul.f32 %v2947_v33, %v3402_v0  ;;  %v882_v18 = vmul.f32 %v2947_v33, %v3405_v1 }
 0x15a   : > { %v883_v19 = vmul.f32 %v2949_v59, %v3388_v54  ;;  %v884_v36 = vmul.f32 %v2949_v59, %v3391_v55  ;;  %v856_v37 = vadd.f32 1e-05, %v840_v32  ;;  %v857_v61 = vadd.f32 1e-05, %v841_v50  ;;  %v818_v38 = vpop.xlane.xlu1 %817  ;;  %v821_v39 = vpop.xlane.xlu0 %820 }
 0x15b   : > { %v2616_v2 = vpack.c.bf16 %v966_v52, %v965_v60  ;;  %v924_v17 = vmul.f32 %v3547_v42, %v881_v53  ;;  %v925_v5 = vmul.f32 %v3549_v44, %v882_v18  ;;  %v842_v43 = vmul.f32 0.00390625, %v818_v38 }
 0x15c   : > { %v2951_v24 = vpop.eup %2950  ;;  %v926_v45 = vmul.f32 %v3547_v42, %v883_v19  ;;  %v927_v0 = vmul.f32 %v3549_v44, %v884_v36  ;;  %2962 = vrsqrt.f32 %v856_v37  ;;  %v843_v1 = vmul.f32 0.00390625, %v821_v39 }
 0x15d   : > { %v2953_v54 = vpop.eup %2952  ;;  %1093 = vst [vmem:[#allocation2 + $0x30] sm:$0xff] %v2616_v2  ;;  %v967_v55 = vadd.f32 %v3551_v26, %v924_v17  ;;  %v968_v25 = vadd.f32 %v3553_v27, %v925_v5  ;;  %v885_v6 = vmul.f32 %v2951_v24, %v3408_v3  ;;  %v886_v28 = vmul.f32 %v2951_v24, %v3411_v4 }
 0x15e   : > { %v969_v41 = vadd.f32 %v3551_v26, %v926_v45  ;;  %v970_v46 = vadd.f32 %v3553_v27, %v927_v0  ;;  %v887_v12 = vmul.f32 %v2953_v54, %v3422_v9  ;;  %v888_v13 = vmul.f32 %v2953_v54, %v3425_v23  ;;  %v824_v59 = vpop.xlane.xlu1 %823 }
 0x15f   : > { %v2617_v30 = vpack.c.bf16 %v968_v25, %v967_v55  ;;  %v928_v31 = vmul.f32 %v3547_v42, %v885_v6  ;;  %v929_v47 = vmul.f32 %v3549_v44, %v886_v28  ;;  %2964 = vrsqrt.f32 %v857_v61 }
 0x160   : > { %v2955_v32 = vpop.eup %2954  ;;  %v2618_v33 = vpack.c.bf16 %v970_v46, %v969_v41  ;;  %v930_v3 = vmul.f32 %v3547_v42, %v887_v12  ;;  %v931_v4 = vmul.f32 %v3549_v44, %v888_v13  ;;  %v858_v50 = vadd.f32 1e-05, %v842_v43 }
 0x161   : > { %v2957_v60 = vpop.eup %2956  ;;  %1094 = vst [vmem:[#allocation2] sm:$0xff] %v2617_v30  ;;  %v971_v9 = vadd.f32 %v3551_v26, %v928_v31  ;;  %v972_v23 = vadd.f32 %v3553_v27, %v929_v47  ;;  %v889_v52 = vmul.f32 %v2955_v32, %v3428_v29  ;;  %v890_v53 = vmul.f32 %v2955_v32, %v3431_v34 }
 0x162   : > { %1095 = vst [vmem:[#allocation2 + $0x58] sm:$0xff] %v2618_v33  ;;  %v973_v18 = vadd.f32 %v3551_v26, %v930_v3  ;;  %v974_v19 = vadd.f32 %v3553_v27, %v931_v4  ;;  %v891_v36 = vmul.f32 %v2957_v60, %v3442_v48  ;;  %v892_v37 = vmul.f32 %v2957_v60, %v3445_v49  ;;  %v830_v6 = vpop.xlane.xlu1 %829 }
 0x163   : > { %v2619_v61 = vpack.c.bf16 %v972_v23, %v971_v9  ;;  %v932_v38 = vmul.f32 %v3547_v42, %v889_v52  ;;  %v933_v39 = vmul.f32 %v3549_v44, %v890_v53  ;;  %2966 = vrsqrt.f32 %v858_v50 }
 0x164   : > { %v2959_v2 = vpop.eup %2958  ;;  %v2620_v17 = vpack.c.bf16 %v974_v19, %v973_v18  ;;  %v934_v29 = vmul.f32 %v3547_v42, %v891_v36  ;;  %v935_v34 = vmul.f32 %v3549_v44, %v892_v37  ;;  %v859_v5 = vadd.f32 1e-05, %v843_v1  ;;  %v827_v1 = vpop.xlane.xlu0 %826 }
 0x165   : > { %v2961_v43 = vpop.eup %2960  ;;  %1096 = vst [vmem:[#allocation2 + $0x18] sm:$0xff] %v2619_v61  ;;  %v975_v24 = vadd.f32 %v3551_v26, %v932_v38  ;;  %v976_v48 = vadd.f32 %v3553_v27, %v933_v39  ;;  %v893_v49 = vmul.f32 %v2959_v2, %v3448_v51  ;;  %v894_v45 = vmul.f32 %v2959_v2, %v3451_v56 }
 0x166   : > { %1097 = vst [vmem:[#allocation2 + $0x50] sm:$0xff] %v2620_v17  ;;  %v977_v0 = vadd.f32 %v3551_v26, %v934_v29  ;;  %v978_v54 = vadd.f32 %v3553_v27, %v935_v34  ;;  %v895_v55 = vmul.f32 %v2961_v43, %v3462_v62  ;;  %v896_v25 = vmul.f32 %v2961_v43, %v3465_v63 }
 0x167   : > { %v2621_v28 = vpack.c.bf16 %v976_v48, %v975_v24  ;;  %v936_v41 = vmul.f32 %v3547_v42, %v893_v49  ;;  %v937_v46 = vmul.f32 %v3549_v44, %v894_v45  ;;  %2968 = vrsqrt.f32 %v859_v5 }
 0x168   : > { %v2622_v51 = vpack.c.bf16 %v978_v54, %v977_v0  ;;  %v938_v56 = vmul.f32 %v3547_v42, %v895_v55  ;;  %v939_v12 = vmul.f32 %v3549_v44, %v896_v25  ;;  %v844_v13 = vmul.f32 0.00390625, %v824_v59 }
 0x169   : > { %v2963_v30 = vpop.eup %2962  ;;  %1098 = vst [vmem:[#allocation2 + $0x68] sm:$0xff] %v2621_v28  ;;  %v979_v62 = vadd.f32 %v3551_v26, %v936_v41  ;;  %v980_v63 = vadd.f32 %v3553_v27, %v937_v46  ;;  %v845_v31 = vmul.f32 0.00390625, %v827_v1  ;;  %v846_v47 = vmul.f32 0.00390625, %v830_v6 }
 0x16a   : > { %1099 = vst [vmem:[#allocation2 + $0x8] sm:$0xff] %v2622_v51  ;;  %v981_v32 = vadd.f32 %v3551_v26, %v938_v56  ;;  %v982_v33 = vadd.f32 %v3553_v27, %v939_v12  ;;  %v897_v3 = vmul.f32 %v2963_v30, %v3468_v7  ;;  %v898_v4 = vmul.f32 %v2963_v30, %v3471_v10 }
 0x16b   : > { %v2623_v50 = vpack.c.bf16 %v980_v63, %v979_v62  ;;  %v860_v60 = vadd.f32 1e-05, %v844_v13  ;;  %v861_v59 = vadd.f32 1e-05, %v845_v31  ;;  %v862_v9 = vadd.f32 1e-05, %v846_v47 }
 0x16c   : > { %v2965_v23 = vpop.eup %2964  ;;  %v2624_v52 = vpack.c.bf16 %v982_v33, %v981_v32  ;;  %v940_v53 = vmul.f32 %v3547_v42, %v897_v3  ;;  %v941_v18 = vmul.f32 %v3549_v44, %v898_v4 }
 0x16d   : > { %1100 = vst [vmem:[#allocation2 + $0x48] sm:$0xff] %v2623_v50  ;;  %v899_v19 = vmul.f32 %v2965_v23, %v3482_v22  ;;  %v900_v36 = vmul.f32 %v2965_v23, %v3485_v8  ;;  %2970 = vrsqrt.f32 %v860_v60 }
 0x16e   : > { %1101 = vst [vmem:[#allocation2 + $0x40] sm:$0xff] %v2624_v52  ;;  %v983_v7 = vadd.f32 %v3551_v26, %v940_v53  ;;  %v984_v10 = vadd.f32 %v3553_v27, %v941_v18  ;;  %2972 = vrsqrt.f32 %v861_v59 }
 0x16f   : > { %v942_v37 = vmul.f32 %v3547_v42, %v899_v19  ;;  %v943_v61 = vmul.f32 %v3549_v44, %v900_v36  ;;  %2974 = vrsqrt.f32 %v862_v9 }
 0x170   : > { %v2967_v38 = vpop.eup %2966  ;;  %v2625_v39 = vpack.c.bf16 %v984_v10, %v983_v7 }
 0x171   : > { %v985_v2 = vadd.f32 %v3551_v26, %v942_v37  ;;  %v986_v22 = vadd.f32 %v3553_v27, %v943_v61  ;;  %v901_v8 = vmul.f32 %v2967_v38, %v3488_v35  ;;  %v902_v17 = vmul.f32 %v2967_v38, %v3491_v40 }
 0x172   : > { %1102 = vst [vmem:[#allocation2 + $0x20] sm:$0xff] %v2625_v39 }
 0x173   : > { %v2626_v29 = vpack.c.bf16 %v986_v22, %v985_v2  ;;  %v944_v34 = vmul.f32 %v3547_v42, %v901_v8  ;;  %v945_v5 = vmul.f32 %v3549_v44, %v902_v17 }
 0x174   : > { %v2969_v43 = vpop.eup %2968 }
 0x175   : > { %1103 = vst [vmem:[#allocation2 + $0x10] sm:$0xff] %v2626_v29  ;;  %v987_v24 = vadd.f32 %v3551_v26, %v944_v34  ;;  %v988_v48 = vadd.f32 %v3553_v27, %v945_v5  ;;  %v903_v49 = vmul.f32 %v2969_v43, %v3502_v14  ;;  %v904_v45 = vmul.f32 %v2969_v43, %v3505_v15 }
 0x177   : > { %v2627_v0 = vpack.c.bf16 %v988_v48, %v987_v24  ;;  %v946_v35 = vmul.f32 %v3547_v42, %v903_v49  ;;  %v947_v40 = vmul.f32 %v3549_v44, %v904_v45 }
 0x179   : > { %1104 = vst [vmem:[#allocation2 + $0x38] sm:$0xff] %v2627_v0  ;;  %v989_v54 = vadd.f32 %v3551_v26, %v946_v35  ;;  %v990_v55 = vadd.f32 %v3553_v27, %v947_v40 }
 0x17a   : > { %v2971_v25 = vpop.eup %2970 }
 0x17b   : > { %v2973_v1 = vpop.eup %2972  ;;  %v2628_v6 = vpack.c.bf16 %v990_v55, %v989_v54  ;;  %v905_v28 = vmul.f32 %v2971_v25, %v3508_v57  ;;  %v906_v41 = vmul.f32 %v2971_v25, %v3511_v58 }
 0x17c   : > { %v2975_v14 = vpop.eup %2974  ;;  %v907_v15 = vmul.f32 %v2973_v1, %v3522_v20  ;;  %v908_v46 = vmul.f32 %v2973_v1, %v3525_v21 }
 0x17d   : > { %1105 = vst [vmem:[#allocation2 + $0x60] sm:$0xff] %v2628_v6  ;;  %v948_v51 = vmul.f32 %v3547_v42, %v905_v28  ;;  %v949_v56 = vmul.f32 %v3549_v44, %v906_v41  ;;  %v909_v12 = vmul.f32 %v2975_v14, %v3528_v11  ;;  %v910_v13 = vmul.f32 %v2975_v14, %v3531_v16 }
 0x17e   : > { %v950_v30 = vmul.f32 %v3547_v42, %v907_v15  ;;  %v951_v57 = vmul.f32 %v3549_v44, %v908_v46 }
 0x17f   : > { %v991_v58 = vadd.f32 %v3551_v26, %v948_v51  ;;  %v992_v62 = vadd.f32 %v3553_v27, %v949_v56  ;;  %v952_v20 = vmul.f32 %v3547_v42, %v909_v12  ;;  %v953_v21 = vmul.f32 %v3549_v44, %v910_v13 }
 0x180   : > { %v993_v63 = vadd.f32 %v3551_v26, %v950_v30  ;;  %v994_v31 = vadd.f32 %v3553_v27, %v951_v57 }
 0x181   : > { %v2629_v47 = vpack.c.bf16 %v992_v62, %v991_v58  ;;  %v995_v11 = vadd.f32 %v3551_v26, %v952_v20  ;;  %v996_v16 = vadd.f32 %v3553_v27, %v953_v21 }
 0x182   : > { %v2630_v32 = vpack.c.bf16 %v994_v31, %v993_v63 }
 0x183   : > { %1106 = vst [vmem:[#allocation2 + $0x70] sm:$0xff] %v2629_v47  ;;  %v2631_v33 = vpack.c.bf16 %v996_v16, %v995_v11 }
 0x184   : > { %1107 = vst [vmem:[#allocation2 + $0x78] sm:$0xff] %v2630_v32 }
 0x185   : > { %1108 = vst [vmem:[#allocation2 + $0x28] sm:$0xff] %v2631_v33 }
 0x186 PF: > { %v2976_v42 = vld [vmem:[%s3216_s30 + $0x78] sm:$0xff]   ;;  %v2978_v26 = vld [vmem:[%s3216_s30 + $0x70] sm:$0xff]   ;;  %v2980_v3 = vld [vmem:[%s3216_s30 + $0x68] sm:$0xff]   ;;  %s3973_s18 = sld [smem:[#allocation13_spill]]  ;;  %vm1501_vm0 = vcmask 519168   ;;  %s3975_s25 = scalar_lea.vmem %s3946_s6, %s3206_s16 }
 0x187   : > { %v2977_v44 = vld [vmem:[%s3216_s30 + $0x38] sm:$0xff]   ;;  %2680 = vmatprep.subr.bf16.mxu0 %v2976_v42  ;;  %2872 = vmatprep.subr.bf16.mxu1 %v2976_v42  ;;  %v2979_v27 = vld [vmem:[%s3216_s30 + $0x30] sm:$0xff]   ;;  %v2981_v4 = vld [vmem:[%s3216_s30 + $0x28] sm:$0xff]  }
 0x188   : > { %2681 = vmatpush3.bf16.msra.mxu0 %v2977_v44  ;;  %2880 = vmatpush3.bf16.msra.mxu1 %v2977_v44  ;;  %v2982_v50 = vld [vmem:[%s3216_s30 + $0x60] sm:$0xff]   ;;  %v2984_v59 = vld [vmem:[%s3216_s30 + $0x58] sm:$0xff]   ;;  %v2986_v23 = vld [vmem:[%s3216_s30 + $0x50] sm:$0xff]  }
 0x189   : > { %2682 = vmatprep.subr.bf16.mxu0 %v2978_v26  ;;  %2873 = vmatprep.subr.bf16.mxu1 %v2978_v26  ;;  %v2983_v60 = vld [vmem:[%s3216_s30 + $0x20] sm:$0xff]   ;;  %v2985_v9 = vld [vmem:[%s3216_s30 + $0x18] sm:$0xff]   ;;  %v2987_v36 = vld [vmem:[%s3216_s30 + $0x10] sm:$0xff]  }
 0x18a   : > { %v3662_v52 = vld [vmem:[#allocation2 + $0x34] ss:$-48 sps:$4 sm:$0xff]   ;;  %v2988_v7 = vld [vmem:[%s3216_s30 + $0x48] sm:$0xff]   ;;  %v2995_v38 = vld [vmem:[%s3221_s14 + $0x78] sm:$0xff]  }
 0x18b   : > { %v1117_v53 = vld [vmem:[#allocation2 + $0x40] sm:$0xff]  ;;  %1372 = vmatprep.mubr.bf16.mxu0 %v3662_v52  ;;  %v2989_v10 = vld [vmem:[%s3216_s30 + $0x8] sm:$0xff]   ;;  %v2996_v2 = vld [vmem:[%s3230_s2 + $0x78] sm:$0xff]  }
 0x18c   : > { %2683 = vmatpush3.bf16.msra.mxu0 %v2979_v27  ;;  %2881 = vmatpush3.bf16.msra.mxu1 %v2979_v27  ;;  %v1118_v18 = vld [vmem:[#allocation2 + $0x20] sm:$0xff]  ;;  %v2997_v22 = vld [vmem:[%s3221_s14 + $0x38] sm:$0xff]   ;;  %v2999_v5 = vld [vmem:[%s3221_s14 + $0x70] sm:$0xff]  }
 0x18d   : > { %2684 = vmatprep.subr.bf16.mxu0 %v2980_v3  ;;  %2874 = vmatprep.subr.bf16.mxu1 %v2980_v3  ;;  %v3665_v19 = vcombine.high %v1117_v53, %v1118_v18  ;;  %v2990_v37 = vld [vmem:[%s3216_s30 + $0x40] sm:$0xff]   ;;  %v2998_v8 = vld [vmem:[%s3230_s2 + $0x38] sm:$0xff]   ;;  %v3679_v29 = vcombine.low %v1117_v53, %v1118_v18  ;;  %v3000_v43 = vld [vmem:[%s3230_s2 + $0x70] sm:$0xff]  }
 0x18e   : > { %v2991_v61 = vld [vmem:[%s3216_s30] sm:$0xff]   ;;  %v1111_v17 = vld [vmem:[#allocation2 + $0x58] sm:$0xff]  ;;  %v3001_v24 = vld [vmem:[%s3221_s14 + $0x30] sm:$0xff]   ;;  %s3974_s30 = scalar_lea.vmem %s3973_s18, %s3206_s16 }
 0x18f   : > { %1404 = vmatprep.mubr.bf16.mxu1 %v3665_v19  ;;  %v3674_v39 = vld [vmem:[#allocation2 + $0x30] ss:$-48 sps:$4 sm:$0xff]   ;;  %v1112_v34 = vld [vmem:[#allocation2 + $0x18] sm:$0xff]  ;;  %v3006_v0 = vld [vmem:[%s3221_s14 + $0x68] sm:$0xff]  }
 0x190   : > { %2685 = vmatpush3.bf16.msra.mxu0 %v2981_v4  ;;  %2882 = vmatpush3.bf16.msra.mxu1 %v2981_v4  ;;  %v3684_v48 = vcombine.high %v1111_v17, %v1112_v34  ;;  %v3686_v49 = vld [vmem:[#allocation2 + $0x14] ss:$40 sps:$4 sm:$0xff]   ;;  %v3692_v35 = vld [vmem:[#allocation2 + $0x10] ss:$40 sps:$4 sm:$0xff]   ;;  %v3007_v40 = vld [vmem:[%s3230_s2 + $0x68] sm:$0xff]   ;;  %v3698_v55 = vcombine.low %v1111_v17, %v1112_v34 }
 0x191   : > { %2686 = vmatprep.subr.bf16.mxu0 %v2982_v50  ;;  %2875 = vmatprep.subr.bf16.mxu1 %v2982_v50  ;;  %v3002_v45 = vld [vmem:[%s3230_s2 + $0x30] sm:$0xff]   ;;  %v3008_v54 = vld [vmem:[%s3221_s14 + $0x28] sm:$0xff]   ;;  %v3010_v1 = vld [vmem:[%s3221_s14 + $0x60] sm:$0xff]  }
 0x192   : > { %v3009_v25 = vld [vmem:[%s3230_s2 + $0x28] sm:$0xff]   ;;  %v3011_v6 = vld [vmem:[%s3230_s2 + $0x60] sm:$0xff]   ;;  %v3020_v46 = vld [vmem:[%s3221_s14 + $0x58] sm:$0xff]  }
 0x193   : > { %v3703_v28 = vld [vmem:[#allocation2 + $0x54] ss:$24 sps:$4 sm:$0xff]   ;;  %v3012_v41 = vld [vmem:[%s3221_s14 + $0x20] sm:$0xff]   ;;  %v3018_v51 = vld [vmem:[#allocation2 + $0x50] ss:$24 sps:$4 sm:$0xff]  }
 0x194   : > { %2687 = vmatpush3.bf16.msra.mxu0 %v2983_v60  ;;  %2883 = vmatpush3.bf16.msra.mxu1 %v2983_v60  ;;  %v3706_v14 = vld [vmem:[#allocation2 + $0x64] ss:$16 sps:$4 sm:$0xff]   ;;  %v3712_v56 = vld [vmem:[#allocation2 + $0x60] ss:$16 sps:$4 sm:$0xff]   ;;  %v3021_v12 = vld [vmem:[%s3230_s2 + $0x58] sm:$0xff]  }
 0x195   : > { %2688 = vmatprep.subr.bf16.mxu0 %v2984_v59  ;;  %2876 = vmatprep.subr.bf16.mxu1 %v2984_v59  ;;  %v3013_v15 = vld [vmem:[%s3230_s2 + $0x20] sm:$0xff]   ;;  %v3022_v13 = vld [vmem:[%s3221_s14 + $0x18] sm:$0xff]   ;;  %v1115_v57 = vld [vmem:[#allocation2 + $0x8] sm:$0xff] }
 0x196   : > { %v3023_v30 = vld [vmem:[%s3230_s2 + $0x18] sm:$0xff]   ;;  %v1116_v58 = vld [vmem:[#allocation2 + $0x48] sm:$0xff]  ;;  %v3024_v62 = vld [vmem:[%s3221_s14 + $0x50] sm:$0xff]  }
 0x197   : > { %v3025_v20 = vld [vmem:[%s3230_s2 + $0x50] sm:$0xff]   ;;  %v2504_v63 = vcombine.high %v1115_v57, %v1116_v58  ;;  %v3028_v31 = vld [vmem:[#allocation2 + $0x7c] ss:$-80 sps:$4 sm:$0xff]   ;;  %v3030_v32 = vld [vmem:[#allocation2 + $0x78] ss:$-80 sps:$4 sm:$0xff]   ;;  %v2503_v33 = vcombine.low %v1115_v57, %v1116_v58 }
 0x198   : > { %2689 = vmatpush3.bf16.msra.mxu0 %v2985_v9  ;;  %2884 = vmatpush3.bf16.msra.mxu1 %v2985_v9  ;;  %v3026_v21 = vld [vmem:[%s3221_s14 + $0x10] sm:$0xff]   ;;  %v3031_v11 = vld [vmem:[%s3221_s14 + $0x48] sm:$0xff]   ;;  %v3035_v26 = vld [vmem:[%s3221_s14 + $0x40] sm:$0xff]  }
 0x199   : > { %2690 = vmatprep.subr.bf16.mxu0 %v2986_v23  ;;  %2877 = vmatprep.subr.bf16.mxu1 %v2986_v23  ;;  %v3027_v47 = vld [vmem:[%s3230_s2 + $0x10] sm:$0xff]   ;;  %v3032_v16 = vld [vmem:[%s3230_s2 + $0x48] sm:$0xff]   ;;  %v3036_v27 = vld [vmem:[%s3230_s2 + $0x40] sm:$0xff]  }
 0x19a   : > { %v3033_v42 = vld [vmem:[%s3221_s14 + $0x8] sm:$0xff]   ;;  %v3037_v3 = vld [vmem:[%s3221_s14] sm:$0xff]  }
 0x19b   : > { %v3034_v44 = vld [vmem:[%s3230_s2 + $0x8] sm:$0xff]   ;;  %v3038_v4 = vld [vmem:[%s3230_s2] sm:$0xff]  }
 0x19c   : > { %2691 = vmatpush3.bf16.msra.mxu0 %v2987_v36  ;;  %2885 = vmatpush3.bf16.msra.mxu1 %v2987_v36  ;;  %v3759_v59 = vld [vmem:[%s3974_s30] ss:$0 sm:$0xff] }
 0x19d   : > { %2692 = vmatprep.subr.bf16.mxu0 %v2988_v7  ;;  %2878 = vmatprep.subr.bf16.mxu1 %v2988_v7 }
 0x1a0   : > { %2693 = vmatpush3.bf16.msra.mxu0 %v2989_v10  ;;  %2886 = vmatpush3.bf16.msra.mxu1 %v2989_v10 }
 0x1a1   : > { %2694 = vmatprep.subr.bf16.mxu0 %v2990_v37  ;;  %2879 = vmatprep.subr.bf16.mxu1 %v2990_v37 }
 0x1a4   : > { %2695 = vmatpush3.bf16.msra.mxu0 %v2991_v61  ;;  %2887 = vmatpush3.bf16.msra.mxu1 %v2991_v61 }
 0x1a5   : > { %2744 = vmatprep.subr.bf16.mxu1 %v2995_v38  ;;  %2808 = vmatprep.subr.bf16.mxu0 %v2996_v2 }
 0x1a7   : > { %1373 = vmatmul.mubr.bf16.vlgmr.msra.gmra.mxu0 %v3674_v39  ;;  %1405 = vmatmul.mubr.bf16.vlgmr.msra.gmra.mxu1 %v3679_v29 }
 0x1a8   : > { %2745 = vmatpush3.bf16.msra.mxu1 %v2997_v22  ;;  %2809 = vmatpush3.bf16.msra.mxu0 %v2998_v8 }
 0x1a9   : > { %2746 = vmatprep.subr.bf16.mxu1 %v2999_v5  ;;  %2810 = vmatprep.subr.bf16.mxu0 %v3000_v43 }
 0x1aa   : > { %1380 = vmatprep.mubr.bf16.mxu0 %v3684_v48  ;;  %1412 = vmatprep.mubr.bf16.mxu1 %v3686_v49 }
 0x1ac   : > { %2747 = vmatpush3.bf16.msra.mxu1 %v3001_v24  ;;  %2811 = vmatpush3.bf16.msra.mxu0 %v3002_v45 }
 0x1ad   : > { %2748 = vmatprep.subr.bf16.mxu1 %v3006_v0  ;;  %2812 = vmatprep.subr.bf16.mxu0 %v3007_v40 }
 0x1af   : > { %1381 = vmatmul.mubr.bf16.gmra.mxu0 %v3698_v55  ;;  %1413 = vmatmul.mubr.bf16.gmra.mxu1 %v3692_v35 }
 0x1b0   : > { %2749 = vmatpush3.bf16.msra.mxu1 %v3008_v54  ;;  %2813 = vmatpush3.bf16.msra.mxu0 %v3009_v25 }
 0x1b1   : > { %2750 = vmatprep.subr.bf16.mxu1 %v3010_v1  ;;  %2814 = vmatprep.subr.bf16.mxu0 %v3011_v6 }
 0x1b2   : > { %1388 = vmatprep.mubr.bf16.mxu0 %v3703_v28  ;;  %1420 = vmatprep.mubr.bf16.mxu1 %v3706_v14 }
 0x1b4   : > { %2751 = vmatpush3.bf16.msra.mxu1 %v3012_v41  ;;  %2815 = vmatpush3.bf16.msra.mxu0 %v3013_v15 }
 0x1b5   : > { %2752 = vmatprep.subr.bf16.mxu1 %v3020_v46  ;;  %2816 = vmatprep.subr.bf16.mxu0 %v3021_v12 }
 0x1b7   : > { %1389 = vmatmul.mubr.bf16.gmra.mxu0 %v3018_v51  ;;  %1421 = vmatmul.mubr.bf16.gmra.mxu1 %v3712_v56 }
 0x1b8   : > { %2753 = vmatpush3.bf16.msra.mxu1 %v3022_v13  ;;  %2817 = vmatpush3.bf16.msra.mxu0 %v3023_v30 }
 0x1b9   : > { %2754 = vmatprep.subr.bf16.mxu1 %v3024_v62  ;;  %2818 = vmatprep.subr.bf16.mxu0 %v3025_v20 }
 0x1ba   : > { %1396 = vmatprep.mubr.bf16.mxu0 %v2504_v63  ;;  %1428 = vmatprep.mubr.bf16.mxu1 %v3028_v31 }
 0x1bc   : > { %2755 = vmatpush3.bf16.msra.mxu1 %v3026_v21  ;;  %2819 = vmatpush3.bf16.msra.mxu0 %v3027_v47 }
 0x1bd   : > { %2756 = vmatprep.subr.bf16.mxu1 %v3031_v11  ;;  %2820 = vmatprep.subr.bf16.mxu0 %v3032_v16 }
 0x1bf   : > { %1397 = vmatmul.mubr.bf16.gmra.mxu0 %v2503_v33  ;;  %1429 = vmatmul.mubr.bf16.gmra.mxu1 %v3030_v32 }
 0x1c0   : > { %2757 = vmatpush3.bf16.msra.mxu1 %v3033_v42  ;;  %2821 = vmatpush3.bf16.msra.mxu0 %v3034_v44 }
 0x1c1   : > { %2758 = vmatprep.subr.bf16.mxu1 %v3035_v26  ;;  %2822 = vmatprep.subr.bf16.mxu0 %v3036_v27 }
 0x1c2   : > { %1685 = vmatprep.mubr.bf16.mxu1 %v3662_v52  ;;  %1997 = vmatprep.mubr.bf16.mxu0 %v3662_v52 }
 0x1c4   : > { %2759 = vmatpush3.bf16.msra.mxu1 %v3037_v3  ;;  %2823 = vmatpush3.bf16.msra.mxu0 %v3038_v4 }
 0x1c7   : > { %1686 = vmatmul.mubr.bf16.vlgmr.msra.gmra.mxu1 %v3674_v39  ;;  %1998 = vmatmul.mubr.bf16.vlgmr.msra.gmra.mxu0 %v3674_v39 }
 0x1c8   : > { %1693 = vmatprep.mubr.bf16.mxu1 %v3684_v48  ;;  %2005 = vmatprep.mubr.bf16.mxu0 %v3684_v48 }
 0x1cf   : > { %1694 = vmatmul.mubr.bf16.gmra.mxu1 %v3698_v55  ;;  %2006 = vmatmul.mubr.bf16.gmra.mxu0 %v3698_v55 }
 0x1d0   : > { %1701 = vmatprep.mubr.bf16.mxu1 %v3703_v28  ;;  %2013 = vmatprep.mubr.bf16.mxu0 %v3703_v28 }
 0x1d7   : > { %1702 = vmatmul.mubr.bf16.gmra.mxu1 %v3018_v51  ;;  %2014 = vmatmul.mubr.bf16.gmra.mxu0 %v3018_v51 }
 0x1d8   : > { %1709 = vmatprep.mubr.bf16.mxu1 %v2504_v63  ;;  %2021 = vmatprep.mubr.bf16.mxu0 %v2504_v63 }
 0x1df   : > { %1710 = vmatmul.mubr.bf16.gmra.mxu1 %v2503_v33  ;;  %2022 = vmatmul.mubr.bf16.gmra.mxu0 %v2503_v33 }
 0x1e0   : > { %1717 = vmatprep.mubr.bf16.mxu1 %v3665_v19  ;;  %2029 = vmatprep.mubr.bf16.mxu0 %v3665_v19 }
 0x1e7   : > { %1718 = vmatmul.mubr.bf16.gmra.mxu1 %v3679_v29  ;;  %2030 = vmatmul.mubr.bf16.gmra.mxu0 %v3679_v29 }
 0x1e8   : > { %1725 = vmatprep.mubr.bf16.mxu1 %v3686_v49  ;;  %2037 = vmatprep.mubr.bf16.mxu0 %v3686_v49 }
 0x1ef   : > { %1726 = vmatmul.mubr.bf16.gmra.mxu1 %v3692_v35  ;;  %2038 = vmatmul.mubr.bf16.gmra.mxu0 %v3692_v35 }
 0x1f0   : > { %1733 = vmatprep.mubr.bf16.mxu1 %v3706_v14  ;;  %2045 = vmatprep.mubr.bf16.mxu0 %v3706_v14 }
 0x1f7   : > { %1734 = vmatmul.mubr.bf16.gmra.mxu1 %v3712_v56  ;;  %2046 = vmatmul.mubr.bf16.gmra.mxu0 %v3712_v56 }
 0x1f8   : > { %1741 = vmatprep.mubr.bf16.mxu1 %v3028_v31  ;;  %2053 = vmatprep.mubr.bf16.mxu0 %v3028_v31 }
 0x1ff   : > { %1742 = vmatmul.mubr.bf16.gmra.mxu1 %v3030_v32  ;;  %2054 = vmatmul.mubr.bf16.gmra.mxu0 %v3030_v32 }
 0x267   : > { %v2696_v50 = vpop.f32.mrf.mxu0  ;;  %v2720_v60 = vpop.f32.mrf.mxu1 }
 0x269   : > { %v2697_v9 = vpop.f32.mrf.mxu0  ;;  %v2721_v23 = vpop.f32.mrf.mxu1 }
 0x26a   : > { %v2698_v52 = vadd.f32 %v2697_v9, %v2696_v50  ;;  %v2722_v53 = vadd.f32 %v2721_v23, %v2720_v60 }
 0x26b   : > { %v2699_v18 = vpop.f32.mrf.mxu0  ;;  %v2723_v19 = vpop.f32.mrf.mxu1 }
 0x26c   : > { %v1375_v36 = vadd.f32 %v2698_v52, %v3759_v59  ;;  %v1407_v7 = vadd.f32 %v2722_v53, %v3759_v59 }
 0x26d   : > { %v2700_v10 = vpop.f32.mrf.mxu0  ;;  %v2724_v37 = vpop.f32.mrf.mxu1 }
 0x26e   : > { %v2632_v61 = vpack.c.bf16 %v1375_v36, %v1375_v36  ;;  %v2640_v38 = vpack.c.bf16 %v1407_v7, %v1407_v7  ;;  %v2701_v39 = vadd.f32 %v2700_v10, %v2699_v18  ;;  %v2725_v2 = vadd.f32 %v2724_v37, %v2723_v19 }
 0x26f   : > { %v2702_v22 = vpop.f32.mrf.mxu0  ;;  %v2726_v8 = vpop.f32.mrf.mxu1 }
 0x270   : > { %1502 = vst.msk [vmem:[%s3240_s5] sm:$0xf] %vm1501_vm0, %v2632_v61  ;;  %1510 = vst.msk [vmem:[%s3240_s5 + $0x20] sm:$0xf] %vm1501_vm0, %v2640_v38  ;;  %v1378_v17 = vadd.f32 %v2701_v39, %v3759_v59  ;;  %v1410_v29 = vadd.f32 %v2725_v2, %v3759_v59 }
 0x271   : > { %v2703_v34 = vpop.f32.mrf.mxu0  ;;  %v2727_v5 = vpop.f32.mrf.mxu1 }
 0x272   : > { %v2633_v43 = vpack.c.bf16 %v1378_v17, %v1378_v17  ;;  %v2641_v24 = vpack.c.bf16 %v1410_v29, %v1410_v29  ;;  %v2704_v48 = vadd.f32 %v2703_v34, %v2702_v22  ;;  %v2728_v49 = vadd.f32 %v2727_v5, %v2726_v8  ;;  %v3810_v8 = vld [vmem:[%s3975_s25] ss:$0 sm:$0xff] }
 0x273   : > { %v2705_v45 = vpop.f32.mrf.mxu0  ;;  %v2729_v0 = vpop.f32.mrf.mxu1  ;;  %v3817_v29 = vld [vmem:[%s572_s28] ss:$0 sm:$0xff] }
 0x274   : > { %1503 = vst.msk [vmem:[%s3240_s5 + $0x4] sm:$0xf] %vm1501_vm0, %v2633_v43  ;;  %1511 = vst.msk [vmem:[%s3240_s5 + $0x24] sm:$0xf] %vm1501_vm0, %v2641_v24  ;;  %v1383_v35 = vadd.f32 %v2704_v48, %v3759_v59  ;;  %v1415_v40 = vadd.f32 %v2728_v49, %v3759_v59 }
 0x275   : > { %v2706_v54 = vpop.f32.mrf.mxu0  ;;  %v2730_v55 = vpop.f32.mrf.mxu1 }
 0x276   : > { %v2634_v25 = vpack.c.bf16 %v1383_v35, %v1383_v35  ;;  %v2642_v1 = vpack.c.bf16 %v1415_v40, %v1415_v40  ;;  %v2707_v6 = vadd.f32 %v2706_v54, %v2705_v45  ;;  %v2731_v28 = vadd.f32 %v2730_v55, %v2729_v0 }
 0x277   : > { %v2708_v41 = vpop.f32.mrf.mxu0  ;;  %v2732_v14 = vpop.f32.mrf.mxu1 }
 0x278   : > { %1504 = vst.msk [vmem:[%s3240_s5 + $0x8] sm:$0xf] %vm1501_vm0, %v2634_v25  ;;  %1512 = vst.msk [vmem:[%s3240_s5 + $0x28] sm:$0xf] %vm1501_vm0, %v2642_v1  ;;  %v1386_v15 = vadd.f32 %v2707_v6, %v3759_v59  ;;  %v1418_v46 = vadd.f32 %v2731_v28, %v3759_v59 }
 0x279   : > { %v2709_v51 = vpop.f32.mrf.mxu0  ;;  %v2733_v56 = vpop.f32.mrf.mxu1 }
 0x27a   : > { %v2635_v12 = vpack.c.bf16 %v1386_v15, %v1386_v15  ;;  %v2643_v13 = vpack.c.bf16 %v1418_v46, %v1418_v46  ;;  %v2710_v30 = vadd.f32 %v2709_v51, %v2708_v41  ;;  %v2734_v57 = vadd.f32 %v2733_v56, %v2732_v14 }
 0x27b   : > { %v2711_v58 = vpop.f32.mrf.mxu0  ;;  %v2735_v62 = vpop.f32.mrf.mxu1 }
 0x27c   : > { %1505 = vst.msk [vmem:[%s3240_s5 + $0xc] sm:$0xf] %vm1501_vm0, %v2635_v12  ;;  %1513 = vst.msk [vmem:[%s3240_s5 + $0x2c] sm:$0xf] %vm1501_vm0, %v2643_v13  ;;  %v1391_v20 = vadd.f32 %v2710_v30, %v3759_v59  ;;  %v1423_v21 = vadd.f32 %v2734_v57, %v3759_v59 }
 0x27d   : > { %v2712_v63 = vpop.f32.mrf.mxu0  ;;  %v2736_v31 = vpop.f32.mrf.mxu1 }
 0x27e   : > { %v2636_v47 = vpack.c.bf16 %v1391_v20, %v1391_v20  ;;  %v2644_v11 = vpack.c.bf16 %v1423_v21, %v1423_v21  ;;  %v2713_v16 = vadd.f32 %v2712_v63, %v2711_v58  ;;  %v2737_v32 = vadd.f32 %v2736_v31, %v2735_v62 }
 0x27f   : > { %v2714_v33 = vpop.f32.mrf.mxu0  ;;  %v2738_v42 = vpop.f32.mrf.mxu1 }
 0x280   : > { %1506 = vst.msk [vmem:[%s3240_s5 + $0x10] sm:$0xf] %vm1501_vm0, %v2636_v47  ;;  %1514 = vst.msk [vmem:[%s3240_s5 + $0x30] sm:$0xf] %vm1501_vm0, %v2644_v11  ;;  %v1394_v44 = vadd.f32 %v2713_v16, %v3759_v59  ;;  %v1426_v26 = vadd.f32 %v2737_v32, %v3759_v59 }
 0x281   : > { %v2715_v27 = vpop.f32.mrf.mxu0  ;;  %v2739_v3 = vpop.f32.mrf.mxu1 }
 0x282   : > { %v2637_v4 = vpack.c.bf16 %v1394_v44, %v1394_v44  ;;  %v2645_v50 = vpack.c.bf16 %v1426_v26, %v1426_v26  ;;  %v2716_v60 = vadd.f32 %v2715_v27, %v2714_v33  ;;  %v2740_v9 = vadd.f32 %v2739_v3, %v2738_v42 }
 0x283   : > { %v2717_v23 = vpop.f32.mrf.mxu0  ;;  %v2741_v52 = vpop.f32.mrf.mxu1 }
 0x284   : > { %1507 = vst.msk [vmem:[%s3240_s5 + $0x14] sm:$0xf] %vm1501_vm0, %v2637_v4  ;;  %1515 = vst.msk [vmem:[%s3240_s5 + $0x34] sm:$0xf] %vm1501_vm0, %v2645_v50  ;;  %v1399_v53 = vadd.f32 %v2716_v60, %v3759_v59  ;;  %v1431_v18 = vadd.f32 %v2740_v9, %v3759_v59 }
 0x285   : > { %v2718_v19 = vpop.f32.mrf.mxu0  ;;  %v2742_v36 = vpop.f32.mrf.mxu1 }
 0x286   : > { %v2638_v7 = vpack.c.bf16 %v1399_v53, %v1399_v53  ;;  %v2646_v10 = vpack.c.bf16 %v1431_v18, %v1431_v18  ;;  %v2719_v37 = vadd.f32 %v2718_v19, %v2717_v23  ;;  %v2743_v61 = vadd.f32 %v2742_v36, %v2741_v52 }
 0x287   : > { %v2760_v38 = vpop.f32.mrf.mxu1  ;;  %v2824_v39 = vpop.f32.mrf.mxu0 }
 0x288   : > { %1508 = vst.msk [vmem:[%s3240_s5 + $0x18] sm:$0xf] %vm1501_vm0, %v2638_v7  ;;  %1516 = vst.msk [vmem:[%s3240_s5 + $0x38] sm:$0xf] %vm1501_vm0, %v2646_v10  ;;  %v1402_v2 = vadd.f32 %v2719_v37, %v3759_v59  ;;  %v1434_v22 = vadd.f32 %v2743_v61, %v3759_v59 }
 0x289   : > { %v2761_v17 = vpop.f32.mrf.mxu1  ;;  %v2825_v34 = vpop.f32.mrf.mxu0 }
 0x28a   : > { %v2639_v5 = vpack.c.bf16 %v1402_v2, %v1402_v2  ;;  %v2647_v43 = vpack.c.bf16 %v1434_v22, %v1434_v22  ;;  %v2762_v24 = vadd.f32 %v2761_v17, %v2760_v38  ;;  %v2826_v48 = vadd.f32 %v2825_v34, %v2824_v39 }
 0x28b   : > { %v2763_v59 = vpop.f32.mrf.mxu1  ;;  %v2827_v49 = vpop.f32.mrf.mxu0 }
 0x28c   : > { %1509 = vst.msk [vmem:[%s3240_s5 + $0x1c] sm:$0xf] %vm1501_vm0, %v2639_v5  ;;  %1517 = vst.msk [vmem:[%s3240_s5 + $0x3c] sm:$0xf] %vm1501_vm0, %v2647_v43  ;;  %v1688_v45 = vadd.f32 %v2762_v24, %v3810_v8  ;;  %v2000_v0 = vadd.f32 %v2826_v48, %v3817_v29 }
 0x28d   : > { %v2764_v35 = vpop.f32.mrf.mxu1  ;;  %v2828_v40 = vpop.f32.mrf.mxu0 }
 0x28e   : > { %v2648_v54 = vpack.c.bf16 %v1688_v45, %v1688_v45  ;;  %v2664_v55 = vpack.c.bf16 %v2000_v0, %v2000_v0  ;;  %v2765_v25 = vadd.f32 %v2764_v35, %v2763_v59  ;;  %v2829_v1 = vadd.f32 %v2828_v40, %v2827_v49 }
 0x28f   : > { %v2766_v6 = vpop.f32.mrf.mxu1  ;;  %v2830_v28 = vpop.f32.mrf.mxu0 }
 0x290   : > { %1814 = vst.msk [vmem:[%s3245_s20] sm:$0xf] %vm1501_vm0, %v2648_v54  ;;  %2126 = vst.msk [vmem:[%s3250_s19] sm:$0xf] %vm1501_vm0, %v2664_v55  ;;  %v1691_v41 = vadd.f32 %v2765_v25, %v3810_v8  ;;  %v2003_v14 = vadd.f32 %v2829_v1, %v3817_v29 }
 0x291   : > { %v2767_v15 = vpop.f32.mrf.mxu1  ;;  %v2831_v46 = vpop.f32.mrf.mxu0 }
 0x292   : > { %v2649_v51 = vpack.c.bf16 %v1691_v41, %v1691_v41  ;;  %v2665_v56 = vpack.c.bf16 %v2003_v14, %v2003_v14  ;;  %v2768_v12 = vadd.f32 %v2767_v15, %v2766_v6  ;;  %v2832_v13 = vadd.f32 %v2831_v46, %v2830_v28 }
 0x293   : > { %v2769_v30 = vpop.f32.mrf.mxu1  ;;  %v2833_v57 = vpop.f32.mrf.mxu0 }
 0x294   : > { %1815 = vst.msk [vmem:[%s3245_s20 + $0x4] sm:$0xf] %vm1501_vm0, %v2649_v51  ;;  %2127 = vst.msk [vmem:[%s3250_s19 + $0x4] sm:$0xf] %vm1501_vm0, %v2665_v56  ;;  %v1696_v58 = vadd.f32 %v2768_v12, %v3810_v8  ;;  %v2008_v62 = vadd.f32 %v2832_v13, %v3817_v29 }
 0x295   : > { %v2770_v20 = vpop.f32.mrf.mxu1  ;;  %v2834_v21 = vpop.f32.mrf.mxu0 }
 0x296   : > { %v2650_v63 = vpack.c.bf16 %v1696_v58, %v1696_v58  ;;  %v2666_v31 = vpack.c.bf16 %v2008_v62, %v2008_v62  ;;  %v2771_v47 = vadd.f32 %v2770_v20, %v2769_v30  ;;  %v2835_v11 = vadd.f32 %v2834_v21, %v2833_v57 }
 0x297   : > { %v2772_v16 = vpop.f32.mrf.mxu1  ;;  %v2836_v32 = vpop.f32.mrf.mxu0 }
 0x298   : > { %1816 = vst.msk [vmem:[%s3245_s20 + $0x8] sm:$0xf] %vm1501_vm0, %v2650_v63  ;;  %2128 = vst.msk [vmem:[%s3250_s19 + $0x8] sm:$0xf] %vm1501_vm0, %v2666_v31  ;;  %v1699_v33 = vadd.f32 %v2771_v47, %v3810_v8  ;;  %v2011_v42 = vadd.f32 %v2835_v11, %v3817_v29 }
 0x299   : > { %v2773_v44 = vpop.f32.mrf.mxu1  ;;  %v2837_v26 = vpop.f32.mrf.mxu0 }
 0x29a   : > { %v2651_v27 = vpack.c.bf16 %v1699_v33, %v1699_v33  ;;  %v2667_v3 = vpack.c.bf16 %v2011_v42, %v2011_v42  ;;  %v2774_v4 = vadd.f32 %v2773_v44, %v2772_v16  ;;  %v2838_v50 = vadd.f32 %v2837_v26, %v2836_v32 }
 0x29b   : > { %v2775_v60 = vpop.f32.mrf.mxu1  ;;  %v2839_v9 = vpop.f32.mrf.mxu0 }
 0x29c   : > { %1817 = vst.msk [vmem:[%s3245_s20 + $0xc] sm:$0xf] %vm1501_vm0, %v2651_v27  ;;  %2129 = vst.msk [vmem:[%s3250_s19 + $0xc] sm:$0xf] %vm1501_vm0, %v2667_v3  ;;  %v1704_v23 = vadd.f32 %v2774_v4, %v3810_v8  ;;  %v2016_v52 = vadd.f32 %v2838_v50, %v3817_v29 }
 0x29d   : > { %v2776_v53 = vpop.f32.mrf.mxu1  ;;  %v2840_v18 = vpop.f32.mrf.mxu0 }
 0x29e   : > { %v2652_v19 = vpack.c.bf16 %v1704_v23, %v1704_v23  ;;  %v2668_v36 = vpack.c.bf16 %v2016_v52, %v2016_v52  ;;  %v2777_v7 = vadd.f32 %v2776_v53, %v2775_v60  ;;  %v2841_v10 = vadd.f32 %v2840_v18, %v2839_v9 }
 0x29f   : > { %v2778_v37 = vpop.f32.mrf.mxu1  ;;  %v2842_v61 = vpop.f32.mrf.mxu0 }
 0x2a0   : > { %1818 = vst.msk [vmem:[%s3245_s20 + $0x10] sm:$0xf] %vm1501_vm0, %v2652_v19  ;;  %2130 = vst.msk [vmem:[%s3250_s19 + $0x10] sm:$0xf] %vm1501_vm0, %v2668_v36  ;;  %v1707_v38 = vadd.f32 %v2777_v7, %v3810_v8  ;;  %v2019_v39 = vadd.f32 %v2841_v10, %v3817_v29 }
 0x2a1   : > { %v2779_v2 = vpop.f32.mrf.mxu1  ;;  %v2843_v22 = vpop.f32.mrf.mxu0 }
 0x2a2   : > { %v2653_v17 = vpack.c.bf16 %v1707_v38, %v1707_v38  ;;  %v2669_v34 = vpack.c.bf16 %v2019_v39, %v2019_v39  ;;  %v2780_v5 = vadd.f32 %v2779_v2, %v2778_v37  ;;  %v2844_v43 = vadd.f32 %v2843_v22, %v2842_v61 }
 0x2a3   : > { %v2781_v24 = vpop.f32.mrf.mxu1  ;;  %v2845_v48 = vpop.f32.mrf.mxu0 }
 0x2a4   : > { %1819 = vst.msk [vmem:[%s3245_s20 + $0x14] sm:$0xf] %vm1501_vm0, %v2653_v17  ;;  %2131 = vst.msk [vmem:[%s3250_s19 + $0x14] sm:$0xf] %vm1501_vm0, %v2669_v34  ;;  %v1712_v59 = vadd.f32 %v2780_v5, %v3810_v8  ;;  %v2024_v49 = vadd.f32 %v2844_v43, %v3817_v29 }
 0x2a5   : > { %v2782_v45 = vpop.f32.mrf.mxu1  ;;  %v2846_v0 = vpop.f32.mrf.mxu0 }
 0x2a6   : > { %v2654_v35 = vpack.c.bf16 %v1712_v59, %v1712_v59  ;;  %v2670_v40 = vpack.c.bf16 %v2024_v49, %v2024_v49  ;;  %v2783_v54 = vadd.f32 %v2782_v45, %v2781_v24  ;;  %v2847_v55 = vadd.f32 %v2846_v0, %v2845_v48 }
 0x2a7   : > { %v2784_v25 = vpop.f32.mrf.mxu1  ;;  %v2848_v1 = vpop.f32.mrf.mxu0 }
 0x2a8   : > { %1820 = vst.msk [vmem:[%s3245_s20 + $0x18] sm:$0xf] %vm1501_vm0, %v2654_v35  ;;  %2132 = vst.msk [vmem:[%s3250_s19 + $0x18] sm:$0xf] %vm1501_vm0, %v2670_v40  ;;  %v1715_v6 = vadd.f32 %v2783_v54, %v3810_v8  ;;  %v2027_v28 = vadd.f32 %v2847_v55, %v3817_v29 }
 0x2a9   : > { %v2785_v41 = vpop.f32.mrf.mxu1  ;;  %v2849_v14 = vpop.f32.mrf.mxu0 }
 0x2aa   : > { %v2655_v15 = vpack.c.bf16 %v1715_v6, %v1715_v6  ;;  %v2671_v46 = vpack.c.bf16 %v2027_v28, %v2027_v28  ;;  %v2786_v51 = vadd.f32 %v2785_v41, %v2784_v25  ;;  %v2850_v56 = vadd.f32 %v2849_v14, %v2848_v1 }
 0x2ab   : > { %v2787_v12 = vpop.f32.mrf.mxu1  ;;  %v2851_v13 = vpop.f32.mrf.mxu0 }
 0x2ac   : > { %1821 = vst.msk [vmem:[%s3245_s20 + $0x1c] sm:$0xf] %vm1501_vm0, %v2655_v15  ;;  %2133 = vst.msk [vmem:[%s3250_s19 + $0x1c] sm:$0xf] %vm1501_vm0, %v2671_v46  ;;  %v1720_v30 = vadd.f32 %v2786_v51, %v3810_v8  ;;  %v2032_v57 = vadd.f32 %v2850_v56, %v3817_v29 }
 0x2ad   : > { %v2788_v58 = vpop.f32.mrf.mxu1  ;;  %v2852_v62 = vpop.f32.mrf.mxu0 }
 0x2ae   : > { %v2656_v20 = vpack.c.bf16 %v1720_v30, %v1720_v30  ;;  %v2672_v21 = vpack.c.bf16 %v2032_v57, %v2032_v57  ;;  %v2789_v63 = vadd.f32 %v2788_v58, %v2787_v12  ;;  %v2853_v31 = vadd.f32 %v2852_v62, %v2851_v13 }
 0x2af   : > { %v2790_v47 = vpop.f32.mrf.mxu1  ;;  %v2854_v11 = vpop.f32.mrf.mxu0 }
 0x2b0   : > { %1822 = vst.msk [vmem:[%s3245_s20 + $0x20] sm:$0xf] %vm1501_vm0, %v2656_v20  ;;  %2134 = vst.msk [vmem:[%s3250_s19 + $0x20] sm:$0xf] %vm1501_vm0, %v2672_v21  ;;  %v1723_v16 = vadd.f32 %v2789_v63, %v3810_v8  ;;  %v2035_v32 = vadd.f32 %v2853_v31, %v3817_v29 }
 0x2b1   : > { %v2791_v33 = vpop.f32.mrf.mxu1  ;;  %v2855_v42 = vpop.f32.mrf.mxu0 }
 0x2b2   : > { %v2657_v44 = vpack.c.bf16 %v1723_v16, %v1723_v16  ;;  %v2673_v26 = vpack.c.bf16 %v2035_v32, %v2035_v32  ;;  %v2792_v27 = vadd.f32 %v2791_v33, %v2790_v47  ;;  %v2856_v3 = vadd.f32 %v2855_v42, %v2854_v11 }
 0x2b3   : > { %v2793_v4 = vpop.f32.mrf.mxu1  ;;  %v2857_v50 = vpop.f32.mrf.mxu0 }
 0x2b4   : > { %1823 = vst.msk [vmem:[%s3245_s20 + $0x24] sm:$0xf] %vm1501_vm0, %v2657_v44  ;;  %2135 = vst.msk [vmem:[%s3250_s19 + $0x24] sm:$0xf] %vm1501_vm0, %v2673_v26  ;;  %v1728_v60 = vadd.f32 %v2792_v27, %v3810_v8  ;;  %v2040_v9 = vadd.f32 %v2856_v3, %v3817_v29 }
 0x2b5   : > { %v2794_v23 = vpop.f32.mrf.mxu1  ;;  %v2858_v52 = vpop.f32.mrf.mxu0 }
 0x2b6   : > { %v2658_v53 = vpack.c.bf16 %v1728_v60, %v1728_v60  ;;  %v2674_v18 = vpack.c.bf16 %v2040_v9, %v2040_v9  ;;  %v2795_v19 = vadd.f32 %v2794_v23, %v2793_v4  ;;  %v2859_v36 = vadd.f32 %v2858_v52, %v2857_v50 }
 0x2b7   : > { %v2796_v7 = vpop.f32.mrf.mxu1  ;;  %v2860_v10 = vpop.f32.mrf.mxu0 }
 0x2b8   : > { %1824 = vst.msk [vmem:[%s3245_s20 + $0x28] sm:$0xf] %vm1501_vm0, %v2658_v53  ;;  %2136 = vst.msk [vmem:[%s3250_s19 + $0x28] sm:$0xf] %vm1501_vm0, %v2674_v18  ;;  %v1731_v37 = vadd.f32 %v2795_v19, %v3810_v8  ;;  %v2043_v61 = vadd.f32 %v2859_v36, %v3817_v29 }
 0x2b9   : > { %v2797_v38 = vpop.f32.mrf.mxu1  ;;  %v2861_v39 = vpop.f32.mrf.mxu0 }
 0x2ba   : > { %v2659_v2 = vpack.c.bf16 %v1731_v37, %v1731_v37  ;;  %v2675_v22 = vpack.c.bf16 %v2043_v61, %v2043_v61  ;;  %v2798_v17 = vadd.f32 %v2797_v38, %v2796_v7  ;;  %v2862_v34 = vadd.f32 %v2861_v39, %v2860_v10 }
 0x2bb   : > { %v2799_v5 = vpop.f32.mrf.mxu1  ;;  %v2863_v43 = vpop.f32.mrf.mxu0 }
 0x2bc   : > { %1825 = vst.msk [vmem:[%s3245_s20 + $0x2c] sm:$0xf] %vm1501_vm0, %v2659_v2  ;;  %2137 = vst.msk [vmem:[%s3250_s19 + $0x2c] sm:$0xf] %vm1501_vm0, %v2675_v22  ;;  %v1736_v24 = vadd.f32 %v2798_v17, %v3810_v8  ;;  %v2048_v48 = vadd.f32 %v2862_v34, %v3817_v29 }
 0x2bd   : > { %v2800_v59 = vpop.f32.mrf.mxu1  ;;  %v2864_v49 = vpop.f32.mrf.mxu0 }
 0x2be   : > { %v2660_v45 = vpack.c.bf16 %v1736_v24, %v1736_v24  ;;  %v2676_v0 = vpack.c.bf16 %v2048_v48, %v2048_v48  ;;  %v2801_v35 = vadd.f32 %v2800_v59, %v2799_v5  ;;  %v2865_v40 = vadd.f32 %v2864_v49, %v2863_v43 }
 0x2bf   : > { %v2802_v54 = vpop.f32.mrf.mxu1  ;;  %v2866_v55 = vpop.f32.mrf.mxu0 }
 0x2c0   : > { %1826 = vst.msk [vmem:[%s3245_s20 + $0x30] sm:$0xf] %vm1501_vm0, %v2660_v45  ;;  %2138 = vst.msk [vmem:[%s3250_s19 + $0x30] sm:$0xf] %vm1501_vm0, %v2676_v0  ;;  %v1739_v25 = vadd.f32 %v2801_v35, %v3810_v8  ;;  %v2051_v1 = vadd.f32 %v2865_v40, %v3817_v29 }
 0x2c1   : > { %v2803_v6 = vpop.f32.mrf.mxu1  ;;  %v2867_v28 = vpop.f32.mrf.mxu0 }
 0x2c2   : > { %v2661_v41 = vpack.c.bf16 %v1739_v25, %v1739_v25  ;;  %v2677_v14 = vpack.c.bf16 %v2051_v1, %v2051_v1  ;;  %v2804_v15 = vadd.f32 %v2803_v6, %v2802_v54  ;;  %v2868_v46 = vadd.f32 %v2867_v28, %v2866_v55 }
 0x2c3   : > { %v2805_v51 = vpop.f32.mrf.mxu1  ;;  %v2869_v56 = vpop.f32.mrf.mxu0 }
 0x2c4   : > { %1827 = vst.msk [vmem:[%s3245_s20 + $0x34] sm:$0xf] %vm1501_vm0, %v2661_v41  ;;  %2139 = vst.msk [vmem:[%s3250_s19 + $0x34] sm:$0xf] %vm1501_vm0, %v2677_v14  ;;  %v1744_v12 = vadd.f32 %v2804_v15, %v3810_v8  ;;  %v2056_v13 = vadd.f32 %v2868_v46, %v3817_v29 }
 0x2c5   : > { %v2806_v30 = vpop.f32.mrf.mxu1  ;;  %v2870_v57 = vpop.f32.mrf.mxu0 }
 0x2c6   : > { %v2662_v58 = vpack.c.bf16 %v1744_v12, %v1744_v12  ;;  %v2678_v62 = vpack.c.bf16 %v2056_v13, %v2056_v13  ;;  %v2807_v20 = vadd.f32 %v2806_v30, %v2805_v51  ;;  %v2871_v21 = vadd.f32 %v2870_v57, %v2869_v56 }
 0x2c8   : > { %1828 = vst.msk [vmem:[%s3245_s20 + $0x38] sm:$0xf] %vm1501_vm0, %v2662_v58  ;;  %2140 = vst.msk [vmem:[%s3250_s19 + $0x38] sm:$0xf] %vm1501_vm0, %v2678_v62  ;;  %v1747_v63 = vadd.f32 %v2807_v20, %v3810_v8  ;;  %v2059_v31 = vadd.f32 %v2871_v21, %v3817_v29 }
 0x2ca   : > { %v2663_v47 = vpack.c.bf16 %v1747_v63, %v1747_v63  ;;  %v2679_v11 = vpack.c.bf16 %v2059_v31, %v2059_v31 }
 0x2cc   : > { %1829 = vst.msk [vmem:[%s3245_s20 + $0x3c] sm:$0xf] %vm1501_vm0, %v2663_v47  ;;  %2141 = vst.msk [vmem:[%s3250_s19 + $0x3c] sm:$0xf] %vm1501_vm0, %v2679_v11 }
 0x2cd PF: > { %s3976_s5 = sld [smem:[#allocation6_spill]] }
 0x2ce   : > { %s3977_s17 = sld [smem:[#allocation3_spill]] }
 0x2cf   : > { %s3978_s18 = sld [smem:[#allocation4_spill]] }
 0x2d0   : > { %s3979_s19 = sld [smem:[#allocation5_spill]] }
 0x2d1   : > { %s3980_s20 = sld [smem:[#allocation7_spill]] }
 0x2d2   : > { %s3981_s21 = sld [smem:[#allocation8_spill]] }
 0x2d3   : > { %s22_s23 = sadd.s32 1, %s3976_s5   ;;  %s3982_s22 = sld [smem:[#allocation9_spill]] }
 0x2d4   : > { %p19_p10 = scmp.ge.s32.totalorder %s22_s23, 18  }
 0x2d6   :  { %21 = sbr.rel (!%p19_p10) target bundleno = 6 (0x6), region = 132 }

// kernel: opt_decoder_layer.7
= control target key start
LH: loop header
LB: loop body
LE: loop exit
PB: predicated region body
PF: predicated region fallthrough
CT: control target
= control target key end

     0   :  { %s5102_s0 = inlined_call_operand.vmem [shape: f32[512,256], index: 0, kind: input, shape index: {}, may-alias: {0,7}]   ;;  %s5103_s1 = inlined_call_operand.vmem [shape: f32[1,256], index: 1, kind: input, shape index: {}]   ;;  %s5104_s2 = inlined_call_operand.vmem [shape: f32[1,256], index: 2, kind: input, shape index: {}]   ;;  %s5105_s3 = inlined_call_operand.vmem [shape: bf16[256,512], index: 3, kind: input, shape index: {}]   ;;  %s5106_s4 = inlined_call_operand.vmem [shape: f32[1,512], index: 4, kind: input, shape index: {}]   ;;  %s5107_s5 = inlined_call_operand.vmem [shape: bf16[512,256], index: 5, kind: input, shape index: {}]   ;;  %s5108_s6 = inlined_call_operand.vmem [shape: f32[1,256], index: 6, kind: input, shape index: {}]   ;;  %s5109_s7 = inlined_call_operand.vmem [shape: f32[512,256], index: 7, kind: output, shape index: {}, may-alias: {0,7}]  }
   0x1   :  { %5210 = sst [smem:[#allocation56_spill]] %s5105_s3 }
   0x2   :  { %s3532_s24 = smov 0   ;;  %s3534_s25 = smov 0  }
   0x3   :  { %s3536_s26 = smov 0   ;;  %s3538_s27 = smov 0  }
   0x4   :  { %s3540_s28 = smov 0   ;;  %s3542_s29 = smov 0  }
   0x5   :  { %s3544_s30 = smov 0  }
   0x6 LB: > { %s26_s8 = sadd.s32 1, %s3482_s28  ;;  %s29_s9 = sadd.s32 1, %s3486_s29  ;;  %s3490_s30 = sphi %s3544_s30, %s17_s30   ;;  %s3486_s29 = sphi %s3542_s29, %s5379_s29   ;;  %s3482_s28 = sphi %s3540_s28, %s5378_s28   ;;  %s3478_s27 = sphi %s3538_s27, %s5377_s27   ;;  %s3474_s26 = sphi %s3536_s26, %s5376_s26   ;;  %s3470_s25 = sphi %s3534_s25, %s5375_s25   ;;  %s3466_s24 = sphi %s3532_s24, %s5374_s24  }
   0x7   : > { %p27_p0 = scmp.ge.s32.totalorder %s26_s8, 2  ;;  %s104_s10 = sadd.s32 1, %s3470_s25 }
   0x8   : > { %p111_p1 = scmp.ne.s32.totalorder %s3470_s25, %s3466_s24  ;;  %p112_p2 = scmp.eq.s32.totalorder %s3490_s30, 0 }
   0x9   : > { %s5381_s8 = smov (%p27_p0, %s26_s8), 0  ;;  %s5383_s9 = smov (!%p27_p0, %s29_s9), %s3486_s29 }
   0xa   : > { %s101_s11 = ssub.s32 %s3482_s28, %s5381_s8  ;;  %p113_p3 = por %p112_p2, %p111_p1 }
   0xb   : > { %p31_p4 = scmp.ge.s32.totalorder %s5383_s9, 2  ;;  %p102_p5 = scmp.eq.s32.totalorder %s101_s11, 0 }
   0xc   : > { %p2995_p6 = scmp.ge.s32.totalorder %s3490_s30, 4 }
   0xd   : > { %s5385_s9 = smov (%p31_p4, %s5383_s9), 0 }
   0xe   : > { %s3581_s12 = scalar_select %p102_p5, %s3470_s25, %s104_s10  }
   0xf   : > { %245 = sbr.rel (%p2995_p6) target bundleno = 46 (0x2e), region = 28 }
  0x14   : > { %258 = sbr.rel (!%p113_p3) target bundleno = 46 (0x2e), region = 36  ;;  %s260_s13 = sand.u32 (%p113_p3), 1, %s3470_s25  }
  0x15   : > { %s3142_s14 = sshll.u32 (%p113_p3), %s3482_s28, 3  ;;  %s2996_s15 = sshll.u32 (%p113_p3), %s260_s13, 8 }
  0x16   : > { %s5211_s3 = sld [smem:[#allocation56_spill]] (%p113_p3)  ;;  %s3594_s19 = scalar_lea.vmem (%p113_p3), [#allocation3], %s2996_s15 }
  0x1c   : > { %s3589_s18 = scalar_lea.vmem %s5211_s3, %s3142_s14 }
  0x1d   : > { %v356_v0 = vld [vmem:[%s3589_s18] sm:$0xff]  ;;  %v358_v1 = vld [vmem:[%s3589_s18 + $0x10] sm:$0xff] }
  0x1e   : > { %v360_v2 = vld [vmem:[%s3589_s18 + $0x20] sm:$0xff]  ;;  %357 = vst [vmem:[%s3594_s19] sm:$0xff] %v356_v0  ;;  %359 = vst [vmem:[%s3594_s19 + $0x8] sm:$0xff] %v358_v1  ;;  %v362_v3 = vld [vmem:[%s3589_s18 + $0x30] sm:$0xff] }
  0x1f   : > { %361 = vst [vmem:[%s3594_s19 + $0x10] sm:$0xff] %v360_v2  ;;  %v364_v4 = vld [vmem:[%s3589_s18 + $0x40] sm:$0xff]  ;;  %v366_v5 = vld [vmem:[%s3589_s18 + $0x50] sm:$0xff]  ;;  %363 = vst [vmem:[%s3594_s19 + $0x18] sm:$0xff] %v362_v3 }
  0x20   : > { %365 = vst [vmem:[%s3594_s19 + $0x20] sm:$0xff] %v364_v4  ;;  %367 = vst [vmem:[%s3594_s19 + $0x28] sm:$0xff] %v366_v5  ;;  %v368_v6 = vld [vmem:[%s3589_s18 + $0x60] sm:$0xff]  ;;  %v370_v7 = vld [vmem:[%s3589_s18 + $0x70] sm:$0xff] }
  0x21   : > { %v372_v8 = vld [vmem:[%s3589_s18 + $0x80] sm:$0xff]  ;;  %369 = vst [vmem:[%s3594_s19 + $0x30] sm:$0xff] %v368_v6  ;;  %371 = vst [vmem:[%s3594_s19 + $0x38] sm:$0xff] %v370_v7  ;;  %v374_v9 = vld [vmem:[%s3589_s18 + $0x90] sm:$0xff] }
  0x22   : > { %373 = vst [vmem:[%s3594_s19 + $0x40] sm:$0xff] %v372_v8  ;;  %v376_v10 = vld [vmem:[%s3589_s18 + $0xa0] sm:$0xff]  ;;  %v378_v11 = vld [vmem:[%s3589_s18 + $0xb0] sm:$0xff]  ;;  %375 = vst [vmem:[%s3594_s19 + $0x48] sm:$0xff] %v374_v9 }
  0x23   : > { %377 = vst [vmem:[%s3594_s19 + $0x50] sm:$0xff] %v376_v10  ;;  %379 = vst [vmem:[%s3594_s19 + $0x58] sm:$0xff] %v378_v11  ;;  %v380_v12 = vld [vmem:[%s3589_s18 + $0xc0] sm:$0xff]  ;;  %v382_v13 = vld [vmem:[%s3589_s18 + $0xd0] sm:$0xff] }
  0x24   : > { %v384_v14 = vld [vmem:[%s3589_s18 + $0xe0] sm:$0xff]  ;;  %381 = vst [vmem:[%s3594_s19 + $0x60] sm:$0xff] %v380_v12  ;;  %383 = vst [vmem:[%s3594_s19 + $0x68] sm:$0xff] %v382_v13  ;;  %v386_v15 = vld [vmem:[%s3589_s18 + $0xf0] sm:$0xff] }
  0x25   : > { %385 = vst [vmem:[%s3594_s19 + $0x70] sm:$0xff] %v384_v14  ;;  %v388_v16 = vld [vmem:[%s3589_s18 + $0x100] sm:$0xff]  ;;  %v390_v17 = vld [vmem:[%s3589_s18 + $0x110] sm:$0xff]  ;;  %387 = vst [vmem:[%s3594_s19 + $0x78] sm:$0xff] %v386_v15 }
  0x26   : > { %389 = vst [vmem:[%s3594_s19 + $0x80] sm:$0xff] %v388_v16  ;;  %391 = vst [vmem:[%s3594_s19 + $0x88] sm:$0xff] %v390_v17  ;;  %v392_v18 = vld [vmem:[%s3589_s18 + $0x120] sm:$0xff]  ;;  %v394_v19 = vld [vmem:[%s3589_s18 + $0x130] sm:$0xff] }
  0x27   : > { %v396_v20 = vld [vmem:[%s3589_s18 + $0x140] sm:$0xff]  ;;  %393 = vst [vmem:[%s3594_s19 + $0x90] sm:$0xff] %v392_v18  ;;  %395 = vst [vmem:[%s3594_s19 + $0x98] sm:$0xff] %v394_v19  ;;  %v398_v21 = vld [vmem:[%s3589_s18 + $0x150] sm:$0xff] }
  0x28   : > { %397 = vst [vmem:[%s3594_s19 + $0xa0] sm:$0xff] %v396_v20  ;;  %v400_v22 = vld [vmem:[%s3589_s18 + $0x160] sm:$0xff]  ;;  %v402_v23 = vld [vmem:[%s3589_s18 + $0x170] sm:$0xff]  ;;  %399 = vst [vmem:[%s3594_s19 + $0xa8] sm:$0xff] %v398_v21 }
  0x29   : > { %401 = vst [vmem:[%s3594_s19 + $0xb0] sm:$0xff] %v400_v22  ;;  %403 = vst [vmem:[%s3594_s19 + $0xb8] sm:$0xff] %v402_v23  ;;  %v404_v24 = vld [vmem:[%s3589_s18 + $0x180] sm:$0xff]  ;;  %v406_v25 = vld [vmem:[%s3589_s18 + $0x190] sm:$0xff] }
  0x2a   : > { %v408_v26 = vld [vmem:[%s3589_s18 + $0x1a0] sm:$0xff]  ;;  %405 = vst [vmem:[%s3594_s19 + $0xc0] sm:$0xff] %v404_v24  ;;  %407 = vst [vmem:[%s3594_s19 + $0xc8] sm:$0xff] %v406_v25  ;;  %v410_v27 = vld [vmem:[%s3589_s18 + $0x1b0] sm:$0xff] }
  0x2b   : > { %409 = vst [vmem:[%s3594_s19 + $0xd0] sm:$0xff] %v408_v26  ;;  %v412_v28 = vld [vmem:[%s3589_s18 + $0x1c0] sm:$0xff]  ;;  %v414_v29 = vld [vmem:[%s3589_s18 + $0x1d0] sm:$0xff]  ;;  %411 = vst [vmem:[%s3594_s19 + $0xd8] sm:$0xff] %v410_v27 }
  0x2c   : > { %413 = vst [vmem:[%s3594_s19 + $0xe0] sm:$0xff] %v412_v28  ;;  %415 = vst [vmem:[%s3594_s19 + $0xe8] sm:$0xff] %v414_v29  ;;  %v416_v30 = vld [vmem:[%s3589_s18 + $0x1e0] sm:$0xff]  ;;  %v418_v31 = vld [vmem:[%s3589_s18 + $0x1f0] sm:$0xff] }
  0x2d   : > { %417 = vst [vmem:[%s3594_s19 + $0xf0] sm:$0xff] %v416_v30  ;;  %419 = vst [vmem:[%s3594_s19 + $0xf8] sm:$0xff] %v418_v31 }
  0x2e PF: > { %p2999_p7 = scmp.ge.s32.totalorder %s3490_s30, 1  ;;  %p442_p8 = scmp.lt.s32.totalorder %s3490_s30, 5 }
  0x30   : > { %p443_p9 = pnand %p2999_p7, %p442_p8 }
  0x31   : > { %s449_s20 = sand.u32 (!%p443_p9), 1, %s3466_s24   ;;  %s3001_s21 = sshll.u32 (!%p443_p9), %s3478_s27, 5 }
  0x32   : > { %446 = sbr.rel (%p443_p9) target bundleno = 1069 (0x42d), region = 82  ;;  %s3000_s22 = sshll.u32 (!%p443_p9), %s449_s20, 8 }
  0x33   : > { %p498_p10 = scmp.lt.s32.totalorder (!%p443_p9), %s3001_s21, 63  ;;  %s3004_s23 = sshll.u32 (!%p443_p9), %s3474_s26, 1 }
  0x34   : > { %p506_p11 = scmp.lt.s32.totalorder (!%p443_p9), %s3004_s23, 3  ;;  %s3005_s10 = sshll.u32 (!%p443_p9), %s3474_s26, 5 }
  0x35   : > { %p511_p12 = scmp.lt.s32.totalorder (!%p443_p9), %s3005_s10, 63  ;;  %s3684_s14 = scalar_lea.vmem (!%p443_p9), [#allocation3], %s3000_s22 }
  0x36   : > { %p3011_p13 = scmp.ne.s32.totalorder (!%p443_p9), %s3474_s26, 0 }
  0x37   : > { %s5387_s21 = smov (!%p498_p10, %s3001_s21), 63  ;;  %s5389_s23 = smov (!%p506_p11, %s3004_s23), 3 }
  0x38   : > { %s3143_s11 = sshll.u32 %s5387_s21, 4  ;;  %s5391_s10 = smov (!%p511_p12, %s3005_s10), 63 }
  0x39   : > { %s3666_s15 = scalar_lea.vmem %s5102_s0, %s3143_s11  ;;  %s3671_s18 = scalar_lea.vmem %s5109_s7, %s3143_s11 }
  0x3a   : > { %s508_s19 = scalar_lea.vmem %s5106_s4, %s5389_s23  ;;  %s3144_s20 = sshll.u32 %s5391_s10, 3 }
  0x3b   : > { %s3682_s13 = scalar_lea.vmem %s5107_s5, %s3144_s20  ;;  %527 = sbr.rel (%p3011_p13) target bundleno = 476 (0x1dc), region = 90 }
  0x40   : > { %v3688_v32 = vld [vmem:[%s3666_s15] sm:$0xff]  ;;  %v3691_v33 = vld [vmem:[%s3666_s15 + $0x8] sm:$0xff]  ;;  %v1108_v34 = vlaneseq  ;;  %v3705_v39 = vld [vmem:[%s3666_s15 + $0x10] sm:$0xff] }
  0x41   : > { %5212 = vst [vmem:[#allocation4_spill] sm:$0xff] %v3688_v32  ;;  %5213 = vst [vmem:[#allocation5_spill] sm:$0xff] %v3691_v33  ;;  %v594_v35 = vadd.f32 %v3691_v33, %v3688_v32  ;;  %v1481_v36 = vld [vmem:[%s5108_s6] sm:$0x3]  ;;  %v3702_v38 = vld [vmem:[%s3666_s15 + $0x28] sm:$0xff] }
  0x42   : > { %v3699_v37 = vld [vmem:[%s3666_s15 + $0x20] sm:$0xff]  ;;  %5215 = vst [vmem:[#allocation7_spill] sm:$0xff] %v3702_v38  ;;  %5216 = vst [vmem:[#allocation8_spill] sm:$0xff] %v3705_v39  ;;  %v1109_v40 = vshrl.u32 %v1108_v34, 7  ;;  %v3710_v42 = vld [vmem:[%s3666_s15 + $0x18] sm:$0xff] }
  0x43   : > { %5214 = vst [vmem:[#allocation6_spill] sm:$0xff] %v3699_v37  ;;  %v600_v41 = vadd.f32 %v3702_v38, %v3699_v37  ;;  %5217 = vst [vmem:[#allocation9_spill] sm:$0xff] %v3710_v42  ;;  %v3713_v43 = vld [vmem:[%s3666_s15 + $0x30] sm:$0xff]  ;;  %v3716_v44 = vld [vmem:[%s3666_s15 + $0x38] sm:$0xff]  ;;  %595 = vadd.xlane.f32.xlu0 %v594_v35  ;;  %v597_v45 = vadd.f32 %v3710_v42, %v3705_v39 }
  0x44   : > { %5218 = vst [vmem:[#allocation10_spill] sm:$0xff] %v3713_v43  ;;  %5219 = vst [vmem:[#allocation11_spill] sm:$0xff] %v3716_v44  ;;  %v3721_v46 = vld [vmem:[%s3666_s15 + $0x40] sm:$0xff]  ;;  %v3724_v47 = vld [vmem:[%s3666_s15 + $0x48] sm:$0xff]  ;;  %v3729_v49 = vsub.s32 0, %v1109_v40  ;;  %v3731_v50 = vsub.s32 1, %v1109_v40  ;;  %v603_v51 = vadd.f32 %v3716_v44, %v3713_v43 }
  0x45   : > { %5220 = vst [vmem:[#allocation12_spill] sm:$0xff] %v3721_v46  ;;  %5221 = vst [vmem:[#allocation13_spill] sm:$0xff] %v3724_v47  ;;  %v3727_v48 = vld [vmem:[%s3666_s15 + $0x50] sm:$0xff]  ;;  %601 = vadd.xlane.f32.xlu1 %v600_v41  ;;  %v3736_v52 = vld [vmem:[%s3666_s15 + $0x58] sm:$0xff]  ;;  %v606_v63 = vadd.f32 %v3724_v47, %v3721_v46 }
  0x46   : > { %5222 = vst [vmem:[#allocation14_spill] sm:$0xff] %v3727_v48  ;;  %5223 = vst [vmem:[#allocation15_spill] sm:$0xff] %v3729_v49  ;;  %v3739_v53 = vld [vmem:[%s3666_s15 + $0x60] sm:$0xff]  ;;  %v3742_v54 = vld [vmem:[%s3666_s15 + $0x68] sm:$0xff]  ;;  %v3754_v58 = vrot.slane %v1481_v36, %v3729_v49  ;;  %v3757_v59 = vrot.slane %v1481_v36, %v3731_v50  ;;  %v609_v0 = vadd.f32 %v3736_v52, %v3727_v48 }
  0x47   : > { %5224 = vst [vmem:[#allocation16_spill] sm:$0xff] %v3731_v50  ;;  %5225 = vst [vmem:[#allocation17_spill] sm:$0xff] %v3736_v52  ;;  %v3745_v55 = vld [vmem:[%s3666_s15 + $0x70] sm:$0xff]  ;;  %v3748_v56 = vld [vmem:[%s3666_s15 + $0x78] sm:$0xff]  ;;  %598 = vadd.xlane.f32.xlu0 %v597_v45  ;;  %v612_v1 = vadd.f32 %v3742_v54, %v3739_v53 }
  0x48   : > { %5226 = vst [vmem:[#allocation18_spill] sm:$0xff] %v3739_v53  ;;  %5227 = vst [vmem:[#allocation19_spill] sm:$0xff] %v3742_v54  ;;  %v3751_v57 = vld [vmem:[%s3666_s15 + $0x80] sm:$0xff]  ;;  %v3760_v60 = vld [vmem:[%s3666_s15 + $0x88] sm:$0xff]  ;;  %v615_v2 = vadd.f32 %v3748_v56, %v3745_v55  ;;  %v3786_v5 = vadd.f32 %v3754_v58, %v3688_v32  ;;  %v3790_v6 = vadd.f32 %v3757_v59, %v3691_v33 }
  0x49   : > { %5228 = vst [vmem:[#allocation20_spill] sm:$0xff] %v3745_v55  ;;  %5229 = vst [vmem:[#allocation21_spill] sm:$0xff] %v3748_v56  ;;  %v3763_v61 = vld [vmem:[%s3666_s15 + $0x90] sm:$0xff]  ;;  %v3766_v62 = vld [vmem:[%s3666_s15 + $0x98] sm:$0xff]  ;;  %604 = vadd.xlane.f32.xlu1 %v603_v51  ;;  %v3778_v3 = vadd.f32 %v3760_v60, %v3751_v57  ;;  %v3794_v7 = vadd.f32 %v3754_v58, %v3699_v37  ;;  %v3798_v8 = vadd.f32 %v3757_v59, %v3702_v38 }
  0x4a   : > { %5230 = vst [vmem:[#allocation22_spill] sm:$0xff] %v3751_v57  ;;  %5231 = vst [vmem:[#allocation23_spill] sm:$0xff] %v3760_v60  ;;  %v3782_v4 = vadd.f32 %v3766_v62, %v3763_v61  ;;  %v3802_v9 = vadd.f32 %v3754_v58, %v3705_v39  ;;  %v3806_v10 = vadd.f32 %v3757_v59, %v3710_v42  ;;  %v3833_v17 = vld [vmem:[%s3666_s15 + $0xa0] sm:$0xff]  ;;  %v3836_v18 = vld [vmem:[%s3666_s15 + $0xa8] sm:$0xff] }
  0x4b   : > { %5232 = vst [vmem:[#allocation24_spill] sm:$0xff] %v3763_v61  ;;  %5233 = vst [vmem:[#allocation25_spill] sm:$0xff] %v3766_v62  ;;  %v3810_v11 = vadd.f32 %v3754_v58, %v3713_v43  ;;  %v3814_v12 = vadd.f32 %v3757_v59, %v3716_v44  ;;  %607 = vadd.xlane.f32.xlu0 %v606_v63  ;;  %v3818_v13 = vadd.f32 %v3754_v58, %v3721_v46  ;;  %v3839_v19 = vld [vmem:[%s3666_s15 + $0xb0] sm:$0xff]  ;;  %v3842_v20 = vld [vmem:[%s3666_s15 + $0xb8] sm:$0xff] }
  0x4c   : > { %v3822_v14 = vadd.f32 %v3757_v59, %v3724_v47  ;;  %v3826_v15 = vadd.f32 %v3754_v58, %v3727_v48  ;;  %v3830_v16 = vadd.f32 %v3757_v59, %v3736_v52  ;;  %5234 = vst [vmem:[#allocation26_spill] sm:$0xff] %v3833_v17  ;;  %5235 = vst [vmem:[#allocation27_spill] sm:$0xff] %v3836_v18  ;;  %v3861_v25 = vld [vmem:[%s3666_s15 + $0xc0] sm:$0xff]  ;;  %v3864_v26 = vld [vmem:[%s3666_s15 + $0xc8] sm:$0xff] }
  0x4d   : > { %610 = vadd.xlane.f32.xlu1 %v609_v0  ;;  %5236 = vst [vmem:[#allocation28_spill] sm:$0xff] %v3839_v19  ;;  %5237 = vst [vmem:[#allocation29_spill] sm:$0xff] %v3842_v20  ;;  %v3846_v21 = vadd.f32 %v3754_v58, %v3739_v53  ;;  %v3850_v22 = vadd.f32 %v3757_v59, %v3742_v54  ;;  %v3854_v23 = vadd.f32 %v3754_v58, %v3745_v55  ;;  %v3867_v27 = vld [vmem:[%s3666_s15 + $0xd0] sm:$0xff]  ;;  %v3870_v28 = vld [vmem:[%s3666_s15 + $0xd8] sm:$0xff] }
  0x4e   : > { %v3858_v24 = vadd.f32 %v3757_v59, %v3748_v56  ;;  %5238 = vst [vmem:[#allocation30_spill] sm:$0xff] %v3867_v27  ;;  %5239 = vst [vmem:[#allocation31_spill] sm:$0xff] %v3870_v28  ;;  %v3874_v29 = vadd.f32 %v3754_v58, %v3751_v57  ;;  %v3878_v30 = vadd.f32 %v3757_v59, %v3760_v60  ;;  %v3889_v35 = vld [vmem:[%s3666_s15 + $0xe0] sm:$0xff]  ;;  %v3892_v36 = vld [vmem:[%s3666_s15 + $0xe8] sm:$0xff] }
  0x4f   : > { %v3882_v31 = vadd.f32 %v3754_v58, %v3763_v61  ;;  %v3886_v34 = vadd.f32 %v3757_v59, %v3766_v62  ;;  %5240 = vst [vmem:[#allocation32_spill] sm:$0xff] %v3889_v35  ;;  %5241 = vst [vmem:[#allocation33_spill] sm:$0xff] %v3892_v36  ;;  %v3895_v40 = vld [vmem:[%s3666_s15 + $0xf0] sm:$0xff]  ;;  %v3898_v41 = vld [vmem:[%s3666_s15 + $0xf8] sm:$0xff]  ;;  %613 = vadd.xlane.f32.xlu0 %v612_v1  ;;  %v3902_v45 = vadd.f32 %v3754_v58, %v3833_v17 }
  0x50   : > { %5242 = vst [vmem:[#allocation34_spill] sm:$0xff] %v3895_v40  ;;  %5243 = vst [vmem:[#allocation35_spill] sm:$0xff] %v3898_v41  ;;  %v3906_v51 = vadd.f32 %v3757_v59, %v3836_v18  ;;  %v3910_v63 = vadd.f32 %v3754_v58, %v3839_v19  ;;  %v3914_v0 = vadd.f32 %v3757_v59, %v3842_v20  ;;  %v3917_v50 = vld [vmem:[%s3666_s15 + $0x100] sm:$0xff]  ;;  %v3920_v1 = vld [vmem:[%s3666_s15 + $0x108] sm:$0xff] }
  0x51   : > { %5244 = vst [vmem:[#allocation36_spill] sm:$0xff] %v3917_v50  ;;  %5245 = vst [vmem:[#allocation37_spill] sm:$0xff] %v3920_v1  ;;  %v3923_v49 = vld [vmem:[%s3666_s15 + $0x110] sm:$0xff]  ;;  %616 = vadd.xlane.f32.xlu1 %v615_v2  ;;  %v3927_v62 = vadd.f32 %v3754_v58, %v3861_v25  ;;  %v3931_v61 = vadd.f32 %v3757_v59, %v3864_v26  ;;  %v3935_v60 = vadd.f32 %v3754_v58, %v3867_v27  ;;  %v3942_v56 = vld [vmem:[%s3666_s15 + $0x118] sm:$0xff] }
  0x52   : > { %5246 = vst [vmem:[#allocation38_spill] sm:$0xff] %v3923_v49  ;;  %v3939_v57 = vadd.f32 %v3757_v59, %v3870_v28  ;;  %5247 = vst [vmem:[#allocation39_spill] sm:$0xff] %v3942_v56  ;;  %v3945_v2 = vld [vmem:[%s3666_s15 + $0x120] sm:$0xff]  ;;  %v3948_v55 = vld [vmem:[%s3666_s15 + $0x128] sm:$0xff]  ;;  %v3952_v54 = vadd.f32 %v3754_v58, %v3889_v35  ;;  %v3956_v53 = vadd.f32 %v3757_v59, %v3892_v36 }
  0x53   : > { %5248 = vst [vmem:[#allocation40_spill] sm:$0xff] %v3945_v2  ;;  %5249 = vst [vmem:[#allocation41_spill] sm:$0xff] %v3948_v55  ;;  %v3960_v52 = vadd.f32 %v3754_v58, %v3895_v40  ;;  %v3964_v48 = vadd.f32 %v3757_v59, %v3898_v41  ;;  %v3967_v47 = vld [vmem:[%s3666_s15 + $0x130] sm:$0xff]  ;;  %v3970_v46 = vld [vmem:[%s3666_s15 + $0x138] sm:$0xff]  ;;  %v3977_v43 = vadd.f32 %v3754_v58, %v3917_v50  ;;  %619 = vadd.xlane.f32.xlu0 %v3778_v3 }
  0x54   : > { %5250 = vst [vmem:[#allocation42_spill] sm:$0xff] %v3967_v47  ;;  %5251 = vst [vmem:[#allocation43_spill] sm:$0xff] %v3970_v46  ;;  %v3973_v44 = vld [vmem:[%s3666_s15 + $0x140] sm:$0xff]  ;;  %v3981_v42 = vadd.f32 %v3757_v59, %v3920_v1  ;;  %v3985_v39 = vadd.f32 %v3754_v58, %v3923_v49  ;;  %v3989_v38 = vadd.f32 %v3757_v59, %v3942_v56  ;;  %v3992_v37 = vld [vmem:[%s3666_s15 + $0x148] sm:$0xff] }
  0x55   : > { %5252 = vst [vmem:[#allocation44_spill] sm:$0xff] %v3973_v44  ;;  %5253 = vst [vmem:[#allocation45_spill] sm:$0xff] %v3992_v37  ;;  %v3995_v33 = vld [vmem:[%s3666_s15 + $0x150] sm:$0xff]  ;;  %v3998_v32 = vld [vmem:[%s3666_s15 + $0x158] sm:$0xff]  ;;  %v4003_v49 = vadd.f32 %v3836_v18, %v3833_v17  ;;  %v4007_v56 = vadd.f32 %v3754_v58, %v3945_v2  ;;  %v4011_v1 = vadd.f32 %v3757_v59, %v3948_v55  ;;  %622 = vadd.xlane.f32.xlu1 %v3782_v4 }
  0x56   : > { %5254 = vst [vmem:[#allocation46_spill] sm:$0xff] %v3995_v33  ;;  %v4014_v50 = vld [vmem:[%s3666_s15 + $0x160] sm:$0xff]  ;;  %v4017_v41 = vld [vmem:[%s3666_s15 + $0x168] sm:$0xff]  ;;  %v4020_v40 = vld [vmem:[%s3666_s15 + $0x170] sm:$0xff] }
  0x57   : > { %v4023_v3 = vld [vmem:[%s3666_s15 + $0x178] sm:$0xff]  ;;  %v4026_v18 = vld [vmem:[%s3666_s15 + $0x180] sm:$0xff]  ;;  %v4029_v17 = vld [vmem:[%s3666_s15 + $0x188] sm:$0xff]  ;;  %625 = vadd.xlane.f32.xlu0 %v4003_v49 }
  0x58   : > { %5255 = vst [vmem:[#allocation47_spill] sm:$0xff] %v4023_v3  ;;  %5256 = vst [vmem:[#allocation48_spill] sm:$0xff] %v4026_v18  ;;  %v4032_v2 = vld [vmem:[%s3666_s15 + $0x190] sm:$0xff]  ;;  %v4035_v36 = vld [vmem:[%s3666_s15 + $0x198] sm:$0xff] }
  0x59   : > { %5257 = vst [vmem:[#allocation49_spill] sm:$0xff] %v4035_v36  ;;  %v4038_v55 = vld [vmem:[%s3666_s15 + $0x1a0] sm:$0xff]  ;;  %v4041_v35 = vld [vmem:[%s3666_s15 + $0x1a8] sm:$0xff]  ;;  %v4044_v28 = vld [vmem:[%s3666_s15 + $0x1b0] sm:$0xff]  ;;  %v4058_v36 = vadd.f32 %v3842_v20, %v3839_v19  ;;  %v1534_v19 = vadd.f32 %v3757_v59, %v3992_v37  ;;  %v1537_v37 = vadd.f32 %v3754_v58, %v4014_v50 }
  0x5a   : > { %5258 = vst [vmem:[#allocation50_spill] sm:$0xff] %v4041_v35  ;;  %v4047_v27 = vld [vmem:[%s3666_s15 + $0x1b8] sm:$0xff]  ;;  %v4050_v18 = vld [vmem:[%s3666_s15 + $0x1c0] sm:$0xff]  ;;  %v4053_v3 = vld [vmem:[%s3666_s15 + $0x1c8] sm:$0xff]  ;;  %v1531_v35 = vadd.f32 %v3754_v58, %v3967_v47 }
  0x5b   : > { %5259 = vst [vmem:[#allocation51_spill] sm:$0xff] %v4047_v27  ;;  %5260 = vst [vmem:[#allocation52_spill] sm:$0xff] %v4050_v18  ;;  %v1532_v27 = vadd.f32 %v3757_v59, %v3970_v46  ;;  %v1533_v18 = vadd.f32 %v3754_v58, %v3973_v44  ;;  %v4070_v4 = vld [vmem:[%s3666_s15 + $0x1d8] sm:$0xff]  ;;  %v4073_v20 = vld [vmem:[%s3666_s15 + $0x1e0] sm:$0xff]  ;;  %v1535_v46 = vadd.f32 %v3754_v58, %v3995_v33  ;;  %628 = vadd.xlane.f32.xlu1 %v4058_v36 }
  0x5c   : > { %5261 = vst [vmem:[#allocation53_spill] sm:$0xff] %v4053_v3  ;;  %v4067_v3 = vld [vmem:[%s3666_s15 + $0x1d0] sm:$0xff]  ;;  %5262 = vst [vmem:[#allocation54_spill] sm:$0xff] %v4070_v4  ;;  %v1536_v44 = vadd.f32 %v3757_v59, %v3998_v32  ;;  %v4082_v47 = vld [vmem:[%s3666_s15 + $0x1e8] sm:$0xff]  ;;  %v1538_v33 = vadd.f32 %v3757_v59, %v4017_v41 }
  0x5d   : > { %5263 = vst [vmem:[#allocation55_spill] sm:$0xff] %v4073_v20  ;;  %v4085_v4 = vld [vmem:[%s3666_s15 + $0x1f0] sm:$0xff]  ;;  %v4088_v20 = vld [vmem:[%s3666_s15 + $0x1f8] sm:$0xff] }
  0x5e   : > { %1557 = vst [vmem:[%s3671_s18] sm:$0xff] %v3786_v5  ;;  %1558 = vst [vmem:[%s3671_s18 + $0x8] sm:$0xff] %v3790_v6  ;;  %v5266_v49 = vld [vmem:[#allocation30_spill] sm:$0xff]  ;;  %v1547_v5 = vadd.f32 %v3754_v58, %v4044_v28 }
  0x5f   : > { %1559 = vst [vmem:[%s3671_s18 + $0x10] sm:$0xff] %v3802_v9  ;;  %1560 = vst [vmem:[%s3671_s18 + $0x18] sm:$0xff] %v3806_v10  ;;  %v5273_v9 = vld [vmem:[#allocation33_spill] sm:$0xff] }
  0x60   : > { %1561 = vst [vmem:[%s3671_s18 + $0x20] sm:$0xff] %v3794_v7  ;;  %1562 = vst [vmem:[%s3671_s18 + $0x28] sm:$0xff] %v3798_v8 }
  0x61   : > { %1563 = vst [vmem:[%s3671_s18 + $0x30] sm:$0xff] %v3810_v11  ;;  %1564 = vst [vmem:[%s3671_s18 + $0x38] sm:$0xff] %v3814_v12 }
  0x62   : > { %1565 = vst [vmem:[%s3671_s18 + $0x40] sm:$0xff] %v3818_v13  ;;  %1566 = vst [vmem:[%s3671_s18 + $0x48] sm:$0xff] %v3822_v14  ;;  %v5270_v6 = vld [vmem:[#allocation51_spill] sm:$0xff]  ;;  %v5271_v8 = vld [vmem:[#allocation52_spill] sm:$0xff]  ;;  %v1551_v13 = vadd.f32 %v3754_v58, %v4067_v3 }
  0x63   : > { %1567 = vst [vmem:[%s3671_s18 + $0x50] sm:$0xff] %v3826_v15  ;;  %1568 = vst [vmem:[%s3671_s18 + $0x58] sm:$0xff] %v3830_v16  ;;  %v1548_v7 = vadd.f32 %v3757_v59, %v5270_v6  ;;  %v5274_v11 = vld [vmem:[#allocation53_spill] sm:$0xff]  ;;  %v5275_v14 = vld [vmem:[#allocation54_spill] sm:$0xff] }
  0x64   : > { %1569 = vst [vmem:[%s3671_s18 + $0x60] sm:$0xff] %v3846_v21  ;;  %1570 = vst [vmem:[%s3671_s18 + $0x68] sm:$0xff] %v3850_v22  ;;  %v1550_v12 = vadd.f32 %v3757_v59, %v5274_v11  ;;  %v1552_v15 = vadd.f32 %v3757_v59, %v5275_v14  ;;  %v5276_v16 = vld [vmem:[#allocation34_spill] sm:$0xff]  ;;  %v5278_v21 = vld [vmem:[#allocation55_spill] sm:$0xff] }
  0x65   : > { %1571 = vst [vmem:[%s3671_s18 + $0x70] sm:$0xff] %v3854_v23  ;;  %1572 = vst [vmem:[%s3671_s18 + $0x78] sm:$0xff] %v3858_v24  ;;  %v1553_v22 = vadd.f32 %v3754_v58, %v5278_v21  ;;  %v1554_v23 = vadd.f32 %v3757_v59, %v4082_v47  ;;  %v1555_v24 = vadd.f32 %v3754_v58, %v4085_v4 }
  0x66   : > { %1573 = vst [vmem:[%s3671_s18 + $0x80] sm:$0xff] %v3874_v29  ;;  %1574 = vst [vmem:[%s3671_s18 + $0x88] sm:$0xff] %v3878_v30  ;;  %v5279_v29 = vld [vmem:[#allocation36_spill] sm:$0xff]  ;;  %v5280_v30 = vld [vmem:[#allocation37_spill] sm:$0xff] }
  0x67   : > { %1575 = vst [vmem:[%s3671_s18 + $0x90] sm:$0xff] %v3882_v31  ;;  %1576 = vst [vmem:[%s3671_s18 + $0x98] sm:$0xff] %v3886_v34  ;;  %v642_v31 = vadd.f32 %v5280_v30, %v5279_v29  ;;  %v5281_v34 = vld [vmem:[#allocation38_spill] sm:$0xff] }
  0x68   : > { %1577 = vst [vmem:[%s3671_s18 + $0xa0] sm:$0xff] %v3902_v45  ;;  %1578 = vst [vmem:[%s3671_s18 + $0xa8] sm:$0xff] %v3906_v51  ;;  %v5284_v45 = vld [vmem:[#allocation41_spill] sm:$0xff] }
  0x69   : > { %1579 = vst [vmem:[%s3671_s18 + $0xb0] sm:$0xff] %v3910_v63  ;;  %1580 = vst [vmem:[%s3671_s18 + $0xb8] sm:$0xff] %v3914_v0  ;;  %v5286_v63 = vld [vmem:[#allocation43_spill] sm:$0xff] }
  0x6a   : > { %1581 = vst [vmem:[%s3671_s18 + $0xc0] sm:$0xff] %v3927_v62  ;;  %1582 = vst [vmem:[%s3671_s18 + $0xc8] sm:$0xff] %v3931_v61 }
  0x6b   : > { %1583 = vst [vmem:[%s3671_s18 + $0xd0] sm:$0xff] %v3935_v60  ;;  %1584 = vst [vmem:[%s3671_s18 + $0xd8] sm:$0xff] %v3939_v57  ;;  %v1543_v57 = vadd.f32 %v3754_v58, %v4032_v2  ;;  %v5268_v60 = vld [vmem:[#allocation49_spill] sm:$0xff] }
  0x6c   : > { %1585 = vst [vmem:[%s3671_s18 + $0xe0] sm:$0xff] %v3952_v54  ;;  %1586 = vst [vmem:[%s3671_s18 + $0xe8] sm:$0xff] %v3956_v53  ;;  %v5267_v53 = vld [vmem:[#allocation31_spill] sm:$0xff]  ;;  %v1544_v61 = vadd.f32 %v3757_v59, %v5268_v60 }
  0x6d   : > { %1587 = vst [vmem:[%s3671_s18 + $0xf0] sm:$0xff] %v3960_v52  ;;  %1588 = vst [vmem:[%s3671_s18 + $0xf8] sm:$0xff] %v3964_v48  ;;  %v5265_v48 = vld [vmem:[#allocation48_spill] sm:$0xff]  ;;  %v633_v54 = vadd.f32 %v5267_v53, %v5266_v49 }
  0x6e   : > { %1589 = vst [vmem:[%s3671_s18 + $0x100] sm:$0xff] %v3977_v43  ;;  %1590 = vst [vmem:[%s3671_s18 + $0x108] sm:$0xff] %v3981_v42  ;;  %v630_v43 = vadd.f32 %v3864_v26, %v3861_v25  ;;  %v5264_v42 = vld [vmem:[#allocation47_spill] sm:$0xff]  ;;  %v1541_v52 = vadd.f32 %v3754_v58, %v5265_v48 }
  0x6f   : > { %1591 = vst [vmem:[%s3671_s18 + $0x110] sm:$0xff] %v3985_v39  ;;  %1592 = vst [vmem:[%s3671_s18 + $0x118] sm:$0xff] %v3989_v38  ;;  %v1539_v39 = vadd.f32 %v3754_v58, %v4020_v40  ;;  %v1540_v38 = vadd.f32 %v3757_v59, %v5264_v42  ;;  %634 = vadd.xlane.f32.xlu1 %v633_v54  ;;  %v660_v54 = vadd.f32 %v4017_v41, %v4014_v50 }
  0x70   : > { %1593 = vst [vmem:[%s3671_s18 + $0x120] sm:$0xff] %v4007_v56  ;;  %1594 = vst [vmem:[%s3671_s18 + $0x128] sm:$0xff] %v4011_v1  ;;  %v1542_v56 = vadd.f32 %v3757_v59, %v4029_v17  ;;  %631 = vadd.xlane.f32.xlu0 %v630_v43  ;;  %v5287_v1 = vld [vmem:[#allocation44_spill] sm:$0xff]  ;;  %v5288_v43 = vld [vmem:[#allocation45_spill] sm:$0xff] }
  0x71   : > { %1595 = vst [vmem:[%s3671_s18 + $0x130] sm:$0xff] %v1531_v35  ;;  %1596 = vst [vmem:[%s3671_s18 + $0x138] sm:$0xff] %v1532_v27  ;;  %v1556_v27 = vadd.f32 %v3757_v59, %v4088_v20  ;;  %v5282_v35 = vld [vmem:[#allocation39_spill] sm:$0xff] }
  0x72   : > { %1597 = vst [vmem:[%s3671_s18 + $0x140] sm:$0xff] %v1533_v18  ;;  %1598 = vst [vmem:[%s3671_s18 + $0x148] sm:$0xff] %v1534_v19  ;;  %v5277_v18 = vld [vmem:[#allocation35_spill] sm:$0xff]  ;;  %v645_v36 = vadd.f32 %v5282_v35, %v5281_v34 }
  0x73   : > { %1599 = vst [vmem:[%s3671_s18 + $0x150] sm:$0xff] %v1535_v46  ;;  %1600 = vst [vmem:[%s3671_s18 + $0x158] sm:$0xff] %v1536_v44  ;;  %v1545_v44 = vadd.f32 %v3754_v58, %v4038_v55  ;;  %v5269_v46 = vld [vmem:[#allocation50_spill] sm:$0xff]  ;;  %v639_v19 = vadd.f32 %v5277_v18, %v5276_v16 }
  0x74   : > { %1601 = vst [vmem:[%s3671_s18 + $0x160] sm:$0xff] %v1537_v37  ;;  %1602 = vst [vmem:[%s3671_s18 + $0x168] sm:$0xff] %v1538_v33  ;;  %v1546_v62 = vadd.f32 %v3757_v59, %v5269_v46  ;;  %v1549_v33 = vadd.f32 %v3754_v58, %v5271_v8  ;;  %v5272_v37 = vld [vmem:[#allocation32_spill] sm:$0xff]  ;;  %v5285_v59 = vld [vmem:[#allocation42_spill] sm:$0xff] }
  0x75   : > { %1603 = vst [vmem:[%s3671_s18 + $0x170] sm:$0xff] %v1539_v39  ;;  %1604 = vst [vmem:[%s3671_s18 + $0x178] sm:$0xff] %v1540_v38  ;;  %v636_v10 = vadd.f32 %v5273_v9, %v5272_v37  ;;  %640 = vadd.xlane.f32.xlu1 %v639_v19  ;;  %v5283_v58 = vld [vmem:[#allocation40_spill] sm:$0xff]  ;;  %v651_v0 = vadd.f32 %v5286_v63, %v5285_v59  ;;  %v654_v39 = vadd.f32 %v5288_v43, %v5287_v1  ;;  %v5289_v38 = vld [vmem:[#allocation46_spill] sm:$0xff] }
  0x76   : > { %1605 = vst [vmem:[%s3671_s18 + $0x180] sm:$0xff] %v1541_v52  ;;  %1606 = vst [vmem:[%s3671_s18 + $0x188] sm:$0xff] %v1542_v56  ;;  %v648_v51 = vadd.f32 %v5284_v45, %v5283_v58  ;;  %v657_v52 = vadd.f32 %v3998_v32, %v5289_v38  ;;  %v663_v56 = vadd.f32 %v5264_v42, %v4020_v40 }
  0x77   : > { %1607 = vst [vmem:[%s3671_s18 + $0x190] sm:$0xff] %v1543_v57  ;;  %1608 = vst [vmem:[%s3671_s18 + $0x198] sm:$0xff] %v1544_v61  ;;  %637 = vadd.xlane.f32.xlu0 %v636_v10  ;;  %v666_v57 = vadd.f32 %v4029_v17, %v5265_v48  ;;  %v669_v61 = vadd.f32 %v5268_v60, %v4032_v2  ;;  %v687_v10 = vadd.f32 %v4088_v20, %v4085_v4 }
  0x78   : > { %1609 = vst [vmem:[%s3671_s18 + $0x1a0] sm:$0xff] %v1545_v44  ;;  %1610 = vst [vmem:[%s3671_s18 + $0x1a8] sm:$0xff] %v1546_v62  ;;  %v672_v44 = vadd.f32 %v5269_v46, %v4038_v55  ;;  %v675_v62 = vadd.f32 %v5270_v6, %v4044_v28 }
  0x79   : > { %1611 = vst [vmem:[%s3671_s18 + $0x1b0] sm:$0xff] %v1547_v5  ;;  %1612 = vst [vmem:[%s3671_s18 + $0x1b8] sm:$0xff] %v1548_v7  ;;  %646 = vadd.xlane.f32.xlu1 %v645_v36  ;;  %v678_v5 = vadd.f32 %v5274_v11, %v5271_v8  ;;  %v681_v7 = vadd.f32 %v5275_v14, %v4067_v3 }
  0x7a   : > { %1613 = vst [vmem:[%s3671_s18 + $0x1c0] sm:$0xff] %v1549_v33  ;;  %1614 = vst [vmem:[%s3671_s18 + $0x1c8] sm:$0xff] %v1550_v12  ;;  %v684_v33 = vadd.f32 %v4082_v47, %v5278_v21 }
  0x7b   : > { %1615 = vst [vmem:[%s3671_s18 + $0x1d0] sm:$0xff] %v1551_v13  ;;  %1616 = vst [vmem:[%s3671_s18 + $0x1d8] sm:$0xff] %v1552_v15  ;;  %643 = vadd.xlane.f32.xlu0 %v642_v31  ;;  %v5292_v31 = vld [vmem:[#allocation6_spill] sm:$0xff] }
  0x7c   : > { %1617 = vst [vmem:[%s3671_s18 + $0x1e0] sm:$0xff] %v1553_v22  ;;  %1618 = vst [vmem:[%s3671_s18 + $0x1e8] sm:$0xff] %v1554_v23  ;;  %v5290_v22 = vld [vmem:[#allocation4_spill] sm:$0xff] }
  0x7d   : > { %1619 = vst [vmem:[%s3671_s18 + $0x1f0] sm:$0xff] %v1555_v24  ;;  %1620 = vst [vmem:[%s3671_s18 + $0x1f8] sm:$0xff] %v1556_v27  ;;  %652 = vadd.xlane.f32.xlu1 %v651_v0  ;;  %v5291_v24 = vld [vmem:[#allocation5_spill] sm:$0xff] }
  0x7f   : > { %649 = vadd.xlane.f32.xlu0 %v648_v51  ;;  %v5294_v51 = vld [vmem:[#allocation7_spill] sm:$0xff] }
  0x81   : > { %658 = vadd.xlane.f32.xlu1 %v657_v52 }
  0x83   : > { %655 = vadd.xlane.f32.xlu0 %v654_v39 }
  0x85   : > { %664 = vadd.xlane.f32.xlu1 %v663_v56 }
  0x87   : > { %661 = vadd.xlane.f32.xlu0 %v660_v54 }
  0x89   : > { %670 = vadd.xlane.f32.xlu1 %v669_v61 }
  0x8b   : > { %667 = vadd.xlane.f32.xlu0 %v666_v57 }
  0x8d   : > { %676 = vadd.xlane.f32.xlu1 %v675_v62 }
  0x8f   : > { %673 = vadd.xlane.f32.xlu0 %v672_v44 }
  0x91   : > { %682 = vadd.xlane.f32.xlu1 %v681_v7 }
  0x93   : > { %679 = vadd.xlane.f32.xlu0 %v678_v5  ;;  %v5296_v5 = vld [vmem:[#allocation8_spill] sm:$0xff] }
  0x95   : > { %688 = vadd.xlane.f32.xlu1 %v687_v10 }
  0x97   : > { %685 = vadd.xlane.f32.xlu0 %v684_v33  ;;  %v5297_v33 = vld [vmem:[#allocation9_spill] sm:$0xff] }
  0xcc   : > { %v596_v12 = vpop.xlane.xlu0 %595 }
  0xcd   : > { %v691_v13 = vmul.f32 0.00390625, %v596_v12 }
  0xce   : > { %v602_v15 = vpop.xlane.xlu1 %601 }
  0xcf   : > { %v693_v19 = vmul.f32 0.00390625, %v602_v15  ;;  %v4275_v23 = vsub.f32 %v5290_v22, %v691_v13  ;;  %v4278_v27 = vsub.f32 %v5291_v24, %v691_v13  ;;  %v5299_v13 = vld [vmem:[#allocation10_spill] sm:$0xff] }
  0xd0   : > { %v599_v39 = vpop.xlane.xlu0 %598 }
  0xd1   : > { %v4281_v36 = vsub.f32 %v5292_v31, %v693_v19  ;;  %v4284_v0 = vsub.f32 %v5294_v51, %v693_v19  ;;  %v692_v52 = vmul.f32 0.00390625, %v599_v39  ;;  %v787_v56 = vmul.f32 %v4275_v23, %v4275_v23  ;;  %v5301_v19 = vld [vmem:[#allocation11_spill] sm:$0xff] }
  0xd2   : > { %v605_v54 = vpop.xlane.xlu1 %604  ;;  %v788_v57 = vmul.f32 %v4278_v27, %v4278_v27 }
  0xd3   : > { %5293 = vst [vmem:[#allocation47_spill] sm:$0xff] %v4281_v36  ;;  %5295 = vst [vmem:[#allocation48_spill] sm:$0xff] %v4284_v0  ;;  %v694_v61 = vmul.f32 0.00390625, %v605_v54  ;;  %v791_v44 = vmul.f32 %v4281_v36, %v4281_v36  ;;  %v792_v62 = vmul.f32 %v4284_v0, %v4284_v0  ;;  %v4295_v7 = vsub.f32 %v5296_v5, %v692_v52 }
  0xd4   : > { %v4298_v10 = vsub.f32 %v5297_v33, %v692_v52  ;;  %v851_v12 = vadd.f32 %v788_v57, %v787_v56  ;;  %v608_v24 = vpop.xlane.xlu0 %607 }
  0xd5   : > { %v4301_v15 = vsub.f32 %v5299_v13, %v694_v61  ;;  %v4304_v22 = vsub.f32 %v5301_v19, %v694_v61  ;;  %v695_v31 = vmul.f32 0.00390625, %v608_v24  ;;  %v857_v39 = vadd.f32 %v792_v62, %v791_v44  ;;  %v5303_v61 = vld [vmem:[#allocation12_spill] sm:$0xff]  ;;  %v5305_v13 = vld [vmem:[#allocation13_spill] sm:$0xff]  ;;  %v5307_v62 = vld [vmem:[#allocation14_spill] sm:$0xff] }
  0xd6   : > { %5298 = vst [vmem:[#allocation30_spill] sm:$0xff] %v4298_v10  ;;  %852 = vadd.xlane.f32.xlu0 %v851_v12  ;;  %v611_v51 = vpop.xlane.xlu1 %610  ;;  %v789_v54 = vmul.f32 %v4295_v7, %v4295_v7  ;;  %v790_v5 = vmul.f32 %v4298_v10, %v4298_v10  ;;  %v5309_v24 = vld [vmem:[#allocation17_spill] sm:$0xff] }
  0xd7   : > { %5300 = vst [vmem:[#allocation31_spill] sm:$0xff] %v4301_v15  ;;  %5302 = vst [vmem:[#allocation49_spill] sm:$0xff] %v4304_v22  ;;  %v696_v52 = vmul.f32 0.00390625, %v611_v51  ;;  %v793_v56 = vmul.f32 %v4301_v15, %v4301_v15  ;;  %v794_v57 = vmul.f32 %v4304_v22, %v4304_v22  ;;  %v4315_v33 = vsub.f32 %v5303_v61, %v695_v31 }
  0xd8   : > { %v4318_v12 = vsub.f32 %v5305_v13, %v695_v31  ;;  %v854_v44 = vadd.f32 %v790_v5, %v789_v54  ;;  %v614_v51 = vpop.xlane.xlu0 %613 }
  0xd9   : > { %5304 = vst [vmem:[#allocation50_spill] sm:$0xff] %v4315_v33  ;;  %v4321_v19 = vsub.f32 %v5307_v62, %v696_v52  ;;  %v4324_v0 = vsub.f32 %v5309_v24, %v696_v52  ;;  %v697_v36 = vmul.f32 0.00390625, %v614_v51  ;;  %v860_v10 = vadd.f32 %v794_v57, %v793_v56  ;;  %v5311_v52 = vld [vmem:[#allocation18_spill] sm:$0xff]  ;;  %v5315_v57 = vld [vmem:[#allocation20_spill] sm:$0xff]  ;;  %v5317_v51 = vld [vmem:[#allocation21_spill] sm:$0xff] }
  0xda   : > { %5306 = vst [vmem:[#allocation51_spill] sm:$0xff] %v4318_v12  ;;  %858 = vadd.xlane.f32.xlu0 %v857_v39  ;;  %855 = vadd.xlane.f32.xlu1 %v854_v44  ;;  %v617_v15 = vpop.xlane.xlu1 %616  ;;  %v795_v61 = vmul.f32 %v4315_v33, %v4315_v33  ;;  %v796_v31 = vmul.f32 %v4318_v12, %v4318_v12  ;;  %v5313_v39 = vld [vmem:[#allocation19_spill] sm:$0xff] }
  0xdb   : > { %5308 = vst [vmem:[#allocation52_spill] sm:$0xff] %v4321_v19  ;;  %5310 = vst [vmem:[#allocation32_spill] sm:$0xff] %v4324_v0  ;;  %v698_v13 = vmul.f32 0.00390625, %v617_v15  ;;  %v797_v54 = vmul.f32 %v4321_v19, %v4321_v19  ;;  %v798_v5 = vmul.f32 %v4324_v0, %v4324_v0  ;;  %v4335_v62 = vsub.f32 %v5311_v52, %v697_v36 }
  0xdc   : > { %v4338_v44 = vsub.f32 %v5313_v39, %v697_v36  ;;  %v863_v56 = vadd.f32 %v796_v31, %v795_v61  ;;  %v620_v15 = vpop.xlane.xlu0 %619 }
  0xdd   : > { %5312 = vst [vmem:[#allocation33_spill] sm:$0xff] %v4335_v62  ;;  %v4341_v24 = vsub.f32 %v5315_v57, %v698_v13  ;;  %v4344_v33 = vsub.f32 %v5317_v51, %v698_v13  ;;  %v699_v12 = vmul.f32 0.00390625, %v620_v15  ;;  %v866_v22 = vadd.f32 %v798_v5, %v797_v54  ;;  %v5319_v13 = vld [vmem:[#allocation22_spill] sm:$0xff]  ;;  %v5323_v5 = vld [vmem:[#allocation24_spill] sm:$0xff]  ;;  %v5325_v15 = vld [vmem:[#allocation25_spill] sm:$0xff] }
  0xde   : > { %5314 = vst [vmem:[#allocation53_spill] sm:$0xff] %v4338_v44  ;;  %861 = vadd.xlane.f32.xlu1 %v860_v10  ;;  %864 = vadd.xlane.f32.xlu0 %v863_v56  ;;  %v623_v19 = vpop.xlane.xlu1 %622  ;;  %v799_v52 = vmul.f32 %v4335_v62, %v4335_v62  ;;  %v800_v36 = vmul.f32 %v4338_v44, %v4338_v44  ;;  %v5321_v10 = vld [vmem:[#allocation23_spill] sm:$0xff] }
  0xdf   : > { %5316 = vst [vmem:[#allocation54_spill] sm:$0xff] %v4341_v24  ;;  %5318 = vst [vmem:[#allocation34_spill] sm:$0xff] %v4344_v33  ;;  %v700_v39 = vmul.f32 0.00390625, %v623_v19  ;;  %v801_v61 = vmul.f32 %v4341_v24, %v4341_v24  ;;  %v802_v31 = vmul.f32 %v4344_v33, %v4344_v33  ;;  %v4355_v57 = vsub.f32 %v5319_v13, %v699_v12 }
  0xe0   : > { %v4358_v56 = vsub.f32 %v5321_v10, %v699_v12  ;;  %v869_v54 = vadd.f32 %v800_v36, %v799_v52  ;;  %v626_v19 = vpop.xlane.xlu0 %625 }
  0xe1   : > { %5320 = vst [vmem:[#allocation35_spill] sm:$0xff] %v4355_v57  ;;  %v4361_v51 = vsub.f32 %v5323_v5, %v700_v39  ;;  %v4364_v62 = vsub.f32 %v5325_v15, %v700_v39  ;;  %v701_v44 = vmul.f32 0.00390625, %v626_v19  ;;  %v872_v0 = vadd.f32 %v802_v31, %v801_v61  ;;  %v5326_v39 = vld [vmem:[#allocation26_spill] sm:$0xff]  ;;  %v5328_v31 = vld [vmem:[#allocation28_spill] sm:$0xff]  ;;  %v5329_v19 = vld [vmem:[#allocation29_spill] sm:$0xff] }
  0xe2   : > { %5322 = vst [vmem:[#allocation55_spill] sm:$0xff] %v4358_v56  ;;  %867 = vadd.xlane.f32.xlu1 %v866_v22  ;;  %870 = vadd.xlane.f32.xlu0 %v869_v54  ;;  %v803_v13 = vmul.f32 %v4355_v57, %v4355_v57  ;;  %v804_v12 = vmul.f32 %v4358_v56, %v4358_v56  ;;  %v5327_v22 = vld [vmem:[#allocation27_spill] sm:$0xff] }
  0xe3   : > { %5324 = vst [vmem:[#allocation36_spill] sm:$0xff] %v4361_v51  ;;  %v805_v52 = vmul.f32 %v4361_v51, %v4361_v51  ;;  %v806_v36 = vmul.f32 %v4364_v62, %v4364_v62  ;;  %v4375_v5 = vsub.f32 %v5326_v39, %v701_v44  ;;  %v4378_v54 = vsub.f32 %v5327_v22, %v701_v44 }
  0xe4   : > { %v629_v24 = vpop.xlane.xlu1 %628  ;;  %v875_v61 = vadd.f32 %v804_v12, %v803_v13 }
  0xe5   : > { %v702_v10 = vmul.f32 0.00390625, %v629_v24  ;;  %v878_v33 = vadd.f32 %v806_v36, %v805_v52  ;;  %v807_v39 = vmul.f32 %v4375_v5, %v4375_v5  ;;  %v808_v44 = vmul.f32 %v4378_v54, %v4378_v54 }
  0xe6   : > { %873 = vadd.xlane.f32.xlu1 %v872_v0  ;;  %876 = vadd.xlane.f32.xlu0 %v875_v61 }
  0xe7   : > { %v4381_v15 = vsub.f32 %v5328_v31, %v702_v10  ;;  %v4384_v57 = vsub.f32 %v5329_v19, %v702_v10  ;;  %v881_v52 = vadd.f32 %v808_v44, %v807_v39 }
  0xe9   : > { %v809_v13 = vmul.f32 %v4381_v15, %v4381_v15  ;;  %v810_v12 = vmul.f32 %v4384_v57, %v4384_v57 }
  0xea   : > { %879 = vadd.xlane.f32.xlu1 %v878_v33  ;;  %882 = vadd.xlane.f32.xlu0 %v881_v52 }
  0xf8   : > { %v635_v51 = vpop.xlane.xlu1 %634 }
  0xf9   : > { %v632_v24 = vpop.xlane.xlu0 %631  ;;  %v704_v22 = vmul.f32 0.00390625, %v635_v51 }
  0xfa   : > { %v703_v56 = vmul.f32 0.00390625, %v632_v24  ;;  %v884_v24 = vadd.f32 %v810_v12, %v809_v13 }
  0xfb   : > { %v4401_v36 = vsub.f32 %v5266_v49, %v704_v22  ;;  %v4404_v61 = vsub.f32 %v5267_v53, %v704_v22 }
  0xfc   : > { %v4395_v10 = vsub.f32 %v3861_v25, %v703_v56  ;;  %v4398_v0 = vsub.f32 %v3864_v26, %v703_v56  ;;  %885 = vadd.xlane.f32.xlu1 %v884_v24 }
  0xfd   : > { %v813_v49 = vmul.f32 %v4401_v36, %v4401_v36  ;;  %v814_v53 = vmul.f32 %v4404_v61, %v4404_v61 }
  0xfe   : > { %v641_v19 = vpop.xlane.xlu1 %640  ;;  %v811_v25 = vmul.f32 %v4395_v10, %v4395_v10  ;;  %v812_v26 = vmul.f32 %v4398_v0, %v4398_v0 }
  0xff   : > { %v706_v56 = vmul.f32 0.00390625, %v641_v19  ;;  %v890_v19 = vadd.f32 %v814_v53, %v813_v49 }
 0x100   : > { %v638_v51 = vpop.xlane.xlu0 %637  ;;  %v887_v44 = vadd.f32 %v812_v26, %v811_v25 }
 0x101   : > { %v705_v31 = vmul.f32 0.00390625, %v638_v51  ;;  %v4421_v22 = vsub.f32 %v5276_v16, %v706_v56  ;;  %v4424_v13 = vsub.f32 %v5277_v18, %v706_v56  ;;  %891 = vadd.xlane.f32.xlu1 %v890_v19 }
 0x102   : > { %888 = vadd.xlane.f32.xlu0 %v887_v44  ;;  %v647_v51 = vpop.xlane.xlu1 %646 }
 0x103   : > { %v4415_v39 = vsub.f32 %v5272_v37, %v705_v31  ;;  %v4418_v33 = vsub.f32 %v5273_v9, %v705_v31  ;;  %v708_v31 = vmul.f32 0.00390625, %v647_v51  ;;  %v817_v16 = vmul.f32 %v4421_v22, %v4421_v22 }
 0x104   : > { %v644_v12 = vpop.xlane.xlu0 %643  ;;  %v818_v18 = vmul.f32 %v4424_v13, %v4424_v13 }
 0x105   : > { %v707_v52 = vmul.f32 0.00390625, %v644_v12  ;;  %v815_v37 = vmul.f32 %v4415_v39, %v4415_v39  ;;  %v816_v9 = vmul.f32 %v4418_v33, %v4418_v33  ;;  %v4441_v56 = vsub.f32 %v5281_v34, %v708_v31 }
 0x106   : > { %v4444_v49 = vsub.f32 %v5282_v35, %v708_v31  ;;  %v653_v12 = vpop.xlane.xlu1 %652  ;;  %v896_v51 = vadd.f32 %v818_v18, %v817_v16 }
 0x107   : > { %v4435_v25 = vsub.f32 %v5279_v29, %v707_v52  ;;  %v4438_v24 = vsub.f32 %v5280_v30, %v707_v52  ;;  %v893_v26 = vadd.f32 %v816_v9, %v815_v37  ;;  %v710_v52 = vmul.f32 0.00390625, %v653_v12 }
 0x108   : > { %v650_v53 = vpop.xlane.xlu0 %649  ;;  %v821_v34 = vmul.f32 %v4441_v56, %v4441_v56  ;;  %v822_v35 = vmul.f32 %v4444_v49, %v4444_v49  ;;  %897 = vadd.xlane.f32.xlu1 %v896_v51 }
 0x109   : > { %v709_v44 = vmul.f32 0.00390625, %v650_v53  ;;  %894 = vadd.xlane.f32.xlu0 %v893_v26  ;;  %v819_v29 = vmul.f32 %v4435_v25, %v4435_v25  ;;  %v820_v30 = vmul.f32 %v4438_v24, %v4438_v24  ;;  %v4461_v31 = vsub.f32 %v5285_v59, %v710_v52 }
 0x10a   : > { %v4464_v16 = vsub.f32 %v5286_v63, %v710_v52  ;;  %v659_v53 = vpop.xlane.xlu1 %658  ;;  %v902_v12 = vadd.f32 %v822_v35, %v821_v34 }
 0x10b   : > { %v4455_v37 = vsub.f32 %v5283_v58, %v709_v44  ;;  %v4458_v19 = vsub.f32 %v5284_v45, %v709_v44  ;;  %v899_v9 = vadd.f32 %v820_v30, %v819_v29  ;;  %v712_v44 = vmul.f32 0.00390625, %v659_v53 }
 0x10c   : > { %v656_v18 = vpop.xlane.xlu0 %655  ;;  %v825_v59 = vmul.f32 %v4461_v31, %v4461_v31  ;;  %v826_v63 = vmul.f32 %v4464_v16, %v4464_v16  ;;  %903 = vadd.xlane.f32.xlu1 %v902_v12 }
 0x10d   : > { %v711_v26 = vmul.f32 0.00390625, %v656_v18  ;;  %900 = vadd.xlane.f32.xlu0 %v899_v9  ;;  %v823_v58 = vmul.f32 %v4455_v37, %v4455_v37  ;;  %v824_v45 = vmul.f32 %v4458_v19, %v4458_v19  ;;  %v4481_v52 = vsub.f32 %v5289_v38, %v712_v44 }
 0x10e   : > { %v4484_v34 = vsub.f32 %v3998_v32, %v712_v44  ;;  %v665_v18 = vpop.xlane.xlu1 %664  ;;  %v908_v53 = vadd.f32 %v826_v63, %v825_v59 }
 0x10f   : > { %v4475_v29 = vsub.f32 %v5287_v1, %v711_v26  ;;  %v4478_v51 = vsub.f32 %v5288_v43, %v711_v26  ;;  %v905_v30 = vadd.f32 %v824_v45, %v823_v58  ;;  %v714_v26 = vmul.f32 0.00390625, %v665_v18 }
 0x110   : > { %v662_v35 = vpop.xlane.xlu0 %661  ;;  %v829_v38 = vmul.f32 %v4481_v52, %v4481_v52  ;;  %v830_v32 = vmul.f32 %v4484_v34, %v4484_v34  ;;  %909 = vadd.xlane.f32.xlu1 %v908_v53 }
 0x111   : > { %v713_v9 = vmul.f32 0.00390625, %v662_v35  ;;  %906 = vadd.xlane.f32.xlu0 %v905_v30  ;;  %v827_v1 = vmul.f32 %v4475_v29, %v4475_v29  ;;  %v828_v43 = vmul.f32 %v4478_v51, %v4478_v51  ;;  %v4501_v44 = vsub.f32 %v4020_v40, %v714_v26 }
 0x112   : > { %v4504_v59 = vsub.f32 %v5264_v42, %v714_v26  ;;  %v671_v35 = vpop.xlane.xlu1 %670  ;;  %v914_v18 = vadd.f32 %v830_v32, %v829_v38 }
 0x113   : > { %v4495_v58 = vsub.f32 %v4014_v50, %v713_v9  ;;  %v4498_v12 = vsub.f32 %v4017_v41, %v713_v9  ;;  %v911_v45 = vadd.f32 %v828_v43, %v827_v1  ;;  %v716_v9 = vmul.f32 0.00390625, %v671_v35 }
 0x114   : > { %v668_v63 = vpop.xlane.xlu0 %667  ;;  %v833_v40 = vmul.f32 %v4501_v44, %v4501_v44  ;;  %v834_v42 = vmul.f32 %v4504_v59, %v4504_v59  ;;  %915 = vadd.xlane.f32.xlu1 %v914_v18 }
 0x115   : > { %v715_v30 = vmul.f32 0.00390625, %v668_v63  ;;  %912 = vadd.xlane.f32.xlu0 %v911_v45  ;;  %v831_v50 = vmul.f32 %v4495_v58, %v4495_v58  ;;  %v832_v41 = vmul.f32 %v4498_v12, %v4498_v12  ;;  %v4521_v26 = vsub.f32 %v4032_v2, %v716_v9 }
 0x116   : > { %v4524_v38 = vsub.f32 %v5268_v60, %v716_v9  ;;  %v677_v63 = vpop.xlane.xlu1 %676  ;;  %v920_v35 = vadd.f32 %v834_v42, %v833_v40 }
 0x117   : > { %v4515_v1 = vsub.f32 %v5265_v48, %v715_v30  ;;  %v4518_v53 = vsub.f32 %v4029_v17, %v715_v30  ;;  %v917_v43 = vadd.f32 %v832_v41, %v831_v50  ;;  %v718_v30 = vmul.f32 0.00390625, %v677_v63 }
 0x118   : > { %5330 = vst [vmem:[#allocation37_spill] sm:$0xff] %v4524_v38  ;;  %v674_v32 = vpop.xlane.xlu0 %673  ;;  %v837_v2 = vmul.f32 %v4521_v26, %v4521_v26  ;;  %v838_v60 = vmul.f32 %v4524_v38, %v4524_v38  ;;  %921 = vadd.xlane.f32.xlu1 %v920_v35 }
 0x119   : > { %v717_v45 = vmul.f32 0.00390625, %v674_v32  ;;  %918 = vadd.xlane.f32.xlu0 %v917_v43  ;;  %v835_v48 = vmul.f32 %v4515_v1, %v4515_v1  ;;  %v836_v17 = vmul.f32 %v4518_v53, %v4518_v53  ;;  %v4541_v9 = vsub.f32 %v4044_v28, %v718_v30 }
 0x11a   : > { %v4544_v40 = vsub.f32 %v5270_v6, %v718_v30  ;;  %v683_v32 = vpop.xlane.xlu1 %682  ;;  %v926_v63 = vadd.f32 %v838_v60, %v837_v2 }
 0x11b   : > { %v4535_v50 = vsub.f32 %v4038_v55, %v717_v45  ;;  %v4538_v18 = vsub.f32 %v5269_v46, %v717_v45  ;;  %v923_v41 = vadd.f32 %v836_v17, %v835_v48  ;;  %5333 = vst [vmem:[#allocation40_spill] sm:$0xff] %v4541_v9  ;;  %v720_v45 = vmul.f32 0.00390625, %v683_v32 }
 0x11c   : > { %5334 = vst [vmem:[#allocation41_spill] sm:$0xff] %v4544_v40  ;;  %v680_v42 = vpop.xlane.xlu0 %679  ;;  %v841_v28 = vmul.f32 %v4541_v9, %v4541_v9  ;;  %v842_v6 = vmul.f32 %v4544_v40, %v4544_v40  ;;  %927 = vadd.xlane.f32.xlu1 %v926_v63 }
 0x11d   : > { %5331 = vst [vmem:[#allocation38_spill] sm:$0xff] %v4535_v50  ;;  %5332 = vst [vmem:[#allocation39_spill] sm:$0xff] %v4538_v18  ;;  %v719_v43 = vmul.f32 0.00390625, %v680_v42  ;;  %924 = vadd.xlane.f32.xlu0 %v923_v41  ;;  %v839_v55 = vmul.f32 %v4535_v50, %v4535_v50  ;;  %v840_v46 = vmul.f32 %v4538_v18, %v4538_v18 }
 0x11e   : > { %v4561_v30 = vsub.f32 %v4067_v3, %v720_v45  ;;  %v4564_v2 = vsub.f32 %v5275_v14, %v720_v45  ;;  %v689_v42 = vpop.xlane.xlu1 %688  ;;  %v932_v32 = vadd.f32 %v842_v6, %v841_v28 }
 0x11f   : > { %v4555_v48 = vsub.f32 %v5271_v8, %v719_v43  ;;  %v4558_v35 = vsub.f32 %v5274_v11, %v719_v43  ;;  %v929_v17 = vadd.f32 %v840_v46, %v839_v55  ;;  %v722_v43 = vmul.f32 0.00390625, %v689_v42 }
 0x120   : > { %5337 = vst [vmem:[#allocation44_spill] sm:$0xff] %v4561_v30  ;;  %5338 = vst [vmem:[#allocation45_spill] sm:$0xff] %v4564_v2  ;;  %v686_v60 = vpop.xlane.xlu0 %685  ;;  %v845_v3 = vmul.f32 %v4561_v30, %v4561_v30  ;;  %v846_v14 = vmul.f32 %v4564_v2, %v4564_v2  ;;  %933 = vadd.xlane.f32.xlu1 %v932_v32  ;;  %v5347_v30 = vld [vmem:[#allocation48_spill] sm:$0xff] }
 0x121   : > { %5335 = vst [vmem:[#allocation42_spill] sm:$0xff] %v4555_v48  ;;  %5336 = vst [vmem:[#allocation43_spill] sm:$0xff] %v4558_v35  ;;  %v721_v41 = vmul.f32 0.00390625, %v686_v60  ;;  %930 = vadd.xlane.f32.xlu0 %v929_v17  ;;  %v843_v8 = vmul.f32 %v4555_v48, %v4555_v48  ;;  %v844_v11 = vmul.f32 %v4558_v35, %v4558_v35 }
 0x122   : > { %v4581_v45 = vsub.f32 %v4085_v4, %v722_v43  ;;  %v4584_v28 = vsub.f32 %v4088_v20, %v722_v43  ;;  %v938_v6 = vadd.f32 %v846_v14, %v845_v3 }
 0x123   : > { %v4575_v55 = vsub.f32 %v5278_v21, %v721_v41  ;;  %v4578_v63 = vsub.f32 %v4082_v47, %v721_v41  ;;  %v935_v46 = vadd.f32 %v844_v11, %v843_v8 }
 0x124   : > { %5341 = vst [vmem:[#allocation5_spill] sm:$0xff] %v4581_v45  ;;  %5342 = vst [vmem:[#allocation6_spill] sm:$0xff] %v4584_v28  ;;  %v849_v47 = vmul.f32 %v4581_v45, %v4581_v45  ;;  %v850_v60 = vmul.f32 %v4584_v28, %v4584_v28  ;;  %939 = vadd.xlane.f32.xlu1 %v938_v6 }
 0x125   : > { %5339 = vst [vmem:[#allocation46_spill] sm:$0xff] %v4575_v55  ;;  %5340 = vst [vmem:[#allocation4_spill] sm:$0xff] %v4578_v63  ;;  %936 = vadd.xlane.f32.xlu0 %v935_v46  ;;  %v847_v17 = vmul.f32 %v4575_v55, %v4575_v55  ;;  %v848_v21 = vmul.f32 %v4578_v63, %v4578_v63 }
 0x126   : > { %v944_v20 = vadd.f32 %v850_v60, %v849_v47  ;;  %v592_v60 = vld [vmem:[%s5103_s1] sm:$0x3] }
 0x127   : > { %v941_v4 = vadd.f32 %v848_v21, %v847_v17 }
 0x128   : > { %945 = vadd.xlane.f32.xlu1 %v944_v20 }
 0x129   : > { %942 = vadd.xlane.f32.xlu0 %v941_v4 }
 0x15f   : > { %v853_v41 = vpop.xlane.xlu0 %852 }
 0x160   : > { %v947_v42 = vmul.f32 0.00390625, %v853_v41  ;;  %v593_v41 = vld [vmem:[%s5104_s2] sm:$0x3] }
 0x162   : > { %v979_v32 = vadd.f32 1e-05, %v947_v42 }
 0x163   : > { %v856_v8 = vpop.xlane.xlu1 %855  ;;  %v859_v11 = vpop.xlane.xlu0 %858 }
 0x164   : > { %3234 = vrsqrt.f32 %v979_v32  ;;  %v948_v43 = vmul.f32 0.00390625, %v856_v8  ;;  %v949_v3 = vmul.f32 0.00390625, %v859_v11  ;;  %v5344_v8 = vld [vmem:[#allocation16_spill] sm:$0xff] }
 0x165   : > { %v4604_v11 = vrot.slane %v592_v60, %v5344_v8 }
 0x166   : > { %v980_v14 = vadd.f32 1e-05, %v948_v43  ;;  %v981_v46 = vadd.f32 1e-05, %v949_v3 }
 0x167   : > { %v862_v63 = vpop.xlane.xlu1 %861  ;;  %v865_v45 = vpop.xlane.xlu0 %864 }
 0x168   : > { %3236 = vrsqrt.f32 %v980_v14  ;;  %v950_v55 = vmul.f32 0.00390625, %v862_v63  ;;  %v951_v28 = vmul.f32 0.00390625, %v865_v45  ;;  %v5343_v45 = vld [vmem:[#allocation15_spill] sm:$0xff] }
 0x169   : > { %3238 = vrsqrt.f32 %v981_v46  ;;  %v4601_v32 = vrot.slane %v592_v60, %v5343_v45  ;;  %v4607_v46 = vrot.slane %v593_v41, %v5343_v45 }
 0x16a   : > { %v982_v6 = vadd.f32 1e-05, %v950_v55  ;;  %v983_v17 = vadd.f32 1e-05, %v951_v28 }
 0x16b   : > { %v868_v21 = vpop.xlane.xlu1 %867  ;;  %v871_v47 = vpop.xlane.xlu0 %870 }
 0x16c   : > { %3240 = vrsqrt.f32 %v982_v6  ;;  %v952_v4 = vmul.f32 0.00390625, %v868_v21  ;;  %v953_v20 = vmul.f32 0.00390625, %v871_v47  ;;  %v4610_v6 = vrot.slane %v593_v41, %v5344_v8  ;;  %v5345_v8 = vld [vmem:[#allocation30_spill] sm:$0xff] }
 0x16d   : > { %3242 = vrsqrt.f32 %v983_v17 }
 0x16e   : > { %v984_v42 = vadd.f32 1e-05, %v952_v4  ;;  %v985_v63 = vadd.f32 1e-05, %v953_v20 }
 0x16f   : > { %v874_v55 = vpop.xlane.xlu1 %873  ;;  %v877_v28 = vpop.xlane.xlu0 %876 }
 0x170   : > { %3244 = vrsqrt.f32 %v984_v42  ;;  %v954_v43 = vmul.f32 0.00390625, %v874_v55  ;;  %v955_v3 = vmul.f32 0.00390625, %v877_v28 }
 0x171   : > { %v3235_v14 = vpop.eup %3234  ;;  %3246 = vrsqrt.f32 %v985_v63 }
 0x172   : > { %v1043_v17 = vmul.f32 %v3235_v14, %v4275_v23  ;;  %v1044_v21 = vmul.f32 %v3235_v14, %v4278_v27  ;;  %v986_v47 = vadd.f32 1e-05, %v954_v43  ;;  %v987_v4 = vadd.f32 1e-05, %v955_v3  ;;  %v5346_v3 = vld [vmem:[#allocation47_spill] sm:$0xff] }
 0x173   : > { %v880_v20 = vpop.xlane.xlu1 %879  ;;  %v883_v60 = vpop.xlane.xlu0 %882 }
 0x174   : > { %v1118_v42 = vmul.f32 %v4601_v32, %v1043_v17  ;;  %v1119_v55 = vmul.f32 %v4604_v11, %v1044_v21  ;;  %3248 = vrsqrt.f32 %v986_v47  ;;  %v956_v28 = vmul.f32 0.00390625, %v880_v20 }
 0x175   : > { %v3237_v45 = vpop.eup %3236  ;;  %3250 = vrsqrt.f32 %v987_v4  ;;  %v957_v2 = vmul.f32 0.00390625, %v883_v60 }
 0x176   : > { %v3239_v41 = vpop.eup %3238  ;;  %v1193_v63 = vadd.f32 %v4607_v46, %v1118_v42  ;;  %v1194_v23 = vadd.f32 %v4610_v6, %v1119_v55  ;;  %v1045_v27 = vmul.f32 %v3237_v45, %v4295_v7  ;;  %v1046_v43 = vmul.f32 %v3237_v45, %v5345_v8 }
 0x177   : > { %v1047_v14 = vmul.f32 %v3239_v41, %v5346_v3  ;;  %v1048_v17 = vmul.f32 %v3239_v41, %v5347_v30  ;;  %v988_v35 = vadd.f32 1e-05, %v956_v28  ;;  %v989_v21 = vadd.f32 1e-05, %v957_v2  ;;  %v5348_v28 = vld [vmem:[#allocation31_spill] sm:$0xff]  ;;  %v5350_v3 = vld [vmem:[#allocation50_spill] sm:$0xff] }
 0x178   : > { %v3146_v48 = vpack.c.bf16 %v1194_v23, %v1193_v63  ;;  %v1120_v4 = vmul.f32 %v4601_v32, %v1045_v27  ;;  %v1121_v60 = vmul.f32 %v4604_v11, %v1046_v43  ;;  %v5349_v63 = vld [vmem:[#allocation49_spill] sm:$0xff] }
 0x179   : > { %v3241_v40 = vpop.eup %3240  ;;  %v1122_v55 = vmul.f32 %v4601_v32, %v1047_v14  ;;  %v1123_v7 = vmul.f32 %v4604_v11, %v1048_v17  ;;  %3252 = vrsqrt.f32 %v988_v35 }
 0x17a   : > { %v3243_v8 = vpop.eup %3242  ;;  %1449 = vst [vmem:[#allocation2 + $0xb0] sm:$0xff] %v3146_v48  ;;  %v1195_v30 = vadd.f32 %v4607_v46, %v1120_v4  ;;  %v1196_v2 = vadd.f32 %v4610_v6, %v1121_v60  ;;  %v1049_v41 = vmul.f32 %v3241_v40, %v5348_v28  ;;  %v1050_v23 = vmul.f32 %v3241_v40, %v5349_v63 }
 0x17b   : > { %v1197_v27 = vadd.f32 %v4607_v46, %v1122_v55  ;;  %v1198_v43 = vadd.f32 %v4610_v6, %v1123_v7  ;;  %v1051_v14 = vmul.f32 %v3243_v8, %v5350_v3  ;;  %3254 = vrsqrt.f32 %v989_v21 }
 0x17c   : > { %v3147_v9 = vpack.c.bf16 %v1196_v2, %v1195_v30  ;;  %v1124_v48 = vmul.f32 %v4601_v32, %v1049_v41  ;;  %v1125_v4 = vmul.f32 %v4604_v11, %v1050_v23  ;;  %v5353_v2 = vld [vmem:[#allocation32_spill] sm:$0xff] }
 0x17d   : > { %v3245_v60 = vpop.eup %3244  ;;  %v3148_v28 = vpack.c.bf16 %v1198_v43, %v1197_v27  ;;  %v1126_v40 = vmul.f32 %v4601_v32, %v1051_v14  ;;  %v5354_v27 = vld [vmem:[#allocation33_spill] sm:$0xff] }
 0x17e   : > { %v3247_v7 = vpop.eup %3246  ;;  %1450 = vst [vmem:[#allocation2] sm:$0xff] %v3147_v9  ;;  %v1199_v3 = vadd.f32 %v4607_v46, %v1124_v48  ;;  %v1054_v41 = vmul.f32 %v3245_v60, %v5353_v2  ;;  %v5355_v14 = vld [vmem:[#allocation53_spill] sm:$0xff] }
 0x17f   : > { %1451 = vst [vmem:[#allocation2 + $0xd8] sm:$0xff] %v3148_v28  ;;  %v1201_v21 = vadd.f32 %v4607_v46, %v1126_v40  ;;  %v1055_v43 = vmul.f32 %v3247_v7, %v5354_v27  ;;  %v5356_v27 = vld [vmem:[#allocation54_spill] sm:$0xff] }
 0x185   : > { %v886_v47 = vpop.xlane.xlu1 %885 }
 0x186   : > { %v958_v42 = vmul.f32 0.00390625, %v886_v47  ;;  %v5351_v47 = vld [vmem:[#allocation51_spill] sm:$0xff] }
 0x187   : > { %v1052_v17 = vmul.f32 %v3243_v8, %v5351_v47  ;;  %v1200_v8 = vadd.f32 %v4610_v6, %v1125_v4  ;;  %v5352_v47 = vld [vmem:[#allocation52_spill] sm:$0xff]  ;;  %v1129_v4 = vmul.f32 %v4604_v11, %v1054_v41 }
 0x188   : > { %v990_v63 = vadd.f32 1e-05, %v958_v42  ;;  %v1053_v30 = vmul.f32 %v3245_v60, %v5352_v47  ;;  %v3249_v47 = vpop.eup %3248  ;;  %v1130_v60 = vmul.f32 %v4601_v32, %v1055_v43  ;;  %v5359_v43 = vld [vmem:[#allocation55_spill] sm:$0xff] }
 0x189   : > { %v1127_v55 = vmul.f32 %v4604_v11, %v1052_v17  ;;  %v1056_v17 = vmul.f32 %v3247_v7, %v5355_v14  ;;  %v3149_v9 = vpack.c.bf16 %v1200_v8, %v1199_v3  ;;  %v1204_v7 = vadd.f32 %v4610_v6, %v1129_v4  ;;  %v5357_v8 = vld [vmem:[#allocation34_spill] sm:$0xff] }
 0x18a   : > { %v892_v35 = vpop.xlane.xlu1 %891  ;;  %v1128_v48 = vmul.f32 %v4601_v32, %v1053_v30  ;;  %3256 = vrsqrt.f32 %v990_v63  ;;  %v1057_v3 = vmul.f32 %v3249_v47, %v5356_v27  ;;  %v1058_v30 = vmul.f32 %v3249_v47, %v5357_v8 }
 0x18b   : > { %v889_v20 = vpop.xlane.xlu0 %888  ;;  %v1202_v23 = vadd.f32 %v4610_v6, %v1127_v55  ;;  %v1131_v28 = vmul.f32 %v4604_v11, %v1056_v17  ;;  %v3251_v55 = vpop.eup %3250  ;;  %1452 = vst [vmem:[#allocation2 + $0x18] sm:$0xff] %v3149_v9  ;;  %v1205_v63 = vadd.f32 %v4607_v46, %v1130_v60  ;;  %v960_v60 = vmul.f32 0.00390625, %v892_v35 }
 0x18c   : > { %v959_v45 = vmul.f32 0.00390625, %v889_v20  ;;  %v1203_v2 = vadd.f32 %v4607_v46, %v1128_v48  ;;  %v1060_v14 = vmul.f32 %v3251_v55, %v5359_v43  ;;  %v1132_v48 = vmul.f32 %v4601_v32, %v1057_v3  ;;  %v3253_v8 = vpop.eup %3252 }
 0x18d   : > { %v3150_v50 = vpack.c.bf16 %v1202_v23, %v1201_v21  ;;  %v1206_v41 = vadd.f32 %v4610_v6, %v1131_v28  ;;  %v5358_v21 = vld [vmem:[#allocation35_spill] sm:$0xff]  ;;  %v1133_v4 = vmul.f32 %v4604_v11, %v1058_v30  ;;  %v1062_v30 = vmul.f32 %v3253_v8, %v4364_v62 }
 0x18e   : > { %v991_v40 = vadd.f32 1e-05, %v959_v45  ;;  %v1059_v23 = vmul.f32 %v3251_v55, %v5358_v21  ;;  %v3151_v9 = vpack.c.bf16 %v1204_v7, %v1203_v2  ;;  %v1207_v28 = vadd.f32 %v4607_v46, %v1132_v48  ;;  %v3255_v48 = vpop.eup %3254 }
 0x18f   : > { %1453 = vst [vmem:[#allocation2 + $0x50] sm:$0xff] %v3150_v50  ;;  %v3152_v27 = vpack.c.bf16 %v1206_v41, %v1205_v63  ;;  %v1135_v50 = vmul.f32 %v4604_v11, %v1060_v14  ;;  %v1208_v55 = vadd.f32 %v4610_v6, %v1133_v4 }
 0x190   : > { %3258 = vrsqrt.f32 %v991_v40  ;;  %v1134_v47 = vmul.f32 %v4601_v32, %v1059_v23  ;;  %1454 = vst [vmem:[#allocation2 + $0x68] sm:$0xff] %v3151_v9  ;;  %v5360_v40 = vld [vmem:[#allocation36_spill] sm:$0xff]  ;;  %v992_v23 = vadd.f32 1e-05, %v960_v60 }
 0x191   : > { %v898_v42 = vpop.xlane.xlu1 %897  ;;  %1455 = vst [vmem:[#allocation2 + $0x30] sm:$0xff] %v3152_v27  ;;  %v1210_v7 = vadd.f32 %v4610_v6, %v1135_v50  ;;  %v1061_v3 = vmul.f32 %v3253_v8, %v5360_v40  ;;  %v3153_v35 = vpack.c.bf16 %v1208_v55, %v1207_v28  ;;  %v1063_v27 = vmul.f32 %v3255_v48, %v4375_v5 }
 0x192   : > { %v895_v20 = vpop.xlane.xlu0 %894  ;;  %v962_v43 = vmul.f32 0.00390625, %v898_v42  ;;  %v1209_v2 = vadd.f32 %v4607_v46, %v1134_v47  ;;  %v1137_v42 = vmul.f32 %v4604_v11, %v1062_v30  ;;  %v1064_v47 = vmul.f32 %v3255_v48, %v4378_v54 }
 0x193   : > { %v961_v21 = vmul.f32 0.00390625, %v895_v20  ;;  %v1136_v20 = vmul.f32 %v4601_v32, %v1061_v3  ;;  %1456 = vst [vmem:[#allocation2 + $0x48] sm:$0xff] %v3153_v35  ;;  %3260 = vrsqrt.f32 %v992_v23 }
 0x194   : > { %v994_v9 = vadd.f32 1e-05, %v962_v43  ;;  %v3154_v38 = vpack.c.bf16 %v1210_v7, %v1209_v2  ;;  %v1212_v60 = vadd.f32 %v4610_v6, %v1137_v42 }
 0x195   : > { %v904_v45 = vpop.xlane.xlu1 %903  ;;  %v993_v14 = vadd.f32 1e-05, %v961_v21  ;;  %v1211_v50 = vadd.f32 %v4607_v46, %v1136_v20  ;;  %v1138_v21 = vmul.f32 %v4601_v32, %v1063_v27 }
 0x196   : > { %v901_v18 = vpop.xlane.xlu0 %900  ;;  %v964_v62 = vmul.f32 0.00390625, %v904_v45  ;;  %1457 = vst [vmem:[#allocation2 + $0x80] sm:$0xff] %v3154_v38 }
 0x197   : > { %v963_v4 = vmul.f32 0.00390625, %v901_v18  ;;  %3262 = vrsqrt.f32 %v993_v14  ;;  %v1139_v18 = vmul.f32 %v4604_v11, %v1064_v47  ;;  %v3257_v5 = vpop.eup %3256  ;;  %v3155_v2 = vpack.c.bf16 %v1212_v60, %v1211_v50 }
 0x198   : > { %3264 = vrsqrt.f32 %v994_v9  ;;  %v996_v43 = vadd.f32 1e-05, %v964_v62  ;;  %v1213_v38 = vadd.f32 %v4607_v46, %v1138_v21  ;;  %v1065_v40 = vmul.f32 %v3257_v5, %v4381_v15 }
 0x199   : > { %v910_v63 = vpop.xlane.xlu1 %909  ;;  %v995_v8 = vadd.f32 1e-05, %v963_v4  ;;  %v1214_v7 = vadd.f32 %v4610_v6, %v1139_v18  ;;  %v1066_v3 = vmul.f32 %v3257_v5, %v4384_v57  ;;  %1458 = vst [vmem:[#allocation2 + $0x88] sm:$0xff] %v3155_v2 }
 0x19a   : > { %v907_v17 = vpop.xlane.xlu0 %906  ;;  %v966_v45 = vmul.f32 0.00390625, %v910_v63  ;;  %v1140_v20 = vmul.f32 %v4601_v32, %v1065_v40 }
 0x19b   : > { %3266 = vrsqrt.f32 %v995_v8  ;;  %v965_v54 = vmul.f32 0.00390625, %v907_v17  ;;  %v3156_v48 = vpack.c.bf16 %v1214_v7, %v1213_v38  ;;  %v1141_v17 = vmul.f32 %v4604_v11, %v1066_v3 }
 0x19c   : > { %3268 = vrsqrt.f32 %v996_v43  ;;  %v998_v35 = vadd.f32 1e-05, %v966_v45  ;;  %v1215_v57 = vadd.f32 %v4607_v46, %v1140_v20 }
 0x19d   : > { %v916_v28 = vpop.xlane.xlu1 %915  ;;  %v997_v30 = vadd.f32 1e-05, %v965_v54  ;;  %v3259_v42 = vpop.eup %3258  ;;  %1459 = vst [vmem:[#allocation2 + $0xe8] sm:$0xff] %v3156_v48  ;;  %v1216_v47 = vadd.f32 %v4610_v6, %v1141_v17 }
 0x19e   : > { %v913_v41 = vpop.xlane.xlu0 %912  ;;  %v968_v63 = vmul.f32 0.00390625, %v916_v28  ;;  %v1068_v62 = vmul.f32 %v3259_v42, %v4398_v0 }
 0x19f   : > { %v967_v23 = vmul.f32 0.00390625, %v913_v41  ;;  %3270 = vrsqrt.f32 %v997_v30  ;;  %v1067_v41 = vmul.f32 %v3259_v42, %v4395_v10  ;;  %v3157_v18 = vpack.c.bf16 %v1216_v47, %v1215_v57 }
 0x1a0   : > { %3272 = vrsqrt.f32 %v998_v35  ;;  %v1000_v50 = vadd.f32 1e-05, %v968_v63  ;;  %v3261_v45 = vpop.eup %3260 }
 0x1a1   : > { %v922_v14 = vpop.xlane.xlu1 %921  ;;  %v999_v4 = vadd.f32 1e-05, %v967_v23  ;;  %v1142_v43 = vmul.f32 %v4601_v32, %v1067_v41  ;;  %1460 = vst [vmem:[#allocation2 + $0xb8] sm:$0xff] %v3157_v18 }
 0x1a2   : > { %v919_v55 = vpop.xlane.xlu0 %918  ;;  %v970_v15 = vmul.f32 0.00390625, %v922_v14  ;;  %v1069_v14 = vmul.f32 %v3261_v45, %v4401_v36 }
 0x1a3   : > { %v969_v27 = vmul.f32 0.00390625, %v919_v55  ;;  %v1143_v55 = vmul.f32 %v4604_v11, %v1068_v62  ;;  %3274 = vrsqrt.f32 %v999_v4  ;;  %v1217_v10 = vadd.f32 %v4607_v46, %v1142_v43 }
 0x1a4   : > { %v1002_v8 = vadd.f32 1e-05, %v970_v15  ;;  %3276 = vrsqrt.f32 %v1000_v50  ;;  %v3263_v35 = vpop.eup %3262 }
 0x1a5   : > { %v1001_v60 = vadd.f32 1e-05, %v969_v27  ;;  %v928_v21 = vpop.xlane.xlu1 %927  ;;  %v1218_v0 = vadd.f32 %v4610_v6, %v1143_v55  ;;  %v3265_v20 = vpop.eup %3264  ;;  %v1071_v17 = vmul.f32 %v3263_v35, %v4415_v39  ;;  %v1072_v63 = vmul.f32 %v3263_v35, %v4418_v33 }
 0x1a6   : > { %v925_v9 = vpop.xlane.xlu0 %924  ;;  %v972_v2 = vmul.f32 0.00390625, %v928_v21  ;;  %v1144_v27 = vmul.f32 %v4601_v32, %v1069_v14  ;;  %v1073_v36 = vmul.f32 %v3265_v20, %v4421_v22 }
 0x1a7   : > { %v971_v5 = vmul.f32 0.00390625, %v925_v9  ;;  %3278 = vrsqrt.f32 %v1001_v60  ;;  %v3158_v23 = vpack.c.bf16 %v1218_v0, %v1217_v10  ;;  %v1070_v9 = vmul.f32 %v3261_v45, %v4404_v61 }
 0x1a8   : > { %3280 = vrsqrt.f32 %v1002_v8  ;;  %v4690_v7 = vadd.f32 1e-05, %v972_v2  ;;  %v3267_v4 = vpop.eup %3266  ;;  %v1074_v61 = vmul.f32 %v3265_v20, %v4424_v13  ;;  %v1146_v57 = vmul.f32 %v4601_v32, %v1071_v17 }
 0x1a9   : > { %v1003_v38 = vadd.f32 1e-05, %v971_v5  ;;  %v934_v3 = vpop.xlane.xlu1 %933  ;;  %1461 = vst [vmem:[#allocation2 + $0x60] sm:$0xff] %v3158_v23  ;;  %v1145_v15 = vmul.f32 %v4604_v11, %v1070_v9  ;;  %v1147_v47 = vmul.f32 %v4604_v11, %v1072_v63  ;;  %v1075_v39 = vmul.f32 %v3267_v4, %v4435_v25  ;;  %v3269_v41 = vpop.eup %3268 }
 0x1aa   : > { %v931_v28 = vpop.xlane.xlu0 %930  ;;  %v4696_v48 = vmul.f32 0.00390625, %v934_v3  ;;  %v1076_v33 = vmul.f32 %v3267_v4, %v4438_v24  ;;  %v1219_v62 = vadd.f32 %v4607_v46, %v1144_v27  ;;  %v1148_v60 = vmul.f32 %v4601_v32, %v1073_v36 }
 0x1ab   : > { %v973_v54 = vmul.f32 0.00390625, %v931_v28  ;;  %3282 = vrsqrt.f32 %v1003_v38  ;;  %v1220_v50 = vadd.f32 %v4610_v6, %v1145_v15  ;;  %v1149_v8 = vmul.f32 %v4604_v11, %v1074_v61 }
 0x1ac   : > { %v1221_v22 = vadd.f32 %v4607_v46, %v1146_v57  ;;  %v1222_v13 = vadd.f32 %v4610_v6, %v1147_v47  ;;  %v1150_v21 = vmul.f32 %v4601_v32, %v1075_v39  ;;  %v1151_v28 = vmul.f32 %v4604_v11, %v1076_v33  ;;  %v3271_v25 = vpop.eup %3270 }
 0x1ad   : > { %v4692_v40 = vadd.f32 1e-05, %v973_v54  ;;  %v3159_v18 = vpack.c.bf16 %v1220_v50, %v1219_v62  ;;  %v1223_v24 = vadd.f32 %v4607_v46, %v1148_v60  ;;  %v1224_v43 = vadd.f32 %v4610_v6, %v1149_v8  ;;  %v3273_v0 = vpop.eup %3272 }
 0x1ae   : > { %v937_v30 = vpop.xlane.xlu0 %936  ;;  %v1077_v55 = vmul.f32 %v3269_v41, %v4441_v56  ;;  %v3160_v5 = vpack.c.bf16 %v1222_v13, %v1221_v22  ;;  %v1225_v2 = vadd.f32 %v4607_v46, %v1150_v21  ;;  %v1226_v54 = vadd.f32 %v4610_v6, %v1151_v28  ;;  %v940_v22 = vpop.xlane.xlu1 %939 }
 0x1af   : > { %v4700_v42 = vmul.f32 0.00390625, %v937_v30  ;;  %v1078_v10 = vmul.f32 %v3269_v41, %v4444_v49  ;;  %1462 = vst [vmem:[#allocation2 + $0xf0] sm:$0xff] %v3159_v18  ;;  %v3161_v45 = vpack.c.bf16 %v1224_v43, %v1223_v24  ;;  %v1079_v3 = vmul.f32 %v3271_v25, %v4455_v37 }
 0x1b0   : > { %v1152_v38 = vmul.f32 %v4601_v32, %v1077_v55  ;;  %v1080_v30 = vmul.f32 %v3271_v25, %v4458_v19  ;;  %v3275_v35 = vpop.eup %3274  ;;  %1463 = vst [vmem:[#allocation2 + $0x8] sm:$0xff] %v3160_v5  ;;  %v3162_v23 = vpack.c.bf16 %v1226_v54, %v1225_v2  ;;  %v1081_v14 = vmul.f32 %v3273_v0, %v4461_v31 }
 0x1b1   : > { %v1153_v56 = vmul.f32 %v4604_v11, %v1078_v10  ;;  %v1082_v9 = vmul.f32 %v3273_v0, %v4464_v16  ;;  %v3277_v20 = vpop.eup %3276  ;;  %1464 = vst [vmem:[#allocation2 + $0x78] sm:$0xff] %v3161_v45  ;;  %v1154_v17 = vmul.f32 %v4601_v32, %v1079_v3  ;;  %v1083_v37 = vmul.f32 %v3275_v35, %v4475_v29 }
 0x1b2   : > { %v1227_v49 = vadd.f32 %v4607_v46, %v1152_v38  ;;  %v1155_v63 = vmul.f32 %v4604_v11, %v1080_v30  ;;  %1465 = vst [vmem:[#allocation2 + $0x38] sm:$0xff] %v3162_v23  ;;  %v1156_v27 = vmul.f32 %v4601_v32, %v1081_v14  ;;  %v1084_v16 = vmul.f32 %v3275_v35, %v4478_v51  ;;  %v943_v30 = vpop.xlane.xlu0 %942  ;;  %v946_v35 = vpop.xlane.xlu1 %945 }
 0x1b3   : > { %v1228_v4 = vadd.f32 %v4610_v6, %v1153_v56  ;;  %v1157_v31 = vmul.f32 %v4604_v11, %v1082_v9  ;;  %v1229_v36 = vadd.f32 %v4607_v46, %v1154_v17  ;;  %v1158_v57 = vmul.f32 %v4601_v32, %v1083_v37 }
 0x1b4   : > { %v3279_v19 = vpop.eup %3278  ;;  %v1230_v61 = vadd.f32 %v4610_v6, %v1155_v63  ;;  %v1085_v47 = vmul.f32 %v3277_v20, %v4481_v52  ;;  %v1231_v39 = vadd.f32 %v4607_v46, %v1156_v27  ;;  %v1159_v41 = vmul.f32 %v4604_v11, %v1084_v16  ;;  %v5361_v27 = vld [vmem:[#allocation37_spill] sm:$0xff] }
 0x1b5   : > { %v3281_v15 = vpop.eup %3280  ;;  %v3163_v29 = vpack.c.bf16 %v1228_v4, %v1227_v49  ;;  %v1232_v33 = vadd.f32 %v4610_v6, %v1157_v31  ;;  %v1233_v51 = vadd.f32 %v4607_v46, %v1158_v57  ;;  %v1086_v60 = vmul.f32 %v3277_v20, %v4484_v34  ;;  %v5363_v57 = vld [vmem:[#allocation39_spill] sm:$0xff] }
 0x1b6   : > { %v3164_v50 = vpack.c.bf16 %v1230_v61, %v1229_v36  ;;  %v1160_v8 = vmul.f32 %v4601_v32, %v1085_v47  ;;  %v1234_v52 = vadd.f32 %v4610_v6, %v1159_v41  ;;  %v1087_v21 = vmul.f32 %v3279_v19, %v4495_v58  ;;  %v5362_v36 = vld [vmem:[#allocation38_spill] sm:$0xff] }
 0x1b7   : > { %1466 = vst [vmem:[#allocation2 + $0x58] sm:$0xff] %v3163_v29  ;;  %v3165_v13 = vpack.c.bf16 %v1232_v33, %v1231_v39  ;;  %v1088_v28 = vmul.f32 %v3279_v19, %v4498_v12  ;;  %v1161_v25 = vmul.f32 %v4604_v11, %v1086_v60  ;;  %v1089_v24 = vmul.f32 %v3281_v15, %v4501_v44  ;;  %v5365_v60 = vld [vmem:[#allocation41_spill] sm:$0xff] }
 0x1b8   : > { %v3283_v62 = vpop.eup %3282  ;;  %1467 = vst [vmem:[#allocation2 + $0x40] sm:$0xff] %v3164_v50  ;;  %v1235_v18 = vadd.f32 %v4607_v46, %v1160_v8  ;;  %v1090_v34 = vmul.f32 %v3281_v15, %v4504_v59  ;;  %v3166_v43 = vpack.c.bf16 %v1234_v52, %v1233_v51  ;;  %v1162_v55 = vmul.f32 %v4601_v32, %v1087_v21  ;;  %v5364_v50 = vld [vmem:[#allocation40_spill] sm:$0xff]  ;;  %v5367_v52 = vld [vmem:[#allocation43_spill] sm:$0xff] }
 0x1b9   : > { %1468 = vst [vmem:[#allocation2 + $0xc8] sm:$0xff] %v3165_v13  ;;  %v1163_v5 = vmul.f32 %v4604_v11, %v1088_v28  ;;  %v1091_v2 = vmul.f32 %v3283_v62, %v4515_v1  ;;  %v1236_v58 = vadd.f32 %v4610_v6, %v1161_v25  ;;  %v1164_v12 = vmul.f32 %v4601_v32, %v1089_v24 }
 0x1ba   : > { %v1165_v54 = vmul.f32 %v4604_v11, %v1090_v34  ;;  %v1092_v10 = vmul.f32 %v3283_v62, %v4518_v53  ;;  %1469 = vst [vmem:[#allocation2 + $0xe0] sm:$0xff] %v3166_v43  ;;  %v1237_v44 = vadd.f32 %v4607_v46, %v1162_v55  ;;  %3284 = vrsqrt.f32 %v4690_v7 }
 0x1bb   : > { %v1238_v59 = vadd.f32 %v4610_v6, %v1163_v5  ;;  %v1166_v0 = vmul.f32 %v4601_v32, %v1091_v2  ;;  %v3167_v45 = vpack.c.bf16 %v1236_v58, %v1235_v18  ;;  %v1239_v1 = vadd.f32 %v4607_v46, %v1164_v12 }
 0x1bc   : > { %v1240_v38 = vadd.f32 %v4610_v6, %v1165_v54  ;;  %v1167_v3 = vmul.f32 %v4604_v11, %v1092_v10  ;;  %3286 = vrsqrt.f32 %v4692_v40  ;;  %v1006_v56 = vadd.f32 1e-05, %v4696_v48  ;;  %v5368_v54 = vld [vmem:[#allocation44_spill] sm:$0xff] }
 0x1bd   : > { %v3168_v23 = vpack.c.bf16 %v1238_v59, %v1237_v44  ;;  %v1241_v53 = vadd.f32 %v4607_v46, %v1166_v0  ;;  %1470 = vst [vmem:[#allocation2 + $0x90] sm:$0xff] %v3167_v45  ;;  %v1007_v9 = vadd.f32 1e-05, %v4700_v42  ;;  %v976_v20 = vmul.f32 0.00390625, %v940_v22  ;;  %v5366_v22 = vld [vmem:[#allocation42_spill] sm:$0xff]  ;;  %v5369_v44 = vld [vmem:[#allocation45_spill] sm:$0xff] }
 0x1be   : > { %v3169_v14 = vpack.c.bf16 %v1240_v38, %v1239_v1  ;;  %v1242_v7 = vadd.f32 %v4610_v6, %v1167_v3  ;;  %3288 = vrsqrt.f32 %v1006_v56  ;;  %v977_v49 = vmul.f32 0.00390625, %v943_v30  ;;  %v5370_v0 = vld [vmem:[#allocation46_spill] sm:$0xff] }
 0x1bf   : > { %1471 = vst [vmem:[#allocation2 + $0x70] sm:$0xff] %v3168_v23  ;;  %v978_v17 = vmul.f32 0.00390625, %v946_v35  ;;  %3290 = vrsqrt.f32 %v1007_v9  ;;  %v1008_v37 = vadd.f32 1e-05, %v976_v20  ;;  %v5372_v20 = vld [vmem:[#allocation5_spill] sm:$0xff] }
 0x1c0   : > { %1472 = vst [vmem:[#allocation2 + $0xc0] sm:$0xff] %v3169_v14  ;;  %v3170_v63 = vpack.c.bf16 %v1242_v7, %v1241_v53  ;;  %v1009_v19 = vadd.f32 1e-05, %v977_v49  ;;  %v5371_v53 = vld [vmem:[#allocation4_spill] sm:$0xff] }
 0x1c1   : > { %v1010_v4 = vadd.f32 1e-05, %v978_v17  ;;  %3292 = vrsqrt.f32 %v1008_v37  ;;  %v5373_v17 = vld [vmem:[#allocation6_spill] sm:$0xff] }
 0x1c2   : > { %1473 = vst [vmem:[#allocation2 + $0xa8] sm:$0xff] %v3170_v63  ;;  %3294 = vrsqrt.f32 %v1009_v19 }
 0x1c3   : > { %3296 = vrsqrt.f32 %v1010_v4 }
 0x1c7   : > { %v3285_v40 = vpop.eup %3284 }
 0x1c8   : > { %v1093_v48 = vmul.f32 %v3285_v40, %v4521_v26  ;;  %v1094_v42 = vmul.f32 %v3285_v40, %v5361_v27 }
 0x1c9   : > { %v3287_v31 = vpop.eup %3286 }
 0x1ca   : > { %v1168_v16 = vmul.f32 %v4601_v32, %v1093_v48  ;;  %v1169_v15 = vmul.f32 %v4604_v11, %v1094_v42  ;;  %v1095_v61 = vmul.f32 %v3287_v31, %v5362_v36  ;;  %v1096_v47 = vmul.f32 %v3287_v31, %v5363_v57 }
 0x1cb   : > { %v3289_v29 = vpop.eup %3288 }
 0x1cc   : > { %v3291_v39 = vpop.eup %3290  ;;  %v1243_v33 = vadd.f32 %v4607_v46, %v1168_v16  ;;  %v1244_v41 = vadd.f32 %v4610_v6, %v1169_v15  ;;  %v1170_v62 = vmul.f32 %v4601_v32, %v1095_v61  ;;  %v1171_v26 = vmul.f32 %v4604_v11, %v1096_v47 }
 0x1cd   : > { %v1097_v51 = vmul.f32 %v3289_v29, %v5364_v50  ;;  %v1098_v8 = vmul.f32 %v3289_v29, %v5365_v60  ;;  %v1099_v13 = vmul.f32 %v3291_v39, %v5366_v22  ;;  %v1100_v21 = vmul.f32 %v3291_v39, %v5367_v52 }
 0x1ce   : > { %v3293_v28 = vpop.eup %3292  ;;  %v3171_v25 = vpack.c.bf16 %v1244_v41, %v1243_v33  ;;  %v1245_v18 = vadd.f32 %v4607_v46, %v1170_v62  ;;  %v1246_v24 = vadd.f32 %v4610_v6, %v1171_v26 }
 0x1cf   : > { %v3295_v34 = vpop.eup %3294  ;;  %v1172_v43 = vmul.f32 %v4601_v32, %v1097_v51  ;;  %v1173_v55 = vmul.f32 %v4604_v11, %v1098_v8  ;;  %v1174_v5 = vmul.f32 %v4601_v32, %v1099_v13  ;;  %v1175_v2 = vmul.f32 %v4604_v11, %v1100_v21 }
 0x1d0   : > { %v3297_v58 = vpop.eup %3296  ;;  %1474 = vst [vmem:[#allocation2 + $0xd0] sm:$0xff] %v3171_v25  ;;  %v3172_v12 = vpack.c.bf16 %v1246_v24, %v1245_v18  ;;  %v1101_v10 = vmul.f32 %v3293_v28, %v5368_v54  ;;  %v1102_v59 = vmul.f32 %v3293_v28, %v5369_v44  ;;  %v1103_v45 = vmul.f32 %v3295_v34, %v5370_v0 }
 0x1d1   : > { %v1247_v1 = vadd.f32 %v4607_v46, %v1172_v43  ;;  %v1248_v38 = vadd.f32 %v4610_v6, %v1173_v55  ;;  %v1249_v3 = vadd.f32 %v4607_v46, %v1174_v5  ;;  %v1250_v30 = vadd.f32 %v4610_v6, %v1175_v2 }
 0x1d2   : > { %1475 = vst [vmem:[#allocation2 + $0x10] sm:$0xff] %v3172_v12  ;;  %v1176_v35 = vmul.f32 %v4601_v32, %v1101_v10  ;;  %v1177_v23 = vmul.f32 %v4604_v11, %v1102_v59  ;;  %v1104_v56 = vmul.f32 %v3295_v34, %v5371_v53  ;;  %v1178_v14 = vmul.f32 %v4601_v32, %v1103_v45 }
 0x1d3   : > { %v3173_v7 = vpack.c.bf16 %v1248_v38, %v1247_v1  ;;  %v3174_v9 = vpack.c.bf16 %v1250_v30, %v1249_v3  ;;  %v1105_v49 = vmul.f32 %v3297_v58, %v5372_v20  ;;  %v1106_v63 = vmul.f32 %v3297_v58, %v5373_v17 }
 0x1d4   : > { %v1251_v37 = vadd.f32 %v4607_v46, %v1176_v35  ;;  %v1252_v19 = vadd.f32 %v4610_v6, %v1177_v23  ;;  %v1179_v4 = vmul.f32 %v4604_v11, %v1104_v56  ;;  %v1253_v40 = vadd.f32 %v4607_v46, %v1178_v14 }
 0x1d5   : > { %1476 = vst [vmem:[#allocation2 + $0x28] sm:$0xff] %v3173_v7  ;;  %1477 = vst [vmem:[#allocation2 + $0xa0] sm:$0xff] %v3174_v9  ;;  %v1180_v48 = vmul.f32 %v4601_v32, %v1105_v49  ;;  %v1181_v27 = vmul.f32 %v4604_v11, %v1106_v63 }
 0x1d6   : > { %v3175_v42 = vpack.c.bf16 %v1252_v19, %v1251_v37  ;;  %v1254_v31 = vadd.f32 %v4610_v6, %v1179_v4 }
 0x1d7   : > { %v1255_v16 = vadd.f32 %v4607_v46, %v1180_v48  ;;  %v1256_v15 = vadd.f32 %v4610_v6, %v1181_v27 }
 0x1d8   : > { %1478 = vst [vmem:[#allocation2 + $0xf8] sm:$0xff] %v3175_v42  ;;  %v3176_v36 = vpack.c.bf16 %v1254_v31, %v1253_v40 }
 0x1d9   : > { %v3177_v61 = vpack.c.bf16 %v1256_v15, %v1255_v16 }
 0x1da   : > { %1479 = vst [vmem:[#allocation2 + $0x20] sm:$0xff] %v3176_v36 }
 0x1db   : > { %1480 = vst [vmem:[#allocation2 + $0x98] sm:$0xff] %v3177_v61 }
 0x1dc PF: > { %v3298_v32 = vld [vmem:[%s3684_s14 + $0x74] ss:$8 sps:$4 sm:$0xff]   ;;  %v3300_v11 = vld [vmem:[%s3684_s14 + $0x70] ss:$8 sps:$4 sm:$0xff]   ;;  %v3301_v46 = vld [vmem:[%s3684_s14 + $0x64] ss:$8 sps:$4 sm:$0xff]  }
 0x1dd   : > { %2017 = vmatprep.subr.bf16.mxu0 %v3298_v32  ;;  %v3303_v6 = vld [vmem:[%s3684_s14 + $0x60] ss:$8 sps:$4 sm:$0xff]   ;;  %v3304_v57 = vld [vmem:[%s3684_s14 + $0x54] ss:$8 sps:$4 sm:$0xff]   ;;  %v3306_v47 = vld [vmem:[%s3684_s14 + $0x50] ss:$8 sps:$4 sm:$0xff]  }
 0x1de   : > { %2018 = vmatpush1.bf16.msra.mxu0 %v3300_v11  ;;  %v3307_v29 = vld [vmem:[%s3684_s14 + $0x44] ss:$8 sps:$4 sm:$0xff]   ;;  %v3309_v39 = vld [vmem:[%s3684_s14 + $0x40] ss:$8 sps:$4 sm:$0xff]   ;;  %v3310_v33 = vld [vmem:[%s3684_s14 + $0x34] ss:$8 sps:$4 sm:$0xff]  }
 0x1df   : > { %2019 = vmatprep.subr.bf16.mxu0 %v3301_v46  ;;  %v3312_v41 = vld [vmem:[%s3684_s14 + $0x30] ss:$8 sps:$4 sm:$0xff]   ;;  %v3313_v62 = vld [vmem:[%s3684_s14 + $0x24] ss:$8 sps:$4 sm:$0xff]   ;;  %v3315_v26 = vld [vmem:[%s3684_s14 + $0x20] ss:$8 sps:$4 sm:$0xff]  }
 0x1e0   : > { %v3316_v50 = vld [vmem:[%s3684_s14 + $0x14] ss:$8 sps:$4 sm:$0xff]   ;;  %v3318_v60 = vld [vmem:[%s3684_s14 + $0x10] ss:$8 sps:$4 sm:$0xff]   ;;  %v3319_v8 = vld [vmem:[%s3684_s14 + $0x4] ss:$8 sps:$4 sm:$0xff]  }
 0x1e1   : > { %v3348_v51 = vld [vmem:[#allocation2 + $0xb4] ss:$-176 sps:$4 sm:$0xff]   ;;  %v3321_v22 = vld [vmem:[%s3684_s14] ss:$8 sps:$4 sm:$0xff]   ;;  %v3324_v52 = vld [vmem:[%s3684_s14 + $0xf0] ss:$8 sps:$4 sm:$0xff]  }
 0x1e2   : > { %2020 = vmatpush1.bf16.msra.mxu0 %v3303_v6  ;;  %2049 = vmatprep.mubr.bf16.mxu0 %v3348_v51  ;;  %v3322_v13 = vld [vmem:[%s3684_s14 + $0xf4] ss:$8 sps:$4 sm:$0xff]   ;;  %v3325_v21 = vld [vmem:[%s3684_s14 + $0xe4] ss:$8 sps:$4 sm:$0xff]   ;;  %v3327_v28 = vld [vmem:[%s3684_s14 + $0xe0] ss:$8 sps:$4 sm:$0xff]  }
 0x1e3   : > { %2021 = vmatprep.subr.bf16.mxu0 %v3304_v57  ;;  %v3328_v25 = vld [vmem:[%s3684_s14 + $0xd4] ss:$8 sps:$4 sm:$0xff]   ;;  %v3330_v18 = vld [vmem:[%s3684_s14 + $0xd0] ss:$8 sps:$4 sm:$0xff]   ;;  %v3331_v24 = vld [vmem:[%s3684_s14 + $0xc4] ss:$8 sps:$4 sm:$0xff]  }
 0x1e4   : > { %v3333_v34 = vld [vmem:[%s3684_s14 + $0xc0] ss:$8 sps:$4 sm:$0xff]   ;;  %v3334_v43 = vld [vmem:[%s3684_s14 + $0xb4] ss:$8 sps:$4 sm:$0xff]   ;;  %v3336_v55 = vld [vmem:[%s3684_s14 + $0xb0] ss:$8 sps:$4 sm:$0xff]  }
 0x1e5   : > { %v3337_v5 = vld [vmem:[%s3684_s14 + $0xa4] ss:$8 sps:$4 sm:$0xff]   ;;  %v3339_v2 = vld [vmem:[%s3684_s14 + $0xa0] ss:$8 sps:$4 sm:$0xff]   ;;  %v3340_v58 = vld [vmem:[%s3684_s14 + $0x94] ss:$8 sps:$4 sm:$0xff]  }
 0x1e6   : > { %2022 = vmatpush1.bf16.msra.mxu0 %v3306_v47  ;;  %v3342_v12 = vld [vmem:[%s3684_s14 + $0x90] ss:$8 sps:$4 sm:$0xff]   ;;  %v3343_v54 = vld [vmem:[%s3684_s14 + $0x84] ss:$8 sps:$4 sm:$0xff]   ;;  %v3388_v10 = vld [vmem:[%s3682_s13 + $0x74] ss:$8 sps:$4 sm:$0xff]  }
 0x1e7   : > { %2023 = vmatprep.subr.bf16.mxu0 %v3307_v29  ;;  %v3390_v44 = vld [vmem:[%s3682_s13 + $0x70] ss:$8 sps:$4 sm:$0xff]   ;;  %v3391_v59 = vld [vmem:[%s3682_s13 + $0x64] ss:$8 sps:$4 sm:$0xff]   ;;  %v3345_v0 = vld [vmem:[%s3684_s14 + $0x80] ss:$8 sps:$4 sm:$0xff]   ;;  %2562 = vmatprep.subr.bf16.mxu1 %v3388_v10 }
 0x1e8   : > { %v1623_v45 = vld [vmem:[#allocation2 + $0xd8] sm:$0xff]  ;;  %2563 = vmatpush1.bf16.msra.mxu1 %v3390_v44  ;;  %v3393_v38 = vld [vmem:[%s3682_s13 + $0x60] ss:$8 sps:$4 sm:$0xff]   ;;  %v3397_v53 = vld [vmem:[%s3682_s13 + $0x44] ss:$8 sps:$4 sm:$0xff]  }
 0x1e9   : > { %v1624_v1 = vld [vmem:[#allocation2 + $0x18] sm:$0xff]  ;;  %v3346_v3 = vld [vmem:[#allocation2 + $0xb0] ss:$-176 sps:$4 sm:$0xff]   ;;  %2564 = vmatprep.subr.bf16.mxu1 %v3391_v59  ;;  %v3349_v9 = vld [vmem:[#allocation2 + $0x54] ss:$24 sps:$4 sm:$0xff]  }
 0x1ea   : > { %2024 = vmatpush1.bf16.msra.mxu0 %v3309_v39  ;;  %v3394_v30 = vld [vmem:[%s3682_s13 + $0x54] ss:$8 sps:$4 sm:$0xff]   ;;  %v3047_v35 = vcombine.high %v1623_v45, %v1624_v1  ;;  %v3396_v23 = vld [vmem:[%s3682_s13 + $0x50] ss:$8 sps:$4 sm:$0xff]   ;;  %v3399_v56 = vld [vmem:[%s3682_s13 + $0x40] ss:$8 sps:$4 sm:$0xff]   ;;  %v3046_v14 = vcombine.low %v1623_v45, %v1624_v1  ;;  %v1687_v45 = vlaneseq }
 0x1eb   : > { %2025 = vmatprep.subr.bf16.mxu0 %v3310_v33  ;;  %v3400_v7 = vld [vmem:[%s3682_s13 + $0x34] ss:$8 sps:$4 sm:$0xff]   ;;  %v3402_v20 = vld [vmem:[%s3682_s13 + $0x30] ss:$8 sps:$4 sm:$0xff]   ;;  %v3403_v49 = vld [vmem:[%s3682_s13 + $0x24] ss:$8 sps:$4 sm:$0xff]  }
 0x1ec   : > { %2565 = vmatpush1.bf16.msra.mxu1 %v3393_v38  ;;  %v3405_v17 = vld [vmem:[%s3682_s13 + $0x20] ss:$8 sps:$4 sm:$0xff]   ;;  %v3406_v37 = vld [vmem:[%s3682_s13 + $0x14] ss:$8 sps:$4 sm:$0xff]   ;;  %v3408_v4 = vld [vmem:[%s3682_s13 + $0x10] ss:$8 sps:$4 sm:$0xff]  }
 0x1ed   : > { %2566 = vmatprep.subr.bf16.mxu1 %v3394_v30  ;;  %v3351_v63 = vld [vmem:[#allocation2 + $0x50] ss:$24 sps:$4 sm:$0xff]   ;;  %v3352_v19 = vld [vmem:[#allocation2 + $0x34] ss:$24 sps:$4 sm:$0xff]   ;;  %v3382_v10 = vld [vmem:[#allocation2 + $0xa4] ss:$88 sps:$4 sm:$0xff]  }
 0x1ee   : > { %2026 = vmatpush1.bf16.msra.mxu0 %v3312_v41  ;;  %v3409_v40 = vld [vmem:[%s3682_s13 + $0x4] ss:$8 sps:$4 sm:$0xff]   ;;  %v3411_v48 = vld [vmem:[%s3682_s13] ss:$8 sps:$4 sm:$0xff]   ;;  %v3412_v42 = vld [vmem:[%s3682_s13 + $0xf4] ss:$8 sps:$4 sm:$0xff]  }
 0x1ef   : > { %2027 = vmatprep.subr.bf16.mxu0 %v3313_v62  ;;  %v3354_v27 = vld [vmem:[#allocation2 + $0x30] ss:$24 sps:$4 sm:$0xff]   ;;  %v3355_v31 = vld [vmem:[#allocation2 + $0x84] ss:$8 sps:$4 sm:$0xff]   ;;  %v3418_v32 = vld [vmem:[%s3682_s13 + $0xd4] ss:$8 sps:$4 sm:$0xff]  }
 0x1f0   : > { %2567 = vmatpush1.bf16.msra.mxu1 %v3396_v23  ;;  %v3414_v16 = vld [vmem:[%s3682_s13 + $0xf0] ss:$8 sps:$4 sm:$0xff]   ;;  %v3415_v15 = vld [vmem:[%s3682_s13 + $0xe4] ss:$8 sps:$4 sm:$0xff]   ;;  %v3417_v36 = vld [vmem:[%s3682_s13 + $0xe0] ss:$8 sps:$4 sm:$0xff]  }
 0x1f1   : > { %2568 = vmatprep.subr.bf16.mxu1 %v3397_v53  ;;  %v3357_v61 = vld [vmem:[#allocation2 + $0x80] ss:$8 sps:$4 sm:$0xff]   ;;  %v3358_v11 = vld [vmem:[#allocation2 + $0xec] ss:$-48 sps:$4 sm:$0xff]   ;;  %v3420_v46 = vld [vmem:[%s3682_s13 + $0xd0] ss:$8 sps:$4 sm:$0xff]  }
 0x1f2   : > { %2028 = vmatpush1.bf16.msra.mxu0 %v3315_v26  ;;  %v3421_v6 = vld [vmem:[%s3682_s13 + $0xc4] ss:$8 sps:$4 sm:$0xff]   ;;  %v3423_v57 = vld [vmem:[%s3682_s13 + $0xc0] ss:$8 sps:$4 sm:$0xff]   ;;  %v3424_v29 = vld [vmem:[%s3682_s13 + $0xb4] ss:$8 sps:$4 sm:$0xff]  }
 0x1f3   : > { %2029 = vmatprep.subr.bf16.mxu0 %v3316_v50  ;;  %v3360_v47 = vld [vmem:[#allocation2 + $0xe8] ss:$-48 sps:$4 sm:$0xff]   ;;  %v3361_v39 = vld [vmem:[#allocation2 + $0x64] ss:$144 sps:$4 sm:$0xff]   ;;  %v3363_v41 = vld [vmem:[#allocation2 + $0x60] ss:$144 sps:$4 sm:$0xff]  }
 0x1f4   : > { %2569 = vmatpush1.bf16.msra.mxu1 %v3399_v56  ;;  %v3426_v33 = vld [vmem:[%s3682_s13 + $0xb0] ss:$8 sps:$4 sm:$0xff]   ;;  %v3364_v62 = vld [vmem:[#allocation2 + $0xc] ss:$112 sps:$4 sm:$0xff]   ;;  %v1688_v1 = vshrl.u32 %v1687_v45, 7 }
 0x1f5   : > { %2570 = vmatprep.subr.bf16.mxu1 %v3400_v7  ;;  %v1637_v26 = vld [vmem:[#allocation2 + $0x38] sm:$0xff]  ;;  %v1685_v30 = vld [vmem:[%s508_s19] sm:$0x3] }
 0x1f6   : > { %2030 = vmatpush1.bf16.msra.mxu0 %v3318_v60  ;;  %v1638_v50 = vld [vmem:[#allocation2 + $0x58] sm:$0xff]  ;;  %v1693_v38 = vsub.s32 1, %v1688_v1 }
 0x1f7   : > { %2031 = vmatprep.subr.bf16.mxu0 %v3319_v8  ;;  %v3366_v51 = vld [vmem:[#allocation2 + $0x8] ss:$112 sps:$4 sm:$0xff]   ;;  %v3061_v60 = vcombine.high %v1637_v26, %v1638_v50  ;;  %v3060_v8 = vcombine.low %v1637_v26, %v1638_v50  ;;  %v3385_v59 = vld [vmem:[#allocation2 + $0x24] ss:$120 sps:$4 sm:$0xff]  }
 0x1f8   : > { %2571 = vmatpush1.bf16.msra.mxu1 %v3402_v20  ;;  %v3384_v44 = vld [vmem:[#allocation2 + $0xa0] ss:$88 sps:$4 sm:$0xff]   ;;  %v4885_v23 = vrot.slane %v1685_v30, %v1693_v38 }
 0x1f9   : > { %2572 = vmatprep.subr.bf16.mxu1 %v3403_v49 }
 0x1fa   : > { %2032 = vmatpush1.bf16.msra.mxu0 %v3321_v22  ;;  %v3367_v22 = vld [vmem:[#allocation2 + $0x44] ss:$136 sps:$4 sm:$0xff]  }
 0x1fb   : > { %2033 = vmatprep.subr.bf16.mxu0 %v3322_v13  ;;  %v3427_v13 = vld [vmem:[%s3682_s13 + $0xa4] ss:$8 sps:$4 sm:$0xff]  }
 0x1fc   : > { %2573 = vmatpush1.bf16.msra.mxu1 %v3405_v17 }
 0x1fd   : > { %2574 = vmatprep.subr.bf16.mxu1 %v3406_v37 }
 0x1fe   : > { %2034 = vmatpush2.bf16.msra.mxu0 %v3324_v52  ;;  %v3429_v52 = vld [vmem:[%s3682_s13 + $0xa0] ss:$8 sps:$4 sm:$0xff]  }
 0x1ff   : > { %2035 = vmatprep.subr.bf16.mxu0 %v3325_v21  ;;  %v3369_v21 = vld [vmem:[#allocation2 + $0x40] ss:$136 sps:$4 sm:$0xff]  }
 0x200   : > { %2575 = vmatpush1.bf16.msra.mxu1 %v3408_v4 }
 0x201   : > { %2576 = vmatprep.subr.bf16.mxu1 %v3409_v40 }
 0x202   : > { %2036 = vmatpush2.bf16.msra.mxu0 %v3327_v28  ;;  %v3430_v28 = vld [vmem:[%s3682_s13 + $0x94] ss:$8 sps:$4 sm:$0xff]  }
 0x203   : > { %2037 = vmatprep.subr.bf16.mxu0 %v3328_v25  ;;  %v3370_v25 = vld [vmem:[#allocation2 + $0xe4] ss:$-80 sps:$4 sm:$0xff]  }
 0x204   : > { %2577 = vmatpush1.bf16.msra.mxu1 %v3411_v48 }
 0x205   : > { %2578 = vmatprep.subr.bf16.mxu1 %v3412_v42 }
 0x206   : > { %2038 = vmatpush2.bf16.msra.mxu0 %v3330_v18  ;;  %v3432_v18 = vld [vmem:[%s3682_s13 + $0x90] ss:$8 sps:$4 sm:$0xff]  }
 0x207   : > { %2039 = vmatprep.subr.bf16.mxu0 %v3331_v24  ;;  %v3433_v24 = vld [vmem:[%s3682_s13 + $0x84] ss:$8 sps:$4 sm:$0xff]  }
 0x208   : > { %2579 = vmatpush2.bf16.msra.mxu1 %v3414_v16 }
 0x209   : > { %2580 = vmatprep.subr.bf16.mxu1 %v3415_v15 }
 0x20a   : > { %2040 = vmatpush2.bf16.msra.mxu0 %v3333_v34  ;;  %v3435_v34 = vld [vmem:[%s3682_s13 + $0x80] ss:$8 sps:$4 sm:$0xff]  }
 0x20b   : > { %2041 = vmatprep.subr.bf16.mxu0 %v3334_v43  ;;  %v3372_v43 = vld [vmem:[#allocation2 + $0xe0] ss:$-80 sps:$4 sm:$0xff]  }
 0x20c   : > { %2581 = vmatpush2.bf16.msra.mxu1 %v3417_v36 }
 0x20d   : > { %2582 = vmatprep.subr.bf16.mxu1 %v3418_v32 }
 0x20e   : > { %2042 = vmatpush2.bf16.msra.mxu0 %v3336_v55  ;;  %v3373_v55 = vld [vmem:[#allocation2 + $0x74] ss:$80 sps:$4 sm:$0xff]  }
 0x20f   : > { %2043 = vmatprep.subr.bf16.mxu0 %v3337_v5  ;;  %v3375_v5 = vld [vmem:[#allocation2 + $0x70] ss:$80 sps:$4 sm:$0xff]  }
 0x210   : > { %2583 = vmatpush2.bf16.msra.mxu1 %v3420_v46 }
 0x211   : > { %2584 = vmatprep.subr.bf16.mxu1 %v3421_v6 }
 0x212   : > { %2044 = vmatpush2.bf16.msra.mxu0 %v3339_v2  ;;  %v3376_v2 = vld [vmem:[#allocation2 + $0xac] ss:$40 sps:$4 sm:$0xff]  }
 0x213   : > { %2045 = vmatprep.subr.bf16.mxu0 %v3340_v58  ;;  %v3378_v58 = vld [vmem:[#allocation2 + $0xa8] ss:$40 sps:$4 sm:$0xff]  }
 0x214   : > { %2585 = vmatpush2.bf16.msra.mxu1 %v3423_v57 }
 0x215   : > { %2586 = vmatprep.subr.bf16.mxu1 %v3424_v29 }
 0x216   : > { %2046 = vmatpush2.bf16.msra.mxu0 %v3342_v12  ;;  %v3379_v12 = vld [vmem:[#allocation2 + $0x14] ss:$24 sps:$4 sm:$0xff]  }
 0x217   : > { %2047 = vmatprep.subr.bf16.mxu0 %v3343_v54  ;;  %v3381_v54 = vld [vmem:[#allocation2 + $0x10] ss:$24 sps:$4 sm:$0xff]  }
 0x218   : > { %2587 = vmatpush2.bf16.msra.mxu1 %v3426_v33 }
 0x219   : > { %2588 = vmatprep.subr.bf16.mxu1 %v3427_v13 }
 0x21a   : > { %2048 = vmatpush2.bf16.msra.mxu0 %v3345_v0  ;;  %v3387_v0 = vld [vmem:[#allocation2 + $0x20] ss:$120 sps:$4 sm:$0xff]  }
 0x21c   : > { %2589 = vmatpush2.bf16.msra.mxu1 %v3429_v52 }
 0x21d   : > { %2050 = vmatmul.mubr.bf16.vlgmr.msra.gmra.mxu0 %v3346_v3  ;;  %2590 = vmatprep.subr.bf16.mxu1 %v3430_v28  ;;  %v1689_v3 = vsub.s32 0, %v1688_v1 }
 0x21e   : > { %2059 = vmatprep.mubr.bf16.mxu0 %v3047_v35 }
 0x21f   : > { %v4887_v53 = vrot.slane %v1685_v30, %v1689_v3 }
 0x220   : > { %2591 = vmatpush2.bf16.msra.mxu1 %v3432_v18 }
 0x221   : > { %2592 = vmatprep.subr.bf16.mxu1 %v3433_v24 }
 0x224   : > { %2593 = vmatpush2.bf16.msra.mxu1 %v3435_v34 }
 0x225   : > { %2060 = vmatmul.mubr.bf16.gmra.mxu0 %v3046_v14 }
 0x226   : > { %2069 = vmatprep.mubr.bf16.mxu0 %v3349_v9 }
 0x22d   : > { %2070 = vmatmul.mubr.bf16.gmra.mxu0 %v3351_v63 }
 0x22e   : > { %2079 = vmatprep.mubr.bf16.mxu0 %v3352_v19 }
 0x235   : > { %2080 = vmatmul.mubr.bf16.gmra.mxu0 %v3354_v27 }
 0x236   : > { %2089 = vmatprep.mubr.bf16.mxu0 %v3355_v31 }
 0x23d   : > { %2090 = vmatmul.mubr.bf16.gmra.mxu0 %v3357_v61 }
 0x23e   : > { %2099 = vmatprep.mubr.bf16.mxu0 %v3358_v11 }
 0x245   : > { %2100 = vmatmul.mubr.bf16.gmra.mxu0 %v3360_v47 }
 0x246   : > { %2109 = vmatprep.mubr.bf16.mxu0 %v3361_v39 }
 0x24d   : > { %2110 = vmatmul.mubr.bf16.gmra.mxu0 %v3363_v41 }
 0x24e   : > { %2119 = vmatprep.mubr.bf16.mxu0 %v3364_v62 }
 0x255   : > { %2120 = vmatmul.mubr.bf16.gmra.mxu0 %v3366_v51 }
 0x256   : > { %2129 = vmatprep.mubr.bf16.mxu0 %v3061_v60 }
 0x25d   : > { %2130 = vmatmul.mubr.bf16.gmra.mxu0 %v3060_v8 }
 0x25e   : > { %2139 = vmatprep.mubr.bf16.mxu0 %v3367_v22 }
 0x265   : > { %2140 = vmatmul.mubr.bf16.gmra.mxu0 %v3369_v21 }
 0x266   : > { %2149 = vmatprep.mubr.bf16.mxu0 %v3370_v25 }
 0x26d   : > { %2150 = vmatmul.mubr.bf16.gmra.mxu0 %v3372_v43 }
 0x26e   : > { %2159 = vmatprep.mubr.bf16.mxu0 %v3373_v55 }
 0x275   : > { %2160 = vmatmul.mubr.bf16.gmra.mxu0 %v3375_v5 }
 0x276   : > { %2169 = vmatprep.mubr.bf16.mxu0 %v3376_v2 }
 0x27d   : > { %2170 = vmatmul.mubr.bf16.gmra.mxu0 %v3378_v58 }
 0x27e   : > { %2179 = vmatprep.mubr.bf16.mxu0 %v3379_v12 }
 0x285   : > { %2180 = vmatmul.mubr.bf16.gmra.mxu0 %v3381_v54 }
 0x286   : > { %2189 = vmatprep.mubr.bf16.mxu0 %v3382_v10 }
 0x28d   : > { %2190 = vmatmul.mubr.bf16.gmra.mxu0 %v3384_v44 }
 0x28e   : > { %2199 = vmatprep.mubr.bf16.mxu0 %v3385_v59 }
 0x295   : > { %2200 = vmatmul.mubr.bf16.gmra.mxu0 %v3387_v0 }
 0x2dd   : > { %v2051_v35 = vpop.f32.mrf.mxu0 }
 0x2de   : > { %v2052_v20 = vadd.f32 %v2051_v35, %v4887_v53 }
 0x2df   : > { %v2053_v56 = vpop.f32.mrf.mxu0 }
 0x2e0   : > { %v2054_v7 = vadd.f32 %v2053_v56, %v4885_v23  ;;  %v2210_v40 = vmax.f32 %v2052_v20, 0.0 }
 0x2e1   : > { %v2055_v14 = vpop.f32.mrf.mxu0 }
 0x2e2   : > { %v2056_v9 = vadd.f32 %v2055_v14, %v4887_v53  ;;  %v2211_v19 = vmax.f32 %v2054_v7, 0.0 }
 0x2e3   : > { %v2057_v49 = vpop.f32.mrf.mxu0 }
 0x2e4   : > { %v2058_v17 = vadd.f32 %v2057_v49, %v4885_v23  ;;  %v2212_v63 = vmax.f32 %v2056_v9, 0.0 }
 0x2e5   : > { %v2061_v37 = vpop.f32.mrf.mxu0 }
 0x2e6   : > { %v2213_v4 = vmax.f32 %v2058_v17, 0.0  ;;  %v2338_v42 = vpack.c.bf16 %v2212_v63, %v2210_v40  ;;  %v2062_v36 = vadd.f32 %v2061_v37, %v4887_v53 }
 0x2e7   : > { %v2063_v48 = vpop.f32.mrf.mxu0 }
 0x2e8   : > { %v2339_v27 = vpack.c.bf16 %v2213_v4, %v2211_v19  ;;  %v2064_v16 = vadd.f32 %v2063_v48, %v4885_v23  ;;  %v2214_v47 = vmax.f32 %v2062_v36, 0.0 }
 0x2e9   : > { %v2065_v31 = vpop.f32.mrf.mxu0 }
 0x2ea   : > { %v2066_v15 = vadd.f32 %v2065_v31, %v4887_v53  ;;  %2594 = vmatprep.mubr.bf16.mxu1 %v2339_v27  ;;  %v2215_v6 = vmax.f32 %v2064_v16, 0.0 }
 0x2eb   : > { %v2067_v61 = vpop.f32.mrf.mxu0  ;;  %2595 = vmatmul.mubr.bf16.vlgmr.msra.gmra.mxu1 %v2338_v42 }
 0x2ec   : > { %v2068_v32 = vadd.f32 %v2067_v61, %v4885_v23  ;;  %v2216_v11 = vmax.f32 %v2066_v15, 0.0 }
 0x2ed   : > { %v2071_v46 = vpop.f32.mrf.mxu0 }
 0x2ee   : > { %v2217_v57 = vmax.f32 %v2068_v32, 0.0  ;;  %v2340_v33 = vpack.c.bf16 %v2216_v11, %v2214_v47  ;;  %v2072_v50 = vadd.f32 %v2071_v46, %v4887_v53 }
 0x2ef   : > { %v2073_v29 = vpop.f32.mrf.mxu0 }
 0x2f0   : > { %v2341_v39 = vpack.c.bf16 %v2217_v57, %v2215_v6  ;;  %v2074_v62 = vadd.f32 %v2073_v29, %v4885_v23  ;;  %v2218_v21 = vmax.f32 %v2072_v50, 0.0 }
 0x2f1   : > { %v2075_v41 = vpop.f32.mrf.mxu0 }
 0x2f2   : > { %v2076_v26 = vadd.f32 %v2075_v41, %v4887_v53  ;;  %2604 = vmatprep.mubr.bf16.mxu1 %v2341_v39  ;;  %v2219_v13 = vmax.f32 %v2074_v62, 0.0 }
 0x2f3   : > { %v2077_v51 = vpop.f32.mrf.mxu0  ;;  %2605 = vmatmul.mubr.bf16.gmra.mxu1 %v2340_v33 }
 0x2f4   : > { %v2078_v60 = vadd.f32 %v2077_v51, %v4885_v23  ;;  %v2220_v8 = vmax.f32 %v2076_v26, 0.0 }
 0x2f5   : > { %v2081_v22 = vpop.f32.mrf.mxu0 }
 0x2f6   : > { %v2221_v52 = vmax.f32 %v2078_v60, 0.0  ;;  %v2342_v18 = vpack.c.bf16 %v2220_v8, %v2218_v21  ;;  %v2082_v55 = vadd.f32 %v2081_v22, %v4887_v53 }
 0x2f7   : > { %v2083_v28 = vpop.f32.mrf.mxu0 }
 0x2f8   : > { %v2343_v25 = vpack.c.bf16 %v2221_v52, %v2219_v13  ;;  %v2084_v34 = vadd.f32 %v2083_v28, %v4885_v23  ;;  %v2222_v44 = vmax.f32 %v2082_v55, 0.0 }
 0x2f9   : > { %v2085_v24 = vpop.f32.mrf.mxu0 }
 0x2fa   : > { %v2086_v43 = vadd.f32 %v2085_v24, %v4887_v53  ;;  %2614 = vmatprep.mubr.bf16.mxu1 %v2343_v25  ;;  %v2223_v54 = vmax.f32 %v2084_v34, 0.0 }
 0x2fb   : > { %v2087_v5 = vpop.f32.mrf.mxu0  ;;  %2615 = vmatmul.mubr.bf16.gmra.mxu1 %v2342_v18 }
 0x2fc   : > { %v2088_v2 = vadd.f32 %v2087_v5, %v4885_v23  ;;  %v2224_v58 = vmax.f32 %v2086_v43, 0.0 }
 0x2fd   : > { %v2091_v12 = vpop.f32.mrf.mxu0 }
 0x2fe   : > { %v2225_v10 = vmax.f32 %v2088_v2, 0.0  ;;  %v2344_v45 = vpack.c.bf16 %v2224_v58, %v2222_v44  ;;  %v2092_v30 = vadd.f32 %v2091_v12, %v4887_v53 }
 0x2ff   : > { %v2093_v59 = vpop.f32.mrf.mxu0 }
 0x300   : > { %v2345_v0 = vpack.c.bf16 %v2225_v10, %v2223_v54  ;;  %v2094_v38 = vadd.f32 %v2093_v59, %v4885_v23  ;;  %v2226_v49 = vmax.f32 %v2092_v30, 0.0 }
 0x301   : > { %v2095_v1 = vpop.f32.mrf.mxu0 }
 0x302   : > { %v2096_v3 = vadd.f32 %v2095_v1, %v4887_v53  ;;  %2624 = vmatprep.mubr.bf16.mxu1 %v2345_v0  ;;  %v2227_v9 = vmax.f32 %v2094_v38, 0.0 }
 0x303   : > { %v2097_v35 = vpop.f32.mrf.mxu0  ;;  %2625 = vmatmul.mubr.bf16.gmra.mxu1 %v2344_v45 }
 0x304   : > { %v2098_v56 = vadd.f32 %v2097_v35, %v4885_v23  ;;  %v2228_v14 = vmax.f32 %v2096_v3, 0.0 }
 0x305   : > { %v2101_v7 = vpop.f32.mrf.mxu0 }
 0x306   : > { %v2229_v20 = vmax.f32 %v2098_v56, 0.0  ;;  %v2346_v37 = vpack.c.bf16 %v2228_v14, %v2226_v49  ;;  %v2102_v48 = vadd.f32 %v2101_v7, %v4887_v53 }
 0x307   : > { %v2103_v17 = vpop.f32.mrf.mxu0 }
 0x308   : > { %v2347_v63 = vpack.c.bf16 %v2229_v20, %v2227_v9  ;;  %v2104_v4 = vadd.f32 %v2103_v17, %v4885_v23  ;;  %v2230_v61 = vmax.f32 %v2102_v48, 0.0 }
 0x309   : > { %v2105_v19 = vpop.f32.mrf.mxu0 }
 0x30a   : > { %v2106_v40 = vadd.f32 %v2105_v19, %v4887_v53  ;;  %2634 = vmatprep.mubr.bf16.mxu1 %v2347_v63  ;;  %v2231_v15 = vmax.f32 %v2104_v4, 0.0 }
 0x30b   : > { %v2107_v27 = vpop.f32.mrf.mxu0  ;;  %2635 = vmatmul.mubr.bf16.gmra.mxu1 %v2346_v37 }
 0x30c   : > { %v2108_v42 = vadd.f32 %v2107_v27, %v4885_v23  ;;  %v2232_v31 = vmax.f32 %v2106_v40, 0.0 }
 0x30d   : > { %v2111_v16 = vpop.f32.mrf.mxu0 }
 0x30e   : > { %v2233_v36 = vmax.f32 %v2108_v42, 0.0  ;;  %v2348_v46 = vpack.c.bf16 %v2232_v31, %v2230_v61  ;;  %v2112_v29 = vadd.f32 %v2111_v16, %v4887_v53 }
 0x30f   : > { %v2113_v32 = vpop.f32.mrf.mxu0 }
 0x310   : > { %v2349_v11 = vpack.c.bf16 %v2233_v36, %v2231_v15  ;;  %v2114_v57 = vadd.f32 %v2113_v32, %v4885_v23  ;;  %v2234_v51 = vmax.f32 %v2112_v29, 0.0 }
 0x311   : > { %v2115_v6 = vpop.f32.mrf.mxu0 }
 0x312   : > { %v2116_v47 = vadd.f32 %v2115_v6, %v4887_v53  ;;  %2644 = vmatprep.mubr.bf16.mxu1 %v2349_v11  ;;  %v2235_v26 = vmax.f32 %v2114_v57, 0.0 }
 0x313   : > { %v2117_v39 = vpop.f32.mrf.mxu0  ;;  %2645 = vmatmul.mubr.bf16.gmra.mxu1 %v2348_v46 }
 0x314   : > { %v2118_v33 = vadd.f32 %v2117_v39, %v4885_v23  ;;  %v2236_v41 = vmax.f32 %v2116_v47, 0.0 }
 0x315   : > { %v2121_v62 = vpop.f32.mrf.mxu0 }
 0x316   : > { %v2237_v50 = vmax.f32 %v2118_v33, 0.0  ;;  %v2350_v22 = vpack.c.bf16 %v2236_v41, %v2234_v51  ;;  %v2122_v28 = vadd.f32 %v2121_v62, %v4887_v53 }
 0x317   : > { %v2123_v60 = vpop.f32.mrf.mxu0 }
 0x318   : > { %v2351_v8 = vpack.c.bf16 %v2237_v50, %v2235_v26  ;;  %v2124_v52 = vadd.f32 %v2123_v60, %v4885_v23  ;;  %v2238_v5 = vmax.f32 %v2122_v28, 0.0 }
 0x319   : > { %v2125_v13 = vpop.f32.mrf.mxu0 }
 0x31a   : > { %v2126_v21 = vadd.f32 %v2125_v13, %v4887_v53  ;;  %2654 = vmatprep.mubr.bf16.mxu1 %v2351_v8  ;;  %v2239_v43 = vmax.f32 %v2124_v52, 0.0 }
 0x31b   : > { %v2127_v25 = vpop.f32.mrf.mxu0  ;;  %2655 = vmatmul.mubr.bf16.gmra.mxu1 %v2350_v22 }
 0x31c   : > { %v2128_v18 = vadd.f32 %v2127_v25, %v4885_v23  ;;  %v2240_v24 = vmax.f32 %v2126_v21, 0.0 }
 0x31d   : > { %v2131_v34 = vpop.f32.mrf.mxu0 }
 0x31e   : > { %v2241_v55 = vmax.f32 %v2128_v18, 0.0  ;;  %v2352_v12 = vpack.c.bf16 %v2240_v24, %v2238_v5  ;;  %v2132_v59 = vadd.f32 %v2131_v34, %v4887_v53 }
 0x31f   : > { %v2133_v2 = vpop.f32.mrf.mxu0 }
 0x320   : > { %v2353_v58 = vpack.c.bf16 %v2241_v55, %v2239_v43  ;;  %v2134_v10 = vadd.f32 %v2133_v2, %v4885_v23  ;;  %v2242_v35 = vmax.f32 %v2132_v59, 0.0 }
 0x321   : > { %v2135_v54 = vpop.f32.mrf.mxu0 }
 0x322   : > { %v2136_v44 = vadd.f32 %v2135_v54, %v4887_v53  ;;  %2664 = vmatprep.mubr.bf16.mxu1 %v2353_v58  ;;  %v2243_v3 = vmax.f32 %v2134_v10, 0.0 }
 0x323   : > { %v2137_v0 = vpop.f32.mrf.mxu0  ;;  %2665 = vmatmul.mubr.bf16.gmra.mxu1 %v2352_v12 }
 0x324   : > { %v2138_v45 = vadd.f32 %v2137_v0, %v4885_v23  ;;  %v2244_v1 = vmax.f32 %v2136_v44, 0.0 }
 0x325   : > { %v2141_v38 = vpop.f32.mrf.mxu0 }
 0x326   : > { %v2245_v30 = vmax.f32 %v2138_v45, 0.0  ;;  %v2354_v7 = vpack.c.bf16 %v2244_v1, %v2242_v35  ;;  %v2142_v17 = vadd.f32 %v2141_v38, %v4887_v53 }
 0x327   : > { %v2143_v56 = vpop.f32.mrf.mxu0 }
 0x328   : > { %v2355_v14 = vpack.c.bf16 %v2245_v30, %v2243_v3  ;;  %v2144_v20 = vadd.f32 %v2143_v56, %v4885_v23  ;;  %v2246_v27 = vmax.f32 %v2142_v17, 0.0 }
 0x329   : > { %v2145_v9 = vpop.f32.mrf.mxu0 }
 0x32a   : > { %v2146_v49 = vadd.f32 %v2145_v9, %v4887_v53  ;;  %2674 = vmatprep.mubr.bf16.mxu1 %v2355_v14  ;;  %v2247_v40 = vmax.f32 %v2144_v20, 0.0 }
 0x32b   : > { %v2147_v63 = vpop.f32.mrf.mxu0  ;;  %2675 = vmatmul.mubr.bf16.gmra.mxu1 %v2354_v7 }
 0x32c   : > { %v2148_v37 = vadd.f32 %v2147_v63, %v4885_v23  ;;  %v2248_v19 = vmax.f32 %v2146_v49, 0.0 }
 0x32d   : > { %v2151_v4 = vpop.f32.mrf.mxu0 }
 0x32e   : > { %v2249_v48 = vmax.f32 %v2148_v37, 0.0  ;;  %v2356_v16 = vpack.c.bf16 %v2248_v19, %v2246_v27  ;;  %v2152_v32 = vadd.f32 %v2151_v4, %v4887_v53 }
 0x32f   : > { %v2153_v42 = vpop.f32.mrf.mxu0 }
 0x330   : > { %v2357_v31 = vpack.c.bf16 %v2249_v48, %v2247_v40  ;;  %v2154_v36 = vadd.f32 %v2153_v42, %v4885_v23  ;;  %v2250_v39 = vmax.f32 %v2152_v32, 0.0 }
 0x331   : > { %v2155_v15 = vpop.f32.mrf.mxu0 }
 0x332   : > { %v2156_v61 = vadd.f32 %v2155_v15, %v4887_v53  ;;  %2684 = vmatprep.mubr.bf16.mxu1 %v2357_v31  ;;  %v2251_v47 = vmax.f32 %v2154_v36, 0.0 }
 0x333   : > { %v2157_v11 = vpop.f32.mrf.mxu0  ;;  %2685 = vmatmul.mubr.bf16.gmra.mxu1 %v2356_v16 }
 0x334   : > { %v2158_v46 = vadd.f32 %v2157_v11, %v4885_v23  ;;  %v2252_v6 = vmax.f32 %v2156_v61, 0.0 }
 0x335   : > { %v2161_v57 = vpop.f32.mrf.mxu0 }
 0x336   : > { %v2253_v29 = vmax.f32 %v2158_v46, 0.0  ;;  %v2358_v62 = vpack.c.bf16 %v2252_v6, %v2250_v39  ;;  %v2162_v60 = vadd.f32 %v2161_v57, %v4887_v53 }
 0x337   : > { %v2163_v33 = vpop.f32.mrf.mxu0 }
 0x338   : > { %v2359_v41 = vpack.c.bf16 %v2253_v29, %v2251_v47  ;;  %v2164_v50 = vadd.f32 %v2163_v33, %v4885_v23  ;;  %v2254_v25 = vmax.f32 %v2162_v60, 0.0 }
 0x339   : > { %v2165_v26 = vpop.f32.mrf.mxu0 }
 0x33a   : > { %v2166_v51 = vadd.f32 %v2165_v26, %v4887_v53  ;;  %2694 = vmatprep.mubr.bf16.mxu1 %v2359_v41  ;;  %v2255_v21 = vmax.f32 %v2164_v50, 0.0 }
 0x33b   : > { %v2167_v8 = vpop.f32.mrf.mxu0  ;;  %2695 = vmatmul.mubr.bf16.gmra.mxu1 %v2358_v62 }
 0x33c   : > { %v2168_v22 = vadd.f32 %v2167_v8, %v4885_v23  ;;  %v2256_v13 = vmax.f32 %v2166_v51, 0.0 }
 0x33d   : > { %v2171_v52 = vpop.f32.mrf.mxu0 }
 0x33e   : > { %v2257_v28 = vmax.f32 %v2168_v22, 0.0  ;;  %v2360_v34 = vpack.c.bf16 %v2256_v13, %v2254_v25  ;;  %v2172_v2 = vadd.f32 %v2171_v52, %v4887_v53  ;;  %v2274_v13 = vld [vmem:[%s3671_s18] sm:$0xff]  ;;  %v2275_v52 = vld [vmem:[%s3671_s18 + $0x8] sm:$0xff] }
 0x33f   : > { %v2173_v18 = vpop.f32.mrf.mxu0 }
 0x340   : > { %v2361_v24 = vpack.c.bf16 %v2257_v28, %v2255_v21  ;;  %v2174_v55 = vadd.f32 %v2173_v18, %v4885_v23  ;;  %v2258_v0 = vmax.f32 %v2172_v2, 0.0 }
 0x341   : > { %v2175_v43 = vpop.f32.mrf.mxu0 }
 0x342   : > { %v2176_v5 = vadd.f32 %v2175_v43, %v4887_v53  ;;  %2704 = vmatprep.mubr.bf16.mxu1 %v2361_v24  ;;  %v2259_v44 = vmax.f32 %v2174_v55, 0.0  ;;  %v2277_v24 = vld [vmem:[%s3671_s18 + $0x18] sm:$0xff]  ;;  %v2278_v55 = vld [vmem:[%s3671_s18 + $0x20] sm:$0xff] }
 0x343   : > { %v2177_v58 = vpop.f32.mrf.mxu0  ;;  %2705 = vmatmul.mubr.bf16.gmra.mxu1 %v2360_v34 }
 0x344   : > { %v2178_v12 = vadd.f32 %v2177_v58, %v4885_v23  ;;  %v2260_v54 = vmax.f32 %v2176_v5, 0.0  ;;  %v2279_v58 = vld [vmem:[%s3671_s18 + $0x28] sm:$0xff] }
 0x345   : > { %v2181_v10 = vpop.f32.mrf.mxu0 }
 0x346   : > { %v2261_v59 = vmax.f32 %v2178_v12, 0.0  ;;  %v2362_v38 = vpack.c.bf16 %v2260_v54, %v2258_v0  ;;  %v2182_v56 = vadd.f32 %v2181_v10, %v4887_v53  ;;  %v2280_v10 = vld [vmem:[%s3671_s18 + $0x30] sm:$0xff]  ;;  %v2281_v0 = vld [vmem:[%s3671_s18 + $0x38] sm:$0xff] }
 0x347   : > { %v2183_v45 = vpop.f32.mrf.mxu0 }
 0x348   : > { %v2363_v1 = vpack.c.bf16 %v2261_v59, %v2259_v44  ;;  %v2184_v30 = vadd.f32 %v2183_v45, %v4885_v23  ;;  %v2262_v63 = vmax.f32 %v2182_v56, 0.0 }
 0x349   : > { %v2185_v3 = vpop.f32.mrf.mxu0 }
 0x34a   : > { %v2186_v35 = vadd.f32 %v2185_v3, %v4887_v53  ;;  %2714 = vmatprep.mubr.bf16.mxu1 %v2363_v1  ;;  %v2263_v49 = vmax.f32 %v2184_v30, 0.0 }
 0x34b   : > { %v2187_v14 = vpop.f32.mrf.mxu0  ;;  %2715 = vmatmul.mubr.bf16.gmra.mxu1 %v2362_v38  ;;  %v2282_v38 = vld [vmem:[%s3671_s18 + $0x40] sm:$0xff] }
 0x34c   : > { %v2188_v7 = vadd.f32 %v2187_v14, %v4885_v23  ;;  %v2264_v9 = vmax.f32 %v2186_v35, 0.0  ;;  %v2283_v35 = vld [vmem:[%s3671_s18 + $0x48] sm:$0xff] }
 0x34d   : > { %v2191_v20 = vpop.f32.mrf.mxu0 }
 0x34e   : > { %v2265_v17 = vmax.f32 %v2188_v7, 0.0  ;;  %v2364_v4 = vpack.c.bf16 %v2264_v9, %v2262_v63  ;;  %v2192_v42 = vadd.f32 %v2191_v20, %v4887_v53  ;;  %v2284_v7 = vld [vmem:[%s3671_s18 + $0x50] sm:$0xff] }
 0x34f   : > { %v2193_v37 = vpop.f32.mrf.mxu0 }
 0x350   : > { %v2365_v19 = vpack.c.bf16 %v2265_v17, %v2263_v49  ;;  %v2194_v48 = vadd.f32 %v2193_v37, %v4885_v23  ;;  %v2266_v11 = vmax.f32 %v2192_v42, 0.0  ;;  %v2285_v49 = vld [vmem:[%s3671_s18 + $0x58] sm:$0xff]  ;;  %v2286_v37 = vld [vmem:[%s3671_s18 + $0x60] sm:$0xff]  ;;  %v2288_v42 = vld [vmem:[%s3671_s18 + $0x70] sm:$0xff] }
 0x351   : > { %v2195_v40 = vpop.f32.mrf.mxu0 }
 0x352   : > { %v2196_v27 = vadd.f32 %v2195_v40, %v4887_v53  ;;  %2724 = vmatprep.mubr.bf16.mxu1 %v2365_v19  ;;  %v2267_v61 = vmax.f32 %v2194_v48, 0.0  ;;  %v2287_v40 = vld [vmem:[%s3671_s18 + $0x68] sm:$0xff] }
 0x353   : > { %v2197_v31 = vpop.f32.mrf.mxu0  ;;  %2725 = vmatmul.mubr.bf16.gmra.mxu1 %v2364_v4 }
 0x354   : > { %v2198_v16 = vadd.f32 %v2197_v31, %v4885_v23  ;;  %v2268_v15 = vmax.f32 %v2196_v27, 0.0 }
 0x355   : > { %v2201_v36 = vpop.f32.mrf.mxu0 }
 0x356   : > { %v2269_v32 = vmax.f32 %v2198_v16, 0.0  ;;  %v2366_v57 = vpack.c.bf16 %v2268_v15, %v2266_v11  ;;  %v2202_v33 = vadd.f32 %v2201_v36, %v4887_v53  ;;  %v2289_v15 = vld [vmem:[%s3671_s18 + $0x78] sm:$0xff] }
 0x357   : > { %v2203_v46 = vpop.f32.mrf.mxu0 }
 0x358   : > { %v2367_v6 = vpack.c.bf16 %v2269_v32, %v2267_v61  ;;  %v2204_v29 = vadd.f32 %v2203_v46, %v4885_v23  ;;  %v2270_v60 = vmax.f32 %v2202_v33, 0.0  ;;  %v2290_v32 = vld [vmem:[%s3671_s18 + $0x80] sm:$0xff] }
 0x359   : > { %v2205_v47 = vpop.f32.mrf.mxu0 }
 0x35a   : > { %v2206_v39 = vadd.f32 %v2205_v47, %v4887_v53  ;;  %2734 = vmatprep.mubr.bf16.mxu1 %v2367_v6  ;;  %v2271_v50 = vmax.f32 %v2204_v29, 0.0  ;;  %v2291_v6 = vld [vmem:[%s3671_s18 + $0x88] sm:$0xff]  ;;  %v2292_v29 = vld [vmem:[%s3671_s18 + $0x90] sm:$0xff] }
 0x35b   : > { %v2207_v41 = vpop.f32.mrf.mxu0  ;;  %2735 = vmatmul.mubr.bf16.gmra.mxu1 %v2366_v57 }
 0x35c   : > { %v2208_v62 = vadd.f32 %v2207_v41, %v4885_v23  ;;  %v2272_v26 = vmax.f32 %v2206_v39, 0.0  ;;  %v2276_v23 = vld [vmem:[%s3671_s18 + $0x10] sm:$0xff]  ;;  %v2293_v41 = vld [vmem:[%s3671_s18 + $0x98] sm:$0xff] }
 0x35e   : > { %v2273_v51 = vmax.f32 %v2208_v62, 0.0  ;;  %v2368_v22 = vpack.c.bf16 %v2272_v26, %v2270_v60 }
 0x360   : > { %v2369_v8 = vpack.c.bf16 %v2273_v51, %v2271_v50  ;;  %v2294_v50 = vld [vmem:[%s3671_s18 + $0xa0] sm:$0xff] }
 0x362   : > { %2744 = vmatprep.mubr.bf16.mxu1 %v2369_v8  ;;  %v2295_v8 = vld [vmem:[%s3671_s18 + $0xa8] sm:$0xff] }
 0x363   : > { %2745 = vmatmul.mubr.bf16.gmra.mxu1 %v2368_v22 }
 0x3ab   : > { %v2596_v53 = vpop.f32.mrf.mxu1 }
 0x3ac   : > { %v2755_v21 = vadd.f32 %v2596_v53, %v2274_v13  ;;  %v2296_v53 = vld [vmem:[%s3671_s18 + $0xb0] sm:$0xff] }
 0x3ad   : > { %v2598_v28 = vpop.f32.mrf.mxu1 }
 0x3ae   : > { %2819 = vst [vmem:[%s3671_s18] sm:$0xff] %v2755_v21  ;;  %v2756_v25 = vadd.f32 %v2598_v28, %v2275_v52  ;;  %v2297_v28 = vld [vmem:[%s3671_s18 + $0xb8] sm:$0xff] }
 0x3af   : > { %v2600_v18 = vpop.f32.mrf.mxu1 }
 0x3b0   : > { %2820 = vst [vmem:[%s3671_s18 + $0x8] sm:$0xff] %v2756_v25  ;;  %v2757_v34 = vadd.f32 %v2600_v18, %v2276_v23  ;;  %v2298_v18 = vld [vmem:[%s3671_s18 + $0xc0] sm:$0xff] }
 0x3b1   : > { %v2602_v43 = vpop.f32.mrf.mxu1 }
 0x3b2   : > { %2821 = vst [vmem:[%s3671_s18 + $0x10] sm:$0xff] %v2757_v34  ;;  %v2758_v5 = vadd.f32 %v2602_v43, %v2277_v24  ;;  %v2299_v43 = vld [vmem:[%s3671_s18 + $0xc8] sm:$0xff] }
 0x3b3   : > { %v2606_v2 = vpop.f32.mrf.mxu1 }
 0x3b4   : > { %2822 = vst [vmem:[%s3671_s18 + $0x18] sm:$0xff] %v2758_v5  ;;  %v2759_v12 = vadd.f32 %v2606_v2, %v2278_v55  ;;  %v2300_v2 = vld [vmem:[%s3671_s18 + $0xd0] sm:$0xff] }
 0x3b5   : > { %v2608_v54 = vpop.f32.mrf.mxu1 }
 0x3b6   : > { %2823 = vst [vmem:[%s3671_s18 + $0x20] sm:$0xff] %v2759_v12  ;;  %v2760_v44 = vadd.f32 %v2608_v54, %v2279_v58  ;;  %v2301_v54 = vld [vmem:[%s3671_s18 + $0xd8] sm:$0xff] }
 0x3b7   : > { %v2610_v59 = vpop.f32.mrf.mxu1 }
 0x3b8   : > { %2824 = vst [vmem:[%s3671_s18 + $0x28] sm:$0xff] %v2760_v44  ;;  %v2761_v45 = vadd.f32 %v2610_v59, %v2280_v10  ;;  %v2302_v59 = vld [vmem:[%s3671_s18 + $0xe0] sm:$0xff] }
 0x3b9   : > { %v2612_v1 = vpop.f32.mrf.mxu1 }
 0x3ba   : > { %2825 = vst [vmem:[%s3671_s18 + $0x30] sm:$0xff] %v2761_v45  ;;  %v2762_v3 = vadd.f32 %v2612_v1, %v2281_v0  ;;  %v2303_v1 = vld [vmem:[%s3671_s18 + $0xe8] sm:$0xff] }
 0x3bb   : > { %v2616_v30 = vpop.f32.mrf.mxu1 }
 0x3bc   : > { %2826 = vst [vmem:[%s3671_s18 + $0x38] sm:$0xff] %v2762_v3  ;;  %v2763_v56 = vadd.f32 %v2616_v30, %v2282_v38  ;;  %v2304_v30 = vld [vmem:[%s3671_s18 + $0xf0] sm:$0xff] }
 0x3bd   : > { %v2618_v14 = vpop.f32.mrf.mxu1 }
 0x3be   : > { %2827 = vst [vmem:[%s3671_s18 + $0x40] sm:$0xff] %v2763_v56  ;;  %v2764_v9 = vadd.f32 %v2618_v14, %v2283_v35  ;;  %v2305_v14 = vld [vmem:[%s3671_s18 + $0xf8] sm:$0xff] }
 0x3bf   : > { %v2620_v20 = vpop.f32.mrf.mxu1 }
 0x3c0   : > { %2828 = vst [vmem:[%s3671_s18 + $0x48] sm:$0xff] %v2764_v9  ;;  %v2765_v17 = vadd.f32 %v2620_v20, %v2284_v7  ;;  %v2306_v20 = vld [vmem:[%s3671_s18 + $0x100] sm:$0xff] }
 0x3c1   : > { %v2622_v63 = vpop.f32.mrf.mxu1 }
 0x3c2   : > { %2829 = vst [vmem:[%s3671_s18 + $0x50] sm:$0xff] %v2765_v17  ;;  %v2766_v19 = vadd.f32 %v2622_v63, %v2285_v49  ;;  %v2307_v63 = vld [vmem:[%s3671_s18 + $0x108] sm:$0xff] }
 0x3c3   : > { %v2626_v4 = vpop.f32.mrf.mxu1 }
 0x3c4   : > { %2830 = vst [vmem:[%s3671_s18 + $0x58] sm:$0xff] %v2766_v19  ;;  %v2767_v48 = vadd.f32 %v2626_v4, %v2286_v37  ;;  %v2308_v4 = vld [vmem:[%s3671_s18 + $0x110] sm:$0xff] }
 0x3c5   : > { %v2628_v27 = vpop.f32.mrf.mxu1 }
 0x3c6   : > { %2831 = vst [vmem:[%s3671_s18 + $0x60] sm:$0xff] %v2767_v48  ;;  %v2768_v31 = vadd.f32 %v2628_v27, %v2287_v40  ;;  %v2309_v27 = vld [vmem:[%s3671_s18 + $0x118] sm:$0xff] }
 0x3c7   : > { %v2630_v16 = vpop.f32.mrf.mxu1 }
 0x3c8   : > { %2832 = vst [vmem:[%s3671_s18 + $0x68] sm:$0xff] %v2768_v31  ;;  %v2769_v36 = vadd.f32 %v2630_v16, %v2288_v42  ;;  %v2310_v16 = vld [vmem:[%s3671_s18 + $0x120] sm:$0xff] }
 0x3c9   : > { %v2632_v61 = vpop.f32.mrf.mxu1 }
 0x3ca   : > { %2833 = vst [vmem:[%s3671_s18 + $0x70] sm:$0xff] %v2769_v36  ;;  %v2770_v11 = vadd.f32 %v2632_v61, %v2289_v15  ;;  %v2311_v61 = vld [vmem:[%s3671_s18 + $0x128] sm:$0xff] }
 0x3cb   : > { %v2636_v46 = vpop.f32.mrf.mxu1 }
 0x3cc   : > { %2834 = vst [vmem:[%s3671_s18 + $0x78] sm:$0xff] %v2770_v11  ;;  %v2771_v57 = vadd.f32 %v2636_v46, %v2290_v32  ;;  %v2312_v46 = vld [vmem:[%s3671_s18 + $0x130] sm:$0xff] }
 0x3cd   : > { %v2638_v47 = vpop.f32.mrf.mxu1 }
 0x3ce   : > { %2835 = vst [vmem:[%s3671_s18 + $0x80] sm:$0xff] %v2771_v57  ;;  %v2772_v39 = vadd.f32 %v2638_v47, %v2291_v6  ;;  %v2313_v47 = vld [vmem:[%s3671_s18 + $0x138] sm:$0xff] }
 0x3cf   : > { %v2640_v33 = vpop.f32.mrf.mxu1 }
 0x3d0   : > { %2836 = vst [vmem:[%s3671_s18 + $0x88] sm:$0xff] %v2772_v39  ;;  %v2773_v62 = vadd.f32 %v2640_v33, %v2292_v29  ;;  %v2314_v33 = vld [vmem:[%s3671_s18 + $0x140] sm:$0xff] }
 0x3d1   : > { %v2642_v26 = vpop.f32.mrf.mxu1 }
 0x3d2   : > { %2837 = vst [vmem:[%s3671_s18 + $0x90] sm:$0xff] %v2773_v62  ;;  %v2774_v51 = vadd.f32 %v2642_v26, %v2293_v41  ;;  %v2315_v26 = vld [vmem:[%s3671_s18 + $0x148] sm:$0xff] }
 0x3d3   : > { %v2646_v60 = vpop.f32.mrf.mxu1 }
 0x3d4   : > { %2838 = vst [vmem:[%s3671_s18 + $0x98] sm:$0xff] %v2774_v51  ;;  %v2775_v22 = vadd.f32 %v2646_v60, %v2294_v50  ;;  %v2316_v60 = vld [vmem:[%s3671_s18 + $0x150] sm:$0xff] }
 0x3d5   : > { %v2648_v13 = vpop.f32.mrf.mxu1 }
 0x3d6   : > { %2839 = vst [vmem:[%s3671_s18 + $0xa0] sm:$0xff] %v2775_v22  ;;  %v2776_v52 = vadd.f32 %v2648_v13, %v2295_v8  ;;  %v2317_v13 = vld [vmem:[%s3671_s18 + $0x158] sm:$0xff] }
 0x3d7   : > { %v2650_v21 = vpop.f32.mrf.mxu1 }
 0x3d8   : > { %2840 = vst [vmem:[%s3671_s18 + $0xa8] sm:$0xff] %v2776_v52  ;;  %v2777_v23 = vadd.f32 %v2650_v21, %v2296_v53  ;;  %v2318_v21 = vld [vmem:[%s3671_s18 + $0x160] sm:$0xff] }
 0x3d9   : > { %v2652_v25 = vpop.f32.mrf.mxu1 }
 0x3da   : > { %2841 = vst [vmem:[%s3671_s18 + $0xb0] sm:$0xff] %v2777_v23  ;;  %v2778_v24 = vadd.f32 %v2652_v25, %v2297_v28  ;;  %v2319_v25 = vld [vmem:[%s3671_s18 + $0x168] sm:$0xff] }
 0x3db   : > { %v2656_v34 = vpop.f32.mrf.mxu1 }
 0x3dc   : > { %2842 = vst [vmem:[%s3671_s18 + $0xb8] sm:$0xff] %v2778_v24  ;;  %v2779_v55 = vadd.f32 %v2656_v34, %v2298_v18  ;;  %v2320_v34 = vld [vmem:[%s3671_s18 + $0x170] sm:$0xff] }
 0x3dd   : > { %v2658_v5 = vpop.f32.mrf.mxu1 }
 0x3de   : > { %2843 = vst [vmem:[%s3671_s18 + $0xc0] sm:$0xff] %v2779_v55  ;;  %v2780_v58 = vadd.f32 %v2658_v5, %v2299_v43  ;;  %v2321_v5 = vld [vmem:[%s3671_s18 + $0x178] sm:$0xff] }
 0x3df   : > { %v2660_v12 = vpop.f32.mrf.mxu1 }
 0x3e0   : > { %2844 = vst [vmem:[%s3671_s18 + $0xc8] sm:$0xff] %v2780_v58  ;;  %v2781_v10 = vadd.f32 %v2660_v12, %v2300_v2  ;;  %v2322_v12 = vld [vmem:[%s3671_s18 + $0x180] sm:$0xff] }
 0x3e1   : > { %v2662_v44 = vpop.f32.mrf.mxu1 }
 0x3e2   : > { %2845 = vst [vmem:[%s3671_s18 + $0xd0] sm:$0xff] %v2781_v10  ;;  %v2782_v0 = vadd.f32 %v2662_v44, %v2301_v54  ;;  %v2323_v44 = vld [vmem:[%s3671_s18 + $0x188] sm:$0xff] }
 0x3e3   : > { %v2666_v45 = vpop.f32.mrf.mxu1 }
 0x3e4   : > { %2846 = vst [vmem:[%s3671_s18 + $0xd8] sm:$0xff] %v2782_v0  ;;  %v2783_v38 = vadd.f32 %v2666_v45, %v2302_v59  ;;  %v2324_v45 = vld [vmem:[%s3671_s18 + $0x190] sm:$0xff] }
 0x3e5   : > { %v2668_v3 = vpop.f32.mrf.mxu1 }
 0x3e6   : > { %2847 = vst [vmem:[%s3671_s18 + $0xe0] sm:$0xff] %v2783_v38  ;;  %v2784_v35 = vadd.f32 %v2668_v3, %v2303_v1  ;;  %v2325_v3 = vld [vmem:[%s3671_s18 + $0x198] sm:$0xff] }
 0x3e7   : > { %v2670_v56 = vpop.f32.mrf.mxu1 }
 0x3e8   : > { %2848 = vst [vmem:[%s3671_s18 + $0xe8] sm:$0xff] %v2784_v35  ;;  %v2785_v7 = vadd.f32 %v2670_v56, %v2304_v30  ;;  %v2326_v56 = vld [vmem:[%s3671_s18 + $0x1a0] sm:$0xff] }
 0x3e9   : > { %v2672_v9 = vpop.f32.mrf.mxu1 }
 0x3ea   : > { %2849 = vst [vmem:[%s3671_s18 + $0xf0] sm:$0xff] %v2785_v7  ;;  %v2786_v49 = vadd.f32 %v2672_v9, %v2305_v14  ;;  %v2327_v9 = vld [vmem:[%s3671_s18 + $0x1a8] sm:$0xff] }
 0x3eb   : > { %v2676_v17 = vpop.f32.mrf.mxu1 }
 0x3ec   : > { %2850 = vst [vmem:[%s3671_s18 + $0xf8] sm:$0xff] %v2786_v49  ;;  %v2787_v37 = vadd.f32 %v2676_v17, %v2306_v20  ;;  %v2328_v17 = vld [vmem:[%s3671_s18 + $0x1b0] sm:$0xff] }
 0x3ed   : > { %v2678_v19 = vpop.f32.mrf.mxu1 }
 0x3ee   : > { %2851 = vst [vmem:[%s3671_s18 + $0x100] sm:$0xff] %v2787_v37  ;;  %v2788_v40 = vadd.f32 %v2678_v19, %v2307_v63  ;;  %v2329_v19 = vld [vmem:[%s3671_s18 + $0x1b8] sm:$0xff] }
 0x3ef   : > { %v2680_v48 = vpop.f32.mrf.mxu1 }
 0x3f0   : > { %2852 = vst [vmem:[%s3671_s18 + $0x108] sm:$0xff] %v2788_v40  ;;  %v2789_v42 = vadd.f32 %v2680_v48, %v2308_v4  ;;  %v2330_v48 = vld [vmem:[%s3671_s18 + $0x1c0] sm:$0xff] }
 0x3f1   : > { %v2682_v31 = vpop.f32.mrf.mxu1 }
 0x3f2   : > { %2853 = vst [vmem:[%s3671_s18 + $0x110] sm:$0xff] %v2789_v42  ;;  %v2790_v15 = vadd.f32 %v2682_v31, %v2309_v27  ;;  %v2331_v31 = vld [vmem:[%s3671_s18 + $0x1c8] sm:$0xff] }
 0x3f3   : > { %v2686_v36 = vpop.f32.mrf.mxu1 }
 0x3f4   : > { %2854 = vst [vmem:[%s3671_s18 + $0x118] sm:$0xff] %v2790_v15  ;;  %v2791_v32 = vadd.f32 %v2686_v36, %v2310_v16  ;;  %v2332_v36 = vld [vmem:[%s3671_s18 + $0x1d0] sm:$0xff] }
 0x3f5   : > { %v2688_v11 = vpop.f32.mrf.mxu1 }
 0x3f6   : > { %2855 = vst [vmem:[%s3671_s18 + $0x120] sm:$0xff] %v2791_v32  ;;  %v2792_v6 = vadd.f32 %v2688_v11, %v2311_v61  ;;  %v2333_v11 = vld [vmem:[%s3671_s18 + $0x1d8] sm:$0xff] }
 0x3f7   : > { %v2690_v57 = vpop.f32.mrf.mxu1 }
 0x3f8   : > { %2856 = vst [vmem:[%s3671_s18 + $0x128] sm:$0xff] %v2792_v6  ;;  %v2793_v29 = vadd.f32 %v2690_v57, %v2312_v46  ;;  %v2334_v57 = vld [vmem:[%s3671_s18 + $0x1e0] sm:$0xff] }
 0x3f9   : > { %v2692_v39 = vpop.f32.mrf.mxu1 }
 0x3fa   : > { %2857 = vst [vmem:[%s3671_s18 + $0x130] sm:$0xff] %v2793_v29  ;;  %v2794_v41 = vadd.f32 %v2692_v39, %v2313_v47  ;;  %v2335_v39 = vld [vmem:[%s3671_s18 + $0x1e8] sm:$0xff] }
 0x3fb   : > { %v2696_v62 = vpop.f32.mrf.mxu1 }
 0x3fc   : > { %2858 = vst [vmem:[%s3671_s18 + $0x138] sm:$0xff] %v2794_v41  ;;  %v2795_v50 = vadd.f32 %v2696_v62, %v2314_v33  ;;  %v2336_v62 = vld [vmem:[%s3671_s18 + $0x1f0] sm:$0xff] }
 0x3fd   : > { %v2698_v51 = vpop.f32.mrf.mxu1 }
 0x3fe   : > { %2859 = vst [vmem:[%s3671_s18 + $0x140] sm:$0xff] %v2795_v50  ;;  %v2796_v8 = vadd.f32 %v2698_v51, %v2315_v26  ;;  %v2337_v51 = vld [vmem:[%s3671_s18 + $0x1f8] sm:$0xff] }
 0x3ff   : > { %v2700_v22 = vpop.f32.mrf.mxu1 }
 0x400   : > { %2860 = vst [vmem:[%s3671_s18 + $0x148] sm:$0xff] %v2796_v8  ;;  %v2797_v53 = vadd.f32 %v2700_v22, %v2316_v60 }
 0x401   : > { %v2702_v52 = vpop.f32.mrf.mxu1 }
 0x402   : > { %2861 = vst [vmem:[%s3671_s18 + $0x150] sm:$0xff] %v2797_v53  ;;  %v2798_v28 = vadd.f32 %v2702_v52, %v2317_v13 }
 0x403   : > { %v2706_v23 = vpop.f32.mrf.mxu1 }
 0x404   : > { %2862 = vst [vmem:[%s3671_s18 + $0x158] sm:$0xff] %v2798_v28  ;;  %v2799_v18 = vadd.f32 %v2706_v23, %v2318_v21 }
 0x405   : > { %v2708_v24 = vpop.f32.mrf.mxu1 }
 0x406   : > { %2863 = vst [vmem:[%s3671_s18 + $0x160] sm:$0xff] %v2799_v18  ;;  %v2800_v43 = vadd.f32 %v2708_v24, %v2319_v25 }
 0x407   : > { %v2710_v55 = vpop.f32.mrf.mxu1 }
 0x408   : > { %2864 = vst [vmem:[%s3671_s18 + $0x168] sm:$0xff] %v2800_v43  ;;  %v2801_v2 = vadd.f32 %v2710_v55, %v2320_v34 }
 0x409   : > { %v2712_v58 = vpop.f32.mrf.mxu1 }
 0x40a   : > { %2865 = vst [vmem:[%s3671_s18 + $0x170] sm:$0xff] %v2801_v2  ;;  %v2802_v54 = vadd.f32 %v2712_v58, %v2321_v5 }
 0x40b   : > { %v2716_v10 = vpop.f32.mrf.mxu1 }
 0x40c   : > { %2866 = vst [vmem:[%s3671_s18 + $0x178] sm:$0xff] %v2802_v54  ;;  %v2803_v59 = vadd.f32 %v2716_v10, %v2322_v12 }
 0x40d   : > { %v2718_v0 = vpop.f32.mrf.mxu1 }
 0x40e   : > { %2867 = vst [vmem:[%s3671_s18 + $0x180] sm:$0xff] %v2803_v59  ;;  %v2804_v1 = vadd.f32 %v2718_v0, %v2323_v44 }
 0x40f   : > { %v2720_v38 = vpop.f32.mrf.mxu1 }
 0x410   : > { %2868 = vst [vmem:[%s3671_s18 + $0x188] sm:$0xff] %v2804_v1  ;;  %v2805_v30 = vadd.f32 %v2720_v38, %v2324_v45 }
 0x411   : > { %v2722_v35 = vpop.f32.mrf.mxu1 }
 0x412   : > { %2869 = vst [vmem:[%s3671_s18 + $0x190] sm:$0xff] %v2805_v30  ;;  %v2806_v14 = vadd.f32 %v2722_v35, %v2325_v3 }
 0x413   : > { %v2726_v7 = vpop.f32.mrf.mxu1 }
 0x414   : > { %2870 = vst [vmem:[%s3671_s18 + $0x198] sm:$0xff] %v2806_v14  ;;  %v2807_v20 = vadd.f32 %v2726_v7, %v2326_v56 }
 0x415   : > { %v2728_v49 = vpop.f32.mrf.mxu1 }
 0x416   : > { %2871 = vst [vmem:[%s3671_s18 + $0x1a0] sm:$0xff] %v2807_v20  ;;  %v2808_v63 = vadd.f32 %v2728_v49, %v2327_v9 }
 0x417   : > { %v2730_v37 = vpop.f32.mrf.mxu1 }
 0x418   : > { %2872 = vst [vmem:[%s3671_s18 + $0x1a8] sm:$0xff] %v2808_v63  ;;  %v2809_v4 = vadd.f32 %v2730_v37, %v2328_v17 }
 0x419   : > { %v2732_v40 = vpop.f32.mrf.mxu1 }
 0x41a   : > { %2873 = vst [vmem:[%s3671_s18 + $0x1b0] sm:$0xff] %v2809_v4  ;;  %v2810_v27 = vadd.f32 %v2732_v40, %v2329_v19 }
 0x41b   : > { %v2736_v42 = vpop.f32.mrf.mxu1 }
 0x41c   : > { %2874 = vst [vmem:[%s3671_s18 + $0x1b8] sm:$0xff] %v2810_v27  ;;  %v2811_v16 = vadd.f32 %v2736_v42, %v2330_v48 }
 0x41d   : > { %v2738_v15 = vpop.f32.mrf.mxu1 }
 0x41e   : > { %2875 = vst [vmem:[%s3671_s18 + $0x1c0] sm:$0xff] %v2811_v16  ;;  %v2812_v61 = vadd.f32 %v2738_v15, %v2331_v31 }
 0x41f   : > { %v2740_v32 = vpop.f32.mrf.mxu1 }
 0x420   : > { %2876 = vst [vmem:[%s3671_s18 + $0x1c8] sm:$0xff] %v2812_v61  ;;  %v2813_v46 = vadd.f32 %v2740_v32, %v2332_v36 }
 0x421   : > { %v2742_v6 = vpop.f32.mrf.mxu1 }
 0x422   : > { %2877 = vst [vmem:[%s3671_s18 + $0x1d0] sm:$0xff] %v2813_v46  ;;  %v2814_v47 = vadd.f32 %v2742_v6, %v2333_v11 }
 0x423   : > { %v2746_v29 = vpop.f32.mrf.mxu1 }
 0x424   : > { %2878 = vst [vmem:[%s3671_s18 + $0x1d8] sm:$0xff] %v2814_v47  ;;  %v2815_v33 = vadd.f32 %v2746_v29, %v2334_v57 }
 0x425   : > { %v2748_v41 = vpop.f32.mrf.mxu1 }
 0x426   : > { %2879 = vst [vmem:[%s3671_s18 + $0x1e0] sm:$0xff] %v2815_v33  ;;  %v2816_v26 = vadd.f32 %v2748_v41, %v2335_v39 }
 0x427   : > { %v2750_v50 = vpop.f32.mrf.mxu1 }
 0x428   : > { %2880 = vst [vmem:[%s3671_s18 + $0x1e8] sm:$0xff] %v2816_v26  ;;  %v2817_v60 = vadd.f32 %v2750_v50, %v2336_v62 }
 0x429   : > { %v2752_v8 = vpop.f32.mrf.mxu1 }
 0x42a   : > { %2881 = vst [vmem:[%s3671_s18 + $0x1f0] sm:$0xff] %v2817_v60  ;;  %v2818_v22 = vadd.f32 %v2752_v8, %v2337_v51 }
 0x42c   : > { %2882 = vst [vmem:[%s3671_s18 + $0x1f8] sm:$0xff] %v2818_v22 }
 0x42d PF: > { %s17_s30 = sadd.s32 1, %s3490_s30   ;;  %s5374_s24 = smov %s3470_s25 }
 0x42e   : > { %p14_p0 = scmp.ge.s32.totalorder %s17_s30, 6   ;;  %s5375_s25 = smov %s3581_s12 }
 0x42f   : > { %s5376_s26 = smov %s3482_s28  ;;  %s5377_s27 = smov %s3486_s29 }
 0x430   : > { %s5378_s28 = smov %s5381_s8  ;;  %s5379_s29 = smov %s5385_s9 }
 0x431   :  { %16 = sbr.rel (!%p14_p0) target bundleno = 6 (0x6), region = 134 }

</bundles_post_ra>
